<compile_context>
chip_gen: v5e
topology: v5e:2x2
jax: 0.10.0
libtpu: 0.0.40
codegen_flags: <defaults>
</compile_context>

<pallas_src>
import numpy as np
import jax
import jax.numpy as jnp
from jax.experimental import pallas as pl
from jax.experimental.pallas import tpu as pltpu

# ---------------- problem sizes (small, consistent with the module) ----------
N_NODES = 16      # number of graph nodes
L = 8             # len(identifiers)  -- number of unique node labels
K = 3             # class_number      -- number of graph classes
S = 32            # args.step_dimensions
C = 64            # args.combined_dimensions
T_STEPS = 10      # args.time          -- fused walk length
B_WALKS = 16      # independent walks (batched)
BB = B_WALKS      # walks per grid step: all of them -> grid=(1,) on single-TC chips
OUT_W = 256       # packed, lane-dense per-step output width (2 f32 vregs)

# The module calls np.random.seed(10) before every np.random.choice, so the
# single uniform draw used by choice(p=...) is a compile-time constant.
U0 = float(np.random.RandomState(10).random_sample())

# packed output lane layout (per step, per walk):
#   [  0:  8]  new attention (softmax of rank logits)
#   [  8: 11]  log_softmax(label predictions)
#   [ 11]      attention score of the sampled label
#   [ 12]      sampled label (as float)
#   [ 16: 24]  raw attention spread (for host-side sampling verification)
#   [128:192]  LSTM h        [192:256]  LSTM c        (rest: zero padding)


# ---------------- fused walk kernel ------------------------------------------
def gam_walk_kernel(nf_ref, att0_ref, w1_ref, w2_ref, hb_ref, c0_ref,
                    head_ref, out_ref):
    f32 = jnp.float32

    # ---- prologue: loop-invariant, loaded once ------------------------------
    w1 = w1_ref[...]          # (L, 4C)  folded step+LSTM weights, gate cols [i,f,o,g]
    w2 = w2_ref[...]          # (L, 4C)
    hb = hb_ref[...]          # (1, 4C)  h0 @ w_hh + b_ih + b_hh (same permutation)
    c0 = c0_ref[...]          # (1, C)   module never feeds c back -> fixed every step
    head_w = head_ref[...]    # (C, L+K) [theta_rank | theta_classification]

    # constant upper-triangular ones -> inclusive prefix sum as one MXU op
    r = jax.lax.broadcasted_iota(jnp.int32, (L, L), 0)
    c_ = jax.lax.broadcasted_iota(jnp.int32, (L, L), 1)
    tri = (r <= c_).astype(f32)
    lane = jax.lax.broadcasted_iota(jnp.int32, (BB, L), 1)

    # zero the packed output slab once so padding lanes are defined
    out_ref[...] = jnp.zeros_like(out_ref)

    att = att0_ref[...]       # (BB, L) carried in vregs across steps

    # fully-unrolled fixed-length walk (T_STEPS static) -> static slices and
    # cross-step instruction overlap for the scheduler.
    for t in range(T_STEPS):
        nf = nf_ref[t]                               # (BB, L), attention-independent

        # ---- attention spread + deterministic np.random.choice(seed=10) -----
        spread = att * nf
        cdf = jnp.dot(spread, tri, preferred_element_type=f32)   # inclusive cumsum
        total = jnp.sum(spread, axis=1, keepdims=True)
        # label = #{i : cdf_norm[i] <= U0} == #{i : cdf[i] <= U0 * total}
        # (the 1/sum normalisation is folded into the threshold -> no divide)
        cnt = jnp.sum((cdf <= U0 * total).astype(jnp.int32),
                      axis=1, keepdims=True)
        cnt = jnp.minimum(cnt, L - 1)                # graceful if total == 0
        onehot = (lane == cnt).astype(f32)                          # (BB, L)
        att_score = jnp.sum(att * onehot, axis=1, keepdims=True)    # (BB, 1)

        # ---- StepNetworkLayer + LSTM input projection, fully folded ----------
        gates = (jnp.dot(att, w1, preferred_element_type=f32)
                 + jnp.dot(onehot, w2, preferred_element_type=f32)
                 + hb)                                              # (BB, 4C)
        sig = jax.nn.sigmoid(gates[:, 0:3 * C])      # [i | f | o] one EUP pass
        i_g = sig[:, 0:C]
        f_g = sig[:, C:2 * C]
        o_g = sig[:, 2 * C:3 * C]
        g_g = jnp.tanh(gates[:, 3 * C:4 * C])        # [g] one short tanh pass
        c_new = f_g * c0 + i_g * g_g
        h_new = o_g * jnp.tanh(c_new)                               # (BB, C)

        # ---- DownStreamNetworkLayer: fused rank + classification head --------
        head = jnp.dot(h_new, head_w, preferred_element_type=f32)  # (BB, L+K)
        logits = head[:, 0:L]
        preds = head[:, L:L + K]
        # exact normalisation: the returned attention must sum to 1 for the
        # host-side np.random.choice in the surrounding training loop.
        e = jnp.exp(logits - jnp.max(logits, axis=1, keepdims=True))
        new_att = e / jnp.sum(e, axis=1, keepdims=True)
        pm = preds - jnp.max(preds, axis=1, keepdims=True)
        logp = pm - jnp.log(jnp.sum(jnp.exp(pm), axis=1, keepdims=True))

        # ---- direct lane-aligned sub-slice stores (no per-step concatenate) --
        out_ref[t, :, 0:L] = new_att
        out_ref[t, :, L:L + K] = logp
        out_ref[t, :, L + K:L + K + 1] = att_score
        out_ref[t, :, L + K + 1:L + K + 2] = cnt.astype(f32)
        out_ref[t, :, 16:16 + L] = spread
        out_ref[t, :, 128:128 + C] = h_new
        out_ref[t, :, 128 + C:128 + 2 * C] = c_new

        att = new_att


def _resident(arr):
    """Whole-array block with a constant block index: DMA'd once, then resident
    in VMEM for every (single) grid step and every unrolled time step."""
    nd = arr.ndim
    return pl.BlockSpec(arr.shape, lambda i, _nd=nd: (0,) * _nd)


def gam_walk(neighbor_vecs, attention0, features, params):
    T, B, N = neighbor_vecs.shape
    assert T == T_STEPS and N == N_NODES and B == B_WALKS and B % BB == 0
    nb = B // BB   # == 1

    # Hoisted neighbourhood matmul: nf never depends on the carried attention,
    # so it is ONE (T*B, N) x (N, L) matmul here instead of T dependent MXU ops
    # inside the serial in-kernel time loop.
    nf = jnp.dot(neighbor_vecs.reshape(T * B, N), features,
                 precision=jax.lax.Precision.HIGHEST).reshape(T, B, L)

    in_specs = [
        pl.BlockSpec((T_STEPS, BB, L), lambda i: (0, i, 0)),   # per-step spreads basis
        pl.BlockSpec((BB, L), lambda i: (i, 0)),               # initial attention
        _resident(params["W1p"]), _resident(params["W2p"]),
        _resident(params["hbp"]), _resident(params["c0"]),
        _resident(params["head"]),
    ]
    out_spec = pl.BlockSpec((T_STEPS, BB, OUT_W), lambda i: (0, i, 0))

    # TODO(synk): on v7x (2 TensorCores) use BB = B // 2 and CORE_PARALLEL on the
    # walk-batch grid axis so each core runs one walk block; single-TC v5e/v6e
    # want exactly one grid step, as configured here.
    return pl.pallas_call(
        gam_walk_kernel,
        grid=(nb,),
        in_specs=in_specs,
        out_specs=out_spec,
        out_shape=jax.ShapeDtypeStruct((T_STEPS, B, OUT_W), jnp.float32),
        compiler_params=pltpu.CompilerParams(
            dimension_semantics=("arbitrary",),
            vmem_limit_bytes=4 * 1024 * 1024),
    )(nf, attention0, params["W1p"], params["W2p"],
      params["hbp"], params["c0"], params["head"])


# ---------------- deterministic parameter construction -----------------------
def build_params(key):
    ks = jax.random.split(key, 10)
    hp = lambda a, b: jnp.dot(a, b, precision=jax.lax.Precision.HIGHEST)
    xavier = lambda k, fi, fo: (jax.random.normal(k, (fi, fo), jnp.float32)
                                * np.sqrt(2.0 / (fi + fo)))
    u = lambda k, shape, lo, hi: jax.random.uniform(k, shape, jnp.float32, lo, hi)
    bound = 1.0 / np.sqrt(C)

    t1 = u(ks[0], (L, S), -1.0, 1.0)                    # StepNetworkLayer U(-1,1)
    t2 = u(ks[1], (L, S), -1.0, 1.0)
    t3 = u(ks[2], (2 * S, C), -1.0, 1.0)
    w_ih = u(ks[3], (C, 4 * C), -bound, bound)          # LSTM, stored transposed (x @ W)
    w_hh = u(ks[4], (C, 4 * C), -bound, bound)          # gate col order [i, f, g, o]
    bias = (u(ks[5], (1, 4 * C), -bound, bound)
            + u(ks[6], (1, 4 * C), -bound, bound))      # b_ih + b_hh
    h0 = jax.random.normal(ks[9], (1, C), jnp.float32)  # torch.manual_seed(10); randn
    tcls = xavier(ks[7], C, K)                          # xavier normal
    trank = xavier(ks[8], C, L)

    # StepNetworkLayer fold:  cat(a@T1, f@T2)@T3 == a@A1 + f@A2
    A1 = hp(t1, t3[:S, :])
    A2 = hp(t2, t3[S:, :])
    # fold w_ih straight through the step layer; fold h0@w_hh + bias once
    W1 = hp(A1, w_ih)                 # (L, 4C)
    W2 = hp(A2, w_ih)                 # (L, 4C)
    hb = hp(h0, w_hh) + bias          # (1, 4C)

    def perm_ifog(w):                 # gate cols [i,f,g,o] -> [i,f,o,g]
        return jnp.concatenate(
            [w[:, 0:C], w[:, C:2 * C], w[:, 3 * C:4 * C], w[:, 2 * C:3 * C]], axis=1)

    return {
        # originals (all f32) -- used only by the pure-JAX reference
        "theta_step_1": t1, "theta_step_2": t2, "theta_step_3": t3,
        "w_ih": w_ih, "w_hh": w_hh, "bias": bias,
        "theta_classification": tcls, "theta_rank": trank,
        "h0": h0, "c0": h0,   # module reseeds with the same seed -> h0 == c0
        # device-side folded parameters (the only tensors the kernel sees)
        "W1p": perm_ifog(W1), "W2p": perm_ifog(W2), "hbp": perm_ifog(hb),
        "head": jnp.concatenate([trank, tcls], axis=1),   # (C, L+K)
    }


# ---------------- pure-JAX reference (original, unfolded module math) --------
def gam_walk_ref(neighbor_vecs, attention0, features, params, labels):
    hp = lambda a, b: jnp.dot(a, b, precision=jax.lax.Precision.HIGHEST)
    w_ih = params["w_ih"].astype(jnp.float32)
    w_hh = params["w_hh"].astype(jnp.float32)
    att = attention0
    rows = []
    for t in range(neighbor_vecs.shape[0]):
        onehot = jax.nn.one_hot(labels[t], L, dtype=jnp.float32)      # (B, L)
        att_score = jnp.sum(att * onehot, axis=1)                     # (B,)
        hidden_att = hp(att, params["theta_step_1"])
        hidden_node = hp(onehot, params["theta_step_2"])
        state = hp(jnp.concatenate([hidden_att, hidden_node], axis=1),
                   params["theta_step_3"])
        gates = hp(state, w_ih) + hp(params["h0"], w_hh) + params["bias"]
        i_g = jax.nn.sigmoid(gates[:, 0 * C:1 * C])
        f_g = jax.nn.sigmoid(gates[:, 1 * C:2 * C])
        g_g = jnp.tanh(gates[:, 2 * C:3 * C])
        o_g = jax.nn.sigmoid(gates[:, 3 * C:4 * C])
        c_new = f_g * params["c0"] + i_g * g_g
        h_new = o_g * jnp.tanh(c_new)
        preds = hp(h_new, params["theta_classification"])
        logits = hp(h_new, params["theta_rank"])
        new_att = jax.nn.softmax(logits, axis=1)
        logp = jax.nn.log_softmax(preds, axis=1)
        rows.append((logp, new_att, att_score, h_new, c_new))
        att = new_att
    return rows


if __name__ == "__main__":
    key = jax.random.PRNGKey(0)
    kp, kf, kn = jax.random.split(key, 3)

    params = build_params(kp)

    # synthetic graph data: non-negative node feature matrix and per-step,
    # per-walk binary neighbourhood indicator vectors (host graph-traversal glue).
    # TODO(synk): in the real trainer these come from networkx neighbour sets of
    # the walked node; that graph bookkeeping has no tensor/Pallas equivalent.
    features = jax.random.uniform(kf, (N_NODES, L), jnp.float32)
    nv = (jax.random.uniform(kn, (T_STEPS, B_WALKS, N_NODES)) > 0.5).astype(jnp.float32)
    nv = nv.at[:, :, 0].set(1.0)               # every neighbourhood non-empty
    att0 = jnp.ones((B_WALKS, L), jnp.float32) / L        # setup_attention()

    out = gam_walk(nv, att0, features, params)
    jax.block_until_ready(out)
    out_np = np.asarray(out)

    new_att = out_np[:, :, 0:L]
    logp = out_np[:, :, L:L + K]
    att_score = out_np[:, :, L + K]
    labels_k = np.rint(out_np[:, :, L + K + 1]).astype(np.int32)
    spread_k = out_np[:, :, 16:16 + L].astype(np.float64)
    h_new = out_np[:, :, 128:128 + C]
    c_new = out_np[:, :, 128 + C:128 + 2 * C]

    # structural checks: softmax / log_softmax properly normalised
    assert np.allclose(np.exp(logp).sum(-1), 1.0, atol=1e-5)
    assert np.allclose(new_att.sum(-1), 1.0, atol=1e-5)
    assert labels_k.min() >= 0 and labels_k.max() < L

    # inverse-CDF sampling check against the kernel's own attention spread.
    # A small relative band absorbs f32 (in-kernel cdf / U0) vs float64 rounding
    # when the threshold lands within ULPs of a cdf boundary.
    cdf_h = np.cumsum(spread_k, axis=-1)
    total_h = cdf_h[..., -1:]
    thr = U0 * total_h
    eps = 5e-3 * np.maximum(total_h, 1e-30)
    lbl_lo = np.minimum((cdf_h <= thr - eps).sum(-1), L - 1)
    lbl_hi = np.minimum((cdf_h <= thr + eps).sum(-1), L - 1)
    assert np.all((labels_k >= lbl_lo) & (labels_k <= lbl_hi)), \
        "on-device label sampling mismatch"

    # pure-JAX reference over the same fused walk (driven by the sampled labels;
    # tolerance absorbs MXU default-precision matmul differences vs HIGHEST).
    ref_rows = gam_walk_ref(nv, att0, features, params, labels_k)
    for t, (r_logp, r_att, r_score, r_h, r_c) in enumerate(ref_rows):
        np.testing.assert_allclose(logp[t], np.asarray(r_logp), atol=5e-2, rtol=5e-2)
        np.testing.assert_allclose(new_att[t], np.asarray(r_att), atol=5e-2, rtol=5e-2)
        np.testing.assert_allclose(att_score[t], np.asarray(r_score), atol=5e-2, rtol=5e-2)
        np.testing.assert_allclose(h_new[t], np.asarray(r_h), atol=5e-2, rtol=5e-2)
        np.testing.assert_allclose(c_new[t], np.asarray(r_c), atol=5e-2, rtol=5e-2)

    print("KERNEL_OK")
</pallas_src>

<mosaic_0001>
module attributes {stable_mosaic.version = 11 : i64} {
  func.func @gam_walk_kernel(%arg0: i32, %arg1: memref<10x16x8xf32, #tpu.memory_space<vmem>>, %arg2: memref<16x8xf32, #tpu.memory_space<vmem>>, %arg3: memref<8x256xf32, #tpu.memory_space<vmem>>, %arg4: memref<8x256xf32, #tpu.memory_space<vmem>>, %arg5: memref<1x256xf32, #tpu.memory_space<vmem>>, %arg6: memref<1x64xf32, #tpu.memory_space<vmem>>, %arg7: memref<64x11xf32, #tpu.memory_space<vmem>>, %arg8: memref<10x16x256xf32, #tpu.memory_space<vmem>>) attributes {dimension_semantics = [#tpu.dimension_semantics<arbitrary>], iteration_bounds = array<i64: 1>, scalar_prefetch = 0 : i64, scratch_operands = 0 : i64, tpu.core_type = #tpu.core_type<tc>, window_params = [{transform_indices = @transform_0, window_bounds = array<i64: 10, 16, 8>}, {transform_indices = @transform_1, window_bounds = array<i64: 16, 8>}, {pipeline_mode = #tpu.pipeline_mode<synchronous>, transform_indices = @transform_2, window_bounds = array<i64: 8, 256>}, {pipeline_mode = #tpu.pipeline_mode<synchronous>, transform_indices = @transform_3, window_bounds = array<i64: 8, 256>}, {pipeline_mode = #tpu.pipeline_mode<synchronous>, transform_indices = @transform_4, window_bounds = array<i64: 1, 256>}, {pipeline_mode = #tpu.pipeline_mode<synchronous>, transform_indices = @transform_5, window_bounds = array<i64: 1, 64>}, {pipeline_mode = #tpu.pipeline_mode<synchronous>, transform_indices = @transform_6, window_bounds = array<i64: 64, 11>}, {transform_indices = @transform_7, window_bounds = array<i64: 10, 16, 256>}]} {
    %c0 = arith.constant 0 : index
    %c0_0 = arith.constant 0 : index
    %0 = vector.load %arg3[%c0, %c0_0] : memref<8x256xf32, #tpu.memory_space<vmem>>, vector<8x256xf32>
    %c0_1 = arith.constant 0 : index
    %c0_2 = arith.constant 0 : index
    %1 = vector.load %arg4[%c0_1, %c0_2] : memref<8x256xf32, #tpu.memory_space<vmem>>, vector<8x256xf32>
    %c0_3 = arith.constant 0 : index
    %c0_4 = arith.constant 0 : index
    %2 = vector.load %arg5[%c0_3, %c0_4] : memref<1x256xf32, #tpu.memory_space<vmem>>, vector<1x256xf32>
    %c0_5 = arith.constant 0 : index
    %c0_6 = arith.constant 0 : index
    %3 = vector.load %arg6[%c0_5, %c0_6] : memref<1x64xf32, #tpu.memory_space<vmem>>, vector<1x64xf32>
    %c0_7 = arith.constant 0 : index
    %c0_8 = arith.constant 0 : index
    %4 = vector.load %arg7[%c0_7, %c0_8] : memref<64x11xf32, #tpu.memory_space<vmem>>, vector<64x11xf32>
    %5 = tpu.iota {dimensions = array<i32: 0>} : vector<8x8xi32>
    %6 = tpu.iota {dimensions = array<i32: 1>} : vector<8x8xi32>
    %7 = arith.cmpi sle, %5, %6 : vector<8x8xi32>
    %8 = arith.extui %7 : vector<8x8xi1> to vector<8x8xi32>
    %9 = arith.sitofp %8 : vector<8x8xi32> to vector<8x8xf32>
    %10 = tpu.iota {dimensions = array<i32: 1>} : vector<16x8xi32>
    %cst = arith.constant 0.000000e+00 : f32
    %11 = vector.broadcast %cst : f32 to vector<10x16x256xf32>
    %c0_9 = arith.constant 0 : index
    %c0_10 = arith.constant 0 : index
    %c0_11 = arith.constant 0 : index
    %12 = vector.load %arg8[%c0_9, %c0_10, %c0_11] : memref<10x16x256xf32, #tpu.memory_space<vmem>>, vector<10x16x256xf32>
    tpu.vector_store %arg8[%c0_9, %c0_10, %c0_11], %11 {strides = array<i32>} : memref<10x16x256xf32, #tpu.memory_space<vmem>>, vector<10x16x256xf32>,
    %c0_12 = arith.constant 0 : index
    %c0_13 = arith.constant 0 : index
    %13 = vector.load %arg2[%c0_12, %c0_13] : memref<16x8xf32, #tpu.memory_space<vmem>>, vector<16x8xf32>
    %c0_14 = arith.constant 0 : index
    %c0_15 = arith.constant 0 : index
    %c0_16 = arith.constant 0 : index
    %14 = vector.load %arg1[%c0_14, %c0_15, %c0_16] : memref<10x16x8xf32, #tpu.memory_space<vmem>>, vector<1x16x8xf32>
    %15 = vector.shape_cast %14 : vector<1x16x8xf32> to vector<16x8xf32>
    %16 = arith.mulf %13, %15 : vector<16x8xf32>
    %cst_17 = arith.constant dense<0.000000e+00> : vector<16x8xf32>
    %17 = tpu.matmul %16, %9, %cst_17 {dimension_numbers = #tpu.dot_dimension_numbers<[1], [0], [0], [1], [0, 0, 1, 1], [], []>} : vector<16x8xf32>, vector<8x8xf32>, vector<16x8xf32> -> vector<16x8xf32>
    %cst_18 = arith.constant dense<0.000000e+00> : vector<16xf32>
    %18 = vector.multi_reduction <add>, %16, %cst_18 [1] : vector<16x8xf32> to vector<16xf32>
    %19 = vector.shape_cast %18 : vector<16xf32> to vector<16x1xf32>
    %cst_19 = arith.constant 0.771320641 : f32
    %20 = vector.broadcast %cst_19 : f32 to vector<16x1xf32>
    %21 = arith.mulf %20, %19 : vector<16x1xf32>
    %22 = vector.broadcast %21 : vector<16x1xf32> to vector<16x8xf32>
    %23 = arith.cmpf ole, %17, %22 : vector<16x8xf32>
    %24 = arith.extui %23 : vector<16x8xi1> to vector<16x8xi32>
    %cst_20 = arith.constant dense<0> : vector<16xi32>
    %25 = vector.multi_reduction <add>, %24, %cst_20 [1] : vector<16x8xi32> to vector<16xi32>
    %26 = vector.shape_cast %25 : vector<16xi32> to vector<16x1xi32>
    %c7_i32 = arith.constant 7 : i32
    %27 = vector.broadcast %c7_i32 : i32 to vector<16x1xi32>
    %28 = arith.minsi %26, %27 : vector<16x1xi32>
    %29 = vector.broadcast %28 : vector<16x1xi32> to vector<16x8xi32>
    %30 = arith.cmpi eq, %10, %29 : vector<16x8xi32>
    %31 = arith.extui %30 : vector<16x8xi1> to vector<16x8xi32>
    %32 = arith.sitofp %31 : vector<16x8xi32> to vector<16x8xf32>
    %33 = arith.mulf %13, %32 : vector<16x8xf32>
    %cst_21 = arith.constant dense<0.000000e+00> : vector<16xf32>
    %34 = vector.multi_reduction <add>, %33, %cst_21 [1] : vector<16x8xf32> to vector<16xf32>
    %35 = vector.shape_cast %34 : vector<16xf32> to vector<16x1xf32>
    %cst_22 = arith.constant dense<0.000000e+00> : vector<16x256xf32>
    %36 = tpu.matmul %13, %0, %cst_22 {dimension_numbers = #tpu.dot_dimension_numbers<[1], [0], [0], [1], [0, 0, 1, 1], [], []>} : vector<16x8xf32>, vector<8x256xf32>, vector<16x256xf32> -> vector<16x256xf32>
    %cst_23 = arith.constant dense<0.000000e+00> : vector<16x256xf32>
    %37 = tpu.matmul %32, %1, %cst_23 {dimension_numbers = #tpu.dot_dimension_numbers<[1], [0], [0], [1], [0, 0, 1, 1], [], []>} : vector<16x8xf32>, vector<8x256xf32>, vector<16x256xf32> -> vector<16x256xf32>
    %38 = arith.addf %36, %37 : vector<16x256xf32>
    %39 = vector.broadcast %2 : vector<1x256xf32> to vector<16x256xf32>
    %40 = arith.addf %38, %39 : vector<16x256xf32>
    %41 = vector.extract_strided_slice %40 {offsets = [0, 0], sizes = [16, 192], strides = [1, 1]} : vector<16x256xf32> to vector<16x192xf32>
    %42 = arith.negf %41 : vector<16x192xf32>
    %43 = math.exp %42 : vector<16x192xf32>
    %cst_24 = arith.constant 1.000000e+00 : f32
    %44 = vector.broadcast %cst_24 : f32 to vector<16x192xf32>
    %45 = arith.addf %44, %43 : vector<16x192xf32>
    %46 = arith.divf %44, %45 : vector<16x192xf32>
    %47 = vector.extract_strided_slice %46 {offsets = [0, 0], sizes = [16, 64], strides = [1, 1]} : vector<16x192xf32> to vector<16x64xf32>
    %48 = vector.extract_strided_slice %46 {offsets = [0, 64], sizes = [16, 64], strides = [1, 1]} : vector<16x192xf32> to vector<16x64xf32>
    %49 = vector.extract_strided_slice %46 {offsets = [0, 128], sizes = [16, 64], strides = [1, 1]} : vector<16x192xf32> to vector<16x64xf32>
    %50 = vector.extract_strided_slice %40 {offsets = [0, 192], sizes = [16, 64], strides = [1, 1]} : vector<16x256xf32> to vector<16x64xf32>
    %51 = math.tanh %50 : vector<16x64xf32>
    %52 = vector.broadcast %3 : vector<1x64xf32> to vector<16x64xf32>
    %53 = arith.mulf %48, %52 : vector<16x64xf32>
    %54 = arith.mulf %47, %51 : vector<16x64xf32>
    %55 = arith.addf %53, %54 : vector<16x64xf32>
    %56 = math.tanh %55 : vector<16x64xf32>
    %57 = arith.mulf %49, %56 : vector<16x64xf32>
    %cst_25 = arith.constant dense<0.000000e+00> : vector<16x11xf32>
    %58 = tpu.matmul %57, %4, %cst_25 {dimension_numbers = #tpu.dot_dimension_numbers<[1], [0], [0], [1], [0, 0, 1, 1], [], []>} : vector<16x64xf32>, vector<64x11xf32>, vector<16x11xf32> -> vector<16x11xf32>
    %59 = vector.extract_strided_slice %58 {offsets = [0, 0], sizes = [16, 8], strides = [1, 1]} : vector<16x11xf32> to vector<16x8xf32>
    %60 = vector.extract_strided_slice %58 {offsets = [0, 8], sizes = [16, 3], strides = [1, 1]} : vector<16x11xf32> to vector<16x3xf32>
    %cst_26 = arith.constant dense<0xFF800000> : vector<16xf32>
    %61 = vector.multi_reduction <maximumf>, %59, %cst_26 [1] : vector<16x8xf32> to vector<16xf32>
    %62 = vector.shape_cast %61 : vector<16xf32> to vector<16x1xf32>
    %63 = vector.broadcast %62 : vector<16x1xf32> to vector<16x8xf32>
    %64 = arith.subf %59, %63 : vector<16x8xf32>
    %65 = math.exp %64 : vector<16x8xf32>
    %cst_27 = arith.constant dense<0.000000e+00> : vector<16xf32>
    %66 = vector.multi_reduction <add>, %65, %cst_27 [1] : vector<16x8xf32> to vector<16xf32>
    %67 = vector.shape_cast %66 : vector<16xf32> to vector<16x1xf32>
    %68 = vector.broadcast %67 : vector<16x1xf32> to vector<16x8xf32>
    %69 = arith.divf %65, %68 : vector<16x8xf32>
    %cst_28 = arith.constant dense<0xFF800000> : vector<16xf32>
    %70 = vector.multi_reduction <maximumf>, %60, %cst_28 [1] : vector<16x3xf32> to vector<16xf32>
    %71 = vector.shape_cast %70 : vector<16xf32> to vector<16x1xf32>
    %72 = vector.broadcast %71 : vector<16x1xf32> to vector<16x3xf32>
    %73 = arith.subf %60, %72 : vector<16x3xf32>
    %74 = math.exp %73 : vector<16x3xf32>
    %cst_29 = arith.constant dense<0.000000e+00> : vector<16xf32>
    %75 = vector.multi_reduction <add>, %74, %cst_29 [1] : vector<16x3xf32> to vector<16xf32>
    %76 = vector.shape_cast %75 : vector<16xf32> to vector<16x1xf32>
    %77 = math.log %76 : vector<16x1xf32>
    %78 = vector.broadcast %77 : vector<16x1xf32> to vector<16x3xf32>
    %79 = arith.subf %73, %78 : vector<16x3xf32>
    %c0_30 = arith.constant 0 : index
    %c0_31 = arith.constant 0 : index
    %c0_32 = arith.constant 0 : index
    %80 = vector.load %arg8[%c0_30, %c0_31, %c0_32] : memref<10x16x256xf32, #tpu.memory_space<vmem>>, vector<1x16x8xf32>
    %81 = vector.shape_cast %80 : vector<1x16x8xf32> to vector<16x8xf32>
    %82 = vector.shape_cast %69 : vector<16x8xf32> to vector<1x16x8xf32>
    tpu.vector_store %arg8[%c0_30, %c0_31, %c0_32], %82 {strides = array<i32>} : memref<10x16x256xf32, #tpu.memory_space<vmem>>, vector<1x16x8xf32>,
    %c0_33 = arith.constant 0 : index
    %c0_34 = arith.constant 0 : index
    %c8 = arith.constant 8 : index
    %83 = vector.load %arg8[%c0_33, %c0_34, %c8] : memref<10x16x256xf32, #tpu.memory_space<vmem>>, vector<1x16x3xf32>
    %84 = vector.shape_cast %83 : vector<1x16x3xf32> to vector<16x3xf32>
    %85 = vector.shape_cast %79 : vector<16x3xf32> to vector<1x16x3xf32>
    tpu.vector_store %arg8[%c0_33, %c0_34, %c8], %85 {strides = array<i32>} : memref<10x16x256xf32, #tpu.memory_space<vmem>>, vector<1x16x3xf32>,
    %c0_35 = arith.constant 0 : index
    %c0_36 = arith.constant 0 : index
    %c11 = arith.constant 11 : index
    %86 = vector.load %arg8[%c0_35, %c0_36, %c11] : memref<10x16x256xf32, #tpu.memory_space<vmem>>, vector<1x16x1xf32>
    %87 = vector.shape_cast %86 : vector<1x16x1xf32> to vector<16x1xf32>
    %88 = vector.shape_cast %35 : vector<16x1xf32> to vector<1x16x1xf32>
    tpu.vector_store %arg8[%c0_35, %c0_36, %c11], %88 {strides = array<i32>} : memref<10x16x256xf32, #tpu.memory_space<vmem>>, vector<1x16x1xf32>,
    %89 = arith.sitofp %28 : vector<16x1xi32> to vector<16x1xf32>
    %c0_37 = arith.constant 0 : index
    %c0_38 = arith.constant 0 : index
    %c12 = arith.constant 12 : index
    %90 = vector.load %arg8[%c0_37, %c0_38, %c12] : memref<10x16x256xf32, #tpu.memory_space<vmem>>, vector<1x16x1xf32>
    %91 = vector.shape_cast %90 : vector<1x16x1xf32> to vector<16x1xf32>
    %92 = vector.shape_cast %89 : vector<16x1xf32> to vector<1x16x1xf32>
    tpu.vector_store %arg8[%c0_37, %c0_38, %c12], %92 {strides = array<i32>} : memref<10x16x256xf32, #tpu.memory_space<vmem>>, vector<1x16x1xf32>,
    %c0_39 = arith.constant 0 : index
    %c0_40 = arith.constant 0 : index
    %c16 = arith.constant 16 : index
    %93 = vector.load %arg8[%c0_39, %c0_40, %c16] : memref<10x16x256xf32, #tpu.memory_space<vmem>>, vector<1x16x8xf32>
    %94 = vector.shape_cast %93 : vector<1x16x8xf32> to vector<16x8xf32>
    %95 = vector.shape_cast %16 : vector<16x8xf32> to vector<1x16x8xf32>
    tpu.vector_store %arg8[%c0_39, %c0_40, %c16], %95 {strides = array<i32>} : memref<10x16x256xf32, #tpu.memory_space<vmem>>, vector<1x16x8xf32>,
    %c0_41 = arith.constant 0 : index
    %c0_42 = arith.constant 0 : index
    %c128 = arith.constant 128 : index
    %96 = vector.load %arg8[%c0_41, %c0_42, %c128] : memref<10x16x256xf32, #tpu.memory_space<vmem>>, vector<1x16x64xf32>
    %97 = vector.shape_cast %96 : vector<1x16x64xf32> to vector<16x64xf32>
    %98 = vector.shape_cast %57 : vector<16x64xf32> to vector<1x16x64xf32>
    tpu.vector_store %arg8[%c0_41, %c0_42, %c128], %98 {strides = array<i32>} : memref<10x16x256xf32, #tpu.memory_space<vmem>>, vector<1x16x64xf32>,
    %c0_43 = arith.constant 0 : index
    %c0_44 = arith.constant 0 : index
    %c192 = arith.constant 192 : index
    %99 = vector.load %arg8[%c0_43, %c0_44, %c192] : memref<10x16x256xf32, #tpu.memory_space<vmem>>, vector<1x16x64xf32>
    %100 = vector.shape_cast %99 : vector<1x16x64xf32> to vector<16x64xf32>
    %101 = vector.shape_cast %55 : vector<16x64xf32> to vector<1x16x64xf32>
    tpu.vector_store %arg8[%c0_43, %c0_44, %c192], %101 {strides = array<i32>} : memref<10x16x256xf32, #tpu.memory_space<vmem>>, vector<1x16x64xf32>,
    %c1 = arith.constant 1 : index
    %c0_45 = arith.constant 0 : index
    %c0_46 = arith.constant 0 : index
    %102 = vector.load %arg1[%c1, %c0_45, %c0_46] : memref<10x16x8xf32, #tpu.memory_space<vmem>>, vector<1x16x8xf32>
    %103 = vector.shape_cast %102 : vector<1x16x8xf32> to vector<16x8xf32>
    %104 = arith.mulf %69, %103 : vector<16x8xf32>
    %cst_47 = arith.constant dense<0.000000e+00> : vector<16x8xf32>
    %105 = tpu.matmul %104, %9, %cst_47 {dimension_numbers = #tpu.dot_dimension_numbers<[1], [0], [0], [1], [0, 0, 1, 1], [], []>} : vector<16x8xf32>, vector<8x8xf32>, vector<16x8xf32> -> vector<16x8xf32>
    %cst_48 = arith.constant dense<0.000000e+00> : vector<16xf32>
    %106 = vector.multi_reduction <add>, %104, %cst_48 [1] : vector<16x8xf32> to vector<16xf32>
    %107 = vector.shape_cast %106 : vector<16xf32> to vector<16x1xf32>
    %cst_49 = arith.constant 0.771320641 : f32
    %108 = vector.broadcast %cst_49 : f32 to vector<16x1xf32>
    %109 = arith.mulf %108, %107 : vector<16x1xf32>
    %110 = vector.broadcast %109 : vector<16x1xf32> to vector<16x8xf32>
    %111 = arith.cmpf ole, %105, %110 : vector<16x8xf32>
    %112 = arith.extui %111 : vector<16x8xi1> to vector<16x8xi32>
    %cst_50 = arith.constant dense<0> : vector<16xi32>
    %113 = vector.multi_reduction <add>, %112, %cst_50 [1] : vector<16x8xi32> to vector<16xi32>
    %114 = vector.shape_cast %113 : vector<16xi32> to vector<16x1xi32>
    %c7_i32_51 = arith.constant 7 : i32
    %115 = vector.broadcast %c7_i32_51 : i32 to vector<16x1xi32>
    %116 = arith.minsi %114, %115 : vector<16x1xi32>
    %117 = vector.broadcast %116 : vector<16x1xi32> to vector<16x8xi32>
    %118 = arith.cmpi eq, %10, %117 : vector<16x8xi32>
    %119 = arith.extui %118 : vector<16x8xi1> to vector<16x8xi32>
    %120 = arith.sitofp %119 : vector<16x8xi32> to vector<16x8xf32>
    %121 = arith.mulf %69, %120 : vector<16x8xf32>
    %cst_52 = arith.constant dense<0.000000e+00> : vector<16xf32>
    %122 = vector.multi_reduction <add>, %121, %cst_52 [1] : vector<16x8xf32> to vector<16xf32>
    %123 = vector.shape_cast %122 : vector<16xf32> to vector<16x1xf32>
    %cst_53 = arith.constant dense<0.000000e+00> : vector<16x256xf32>
    %124 = tpu.matmul %69, %0, %cst_53 {dimension_numbers = #tpu.dot_dimension_numbers<[1], [0], [0], [1], [0, 0, 1, 1], [], []>} : vector<16x8xf32>, vector<8x256xf32>, vector<16x256xf32> -> vector<16x256xf32>
    %cst_54 = arith.constant dense<0.000000e+00> : vector<16x256xf32>
    %125 = tpu.matmul %120, %1, %cst_54 {dimension_numbers = #tpu.dot_dimension_numbers<[1], [0], [0], [1], [0, 0, 1, 1], [], []>} : vector<16x8xf32>, vector<8x256xf32>, vector<16x256xf32> -> vector<16x256xf32>
    %126 = arith.addf %124, %125 : vector<16x256xf32>
    %127 = vector.broadcast %2 : vector<1x256xf32> to vector<16x256xf32>
    %128 = arith.addf %126, %127 : vector<16x256xf32>
    %129 = vector.extract_strided_slice %128 {offsets = [0, 0], sizes = [16, 192], strides = [1, 1]} : vector<16x256xf32> to vector<16x192xf32>
    %130 = arith.negf %129 : vector<16x192xf32>
    %131 = math.exp %130 : vector<16x192xf32>
    %cst_55 = arith.constant 1.000000e+00 : f32
    %132 = vector.broadcast %cst_55 : f32 to vector<16x192xf32>
    %133 = arith.addf %132, %131 : vector<16x192xf32>
    %134 = arith.divf %132, %133 : vector<16x192xf32>
    %135 = vector.extract_strided_slice %134 {offsets = [0, 0], sizes = [16, 64], strides = [1, 1]} : vector<16x192xf32> to vector<16x64xf32>
    %136 = vector.extract_strided_slice %134 {offsets = [0, 64], sizes = [16, 64], strides = [1, 1]} : vector<16x192xf32> to vector<16x64xf32>
    %137 = vector.extract_strided_slice %134 {offsets = [0, 128], sizes = [16, 64], strides = [1, 1]} : vector<16x192xf32> to vector<16x64xf32>
    %138 = vector.extract_strided_slice %128 {offsets = [0, 192], sizes = [16, 64], strides = [1, 1]} : vector<16x256xf32> to vector<16x64xf32>
    %139 = math.tanh %138 : vector<16x64xf32>
    %140 = vector.broadcast %3 : vector<1x64xf32> to vector<16x64xf32>
    %141 = arith.mulf %136, %140 : vector<16x64xf32>
    %142 = arith.mulf %135, %139 : vector<16x64xf32>
    %143 = arith.addf %141, %142 : vector<16x64xf32>
    %144 = math.tanh %143 : vector<16x64xf32>
    %145 = arith.mulf %137, %144 : vector<16x64xf32>
    %cst_56 = arith.constant dense<0.000000e+00> : vector<16x11xf32>
    %146 = tpu.matmul %145, %4, %cst_56 {dimension_numbers = #tpu.dot_dimension_numbers<[1], [0], [0], [1], [0, 0, 1, 1], [], []>} : vector<16x64xf32>, vector<64x11xf32>, vector<16x11xf32> -> vector<16x11xf32>
    %147 = vector.extract_strided_slice %146 {offsets = [0, 0], sizes = [16, 8], strides = [1, 1]} : vector<16x11xf32> to vector<16x8xf32>
    %148 = vector.extract_strided_slice %146 {offsets = [0, 8], sizes = [16, 3], strides = [1, 1]} : vector<16x11xf32> to vector<16x3xf32>
    %cst_57 = arith.constant dense<0xFF800000> : vector<16xf32>
    %149 = vector.multi_reduction <maximumf>, %147, %cst_57 [1] : vector<16x8xf32> to vector<16xf32>
    %150 = vector.shape_cast %149 : vector<16xf32> to vector<16x1xf32>
    %151 = vector.broadcast %150 : vector<16x1xf32> to vector<16x8xf32>
    %152 = arith.subf %147, %151 : vector<16x8xf32>
    %153 = math.exp %152 : vector<16x8xf32>
    %cst_58 = arith.constant dense<0.000000e+00> : vector<16xf32>
    %154 = vector.multi_reduction <add>, %153, %cst_58 [1] : vector<16x8xf32> to vector<16xf32>
    %155 = vector.shape_cast %154 : vector<16xf32> to vector<16x1xf32>
    %156 = vector.broadcast %155 : vector<16x1xf32> to vector<16x8xf32>
    %157 = arith.divf %153, %156 : vector<16x8xf32>
    %cst_59 = arith.constant dense<0xFF800000> : vector<16xf32>
    %158 = vector.multi_reduction <maximumf>, %148, %cst_59 [1] : vector<16x3xf32> to vector<16xf32>
    %159 = vector.shape_cast %158 : vector<16xf32> to vector<16x1xf32>
    %160 = vector.broadcast %159 : vector<16x1xf32> to vector<16x3xf32>
    %161 = arith.subf %148, %160 : vector<16x3xf32>
    %162 = math.exp %161 : vector<16x3xf32>
    %cst_60 = arith.constant dense<0.000000e+00> : vector<16xf32>
    %163 = vector.multi_reduction <add>, %162, %cst_60 [1] : vector<16x3xf32> to vector<16xf32>
    %164 = vector.shape_cast %163 : vector<16xf32> to vector<16x1xf32>
    %165 = math.log %164 : vector<16x1xf32>
    %166 = vector.broadcast %165 : vector<16x1xf32> to vector<16x3xf32>
    %167 = arith.subf %161, %166 : vector<16x3xf32>
    %c1_61 = arith.constant 1 : index
    %c0_62 = arith.constant 0 : index
    %c0_63 = arith.constant 0 : index
    %168 = vector.load %arg8[%c1_61, %c0_62, %c0_63] : memref<10x16x256xf32, #tpu.memory_space<vmem>>, vector<1x16x8xf32>
    %169 = vector.shape_cast %168 : vector<1x16x8xf32> to vector<16x8xf32>
    %170 = vector.shape_cast %157 : vector<16x8xf32> to vector<1x16x8xf32>
    tpu.vector_store %arg8[%c1_61, %c0_62, %c0_63], %170 {strides = array<i32>} : memref<10x16x256xf32, #tpu.memory_space<vmem>>, vector<1x16x8xf32>,
    %c1_64 = arith.constant 1 : index
    %c0_65 = arith.constant 0 : index
    %c8_66 = arith.constant 8 : index
    %171 = vector.load %arg8[%c1_64, %c0_65, %c8_66] : memref<10x16x256xf32, #tpu.memory_space<vmem>>, vector<1x16x3xf32>
    %172 = vector.shape_cast %171 : vector<1x16x3xf32> to vector<16x3xf32>
    %173 = vector.shape_cast %167 : vector<16x3xf32> to vector<1x16x3xf32>
    tpu.vector_store %arg8[%c1_64, %c0_65, %c8_66], %173 {strides = array<i32>} : memref<10x16x256xf32, #tpu.memory_space<vmem>>, vector<1x16x3xf32>,
    %c1_67 = arith.constant 1 : index
    %c0_68 = arith.constant 0 : index
    %c11_69 = arith.constant 11 : index
    %174 = vector.load %arg8[%c1_67, %c0_68, %c11_69] : memref<10x16x256xf32, #tpu.memory_space<vmem>>, vector<1x16x1xf32>
    %175 = vector.shape_cast %174 : vector<1x16x1xf32> to vector<16x1xf32>
    %176 = vector.shape_cast %123 : vector<16x1xf32> to vector<1x16x1xf32>
    tpu.vector_store %arg8[%c1_67, %c0_68, %c11_69], %176 {strides = array<i32>} : memref<10x16x256xf32, #tpu.memory_space<vmem>>, vector<1x16x1xf32>,
    %177 = arith.sitofp %116 : vector<16x1xi32> to vector<16x1xf32>
    %c1_70 = arith.constant 1 : index
    %c0_71 = arith.constant 0 : index
    %c12_72 = arith.constant 12 : index
    %178 = vector.load %arg8[%c1_70, %c0_71, %c12_72] : memref<10x16x256xf32, #tpu.memory_space<vmem>>, vector<1x16x1xf32>
    %179 = vector.shape_cast %178 : vector<1x16x1xf32> to vector<16x1xf32>
    %180 = vector.shape_cast %177 : vector<16x1xf32> to vector<1x16x1xf32>
    tpu.vector_store %arg8[%c1_70, %c0_71, %c12_72], %180 {strides = array<i32>} : memref<10x16x256xf32, #tpu.memory_space<vmem>>, vector<1x16x1xf32>,
    %c1_73 = arith.constant 1 : index
    %c0_74 = arith.constant 0 : index
    %c16_75 = arith.constant 16 : index
    %181 = vector.load %arg8[%c1_73, %c0_74, %c16_75] : memref<10x16x256xf32, #tpu.memory_space<vmem>>, vector<1x16x8xf32>
    %182 = vector.shape_cast %181 : vector<1x16x8xf32> to vector<16x8xf32>
    %183 = vector.shape_cast %104 : vector<16x8xf32> to vector<1x16x8xf32>
    tpu.vector_store %arg8[%c1_73, %c0_74, %c16_75], %183 {strides = array<i32>} : memref<10x16x256xf32, #tpu.memory_space<vmem>>, vector<1x16x8xf32>,
    %c1_76 = arith.constant 1 : index
    %c0_77 = arith.constant 0 : index
    %c128_78 = arith.constant 128 : index
    %184 = vector.load %arg8[%c1_76, %c0_77, %c128_78] : memref<10x16x256xf32, #tpu.memory_space<vmem>>, vector<1x16x64xf32>
    %185 = vector.shape_cast %184 : vector<1x16x64xf32> to vector<16x64xf32>
    %186 = vector.shape_cast %145 : vector<16x64xf32> to vector<1x16x64xf32>
    tpu.vector_store %arg8[%c1_76, %c0_77, %c128_78], %186 {strides = array<i32>} : memref<10x16x256xf32, #tpu.memory_space<vmem>>, vector<1x16x64xf32>,
    %c1_79 = arith.constant 1 : index
    %c0_80 = arith.constant 0 : index
    %c192_81 = arith.constant 192 : index
    %187 = vector.load %arg8[%c1_79, %c0_80, %c192_81] : memref<10x16x256xf32, #tpu.memory_space<vmem>>, vector<1x16x64xf32>
    %188 = vector.shape_cast %187 : vector<1x16x64xf32> to vector<16x64xf32>
    %189 = vector.shape_cast %143 : vector<16x64xf32> to vector<1x16x64xf32>
    tpu.vector_store %arg8[%c1_79, %c0_80, %c192_81], %189 {strides = array<i32>} : memref<10x16x256xf32, #tpu.memory_space<vmem>>, vector<1x16x64xf32>,
    %c2 = arith.constant 2 : index
    %c0_82 = arith.constant 0 : index
    %c0_83 = arith.constant 0 : index
    %190 = vector.load %arg1[%c2, %c0_82, %c0_83] : memref<10x16x8xf32, #tpu.memory_space<vmem>>, vector<1x16x8xf32>
    %191 = vector.shape_cast %190 : vector<1x16x8xf32> to vector<16x8xf32>
    %192 = arith.mulf %157, %191 : vector<16x8xf32>
    %cst_84 = arith.constant dense<0.000000e+00> : vector<16x8xf32>
    %193 = tpu.matmul %192, %9, %cst_84 {dimension_numbers = #tpu.dot_dimension_numbers<[1], [0], [0], [1], [0, 0, 1, 1], [], []>} : vector<16x8xf32>, vector<8x8xf32>, vector<16x8xf32> -> vector<16x8xf32>
    %cst_85 = arith.constant dense<0.000000e+00> : vector<16xf32>
    %194 = vector.multi_reduction <add>, %192, %cst_85 [1] : vector<16x8xf32> to vector<16xf32>
    %195 = vector.shape_cast %194 : vector<16xf32> to vector<16x1xf32>
    %cst_86 = arith.constant 0.771320641 : f32
    %196 = vector.broadcast %cst_86 : f32 to vector<16x1xf32>
    %197 = arith.mulf %196, %195 : vector<16x1xf32>
    %198 = vector.broadcast %197 : vector<16x1xf32> to vector<16x8xf32>
    %199 = arith.cmpf ole, %193, %198 : vector<16x8xf32>
    %200 = arith.extui %199 : vector<16x8xi1> to vector<16x8xi32>
    %cst_87 = arith.constant dense<0> : vector<16xi32>
    %201 = vector.multi_reduction <add>, %200, %cst_87 [1] : vector<16x8xi32> to vector<16xi32>
    %202 = vector.shape_cast %201 : vector<16xi32> to vector<16x1xi32>
    %c7_i32_88 = arith.constant 7 : i32
    %203 = vector.broadcast %c7_i32_88 : i32 to vector<16x1xi32>
    %204 = arith.minsi %202, %203 : vector<16x1xi32>
    %205 = vector.broadcast %204 : vector<16x1xi32> to vector<16x8xi32>
    %206 = arith.cmpi eq, %10, %205 : vector<16x8xi32>
    %207 = arith.extui %206 : vector<16x8xi1> to vector<16x8xi32>
    %208 = arith.sitofp %207 : vector<16x8xi32> to vector<16x8xf32>
    %209 = arith.mulf %157, %208 : vector<16x8xf32>
    %cst_89 = arith.constant dense<0.000000e+00> : vector<16xf32>
    %210 = vector.multi_reduction <add>, %209, %cst_89 [1] : vector<16x8xf32> to vector<16xf32>
    %211 = vector.shape_cast %210 : vector<16xf32> to vector<16x1xf32>
    %cst_90 = arith.constant dense<0.000000e+00> : vector<16x256xf32>
    %212 = tpu.matmul %157, %0, %cst_90 {dimension_numbers = #tpu.dot_dimension_numbers<[1], [0], [0], [1], [0, 0, 1, 1], [], []>} : vector<16x8xf32>, vector<8x256xf32>, vector<16x256xf32> -> vector<16x256xf32>
    %cst_91 = arith.constant dense<0.000000e+00> : vector<16x256xf32>
    %213 = tpu.matmul %208, %1, %cst_91 {dimension_numbers = #tpu.dot_dimension_numbers<[1], [0], [0], [1], [0, 0, 1, 1], [], []>} : vector<16x8xf32>, vector<8x256xf32>, vector<16x256xf32> -> vector<16x256xf32>
    %214 = arith.addf %212, %213 : vector<16x256xf32>
    %215 = vector.broadcast %2 : vector<1x256xf32> to vector<16x256xf32>
    %216 = arith.addf %214, %215 : vector<16x256xf32>
    %217 = vector.extract_strided_slice %216 {offsets = [0, 0], sizes = [16, 192], strides = [1, 1]} : vector<16x256xf32> to vector<16x192xf32>
    %218 = arith.negf %217 : vector<16x192xf32>
    %219 = math.exp %218 : vector<16x192xf32>
    %cst_92 = arith.constant 1.000000e+00 : f32
    %220 = vector.broadcast %cst_92 : f32 to vector<16x192xf32>
    %221 = arith.addf %220, %219 : vector<16x192xf32>
    %222 = arith.divf %220, %221 : vector<16x192xf32>
    %223 = vector.extract_strided_slice %222 {offsets = [0, 0], sizes = [16, 64], strides = [1, 1]} : vector<16x192xf32> to vector<16x64xf32>
    %224 = vector.extract_strided_slice %222 {offsets = [0, 64], sizes = [16, 64], strides = [1, 1]} : vector<16x192xf32> to vector<16x64xf32>
    %225 = vector.extract_strided_slice %222 {offsets = [0, 128], sizes = [16, 64], strides = [1, 1]} : vector<16x192xf32> to vector<16x64xf32>
    %226 = vector.extract_strided_slice %216 {offsets = [0, 192], sizes = [16, 64], strides = [1, 1]} : vector<16x256xf32> to vector<16x64xf32>
    %227 = math.tanh %226 : vector<16x64xf32>
    %228 = vector.broadcast %3 : vector<1x64xf32> to vector<16x64xf32>
    %229 = arith.mulf %224, %228 : vector<16x64xf32>
    %230 = arith.mulf %223, %227 : vector<16x64xf32>
    %231 = arith.addf %229, %230 : vector<16x64xf32>
    %232 = math.tanh %231 : vector<16x64xf32>
    %233 = arith.mulf %225, %232 : vector<16x64xf32>
    %cst_93 = arith.constant dense<0.000000e+00> : vector<16x11xf32>
    %234 = tpu.matmul %233, %4, %cst_93 {dimension_numbers = #tpu.dot_dimension_numbers<[1], [0], [0], [1], [0, 0, 1, 1], [], []>} : vector<16x64xf32>, vector<64x11xf32>, vector<16x11xf32> -> vector<16x11xf32>
    %235 = vector.extract_strided_slice %234 {offsets = [0, 0], sizes = [16, 8], strides = [1, 1]} : vector<16x11xf32> to vector<16x8xf32>
    %236 = vector.extract_strided_slice %234 {offsets = [0, 8], sizes = [16, 3], strides = [1, 1]} : vector<16x11xf32> to vector<16x3xf32>
    %cst_94 = arith.constant dense<0xFF800000> : vector<16xf32>
    %237 = vector.multi_reduction <maximumf>, %235, %cst_94 [1] : vector<16x8xf32> to vector<16xf32>
    %238 = vector.shape_cast %237 : vector<16xf32> to vector<16x1xf32>
    %239 = vector.broadcast %238 : vector<16x1xf32> to vector<16x8xf32>
    %240 = arith.subf %235, %239 : vector<16x8xf32>
    %241 = math.exp %240 : vector<16x8xf32>
    %cst_95 = arith.constant dense<0.000000e+00> : vector<16xf32>
    %242 = vector.multi_reduction <add>, %241, %cst_95 [1] : vector<16x8xf32> to vector<16xf32>
    %243 = vector.shape_cast %242 : vector<16xf32> to vector<16x1xf32>
    %244 = vector.broadcast %243 : vector<16x1xf32> to vector<16x8xf32>
    %245 = arith.divf %241, %244 : vector<16x8xf32>
    %cst_96 = arith.constant dense<0xFF800000> : vector<16xf32>
    %246 = vector.multi_reduction <maximumf>, %236, %cst_96 [1] : vector<16x3xf32> to vector<16xf32>
    %247 = vector.shape_cast %246 : vector<16xf32> to vector<16x1xf32>
    %248 = vector.broadcast %247 : vector<16x1xf32> to vector<16x3xf32>
    %249 = arith.subf %236, %248 : vector<16x3xf32>
    %250 = math.exp %249 : vector<16x3xf32>
    %cst_97 = arith.constant dense<0.000000e+00> : vector<16xf32>
    %251 = vector.multi_reduction <add>, %250, %cst_97 [1] : vector<16x3xf32> to vector<16xf32>
    %252 = vector.shape_cast %251 : vector<16xf32> to vector<16x1xf32>
    %253 = math.log %252 : vector<16x1xf32>
    %254 = vector.broadcast %253 : vector<16x1xf32> to vector<16x3xf32>
    %255 = arith.subf %249, %254 : vector<16x3xf32>
    %c2_98 = arith.constant 2 : index
    %c0_99 = arith.constant 0 : index
    %c0_100 = arith.constant 0 : index
    %256 = vector.load %arg8[%c2_98, %c0_99, %c0_100] : memref<10x16x256xf32, #tpu.memory_space<vmem>>, vector<1x16x8xf32>
    %257 = vector.shape_cast %256 : vector<1x16x8xf32> to vector<16x8xf32>
    %258 = vector.shape_cast %245 : vector<16x8xf32> to vector<1x16x8xf32>
    tpu.vector_store %arg8[%c2_98, %c0_99, %c0_100], %258 {strides = array<i32>} : memref<10x16x256xf32, #tpu.memory_space<vmem>>, vector<1x16x8xf32>,
    %c2_101 = arith.constant 2 : index
    %c0_102 = arith.constant 0 : index
    %c8_103 = arith.constant 8 : index
    %259 = vector.load %arg8[%c2_101, %c0_102, %c8_103] : memref<10x16x256xf32, #tpu.memory_space<vmem>>, vector<1x16x3xf32>
    %260 = vector.shape_cast %259 : vector<1x16x3xf32> to vector<16x3xf32>
    %261 = vector.shape_cast %255 : vector<16x3xf32> to vector<1x16x3xf32>
    tpu.vector_store %arg8[%c2_101, %c0_102, %c8_103], %261 {strides = array<i32>} : memref<10x16x256xf32, #tpu.memory_space<vmem>>, vector<1x16x3xf32>,
    %c2_104 = arith.constant 2 : index
    %c0_105 = arith.constant 0 : index
    %c11_106 = arith.constant 11 : index
    %262 = vector.load %arg8[%c2_104, %c0_105, %c11_106] : memref<10x16x256xf32, #tpu.memory_space<vmem>>, vector<1x16x1xf32>
    %263 = vector.shape_cast %262 : vector<1x16x1xf32> to vector<16x1xf32>
    %264 = vector.shape_cast %211 : vector<16x1xf32> to vector<1x16x1xf32>
    tpu.vector_store %arg8[%c2_104, %c0_105, %c11_106], %264 {strides = array<i32>} : memref<10x16x256xf32, #tpu.memory_space<vmem>>, vector<1x16x1xf32>,
    %265 = arith.sitofp %204 : vector<16x1xi32> to vector<16x1xf32>
    %c2_107 = arith.constant 2 : index
    %c0_108 = arith.constant 0 : index
    %c12_109 = arith.constant 12 : index
    %266 = vector.load %arg8[%c2_107, %c0_108, %c12_109] : memref<10x16x256xf32, #tpu.memory_space<vmem>>, vector<1x16x1xf32>
    %267 = vector.shape_cast %266 : vector<1x16x1xf32> to vector<16x1xf32>
    %268 = vector.shape_cast %265 : vector<16x1xf32> to vector<1x16x1xf32>
    tpu.vector_store %arg8[%c2_107, %c0_108, %c12_109], %268 {strides = array<i32>} : memref<10x16x256xf32, #tpu.memory_space<vmem>>, vector<1x16x1xf32>,
    %c2_110 = arith.constant 2 : index
    %c0_111 = arith.constant 0 : index
    %c16_112 = arith.constant 16 : index
    %269 = vector.load %arg8[%c2_110, %c0_111, %c16_112] : memref<10x16x256xf32, #tpu.memory_space<vmem>>, vector<1x16x8xf32>
    %270 = vector.shape_cast %269 : vector<1x16x8xf32> to vector<16x8xf32>
    %271 = vector.shape_cast %192 : vector<16x8xf32> to vector<1x16x8xf32>
    tpu.vector_store %arg8[%c2_110, %c0_111, %c16_112], %271 {strides = array<i32>} : memref<10x16x256xf32, #tpu.memory_space<vmem>>, vector<1x16x8xf32>,
    %c2_113 = arith.constant 2 : index
    %c0_114 = arith.constant 0 : index
    %c128_115 = arith.constant 128 : index
    %272 = vector.load %arg8[%c2_113, %c0_114, %c128_115] : memref<10x16x256xf32, #tpu.memory_space<vmem>>, vector<1x16x64xf32>
    %273 = vector.shape_cast %272 : vector<1x16x64xf32> to vector<16x64xf32>
    %274 = vector.shape_cast %233 : vector<16x64xf32> to vector<1x16x64xf32>
    tpu.vector_store %arg8[%c2_113, %c0_114, %c128_115], %274 {strides = array<i32>} : memref<10x16x256xf32, #tpu.memory_space<vmem>>, vector<1x16x64xf32>,
    %c2_116 = arith.constant 2 : index
    %c0_117 = arith.constant 0 : index
    %c192_118 = arith.constant 192 : index
    %275 = vector.load %arg8[%c2_116, %c0_117, %c192_118] : memref<10x16x256xf32, #tpu.memory_space<vmem>>, vector<1x16x64xf32>
    %276 = vector.shape_cast %275 : vector<1x16x64xf32> to vector<16x64xf32>
    %277 = vector.shape_cast %231 : vector<16x64xf32> to vector<1x16x64xf32>
    tpu.vector_store %arg8[%c2_116, %c0_117, %c192_118], %277 {strides = array<i32>} : memref<10x16x256xf32, #tpu.memory_space<vmem>>, vector<1x16x64xf32>,
    %c3 = arith.constant 3 : index
    %c0_119 = arith.constant 0 : index
    %c0_120 = arith.constant 0 : index
    %278 = vector.load %arg1[%c3, %c0_119, %c0_120] : memref<10x16x8xf32, #tpu.memory_space<vmem>>, vector<1x16x8xf32>
    %279 = vector.shape_cast %278 : vector<1x16x8xf32> to vector<16x8xf32>
    %280 = arith.mulf %245, %279 : vector<16x8xf32>
    %cst_121 = arith.constant dense<0.000000e+00> : vector<16x8xf32>
    %281 = tpu.matmul %280, %9, %cst_121 {dimension_numbers = #tpu.dot_dimension_numbers<[1], [0], [0], [1], [0, 0, 1, 1], [], []>} : vector<16x8xf32>, vector<8x8xf32>, vector<16x8xf32> -> vector<16x8xf32>
    %cst_122 = arith.constant dense<0.000000e+00> : vector<16xf32>
    %282 = vector.multi_reduction <add>, %280, %cst_122 [1] : vector<16x8xf32> to vector<16xf32>
    %283 = vector.shape_cast %282 : vector<16xf32> to vector<16x1xf32>
    %cst_123 = arith.constant 0.771320641 : f32
    %284 = vector.broadcast %cst_123 : f32 to vector<16x1xf32>
    %285 = arith.mulf %284, %283 : vector<16x1xf32>
    %286 = vector.broadcast %285 : vector<16x1xf32> to vector<16x8xf32>
    %287 = arith.cmpf ole, %281, %286 : vector<16x8xf32>
    %288 = arith.extui %287 : vector<16x8xi1> to vector<16x8xi32>
    %cst_124 = arith.constant dense<0> : vector<16xi32>
    %289 = vector.multi_reduction <add>, %288, %cst_124 [1] : vector<16x8xi32> to vector<16xi32>
    %290 = vector.shape_cast %289 : vector<16xi32> to vector<16x1xi32>
    %c7_i32_125 = arith.constant 7 : i32
    %291 = vector.broadcast %c7_i32_125 : i32 to vector<16x1xi32>
    %292 = arith.minsi %290, %291 : vector<16x1xi32>
    %293 = vector.broadcast %292 : vector<16x1xi32> to vector<16x8xi32>
    %294 = arith.cmpi eq, %10, %293 : vector<16x8xi32>
    %295 = arith.extui %294 : vector<16x8xi1> to vector<16x8xi32>
    %296 = arith.sitofp %295 : vector<16x8xi32> to vector<16x8xf32>
    %297 = arith.mulf %245, %296 : vector<16x8xf32>
    %cst_126 = arith.constant dense<0.000000e+00> : vector<16xf32>
    %298 = vector.multi_reduction <add>, %297, %cst_126 [1] : vector<16x8xf32> to vector<16xf32>
    %299 = vector.shape_cast %298 : vector<16xf32> to vector<16x1xf32>
    %cst_127 = arith.constant dense<0.000000e+00> : vector<16x256xf32>
    %300 = tpu.matmul %245, %0, %cst_127 {dimension_numbers = #tpu.dot_dimension_numbers<[1], [0], [0], [1], [0, 0, 1, 1], [], []>} : vector<16x8xf32>, vector<8x256xf32>, vector<16x256xf32> -> vector<16x256xf32>
    %cst_128 = arith.constant dense<0.000000e+00> : vector<16x256xf32>
    %301 = tpu.matmul %296, %1, %cst_128 {dimension_numbers = #tpu.dot_dimension_numbers<[1], [0], [0], [1], [0, 0, 1, 1], [], []>} : vector<16x8xf32>, vector<8x256xf32>, vector<16x256xf32> -> vector<16x256xf32>
    %302 = arith.addf %300, %301 : vector<16x256xf32>
    %303 = vector.broadcast %2 : vector<1x256xf32> to vector<16x256xf32>
    %304 = arith.addf %302, %303 : vector<16x256xf32>
    %305 = vector.extract_strided_slice %304 {offsets = [0, 0], sizes = [16, 192], strides = [1, 1]} : vector<16x256xf32> to vector<16x192xf32>
    %306 = arith.negf %305 : vector<16x192xf32>
    %307 = math.exp %306 : vector<16x192xf32>
    %cst_129 = arith.constant 1.000000e+00 : f32
    %308 = vector.broadcast %cst_129 : f32 to vector<16x192xf32>
    %309 = arith.addf %308, %307 : vector<16x192xf32>
    %310 = arith.divf %308, %309 : vector<16x192xf32>
    %311 = vector.extract_strided_slice %310 {offsets = [0, 0], sizes = [16, 64], strides = [1, 1]} : vector<16x192xf32> to vector<16x64xf32>
    %312 = vector.extract_strided_slice %310 {offsets = [0, 64], sizes = [16, 64], strides = [1, 1]} : vector<16x192xf32> to vector<16x64xf32>
    %313 = vector.extract_strided_slice %310 {offsets = [0, 128], sizes = [16, 64], strides = [1, 1]} : vector<16x192xf32> to vector<16x64xf32>
    %314 = vector.extract_strided_slice %304 {offsets = [0, 192], sizes = [16, 64], strides = [1, 1]} : vector<16x256xf32> to vector<16x64xf32>
    %315 = math.tanh %314 : vector<16x64xf32>
    %316 = vector.broadcast %3 : vector<1x64xf32> to vector<16x64xf32>
    %317 = arith.mulf %312, %316 : vector<16x64xf32>
    %318 = arith.mulf %311, %315 : vector<16x64xf32>
    %319 = arith.addf %317, %318 : vector<16x64xf32>
    %320 = math.tanh %319 : vector<16x64xf32>
    %321 = arith.mulf %313, %320 : vector<16x64xf32>
    %cst_130 = arith.constant dense<0.000000e+00> : vector<16x11xf32>
    %322 = tpu.matmul %321, %4, %cst_130 {dimension_numbers = #tpu.dot_dimension_numbers<[1], [0], [0], [1], [0, 0, 1, 1], [], []>} : vector<16x64xf32>, vector<64x11xf32>, vector<16x11xf32> -> vector<16x11xf32>
    %323 = vector.extract_strided_slice %322 {offsets = [0, 0], sizes = [16, 8], strides = [1, 1]} : vector<16x11xf32> to vector<16x8xf32>
    %324 = vector.extract_strided_slice %322 {offsets = [0, 8], sizes = [16, 3], strides = [1, 1]} : vector<16x11xf32> to vector<16x3xf32>
    %cst_131 = arith.constant dense<0xFF800000> : vector<16xf32>
    %325 = vector.multi_reduction <maximumf>, %323, %cst_131 [1] : vector<16x8xf32> to vector<16xf32>
    %326 = vector.shape_cast %325 : vector<16xf32> to vector<16x1xf32>
    %327 = vector.broadcast %326 : vector<16x1xf32> to vector<16x8xf32>
    %328 = arith.subf %323, %327 : vector<16x8xf32>
    %329 = math.exp %328 : vector<16x8xf32>
    %cst_132 = arith.constant dense<0.000000e+00> : vector<16xf32>
    %330 = vector.multi_reduction <add>, %329, %cst_132 [1] : vector<16x8xf32> to vector<16xf32>
    %331 = vector.shape_cast %330 : vector<16xf32> to vector<16x1xf32>
    %332 = vector.broadcast %331 : vector<16x1xf32> to vector<16x8xf32>
    %333 = arith.divf %329, %332 : vector<16x8xf32>
    %cst_133 = arith.constant dense<0xFF800000> : vector<16xf32>
    %334 = vector.multi_reduction <maximumf>, %324, %cst_133 [1] : vector<16x3xf32> to vector<16xf32>
    %335 = vector.shape_cast %334 : vector<16xf32> to vector<16x1xf32>
    %336 = vector.broadcast %335 : vector<16x1xf32> to vector<16x3xf32>
    %337 = arith.subf %324, %336 : vector<16x3xf32>
    %338 = math.exp %337 : vector<16x3xf32>
    %cst_134 = arith.constant dense<0.000000e+00> : vector<16xf32>
    %339 = vector.multi_reduction <add>, %338, %cst_134 [1] : vector<16x3xf32> to vector<16xf32>
    %340 = vector.shape_cast %339 : vector<16xf32> to vector<16x1xf32>
    %341 = math.log %340 : vector<16x1xf32>
    %342 = vector.broadcast %341 : vector<16x1xf32> to vector<16x3xf32>
    %343 = arith.subf %337, %342 : vector<16x3xf32>
    %c3_135 = arith.constant 3 : index
    %c0_136 = arith.constant 0 : index
    %c0_137 = arith.constant 0 : index
    %344 = vector.load %arg8[%c3_135, %c0_136, %c0_137] : memref<10x16x256xf32, #tpu.memory_space<vmem>>, vector<1x16x8xf32>
    %345 = vector.shape_cast %344 : vector<1x16x8xf32> to vector<16x8xf32>
    %346 = vector.shape_cast %333 : vector<16x8xf32> to vector<1x16x8xf32>
    tpu.vector_store %arg8[%c3_135, %c0_136, %c0_137], %346 {strides = array<i32>} : memref<10x16x256xf32, #tpu.memory_space<vmem>>, vector<1x16x8xf32>,
    %c3_138 = arith.constant 3 : index
    %c0_139 = arith.constant 0 : index
    %c8_140 = arith.constant 8 : index
    %347 = vector.load %arg8[%c3_138, %c0_139, %c8_140] : memref<10x16x256xf32, #tpu.memory_space<vmem>>, vector<1x16x3xf32>
    %348 = vector.shape_cast %347 : vector<1x16x3xf32> to vector<16x3xf32>
    %349 = vector.shape_cast %343 : vector<16x3xf32> to vector<1x16x3xf32>
    tpu.vector_store %arg8[%c3_138, %c0_139, %c8_140], %349 {strides = array<i32>} : memref<10x16x256xf32, #tpu.memory_space<vmem>>, vector<1x16x3xf32>,
    %c3_141 = arith.constant 3 : index
    %c0_142 = arith.constant 0 : index
    %c11_143 = arith.constant 11 : index
    %350 = vector.load %arg8[%c3_141, %c0_142, %c11_143] : memref<10x16x256xf32, #tpu.memory_space<vmem>>, vector<1x16x1xf32>
    %351 = vector.shape_cast %350 : vector<1x16x1xf32> to vector<16x1xf32>
    %352 = vector.shape_cast %299 : vector<16x1xf32> to vector<1x16x1xf32>
    tpu.vector_store %arg8[%c3_141, %c0_142, %c11_143], %352 {strides = array<i32>} : memref<10x16x256xf32, #tpu.memory_space<vmem>>, vector<1x16x1xf32>,
    %353 = arith.sitofp %292 : vector<16x1xi32> to vector<16x1xf32>
    %c3_144 = arith.constant 3 : index
    %c0_145 = arith.constant 0 : index
    %c12_146 = arith.constant 12 : index
    %354 = vector.load %arg8[%c3_144, %c0_145, %c12_146] : memref<10x16x256xf32, #tpu.memory_space<vmem>>, vector<1x16x1xf32>
    %355 = vector.shape_cast %354 : vector<1x16x1xf32> to vector<16x1xf32>
    %356 = vector.shape_cast %353 : vector<16x1xf32> to vector<1x16x1xf32>
    tpu.vector_store %arg8[%c3_144, %c0_145, %c12_146], %356 {strides = array<i32>} : memref<10x16x256xf32, #tpu.memory_space<vmem>>, vector<1x16x1xf32>,
    %c3_147 = arith.constant 3 : index
    %c0_148 = arith.constant 0 : index
    %c16_149 = arith.constant 16 : index
    %357 = vector.load %arg8[%c3_147, %c0_148, %c16_149] : memref<10x16x256xf32, #tpu.memory_space<vmem>>, vector<1x16x8xf32>
    %358 = vector.shape_cast %357 : vector<1x16x8xf32> to vector<16x8xf32>
    %359 = vector.shape_cast %280 : vector<16x8xf32> to vector<1x16x8xf32>
    tpu.vector_store %arg8[%c3_147, %c0_148, %c16_149], %359 {strides = array<i32>} : memref<10x16x256xf32, #tpu.memory_space<vmem>>, vector<1x16x8xf32>,
    %c3_150 = arith.constant 3 : index
    %c0_151 = arith.constant 0 : index
    %c128_152 = arith.constant 128 : index
    %360 = vector.load %arg8[%c3_150, %c0_151, %c128_152] : memref<10x16x256xf32, #tpu.memory_space<vmem>>, vector<1x16x64xf32>
    %361 = vector.shape_cast %360 : vector<1x16x64xf32> to vector<16x64xf32>
    %362 = vector.shape_cast %321 : vector<16x64xf32> to vector<1x16x64xf32>
    tpu.vector_store %arg8[%c3_150, %c0_151, %c128_152], %362 {strides = array<i32>} : memref<10x16x256xf32, #tpu.memory_space<vmem>>, vector<1x16x64xf32>,
    %c3_153 = arith.constant 3 : index
    %c0_154 = arith.constant 0 : index
    %c192_155 = arith.constant 192 : index
    %363 = vector.load %arg8[%c3_153, %c0_154, %c192_155] : memref<10x16x256xf32, #tpu.memory_space<vmem>>, vector<1x16x64xf32>
    %364 = vector.shape_cast %363 : vector<1x16x64xf32> to vector<16x64xf32>
    %365 = vector.shape_cast %319 : vector<16x64xf32> to vector<1x16x64xf32>
    tpu.vector_store %arg8[%c3_153, %c0_154, %c192_155], %365 {strides = array<i32>} : memref<10x16x256xf32, #tpu.memory_space<vmem>>, vector<1x16x64xf32>,
    %c4 = arith.constant 4 : index
    %c0_156 = arith.constant 0 : index
    %c0_157 = arith.constant 0 : index
    %366 = vector.load %arg1[%c4, %c0_156, %c0_157] : memref<10x16x8xf32, #tpu.memory_space<vmem>>, vector<1x16x8xf32>
    %367 = vector.shape_cast %366 : vector<1x16x8xf32> to vector<16x8xf32>
    %368 = arith.mulf %333, %367 : vector<16x8xf32>
    %cst_158 = arith.constant dense<0.000000e+00> : vector<16x8xf32>
    %369 = tpu.matmul %368, %9, %cst_158 {dimension_numbers = #tpu.dot_dimension_numbers<[1], [0], [0], [1], [0, 0, 1, 1], [], []>} : vector<16x8xf32>, vector<8x8xf32>, vector<16x8xf32> -> vector<16x8xf32>
    %cst_159 = arith.constant dense<0.000000e+00> : vector<16xf32>
    %370 = vector.multi_reduction <add>, %368, %cst_159 [1] : vector<16x8xf32> to vector<16xf32>
    %371 = vector.shape_cast %370 : vector<16xf32> to vector<16x1xf32>
    %cst_160 = arith.constant 0.771320641 : f32
    %372 = vector.broadcast %cst_160 : f32 to vector<16x1xf32>
    %373 = arith.mulf %372, %371 : vector<16x1xf32>
    %374 = vector.broadcast %373 : vector<16x1xf32> to vector<16x8xf32>
    %375 = arith.cmpf ole, %369, %374 : vector<16x8xf32>
    %376 = arith.extui %375 : vector<16x8xi1> to vector<16x8xi32>
    %cst_161 = arith.constant dense<0> : vector<16xi32>
    %377 = vector.multi_reduction <add>, %376, %cst_161 [1] : vector<16x8xi32> to vector<16xi32>
    %378 = vector.shape_cast %377 : vector<16xi32> to vector<16x1xi32>
    %c7_i32_162 = arith.constant 7 : i32
    %379 = vector.broadcast %c7_i32_162 : i32 to vector<16x1xi32>
    %380 = arith.minsi %378, %379 : vector<16x1xi32>
    %381 = vector.broadcast %380 : vector<16x1xi32> to vector<16x8xi32>
    %382 = arith.cmpi eq, %10, %381 : vector<16x8xi32>
    %383 = arith.extui %382 : vector<16x8xi1> to vector<16x8xi32>
    %384 = arith.sitofp %383 : vector<16x8xi32> to vector<16x8xf32>
    %385 = arith.mulf %333, %384 : vector<16x8xf32>
    %cst_163 = arith.constant dense<0.000000e+00> : vector<16xf32>
    %386 = vector.multi_reduction <add>, %385, %cst_163 [1] : vector<16x8xf32> to vector<16xf32>
    %387 = vector.shape_cast %386 : vector<16xf32> to vector<16x1xf32>
    %cst_164 = arith.constant dense<0.000000e+00> : vector<16x256xf32>
    %388 = tpu.matmul %333, %0, %cst_164 {dimension_numbers = #tpu.dot_dimension_numbers<[1], [0], [0], [1], [0, 0, 1, 1], [], []>} : vector<16x8xf32>, vector<8x256xf32>, vector<16x256xf32> -> vector<16x256xf32>
    %cst_165 = arith.constant dense<0.000000e+00> : vector<16x256xf32>
    %389 = tpu.matmul %384, %1, %cst_165 {dimension_numbers = #tpu.dot_dimension_numbers<[1], [0], [0], [1], [0, 0, 1, 1], [], []>} : vector<16x8xf32>, vector<8x256xf32>, vector<16x256xf32> -> vector<16x256xf32>
    %390 = arith.addf %388, %389 : vector<16x256xf32>
    %391 = vector.broadcast %2 : vector<1x256xf32> to vector<16x256xf32>
    %392 = arith.addf %390, %391 : vector<16x256xf32>
    %393 = vector.extract_strided_slice %392 {offsets = [0, 0], sizes = [16, 192], strides = [1, 1]} : vector<16x256xf32> to vector<16x192xf32>
    %394 = arith.negf %393 : vector<16x192xf32>
    %395 = math.exp %394 : vector<16x192xf32>
    %cst_166 = arith.constant 1.000000e+00 : f32
    %396 = vector.broadcast %cst_166 : f32 to vector<16x192xf32>
    %397 = arith.addf %396, %395 : vector<16x192xf32>
    %398 = arith.divf %396, %397 : vector<16x192xf32>
    %399 = vector.extract_strided_slice %398 {offsets = [0, 0], sizes = [16, 64], strides = [1, 1]} : vector<16x192xf32> to vector<16x64xf32>
    %400 = vector.extract_strided_slice %398 {offsets = [0, 64], sizes = [16, 64], strides = [1, 1]} : vector<16x192xf32> to vector<16x64xf32>
    %401 = vector.extract_strided_slice %398 {offsets = [0, 128], sizes = [16, 64], strides = [1, 1]} : vector<16x192xf32> to vector<16x64xf32>
    %402 = vector.extract_strided_slice %392 {offsets = [0, 192], sizes = [16, 64], strides = [1, 1]} : vector<16x256xf32> to vector<16x64xf32>
    %403 = math.tanh %402 : vector<16x64xf32>
    %404 = vector.broadcast %3 : vector<1x64xf32> to vector<16x64xf32>
    %405 = arith.mulf %400, %404 : vector<16x64xf32>
    %406 = arith.mulf %399, %403 : vector<16x64xf32>
    %407 = arith.addf %405, %406 : vector<16x64xf32>
    %408 = math.tanh %407 : vector<16x64xf32>
    %409 = arith.mulf %401, %408 : vector<16x64xf32>
    %cst_167 = arith.constant dense<0.000000e+00> : vector<16x11xf32>
    %410 = tpu.matmul %409, %4, %cst_167 {dimension_numbers = #tpu.dot_dimension_numbers<[1], [0], [0], [1], [0, 0, 1, 1], [], []>} : vector<16x64xf32>, vector<64x11xf32>, vector<16x11xf32> -> vector<16x11xf32>
    %411 = vector.extract_strided_slice %410 {offsets = [0, 0], sizes = [16, 8], strides = [1, 1]} : vector<16x11xf32> to vector<16x8xf32>
    %412 = vector.extract_strided_slice %410 {offsets = [0, 8], sizes = [16, 3], strides = [1, 1]} : vector<16x11xf32> to vector<16x3xf32>
    %cst_168 = arith.constant dense<0xFF800000> : vector<16xf32>
    %413 = vector.multi_reduction <maximumf>, %411, %cst_168 [1] : vector<16x8xf32> to vector<16xf32>
    %414 = vector.shape_cast %413 : vector<16xf32> to vector<16x1xf32>
    %415 = vector.broadcast %414 : vector<16x1xf32> to vector<16x8xf32>
    %416 = arith.subf %411, %415 : vector<16x8xf32>
    %417 = math.exp %416 : vector<16x8xf32>
    %cst_169 = arith.constant dense<0.000000e+00> : vector<16xf32>
    %418 = vector.multi_reduction <add>, %417, %cst_169 [1] : vector<16x8xf32> to vector<16xf32>
    %419 = vector.shape_cast %418 : vector<16xf32> to vector<16x1xf32>
    %420 = vector.broadcast %419 : vector<16x1xf32> to vector<16x8xf32>
    %421 = arith.divf %417, %420 : vector<16x8xf32>
    %cst_170 = arith.constant dense<0xFF800000> : vector<16xf32>
    %422 = vector.multi_reduction <maximumf>, %412, %cst_170 [1] : vector<16x3xf32> to vector<16xf32>
    %423 = vector.shape_cast %422 : vector<16xf32> to vector<16x1xf32>
    %424 = vector.broadcast %423 : vector<16x1xf32> to vector<16x3xf32>
    %425 = arith.subf %412, %424 : vector<16x3xf32>
    %426 = math.exp %425 : vector<16x3xf32>
    %cst_171 = arith.constant dense<0.000000e+00> : vector<16xf32>
    %427 = vector.multi_reduction <add>, %426, %cst_171 [1] : vector<16x3xf32> to vector<16xf32>
    %428 = vector.shape_cast %427 : vector<16xf32> to vector<16x1xf32>
    %429 = math.log %428 : vector<16x1xf32>
    %430 = vector.broadcast %429 : vector<16x1xf32> to vector<16x3xf32>
    %431 = arith.subf %425, %430 : vector<16x3xf32>
    %c4_172 = arith.constant 4 : index
    %c0_173 = arith.constant 0 : index
    %c0_174 = arith.constant 0 : index
    %432 = vector.load %arg8[%c4_172, %c0_173, %c0_174] : memref<10x16x256xf32, #tpu.memory_space<vmem>>, vector<1x16x8xf32>
    %433 = vector.shape_cast %432 : vector<1x16x8xf32> to vector<16x8xf32>
    %434 = vector.shape_cast %421 : vector<16x8xf32> to vector<1x16x8xf32>
    tpu.vector_store %arg8[%c4_172, %c0_173, %c0_174], %434 {strides = array<i32>} : memref<10x16x256xf32, #tpu.memory_space<vmem>>, vector<1x16x8xf32>,
    %c4_175 = arith.constant 4 : index
    %c0_176 = arith.constant 0 : index
    %c8_177 = arith.constant 8 : index
    %435 = vector.load %arg8[%c4_175, %c0_176, %c8_177] : memref<10x16x256xf32, #tpu.memory_space<vmem>>, vector<1x16x3xf32>
    %436 = vector.shape_cast %435 : vector<1x16x3xf32> to vector<16x3xf32>
    %437 = vector.shape_cast %431 : vector<16x3xf32> to vector<1x16x3xf32>
    tpu.vector_store %arg8[%c4_175, %c0_176, %c8_177], %437 {strides = array<i32>} : memref<10x16x256xf32, #tpu.memory_space<vmem>>, vector<1x16x3xf32>,
    %c4_178 = arith.constant 4 : index
    %c0_179 = arith.constant 0 : index
    %c11_180 = arith.constant 11 : index
    %438 = vector.load %arg8[%c4_178, %c0_179, %c11_180] : memref<10x16x256xf32, #tpu.memory_space<vmem>>, vector<1x16x1xf32>
    %439 = vector.shape_cast %438 : vector<1x16x1xf32> to vector<16x1xf32>
    %440 = vector.shape_cast %387 : vector<16x1xf32> to vector<1x16x1xf32>
    tpu.vector_store %arg8[%c4_178, %c0_179, %c11_180], %440 {strides = array<i32>} : memref<10x16x256xf32, #tpu.memory_space<vmem>>, vector<1x16x1xf32>,
    %441 = arith.sitofp %380 : vector<16x1xi32> to vector<16x1xf32>
    %c4_181 = arith.constant 4 : index
    %c0_182 = arith.constant 0 : index
    %c12_183 = arith.constant 12 : index
    %442 = vector.load %arg8[%c4_181, %c0_182, %c12_183] : memref<10x16x256xf32, #tpu.memory_space<vmem>>, vector<1x16x1xf32>
    %443 = vector.shape_cast %442 : vector<1x16x1xf32> to vector<16x1xf32>
    %444 = vector.shape_cast %441 : vector<16x1xf32> to vector<1x16x1xf32>
    tpu.vector_store %arg8[%c4_181, %c0_182, %c12_183], %444 {strides = array<i32>} : memref<10x16x256xf32, #tpu.memory_space<vmem>>, vector<1x16x1xf32>,
    %c4_184 = arith.constant 4 : index
    %c0_185 = arith.constant 0 : index
    %c16_186 = arith.constant 16 : index
    %445 = vector.load %arg8[%c4_184, %c0_185, %c16_186] : memref<10x16x256xf32, #tpu.memory_space<vmem>>, vector<1x16x8xf32>
    %446 = vector.shape_cast %445 : vector<1x16x8xf32> to vector<16x8xf32>
    %447 = vector.shape_cast %368 : vector<16x8xf32> to vector<1x16x8xf32>
    tpu.vector_store %arg8[%c4_184, %c0_185, %c16_186], %447 {strides = array<i32>} : memref<10x16x256xf32, #tpu.memory_space<vmem>>, vector<1x16x8xf32>,
    %c4_187 = arith.constant 4 : index
    %c0_188 = arith.constant 0 : index
    %c128_189 = arith.constant 128 : index
    %448 = vector.load %arg8[%c4_187, %c0_188, %c128_189] : memref<10x16x256xf32, #tpu.memory_space<vmem>>, vector<1x16x64xf32>
    %449 = vector.shape_cast %448 : vector<1x16x64xf32> to vector<16x64xf32>
    %450 = vector.shape_cast %409 : vector<16x64xf32> to vector<1x16x64xf32>
    tpu.vector_store %arg8[%c4_187, %c0_188, %c128_189], %450 {strides = array<i32>} : memref<10x16x256xf32, #tpu.memory_space<vmem>>, vector<1x16x64xf32>,
    %c4_190 = arith.constant 4 : index
    %c0_191 = arith.constant 0 : index
    %c192_192 = arith.constant 192 : index
    %451 = vector.load %arg8[%c4_190, %c0_191, %c192_192] : memref<10x16x256xf32, #tpu.memory_space<vmem>>, vector<1x16x64xf32>
    %452 = vector.shape_cast %451 : vector<1x16x64xf32> to vector<16x64xf32>
    %453 = vector.shape_cast %407 : vector<16x64xf32> to vector<1x16x64xf32>
    tpu.vector_store %arg8[%c4_190, %c0_191, %c192_192], %453 {strides = array<i32>} : memref<10x16x256xf32, #tpu.memory_space<vmem>>, vector<1x16x64xf32>,
    %c5 = arith.constant 5 : index
    %c0_193 = arith.constant 0 : index
    %c0_194 = arith.constant 0 : index
    %454 = vector.load %arg1[%c5, %c0_193, %c0_194] : memref<10x16x8xf32, #tpu.memory_space<vmem>>, vector<1x16x8xf32>
    %455 = vector.shape_cast %454 : vector<1x16x8xf32> to vector<16x8xf32>
    %456 = arith.mulf %421, %455 : vector<16x8xf32>
    %cst_195 = arith.constant dense<0.000000e+00> : vector<16x8xf32>
    %457 = tpu.matmul %456, %9, %cst_195 {dimension_numbers = #tpu.dot_dimension_numbers<[1], [0], [0], [1], [0, 0, 1, 1], [], []>} : vector<16x8xf32>, vector<8x8xf32>, vector<16x8xf32> -> vector<16x8xf32>
    %cst_196 = arith.constant dense<0.000000e+00> : vector<16xf32>
    %458 = vector.multi_reduction <add>, %456, %cst_196 [1] : vector<16x8xf32> to vector<16xf32>
    %459 = vector.shape_cast %458 : vector<16xf32> to vector<16x1xf32>
    %cst_197 = arith.constant 0.771320641 : f32
    %460 = vector.broadcast %cst_197 : f32 to vector<16x1xf32>
    %461 = arith.mulf %460, %459 : vector<16x1xf32>
    %462 = vector.broadcast %461 : vector<16x1xf32> to vector<16x8xf32>
    %463 = arith.cmpf ole, %457, %462 : vector<16x8xf32>
    %464 = arith.extui %463 : vector<16x8xi1> to vector<16x8xi32>
    %cst_198 = arith.constant dense<0> : vector<16xi32>
    %465 = vector.multi_reduction <add>, %464, %cst_198 [1] : vector<16x8xi32> to vector<16xi32>
    %466 = vector.shape_cast %465 : vector<16xi32> to vector<16x1xi32>
    %c7_i32_199 = arith.constant 7 : i32
    %467 = vector.broadcast %c7_i32_199 : i32 to vector<16x1xi32>
    %468 = arith.minsi %466, %467 : vector<16x1xi32>
    %469 = vector.broadcast %468 : vector<16x1xi32> to vector<16x8xi32>
    %470 = arith.cmpi eq, %10, %469 : vector<16x8xi32>
    %471 = arith.extui %470 : vector<16x8xi1> to vector<16x8xi32>
    %472 = arith.sitofp %471 : vector<16x8xi32> to vector<16x8xf32>
    %473 = arith.mulf %421, %472 : vector<16x8xf32>
    %cst_200 = arith.constant dense<0.000000e+00> : vector<16xf32>
    %474 = vector.multi_reduction <add>, %473, %cst_200 [1] : vector<16x8xf32> to vector<16xf32>
    %475 = vector.shape_cast %474 : vector<16xf32> to vector<16x1xf32>
    %cst_201 = arith.constant dense<0.000000e+00> : vector<16x256xf32>
    %476 = tpu.matmul %421, %0, %cst_201 {dimension_numbers = #tpu.dot_dimension_numbers<[1], [0], [0], [1], [0, 0, 1, 1], [], []>} : vector<16x8xf32>, vector<8x256xf32>, vector<16x256xf32> -> vector<16x256xf32>
    %cst_202 = arith.constant dense<0.000000e+00> : vector<16x256xf32>
    %477 = tpu.matmul %472, %1, %cst_202 {dimension_numbers = #tpu.dot_dimension_numbers<[1], [0], [0], [1], [0, 0, 1, 1], [], []>} : vector<16x8xf32>, vector<8x256xf32>, vector<16x256xf32> -> vector<16x256xf32>
    %478 = arith.addf %476, %477 : vector<16x256xf32>
    %479 = vector.broadcast %2 : vector<1x256xf32> to vector<16x256xf32>
    %480 = arith.addf %478, %479 : vector<16x256xf32>
    %481 = vector.extract_strided_slice %480 {offsets = [0, 0], sizes = [16, 192], strides = [1, 1]} : vector<16x256xf32> to vector<16x192xf32>
    %482 = arith.negf %481 : vector<16x192xf32>
    %483 = math.exp %482 : vector<16x192xf32>
    %cst_203 = arith.constant 1.000000e+00 : f32
    %484 = vector.broadcast %cst_203 : f32 to vector<16x192xf32>
    %485 = arith.addf %484, %483 : vector<16x192xf32>
    %486 = arith.divf %484, %485 : vector<16x192xf32>
    %487 = vector.extract_strided_slice %486 {offsets = [0, 0], sizes = [16, 64], strides = [1, 1]} : vector<16x192xf32> to vector<16x64xf32>
    %488 = vector.extract_strided_slice %486 {offsets = [0, 64], sizes = [16, 64], strides = [1, 1]} : vector<16x192xf32> to vector<16x64xf32>
    %489 = vector.extract_strided_slice %486 {offsets = [0, 128], sizes = [16, 64], strides = [1, 1]} : vector<16x192xf32> to vector<16x64xf32>
    %490 = vector.extract_strided_slice %480 {offsets = [0, 192], sizes = [16, 64], strides = [1, 1]} : vector<16x256xf32> to vector<16x64xf32>
    %491 = math.tanh %490 : vector<16x64xf32>
    %492 = vector.broadcast %3 : vector<1x64xf32> to vector<16x64xf32>
    %493 = arith.mulf %488, %492 : vector<16x64xf32>
    %494 = arith.mulf %487, %491 : vector<16x64xf32>
    %495 = arith.addf %493, %494 : vector<16x64xf32>
    %496 = math.tanh %495 : vector<16x64xf32>
    %497 = arith.mulf %489, %496 : vector<16x64xf32>
    %cst_204 = arith.constant dense<0.000000e+00> : vector<16x11xf32>
    %498 = tpu.matmul %497, %4, %cst_204 {dimension_numbers = #tpu.dot_dimension_numbers<[1], [0], [0], [1], [0, 0, 1, 1], [], []>} : vector<16x64xf32>, vector<64x11xf32>, vector<16x11xf32> -> vector<16x11xf32>
    %499 = vector.extract_strided_slice %498 {offsets = [0, 0], sizes = [16, 8], strides = [1, 1]} : vector<16x11xf32> to vector<16x8xf32>
    %500 = vector.extract_strided_slice %498 {offsets = [0, 8], sizes = [16, 3], strides = [1, 1]} : vector<16x11xf32> to vector<16x3xf32>
    %cst_205 = arith.constant dense<0xFF800000> : vector<16xf32>
    %501 = vector.multi_reduction <maximumf>, %499, %cst_205 [1] : vector<16x8xf32> to vector<16xf32>
    %502 = vector.shape_cast %501 : vector<16xf32> to vector<16x1xf32>
    %503 = vector.broadcast %502 : vector<16x1xf32> to vector<16x8xf32>
    %504 = arith.subf %499, %503 : vector<16x8xf32>
    %505 = math.exp %504 : vector<16x8xf32>
    %cst_206 = arith.constant dense<0.000000e+00> : vector<16xf32>
    %506 = vector.multi_reduction <add>, %505, %cst_206 [1] : vector<16x8xf32> to vector<16xf32>
    %507 = vector.shape_cast %506 : vector<16xf32> to vector<16x1xf32>
    %508 = vector.broadcast %507 : vector<16x1xf32> to vector<16x8xf32>
    %509 = arith.divf %505, %508 : vector<16x8xf32>
    %cst_207 = arith.constant dense<0xFF800000> : vector<16xf32>
    %510 = vector.multi_reduction <maximumf>, %500, %cst_207 [1] : vector<16x3xf32> to vector<16xf32>
    %511 = vector.shape_cast %510 : vector<16xf32> to vector<16x1xf32>
    %512 = vector.broadcast %511 : vector<16x1xf32> to vector<16x3xf32>
    %513 = arith.subf %500, %512 : vector<16x3xf32>
    %514 = math.exp %513 : vector<16x3xf32>
    %cst_208 = arith.constant dense<0.000000e+00> : vector<16xf32>
    %515 = vector.multi_reduction <add>, %514, %cst_208 [1] : vector<16x3xf32> to vector<16xf32>
    %516 = vector.shape_cast %515 : vector<16xf32> to vector<16x1xf32>
    %517 = math.log %516 : vector<16x1xf32>
    %518 = vector.broadcast %517 : vector<16x1xf32> to vector<16x3xf32>
    %519 = arith.subf %513, %518 : vector<16x3xf32>
    %c5_209 = arith.constant 5 : index
    %c0_210 = arith.constant 0 : index
    %c0_211 = arith.constant 0 : index
    %520 = vector.load %arg8[%c5_209, %c0_210, %c0_211] : memref<10x16x256xf32, #tpu.memory_space<vmem>>, vector<1x16x8xf32>
    %521 = vector.shape_cast %520 : vector<1x16x8xf32> to vector<16x8xf32>
    %522 = vector.shape_cast %509 : vector<16x8xf32> to vector<1x16x8xf32>
    tpu.vector_store %arg8[%c5_209, %c0_210, %c0_211], %522 {strides = array<i32>} : memref<10x16x256xf32, #tpu.memory_space<vmem>>, vector<1x16x8xf32>,
    %c5_212 = arith.constant 5 : index
    %c0_213 = arith.constant 0 : index
    %c8_214 = arith.constant 8 : index
    %523 = vector.load %arg8[%c5_212, %c0_213, %c8_214] : memref<10x16x256xf32, #tpu.memory_space<vmem>>, vector<1x16x3xf32>
    %524 = vector.shape_cast %523 : vector<1x16x3xf32> to vector<16x3xf32>
    %525 = vector.shape_cast %519 : vector<16x3xf32> to vector<1x16x3xf32>
    tpu.vector_store %arg8[%c5_212, %c0_213, %c8_214], %525 {strides = array<i32>} : memref<10x16x256xf32, #tpu.memory_space<vmem>>, vector<1x16x3xf32>,
    %c5_215 = arith.constant 5 : index
    %c0_216 = arith.constant 0 : index
    %c11_217 = arith.constant 11 : index
    %526 = vector.load %arg8[%c5_215, %c0_216, %c11_217] : memref<10x16x256xf32, #tpu.memory_space<vmem>>, vector<1x16x1xf32>
    %527 = vector.shape_cast %526 : vector<1x16x1xf32> to vector<16x1xf32>
    %528 = vector.shape_cast %475 : vector<16x1xf32> to vector<1x16x1xf32>
    tpu.vector_store %arg8[%c5_215, %c0_216, %c11_217], %528 {strides = array<i32>} : memref<10x16x256xf32, #tpu.memory_space<vmem>>, vector<1x16x1xf32>,
    %529 = arith.sitofp %468 : vector<16x1xi32> to vector<16x1xf32>
    %c5_218 = arith.constant 5 : index
    %c0_219 = arith.constant 0 : index
    %c12_220 = arith.constant 12 : index
    %530 = vector.load %arg8[%c5_218, %c0_219, %c12_220] : memref<10x16x256xf32, #tpu.memory_space<vmem>>, vector<1x16x1xf32>
    %531 = vector.shape_cast %530 : vector<1x16x1xf32> to vector<16x1xf32>
    %532 = vector.shape_cast %529 : vector<16x1xf32> to vector<1x16x1xf32>
    tpu.vector_store %arg8[%c5_218, %c0_219, %c12_220], %532 {strides = array<i32>} : memref<10x16x256xf32, #tpu.memory_space<vmem>>, vector<1x16x1xf32>,
    %c5_221 = arith.constant 5 : index
    %c0_222 = arith.constant 0 : index
    %c16_223 = arith.constant 16 : index
    %533 = vector.load %arg8[%c5_221, %c0_222, %c16_223] : memref<10x16x256xf32, #tpu.memory_space<vmem>>, vector<1x16x8xf32>
    %534 = vector.shape_cast %533 : vector<1x16x8xf32> to vector<16x8xf32>
    %535 = vector.shape_cast %456 : vector<16x8xf32> to vector<1x16x8xf32>
    tpu.vector_store %arg8[%c5_221, %c0_222, %c16_223], %535 {strides = array<i32>} : memref<10x16x256xf32, #tpu.memory_space<vmem>>, vector<1x16x8xf32>,
    %c5_224 = arith.constant 5 : index
    %c0_225 = arith.constant 0 : index
    %c128_226 = arith.constant 128 : index
    %536 = vector.load %arg8[%c5_224, %c0_225, %c128_226] : memref<10x16x256xf32, #tpu.memory_space<vmem>>, vector<1x16x64xf32>
    %537 = vector.shape_cast %536 : vector<1x16x64xf32> to vector<16x64xf32>
    %538 = vector.shape_cast %497 : vector<16x64xf32> to vector<1x16x64xf32>
    tpu.vector_store %arg8[%c5_224, %c0_225, %c128_226], %538 {strides = array<i32>} : memref<10x16x256xf32, #tpu.memory_space<vmem>>, vector<1x16x64xf32>,
    %c5_227 = arith.constant 5 : index
    %c0_228 = arith.constant 0 : index
    %c192_229 = arith.constant 192 : index
    %539 = vector.load %arg8[%c5_227, %c0_228, %c192_229] : memref<10x16x256xf32, #tpu.memory_space<vmem>>, vector<1x16x64xf32>
    %540 = vector.shape_cast %539 : vector<1x16x64xf32> to vector<16x64xf32>
    %541 = vector.shape_cast %495 : vector<16x64xf32> to vector<1x16x64xf32>
    tpu.vector_store %arg8[%c5_227, %c0_228, %c192_229], %541 {strides = array<i32>} : memref<10x16x256xf32, #tpu.memory_space<vmem>>, vector<1x16x64xf32>,
    %c6 = arith.constant 6 : index
    %c0_230 = arith.constant 0 : index
    %c0_231 = arith.constant 0 : index
    %542 = vector.load %arg1[%c6, %c0_230, %c0_231] : memref<10x16x8xf32, #tpu.memory_space<vmem>>, vector<1x16x8xf32>
    %543 = vector.shape_cast %542 : vector<1x16x8xf32> to vector<16x8xf32>
    %544 = arith.mulf %509, %543 : vector<16x8xf32>
    %cst_232 = arith.constant dense<0.000000e+00> : vector<16x8xf32>
    %545 = tpu.matmul %544, %9, %cst_232 {dimension_numbers = #tpu.dot_dimension_numbers<[1], [0], [0], [1], [0, 0, 1, 1], [], []>} : vector<16x8xf32>, vector<8x8xf32>, vector<16x8xf32> -> vector<16x8xf32>
    %cst_233 = arith.constant dense<0.000000e+00> : vector<16xf32>
    %546 = vector.multi_reduction <add>, %544, %cst_233 [1] : vector<16x8xf32> to vector<16xf32>
    %547 = vector.shape_cast %546 : vector<16xf32> to vector<16x1xf32>
    %cst_234 = arith.constant 0.771320641 : f32
    %548 = vector.broadcast %cst_234 : f32 to vector<16x1xf32>
    %549 = arith.mulf %548, %547 : vector<16x1xf32>
    %550 = vector.broadcast %549 : vector<16x1xf32> to vector<16x8xf32>
    %551 = arith.cmpf ole, %545, %550 : vector<16x8xf32>
    %552 = arith.extui %551 : vector<16x8xi1> to vector<16x8xi32>
    %cst_235 = arith.constant dense<0> : vector<16xi32>
    %553 = vector.multi_reduction <add>, %552, %cst_235 [1] : vector<16x8xi32> to vector<16xi32>
    %554 = vector.shape_cast %553 : vector<16xi32> to vector<16x1xi32>
    %c7_i32_236 = arith.constant 7 : i32
    %555 = vector.broadcast %c7_i32_236 : i32 to vector<16x1xi32>
    %556 = arith.minsi %554, %555 : vector<16x1xi32>
    %557 = vector.broadcast %556 : vector<16x1xi32> to vector<16x8xi32>
    %558 = arith.cmpi eq, %10, %557 : vector<16x8xi32>
    %559 = arith.extui %558 : vector<16x8xi1> to vector<16x8xi32>
    %560 = arith.sitofp %559 : vector<16x8xi32> to vector<16x8xf32>
    %561 = arith.mulf %509, %560 : vector<16x8xf32>
    %cst_237 = arith.constant dense<0.000000e+00> : vector<16xf32>
    %562 = vector.multi_reduction <add>, %561, %cst_237 [1] : vector<16x8xf32> to vector<16xf32>
    %563 = vector.shape_cast %562 : vector<16xf32> to vector<16x1xf32>
    %cst_238 = arith.constant dense<0.000000e+00> : vector<16x256xf32>
    %564 = tpu.matmul %509, %0, %cst_238 {dimension_numbers = #tpu.dot_dimension_numbers<[1], [0], [0], [1], [0, 0, 1, 1], [], []>} : vector<16x8xf32>, vector<8x256xf32>, vector<16x256xf32> -> vector<16x256xf32>
    %cst_239 = arith.constant dense<0.000000e+00> : vector<16x256xf32>
    %565 = tpu.matmul %560, %1, %cst_239 {dimension_numbers = #tpu.dot_dimension_numbers<[1], [0], [0], [1], [0, 0, 1, 1], [], []>} : vector<16x8xf32>, vector<8x256xf32>, vector<16x256xf32> -> vector<16x256xf32>
    %566 = arith.addf %564, %565 : vector<16x256xf32>
    %567 = vector.broadcast %2 : vector<1x256xf32> to vector<16x256xf32>
    %568 = arith.addf %566, %567 : vector<16x256xf32>
    %569 = vector.extract_strided_slice %568 {offsets = [0, 0], sizes = [16, 192], strides = [1, 1]} : vector<16x256xf32> to vector<16x192xf32>
    %570 = arith.negf %569 : vector<16x192xf32>
    %571 = math.exp %570 : vector<16x192xf32>
    %cst_240 = arith.constant 1.000000e+00 : f32
    %572 = vector.broadcast %cst_240 : f32 to vector<16x192xf32>
    %573 = arith.addf %572, %571 : vector<16x192xf32>
    %574 = arith.divf %572, %573 : vector<16x192xf32>
    %575 = vector.extract_strided_slice %574 {offsets = [0, 0], sizes = [16, 64], strides = [1, 1]} : vector<16x192xf32> to vector<16x64xf32>
    %576 = vector.extract_strided_slice %574 {offsets = [0, 64], sizes = [16, 64], strides = [1, 1]} : vector<16x192xf32> to vector<16x64xf32>
    %577 = vector.extract_strided_slice %574 {offsets = [0, 128], sizes = [16, 64], strides = [1, 1]} : vector<16x192xf32> to vector<16x64xf32>
    %578 = vector.extract_strided_slice %568 {offsets = [0, 192], sizes = [16, 64], strides = [1, 1]} : vector<16x256xf32> to vector<16x64xf32>
    %579 = math.tanh %578 : vector<16x64xf32>
    %580 = vector.broadcast %3 : vector<1x64xf32> to vector<16x64xf32>
    %581 = arith.mulf %576, %580 : vector<16x64xf32>
    %582 = arith.mulf %575, %579 : vector<16x64xf32>
    %583 = arith.addf %581, %582 : vector<16x64xf32>
    %584 = math.tanh %583 : vector<16x64xf32>
    %585 = arith.mulf %577, %584 : vector<16x64xf32>
    %cst_241 = arith.constant dense<0.000000e+00> : vector<16x11xf32>
    %586 = tpu.matmul %585, %4, %cst_241 {dimension_numbers = #tpu.dot_dimension_numbers<[1], [0], [0], [1], [0, 0, 1, 1], [], []>} : vector<16x64xf32>, vector<64x11xf32>, vector<16x11xf32> -> vector<16x11xf32>
    %587 = vector.extract_strided_slice %586 {offsets = [0, 0], sizes = [16, 8], strides = [1, 1]} : vector<16x11xf32> to vector<16x8xf32>
    %588 = vector.extract_strided_slice %586 {offsets = [0, 8], sizes = [16, 3], strides = [1, 1]} : vector<16x11xf32> to vector<16x3xf32>
    %cst_242 = arith.constant dense<0xFF800000> : vector<16xf32>
    %589 = vector.multi_reduction <maximumf>, %587, %cst_242 [1] : vector<16x8xf32> to vector<16xf32>
    %590 = vector.shape_cast %589 : vector<16xf32> to vector<16x1xf32>
    %591 = vector.broadcast %590 : vector<16x1xf32> to vector<16x8xf32>
    %592 = arith.subf %587, %591 : vector<16x8xf32>
    %593 = math.exp %592 : vector<16x8xf32>
    %cst_243 = arith.constant dense<0.000000e+00> : vector<16xf32>
    %594 = vector.multi_reduction <add>, %593, %cst_243 [1] : vector<16x8xf32> to vector<16xf32>
    %595 = vector.shape_cast %594 : vector<16xf32> to vector<16x1xf32>
    %596 = vector.broadcast %595 : vector<16x1xf32> to vector<16x8xf32>
    %597 = arith.divf %593, %596 : vector<16x8xf32>
    %cst_244 = arith.constant dense<0xFF800000> : vector<16xf32>
    %598 = vector.multi_reduction <maximumf>, %588, %cst_244 [1] : vector<16x3xf32> to vector<16xf32>
    %599 = vector.shape_cast %598 : vector<16xf32> to vector<16x1xf32>
    %600 = vector.broadcast %599 : vector<16x1xf32> to vector<16x3xf32>
    %601 = arith.subf %588, %600 : vector<16x3xf32>
    %602 = math.exp %601 : vector<16x3xf32>
    %cst_245 = arith.constant dense<0.000000e+00> : vector<16xf32>
    %603 = vector.multi_reduction <add>, %602, %cst_245 [1] : vector<16x3xf32> to vector<16xf32>
    %604 = vector.shape_cast %603 : vector<16xf32> to vector<16x1xf32>
    %605 = math.log %604 : vector<16x1xf32>
    %606 = vector.broadcast %605 : vector<16x1xf32> to vector<16x3xf32>
    %607 = arith.subf %601, %606 : vector<16x3xf32>
    %c6_246 = arith.constant 6 : index
    %c0_247 = arith.constant 0 : index
    %c0_248 = arith.constant 0 : index
    %608 = vector.load %arg8[%c6_246, %c0_247, %c0_248] : memref<10x16x256xf32, #tpu.memory_space<vmem>>, vector<1x16x8xf32>
    %609 = vector.shape_cast %608 : vector<1x16x8xf32> to vector<16x8xf32>
    %610 = vector.shape_cast %597 : vector<16x8xf32> to vector<1x16x8xf32>
    tpu.vector_store %arg8[%c6_246, %c0_247, %c0_248], %610 {strides = array<i32>} : memref<10x16x256xf32, #tpu.memory_space<vmem>>, vector<1x16x8xf32>,
    %c6_249 = arith.constant 6 : index
    %c0_250 = arith.constant 0 : index
    %c8_251 = arith.constant 8 : index
    %611 = vector.load %arg8[%c6_249, %c0_250, %c8_251] : memref<10x16x256xf32, #tpu.memory_space<vmem>>, vector<1x16x3xf32>
    %612 = vector.shape_cast %611 : vector<1x16x3xf32> to vector<16x3xf32>
    %613 = vector.shape_cast %607 : vector<16x3xf32> to vector<1x16x3xf32>
    tpu.vector_store %arg8[%c6_249, %c0_250, %c8_251], %613 {strides = array<i32>} : memref<10x16x256xf32, #tpu.memory_space<vmem>>, vector<1x16x3xf32>,
    %c6_252 = arith.constant 6 : index
    %c0_253 = arith.constant 0 : index
    %c11_254 = arith.constant 11 : index
    %614 = vector.load %arg8[%c6_252, %c0_253, %c11_254] : memref<10x16x256xf32, #tpu.memory_space<vmem>>, vector<1x16x1xf32>
    %615 = vector.shape_cast %614 : vector<1x16x1xf32> to vector<16x1xf32>
    %616 = vector.shape_cast %563 : vector<16x1xf32> to vector<1x16x1xf32>
    tpu.vector_store %arg8[%c6_252, %c0_253, %c11_254], %616 {strides = array<i32>} : memref<10x16x256xf32, #tpu.memory_space<vmem>>, vector<1x16x1xf32>,
    %617 = arith.sitofp %556 : vector<16x1xi32> to vector<16x1xf32>
    %c6_255 = arith.constant 6 : index
    %c0_256 = arith.constant 0 : index
    %c12_257 = arith.constant 12 : index
    %618 = vector.load %arg8[%c6_255, %c0_256, %c12_257] : memref<10x16x256xf32, #tpu.memory_space<vmem>>, vector<1x16x1xf32>
    %619 = vector.shape_cast %618 : vector<1x16x1xf32> to vector<16x1xf32>
    %620 = vector.shape_cast %617 : vector<16x1xf32> to vector<1x16x1xf32>
    tpu.vector_store %arg8[%c6_255, %c0_256, %c12_257], %620 {strides = array<i32>} : memref<10x16x256xf32, #tpu.memory_space<vmem>>, vector<1x16x1xf32>,
    %c6_258 = arith.constant 6 : index
    %c0_259 = arith.constant 0 : index
    %c16_260 = arith.constant 16 : index
    %621 = vector.load %arg8[%c6_258, %c0_259, %c16_260] : memref<10x16x256xf32, #tpu.memory_space<vmem>>, vector<1x16x8xf32>
    %622 = vector.shape_cast %621 : vector<1x16x8xf32> to vector<16x8xf32>
    %623 = vector.shape_cast %544 : vector<16x8xf32> to vector<1x16x8xf32>
    tpu.vector_store %arg8[%c6_258, %c0_259, %c16_260], %623 {strides = array<i32>} : memref<10x16x256xf32, #tpu.memory_space<vmem>>, vector<1x16x8xf32>,
    %c6_261 = arith.constant 6 : index
    %c0_262 = arith.constant 0 : index
    %c128_263 = arith.constant 128 : index
    %624 = vector.load %arg8[%c6_261, %c0_262, %c128_263] : memref<10x16x256xf32, #tpu.memory_space<vmem>>, vector<1x16x64xf32>
    %625 = vector.shape_cast %624 : vector<1x16x64xf32> to vector<16x64xf32>
    %626 = vector.shape_cast %585 : vector<16x64xf32> to vector<1x16x64xf32>
    tpu.vector_store %arg8[%c6_261, %c0_262, %c128_263], %626 {strides = array<i32>} : memref<10x16x256xf32, #tpu.memory_space<vmem>>, vector<1x16x64xf32>,
    %c6_264 = arith.constant 6 : index
    %c0_265 = arith.constant 0 : index
    %c192_266 = arith.constant 192 : index
    %627 = vector.load %arg8[%c6_264, %c0_265, %c192_266] : memref<10x16x256xf32, #tpu.memory_space<vmem>>, vector<1x16x64xf32>
    %628 = vector.shape_cast %627 : vector<1x16x64xf32> to vector<16x64xf32>
    %629 = vector.shape_cast %583 : vector<16x64xf32> to vector<1x16x64xf32>
    tpu.vector_store %arg8[%c6_264, %c0_265, %c192_266], %629 {strides = array<i32>} : memref<10x16x256xf32, #tpu.memory_space<vmem>>, vector<1x16x64xf32>,
    %c7 = arith.constant 7 : index
    %c0_267 = arith.constant 0 : index
    %c0_268 = arith.constant 0 : index
    %630 = vector.load %arg1[%c7, %c0_267, %c0_268] : memref<10x16x8xf32, #tpu.memory_space<vmem>>, vector<1x16x8xf32>
    %631 = vector.shape_cast %630 : vector<1x16x8xf32> to vector<16x8xf32>
    %632 = arith.mulf %597, %631 : vector<16x8xf32>
    %cst_269 = arith.constant dense<0.000000e+00> : vector<16x8xf32>
    %633 = tpu.matmul %632, %9, %cst_269 {dimension_numbers = #tpu.dot_dimension_numbers<[1], [0], [0], [1], [0, 0, 1, 1], [], []>} : vector<16x8xf32>, vector<8x8xf32>, vector<16x8xf32> -> vector<16x8xf32>
    %cst_270 = arith.constant dense<0.000000e+00> : vector<16xf32>
    %634 = vector.multi_reduction <add>, %632, %cst_270 [1] : vector<16x8xf32> to vector<16xf32>
    %635 = vector.shape_cast %634 : vector<16xf32> to vector<16x1xf32>
    %cst_271 = arith.constant 0.771320641 : f32
    %636 = vector.broadcast %cst_271 : f32 to vector<16x1xf32>
    %637 = arith.mulf %636, %635 : vector<16x1xf32>
    %638 = vector.broadcast %637 : vector<16x1xf32> to vector<16x8xf32>
    %639 = arith.cmpf ole, %633, %638 : vector<16x8xf32>
    %640 = arith.extui %639 : vector<16x8xi1> to vector<16x8xi32>
    %cst_272 = arith.constant dense<0> : vector<16xi32>
    %641 = vector.multi_reduction <add>, %640, %cst_272 [1] : vector<16x8xi32> to vector<16xi32>
    %642 = vector.shape_cast %641 : vector<16xi32> to vector<16x1xi32>
    %c7_i32_273 = arith.constant 7 : i32
    %643 = vector.broadcast %c7_i32_273 : i32 to vector<16x1xi32>
    %644 = arith.minsi %642, %643 : vector<16x1xi32>
    %645 = vector.broadcast %644 : vector<16x1xi32> to vector<16x8xi32>
    %646 = arith.cmpi eq, %10, %645 : vector<16x8xi32>
    %647 = arith.extui %646 : vector<16x8xi1> to vector<16x8xi32>
    %648 = arith.sitofp %647 : vector<16x8xi32> to vector<16x8xf32>
    %649 = arith.mulf %597, %648 : vector<16x8xf32>
    %cst_274 = arith.constant dense<0.000000e+00> : vector<16xf32>
    %650 = vector.multi_reduction <add>, %649, %cst_274 [1] : vector<16x8xf32> to vector<16xf32>
    %651 = vector.shape_cast %650 : vector<16xf32> to vector<16x1xf32>
    %cst_275 = arith.constant dense<0.000000e+00> : vector<16x256xf32>
    %652 = tpu.matmul %597, %0, %cst_275 {dimension_numbers = #tpu.dot_dimension_numbers<[1], [0], [0], [1], [0, 0, 1, 1], [], []>} : vector<16x8xf32>, vector<8x256xf32>, vector<16x256xf32> -> vector<16x256xf32>
    %cst_276 = arith.constant dense<0.000000e+00> : vector<16x256xf32>
    %653 = tpu.matmul %648, %1, %cst_276 {dimension_numbers = #tpu.dot_dimension_numbers<[1], [0], [0], [1], [0, 0, 1, 1], [], []>} : vector<16x8xf32>, vector<8x256xf32>, vector<16x256xf32> -> vector<16x256xf32>
    %654 = arith.addf %652, %653 : vector<16x256xf32>
    %655 = vector.broadcast %2 : vector<1x256xf32> to vector<16x256xf32>
    %656 = arith.addf %654, %655 : vector<16x256xf32>
    %657 = vector.extract_strided_slice %656 {offsets = [0, 0], sizes = [16, 192], strides = [1, 1]} : vector<16x256xf32> to vector<16x192xf32>
    %658 = arith.negf %657 : vector<16x192xf32>
    %659 = math.exp %658 : vector<16x192xf32>
    %cst_277 = arith.constant 1.000000e+00 : f32
    %660 = vector.broadcast %cst_277 : f32 to vector<16x192xf32>
    %661 = arith.addf %660, %659 : vector<16x192xf32>
    %662 = arith.divf %660, %661 : vector<16x192xf32>
    %663 = vector.extract_strided_slice %662 {offsets = [0, 0], sizes = [16, 64], strides = [1, 1]} : vector<16x192xf32> to vector<16x64xf32>
    %664 = vector.extract_strided_slice %662 {offsets = [0, 64], sizes = [16, 64], strides = [1, 1]} : vector<16x192xf32> to vector<16x64xf32>
    %665 = vector.extract_strided_slice %662 {offsets = [0, 128], sizes = [16, 64], strides = [1, 1]} : vector<16x192xf32> to vector<16x64xf32>
    %666 = vector.extract_strided_slice %656 {offsets = [0, 192], sizes = [16, 64], strides = [1, 1]} : vector<16x256xf32> to vector<16x64xf32>
    %667 = math.tanh %666 : vector<16x64xf32>
    %668 = vector.broadcast %3 : vector<1x64xf32> to vector<16x64xf32>
    %669 = arith.mulf %664, %668 : vector<16x64xf32>
    %670 = arith.mulf %663, %667 : vector<16x64xf32>
    %671 = arith.addf %669, %670 : vector<16x64xf32>
    %672 = math.tanh %671 : vector<16x64xf32>
    %673 = arith.mulf %665, %672 : vector<16x64xf32>
    %cst_278 = arith.constant dense<0.000000e+00> : vector<16x11xf32>
    %674 = tpu.matmul %673, %4, %cst_278 {dimension_numbers = #tpu.dot_dimension_numbers<[1], [0], [0], [1], [0, 0, 1, 1], [], []>} : vector<16x64xf32>, vector<64x11xf32>, vector<16x11xf32> -> vector<16x11xf32>
    %675 = vector.extract_strided_slice %674 {offsets = [0, 0], sizes = [16, 8], strides = [1, 1]} : vector<16x11xf32> to vector<16x8xf32>
    %676 = vector.extract_strided_slice %674 {offsets = [0, 8], sizes = [16, 3], strides = [1, 1]} : vector<16x11xf32> to vector<16x3xf32>
    %cst_279 = arith.constant dense<0xFF800000> : vector<16xf32>
    %677 = vector.multi_reduction <maximumf>, %675, %cst_279 [1] : vector<16x8xf32> to vector<16xf32>
    %678 = vector.shape_cast %677 : vector<16xf32> to vector<16x1xf32>
    %679 = vector.broadcast %678 : vector<16x1xf32> to vector<16x8xf32>
    %680 = arith.subf %675, %679 : vector<16x8xf32>
    %681 = math.exp %680 : vector<16x8xf32>
    %cst_280 = arith.constant dense<0.000000e+00> : vector<16xf32>
    %682 = vector.multi_reduction <add>, %681, %cst_280 [1] : vector<16x8xf32> to vector<16xf32>
    %683 = vector.shape_cast %682 : vector<16xf32> to vector<16x1xf32>
    %684 = vector.broadcast %683 : vector<16x1xf32> to vector<16x8xf32>
    %685 = arith.divf %681, %684 : vector<16x8xf32>
    %cst_281 = arith.constant dense<0xFF800000> : vector<16xf32>
    %686 = vector.multi_reduction <maximumf>, %676, %cst_281 [1] : vector<16x3xf32> to vector<16xf32>
    %687 = vector.shape_cast %686 : vector<16xf32> to vector<16x1xf32>
    %688 = vector.broadcast %687 : vector<16x1xf32> to vector<16x3xf32>
    %689 = arith.subf %676, %688 : vector<16x3xf32>
    %690 = math.exp %689 : vector<16x3xf32>
    %cst_282 = arith.constant dense<0.000000e+00> : vector<16xf32>
    %691 = vector.multi_reduction <add>, %690, %cst_282 [1] : vector<16x3xf32> to vector<16xf32>
    %692 = vector.shape_cast %691 : vector<16xf32> to vector<16x1xf32>
    %693 = math.log %692 : vector<16x1xf32>
    %694 = vector.broadcast %693 : vector<16x1xf32> to vector<16x3xf32>
    %695 = arith.subf %689, %694 : vector<16x3xf32>
    %c7_283 = arith.constant 7 : index
    %c0_284 = arith.constant 0 : index
    %c0_285 = arith.constant 0 : index
    %696 = vector.load %arg8[%c7_283, %c0_284, %c0_285] : memref<10x16x256xf32, #tpu.memory_space<vmem>>, vector<1x16x8xf32>
    %697 = vector.shape_cast %696 : vector<1x16x8xf32> to vector<16x8xf32>
    %698 = vector.shape_cast %685 : vector<16x8xf32> to vector<1x16x8xf32>
    tpu.vector_store %arg8[%c7_283, %c0_284, %c0_285], %698 {strides = array<i32>} : memref<10x16x256xf32, #tpu.memory_space<vmem>>, vector<1x16x8xf32>,
    %c7_286 = arith.constant 7 : index
    %c0_287 = arith.constant 0 : index
    %c8_288 = arith.constant 8 : index
    %699 = vector.load %arg8[%c7_286, %c0_287, %c8_288] : memref<10x16x256xf32, #tpu.memory_space<vmem>>, vector<1x16x3xf32>
    %700 = vector.shape_cast %699 : vector<1x16x3xf32> to vector<16x3xf32>
    %701 = vector.shape_cast %695 : vector<16x3xf32> to vector<1x16x3xf32>
    tpu.vector_store %arg8[%c7_286, %c0_287, %c8_288], %701 {strides = array<i32>} : memref<10x16x256xf32, #tpu.memory_space<vmem>>, vector<1x16x3xf32>,
    %c7_289 = arith.constant 7 : index
    %c0_290 = arith.constant 0 : index
    %c11_291 = arith.constant 11 : index
    %702 = vector.load %arg8[%c7_289, %c0_290, %c11_291] : memref<10x16x256xf32, #tpu.memory_space<vmem>>, vector<1x16x1xf32>
    %703 = vector.shape_cast %702 : vector<1x16x1xf32> to vector<16x1xf32>
    %704 = vector.shape_cast %651 : vector<16x1xf32> to vector<1x16x1xf32>
    tpu.vector_store %arg8[%c7_289, %c0_290, %c11_291], %704 {strides = array<i32>} : memref<10x16x256xf32, #tpu.memory_space<vmem>>, vector<1x16x1xf32>,
    %705 = arith.sitofp %644 : vector<16x1xi32> to vector<16x1xf32>
    %c7_292 = arith.constant 7 : index
    %c0_293 = arith.constant 0 : index
    %c12_294 = arith.constant 12 : index
    %706 = vector.load %arg8[%c7_292, %c0_293, %c12_294] : memref<10x16x256xf32, #tpu.memory_space<vmem>>, vector<1x16x1xf32>
    %707 = vector.shape_cast %706 : vector<1x16x1xf32> to vector<16x1xf32>
    %708 = vector.shape_cast %705 : vector<16x1xf32> to vector<1x16x1xf32>
    tpu.vector_store %arg8[%c7_292, %c0_293, %c12_294], %708 {strides = array<i32>} : memref<10x16x256xf32, #tpu.memory_space<vmem>>, vector<1x16x1xf32>,
    %c7_295 = arith.constant 7 : index
    %c0_296 = arith.constant 0 : index
    %c16_297 = arith.constant 16 : index
    %709 = vector.load %arg8[%c7_295, %c0_296, %c16_297] : memref<10x16x256xf32, #tpu.memory_space<vmem>>, vector<1x16x8xf32>
    %710 = vector.shape_cast %709 : vector<1x16x8xf32> to vector<16x8xf32>
    %711 = vector.shape_cast %632 : vector<16x8xf32> to vector<1x16x8xf32>
    tpu.vector_store %arg8[%c7_295, %c0_296, %c16_297], %711 {strides = array<i32>} : memref<10x16x256xf32, #tpu.memory_space<vmem>>, vector<1x16x8xf32>,
    %c7_298 = arith.constant 7 : index
    %c0_299 = arith.constant 0 : index
    %c128_300 = arith.constant 128 : index
    %712 = vector.load %arg8[%c7_298, %c0_299, %c128_300] : memref<10x16x256xf32, #tpu.memory_space<vmem>>, vector<1x16x64xf32>
    %713 = vector.shape_cast %712 : vector<1x16x64xf32> to vector<16x64xf32>
    %714 = vector.shape_cast %673 : vector<16x64xf32> to vector<1x16x64xf32>
    tpu.vector_store %arg8[%c7_298, %c0_299, %c128_300], %714 {strides = array<i32>} : memref<10x16x256xf32, #tpu.memory_space<vmem>>, vector<1x16x64xf32>,
    %c7_301 = arith.constant 7 : index
    %c0_302 = arith.constant 0 : index
    %c192_303 = arith.constant 192 : index
    %715 = vector.load %arg8[%c7_301, %c0_302, %c192_303] : memref<10x16x256xf32, #tpu.memory_space<vmem>>, vector<1x16x64xf32>
    %716 = vector.shape_cast %715 : vector<1x16x64xf32> to vector<16x64xf32>
    %717 = vector.shape_cast %671 : vector<16x64xf32> to vector<1x16x64xf32>
    tpu.vector_store %arg8[%c7_301, %c0_302, %c192_303], %717 {strides = array<i32>} : memref<10x16x256xf32, #tpu.memory_space<vmem>>, vector<1x16x64xf32>,
    %c8_304 = arith.constant 8 : index
    %c0_305 = arith.constant 0 : index
    %c0_306 = arith.constant 0 : index
    %718 = vector.load %arg1[%c8_304, %c0_305, %c0_306] : memref<10x16x8xf32, #tpu.memory_space<vmem>>, vector<1x16x8xf32>
    %719 = vector.shape_cast %718 : vector<1x16x8xf32> to vector<16x8xf32>
    %720 = arith.mulf %685, %719 : vector<16x8xf32>
    %cst_307 = arith.constant dense<0.000000e+00> : vector<16x8xf32>
    %721 = tpu.matmul %720, %9, %cst_307 {dimension_numbers = #tpu.dot_dimension_numbers<[1], [0], [0], [1], [0, 0, 1, 1], [], []>} : vector<16x8xf32>, vector<8x8xf32>, vector<16x8xf32> -> vector<16x8xf32>
    %cst_308 = arith.constant dense<0.000000e+00> : vector<16xf32>
    %722 = vector.multi_reduction <add>, %720, %cst_308 [1] : vector<16x8xf32> to vector<16xf32>
    %723 = vector.shape_cast %722 : vector<16xf32> to vector<16x1xf32>
    %cst_309 = arith.constant 0.771320641 : f32
    %724 = vector.broadcast %cst_309 : f32 to vector<16x1xf32>
    %725 = arith.mulf %724, %723 : vector<16x1xf32>
    %726 = vector.broadcast %725 : vector<16x1xf32> to vector<16x8xf32>
    %727 = arith.cmpf ole, %721, %726 : vector<16x8xf32>
    %728 = arith.extui %727 : vector<16x8xi1> to vector<16x8xi32>
    %cst_310 = arith.constant dense<0> : vector<16xi32>
    %729 = vector.multi_reduction <add>, %728, %cst_310 [1] : vector<16x8xi32> to vector<16xi32>
    %730 = vector.shape_cast %729 : vector<16xi32> to vector<16x1xi32>
    %c7_i32_311 = arith.constant 7 : i32
    %731 = vector.broadcast %c7_i32_311 : i32 to vector<16x1xi32>
    %732 = arith.minsi %730, %731 : vector<16x1xi32>
    %733 = vector.broadcast %732 : vector<16x1xi32> to vector<16x8xi32>
    %734 = arith.cmpi eq, %10, %733 : vector<16x8xi32>
    %735 = arith.extui %734 : vector<16x8xi1> to vector<16x8xi32>
    %736 = arith.sitofp %735 : vector<16x8xi32> to vector<16x8xf32>
    %737 = arith.mulf %685, %736 : vector<16x8xf32>
    %cst_312 = arith.constant dense<0.000000e+00> : vector<16xf32>
    %738 = vector.multi_reduction <add>, %737, %cst_312 [1] : vector<16x8xf32> to vector<16xf32>
    %739 = vector.shape_cast %738 : vector<16xf32> to vector<16x1xf32>
    %cst_313 = arith.constant dense<0.000000e+00> : vector<16x256xf32>
    %740 = tpu.matmul %685, %0, %cst_313 {dimension_numbers = #tpu.dot_dimension_numbers<[1], [0], [0], [1], [0, 0, 1, 1], [], []>} : vector<16x8xf32>, vector<8x256xf32>, vector<16x256xf32> -> vector<16x256xf32>
    %cst_314 = arith.constant dense<0.000000e+00> : vector<16x256xf32>
    %741 = tpu.matmul %736, %1, %cst_314 {dimension_numbers = #tpu.dot_dimension_numbers<[1], [0], [0], [1], [0, 0, 1, 1], [], []>} : vector<16x8xf32>, vector<8x256xf32>, vector<16x256xf32> -> vector<16x256xf32>
    %742 = arith.addf %740, %741 : vector<16x256xf32>
    %743 = vector.broadcast %2 : vector<1x256xf32> to vector<16x256xf32>
    %744 = arith.addf %742, %743 : vector<16x256xf32>
    %745 = vector.extract_strided_slice %744 {offsets = [0, 0], sizes = [16, 192], strides = [1, 1]} : vector<16x256xf32> to vector<16x192xf32>
    %746 = arith.negf %745 : vector<16x192xf32>
    %747 = math.exp %746 : vector<16x192xf32>
    %cst_315 = arith.constant 1.000000e+00 : f32
    %748 = vector.broadcast %cst_315 : f32 to vector<16x192xf32>
    %749 = arith.addf %748, %747 : vector<16x192xf32>
    %750 = arith.divf %748, %749 : vector<16x192xf32>
    %751 = vector.extract_strided_slice %750 {offsets = [0, 0], sizes = [16, 64], strides = [1, 1]} : vector<16x192xf32> to vector<16x64xf32>
    %752 = vector.extract_strided_slice %750 {offsets = [0, 64], sizes = [16, 64], strides = [1, 1]} : vector<16x192xf32> to vector<16x64xf32>
    %753 = vector.extract_strided_slice %750 {offsets = [0, 128], sizes = [16, 64], strides = [1, 1]} : vector<16x192xf32> to vector<16x64xf32>
    %754 = vector.extract_strided_slice %744 {offsets = [0, 192], sizes = [16, 64], strides = [1, 1]} : vector<16x256xf32> to vector<16x64xf32>
    %755 = math.tanh %754 : vector<16x64xf32>
    %756 = vector.broadcast %3 : vector<1x64xf32> to vector<16x64xf32>
    %757 = arith.mulf %752, %756 : vector<16x64xf32>
    %758 = arith.mulf %751, %755 : vector<16x64xf32>
    %759 = arith.addf %757, %758 : vector<16x64xf32>
    %760 = math.tanh %759 : vector<16x64xf32>
    %761 = arith.mulf %753, %760 : vector<16x64xf32>
    %cst_316 = arith.constant dense<0.000000e+00> : vector<16x11xf32>
    %762 = tpu.matmul %761, %4, %cst_316 {dimension_numbers = #tpu.dot_dimension_numbers<[1], [0], [0], [1], [0, 0, 1, 1], [], []>} : vector<16x64xf32>, vector<64x11xf32>, vector<16x11xf32> -> vector<16x11xf32>
    %763 = vector.extract_strided_slice %762 {offsets = [0, 0], sizes = [16, 8], strides = [1, 1]} : vector<16x11xf32> to vector<16x8xf32>
    %764 = vector.extract_strided_slice %762 {offsets = [0, 8], sizes = [16, 3], strides = [1, 1]} : vector<16x11xf32> to vector<16x3xf32>
    %cst_317 = arith.constant dense<0xFF800000> : vector<16xf32>
    %765 = vector.multi_reduction <maximumf>, %763, %cst_317 [1] : vector<16x8xf32> to vector<16xf32>
    %766 = vector.shape_cast %765 : vector<16xf32> to vector<16x1xf32>
    %767 = vector.broadcast %766 : vector<16x1xf32> to vector<16x8xf32>
    %768 = arith.subf %763, %767 : vector<16x8xf32>
    %769 = math.exp %768 : vector<16x8xf32>
    %cst_318 = arith.constant dense<0.000000e+00> : vector<16xf32>
    %770 = vector.multi_reduction <add>, %769, %cst_318 [1] : vector<16x8xf32> to vector<16xf32>
    %771 = vector.shape_cast %770 : vector<16xf32> to vector<16x1xf32>
    %772 = vector.broadcast %771 : vector<16x1xf32> to vector<16x8xf32>
    %773 = arith.divf %769, %772 : vector<16x8xf32>
    %cst_319 = arith.constant dense<0xFF800000> : vector<16xf32>
    %774 = vector.multi_reduction <maximumf>, %764, %cst_319 [1] : vector<16x3xf32> to vector<16xf32>
    %775 = vector.shape_cast %774 : vector<16xf32> to vector<16x1xf32>
    %776 = vector.broadcast %775 : vector<16x1xf32> to vector<16x3xf32>
    %777 = arith.subf %764, %776 : vector<16x3xf32>
    %778 = math.exp %777 : vector<16x3xf32>
    %cst_320 = arith.constant dense<0.000000e+00> : vector<16xf32>
    %779 = vector.multi_reduction <add>, %778, %cst_320 [1] : vector<16x3xf32> to vector<16xf32>
    %780 = vector.shape_cast %779 : vector<16xf32> to vector<16x1xf32>
    %781 = math.log %780 : vector<16x1xf32>
    %782 = vector.broadcast %781 : vector<16x1xf32> to vector<16x3xf32>
    %783 = arith.subf %777, %782 : vector<16x3xf32>
    %c8_321 = arith.constant 8 : index
    %c0_322 = arith.constant 0 : index
    %c0_323 = arith.constant 0 : index
    %784 = vector.load %arg8[%c8_321, %c0_322, %c0_323] : memref<10x16x256xf32, #tpu.memory_space<vmem>>, vector<1x16x8xf32>
    %785 = vector.shape_cast %784 : vector<1x16x8xf32> to vector<16x8xf32>
    %786 = vector.shape_cast %773 : vector<16x8xf32> to vector<1x16x8xf32>
    tpu.vector_store %arg8[%c8_321, %c0_322, %c0_323], %786 {strides = array<i32>} : memref<10x16x256xf32, #tpu.memory_space<vmem>>, vector<1x16x8xf32>,
    %c8_324 = arith.constant 8 : index
    %c0_325 = arith.constant 0 : index
    %c8_326 = arith.constant 8 : index
    %787 = vector.load %arg8[%c8_324, %c0_325, %c8_326] : memref<10x16x256xf32, #tpu.memory_space<vmem>>, vector<1x16x3xf32>
    %788 = vector.shape_cast %787 : vector<1x16x3xf32> to vector<16x3xf32>
    %789 = vector.shape_cast %783 : vector<16x3xf32> to vector<1x16x3xf32>
    tpu.vector_store %arg8[%c8_324, %c0_325, %c8_326], %789 {strides = array<i32>} : memref<10x16x256xf32, #tpu.memory_space<vmem>>, vector<1x16x3xf32>,
    %c8_327 = arith.constant 8 : index
    %c0_328 = arith.constant 0 : index
    %c11_329 = arith.constant 11 : index
    %790 = vector.load %arg8[%c8_327, %c0_328, %c11_329] : memref<10x16x256xf32, #tpu.memory_space<vmem>>, vector<1x16x1xf32>
    %791 = vector.shape_cast %790 : vector<1x16x1xf32> to vector<16x1xf32>
    %792 = vector.shape_cast %739 : vector<16x1xf32> to vector<1x16x1xf32>
    tpu.vector_store %arg8[%c8_327, %c0_328, %c11_329], %792 {strides = array<i32>} : memref<10x16x256xf32, #tpu.memory_space<vmem>>, vector<1x16x1xf32>,
    %793 = arith.sitofp %732 : vector<16x1xi32> to vector<16x1xf32>
    %c8_330 = arith.constant 8 : index
    %c0_331 = arith.constant 0 : index
    %c12_332 = arith.constant 12 : index
    %794 = vector.load %arg8[%c8_330, %c0_331, %c12_332] : memref<10x16x256xf32, #tpu.memory_space<vmem>>, vector<1x16x1xf32>
    %795 = vector.shape_cast %794 : vector<1x16x1xf32> to vector<16x1xf32>
    %796 = vector.shape_cast %793 : vector<16x1xf32> to vector<1x16x1xf32>
    tpu.vector_store %arg8[%c8_330, %c0_331, %c12_332], %796 {strides = array<i32>} : memref<10x16x256xf32, #tpu.memory_space<vmem>>, vector<1x16x1xf32>,
    %c8_333 = arith.constant 8 : index
    %c0_334 = arith.constant 0 : index
    %c16_335 = arith.constant 16 : index
    %797 = vector.load %arg8[%c8_333, %c0_334, %c16_335] : memref<10x16x256xf32, #tpu.memory_space<vmem>>, vector<1x16x8xf32>
    %798 = vector.shape_cast %797 : vector<1x16x8xf32> to vector<16x8xf32>
    %799 = vector.shape_cast %720 : vector<16x8xf32> to vector<1x16x8xf32>
    tpu.vector_store %arg8[%c8_333, %c0_334, %c16_335], %799 {strides = array<i32>} : memref<10x16x256xf32, #tpu.memory_space<vmem>>, vector<1x16x8xf32>,
    %c8_336 = arith.constant 8 : index
    %c0_337 = arith.constant 0 : index
    %c128_338 = arith.constant 128 : index
    %800 = vector.load %arg8[%c8_336, %c0_337, %c128_338] : memref<10x16x256xf32, #tpu.memory_space<vmem>>, vector<1x16x64xf32>
    %801 = vector.shape_cast %800 : vector<1x16x64xf32> to vector<16x64xf32>
    %802 = vector.shape_cast %761 : vector<16x64xf32> to vector<1x16x64xf32>
    tpu.vector_store %arg8[%c8_336, %c0_337, %c128_338], %802 {strides = array<i32>} : memref<10x16x256xf32, #tpu.memory_space<vmem>>, vector<1x16x64xf32>,
    %c8_339 = arith.constant 8 : index
    %c0_340 = arith.constant 0 : index
    %c192_341 = arith.constant 192 : index
    %803 = vector.load %arg8[%c8_339, %c0_340, %c192_341] : memref<10x16x256xf32, #tpu.memory_space<vmem>>, vector<1x16x64xf32>
    %804 = vector.shape_cast %803 : vector<1x16x64xf32> to vector<16x64xf32>
    %805 = vector.shape_cast %759 : vector<16x64xf32> to vector<1x16x64xf32>
    tpu.vector_store %arg8[%c8_339, %c0_340, %c192_341], %805 {strides = array<i32>} : memref<10x16x256xf32, #tpu.memory_space<vmem>>, vector<1x16x64xf32>,
    %c9 = arith.constant 9 : index
    %c0_342 = arith.constant 0 : index
    %c0_343 = arith.constant 0 : index
    %806 = vector.load %arg1[%c9, %c0_342, %c0_343] : memref<10x16x8xf32, #tpu.memory_space<vmem>>, vector<1x16x8xf32>
    %807 = vector.shape_cast %806 : vector<1x16x8xf32> to vector<16x8xf32>
    %808 = arith.mulf %773, %807 : vector<16x8xf32>
    %cst_344 = arith.constant dense<0.000000e+00> : vector<16x8xf32>
    %809 = tpu.matmul %808, %9, %cst_344 {dimension_numbers = #tpu.dot_dimension_numbers<[1], [0], [0], [1], [0, 0, 1, 1], [], []>} : vector<16x8xf32>, vector<8x8xf32>, vector<16x8xf32> -> vector<16x8xf32>
    %cst_345 = arith.constant dense<0.000000e+00> : vector<16xf32>
    %810 = vector.multi_reduction <add>, %808, %cst_345 [1] : vector<16x8xf32> to vector<16xf32>
    %811 = vector.shape_cast %810 : vector<16xf32> to vector<16x1xf32>
    %cst_346 = arith.constant 0.771320641 : f32
    %812 = vector.broadcast %cst_346 : f32 to vector<16x1xf32>
    %813 = arith.mulf %812, %811 : vector<16x1xf32>
    %814 = vector.broadcast %813 : vector<16x1xf32> to vector<16x8xf32>
    %815 = arith.cmpf ole, %809, %814 : vector<16x8xf32>
    %816 = arith.extui %815 : vector<16x8xi1> to vector<16x8xi32>
    %cst_347 = arith.constant dense<0> : vector<16xi32>
    %817 = vector.multi_reduction <add>, %816, %cst_347 [1] : vector<16x8xi32> to vector<16xi32>
    %818 = vector.shape_cast %817 : vector<16xi32> to vector<16x1xi32>
    %c7_i32_348 = arith.constant 7 : i32
    %819 = vector.broadcast %c7_i32_348 : i32 to vector<16x1xi32>
    %820 = arith.minsi %818, %819 : vector<16x1xi32>
    %821 = vector.broadcast %820 : vector<16x1xi32> to vector<16x8xi32>
    %822 = arith.cmpi eq, %10, %821 : vector<16x8xi32>
    %823 = arith.extui %822 : vector<16x8xi1> to vector<16x8xi32>
    %824 = arith.sitofp %823 : vector<16x8xi32> to vector<16x8xf32>
    %825 = arith.mulf %773, %824 : vector<16x8xf32>
    %cst_349 = arith.constant dense<0.000000e+00> : vector<16xf32>
    %826 = vector.multi_reduction <add>, %825, %cst_349 [1] : vector<16x8xf32> to vector<16xf32>
    %827 = vector.shape_cast %826 : vector<16xf32> to vector<16x1xf32>
    %cst_350 = arith.constant dense<0.000000e+00> : vector<16x256xf32>
    %828 = tpu.matmul %773, %0, %cst_350 {dimension_numbers = #tpu.dot_dimension_numbers<[1], [0], [0], [1], [0, 0, 1, 1], [], []>} : vector<16x8xf32>, vector<8x256xf32>, vector<16x256xf32> -> vector<16x256xf32>
    %cst_351 = arith.constant dense<0.000000e+00> : vector<16x256xf32>
    %829 = tpu.matmul %824, %1, %cst_351 {dimension_numbers = #tpu.dot_dimension_numbers<[1], [0], [0], [1], [0, 0, 1, 1], [], []>} : vector<16x8xf32>, vector<8x256xf32>, vector<16x256xf32> -> vector<16x256xf32>
    %830 = arith.addf %828, %829 : vector<16x256xf32>
    %831 = vector.broadcast %2 : vector<1x256xf32> to vector<16x256xf32>
    %832 = arith.addf %830, %831 : vector<16x256xf32>
    %833 = vector.extract_strided_slice %832 {offsets = [0, 0], sizes = [16, 192], strides = [1, 1]} : vector<16x256xf32> to vector<16x192xf32>
    %834 = arith.negf %833 : vector<16x192xf32>
    %835 = math.exp %834 : vector<16x192xf32>
    %cst_352 = arith.constant 1.000000e+00 : f32
    %836 = vector.broadcast %cst_352 : f32 to vector<16x192xf32>
    %837 = arith.addf %836, %835 : vector<16x192xf32>
    %838 = arith.divf %836, %837 : vector<16x192xf32>
    %839 = vector.extract_strided_slice %838 {offsets = [0, 0], sizes = [16, 64], strides = [1, 1]} : vector<16x192xf32> to vector<16x64xf32>
    %840 = vector.extract_strided_slice %838 {offsets = [0, 64], sizes = [16, 64], strides = [1, 1]} : vector<16x192xf32> to vector<16x64xf32>
    %841 = vector.extract_strided_slice %838 {offsets = [0, 128], sizes = [16, 64], strides = [1, 1]} : vector<16x192xf32> to vector<16x64xf32>
    %842 = vector.extract_strided_slice %832 {offsets = [0, 192], sizes = [16, 64], strides = [1, 1]} : vector<16x256xf32> to vector<16x64xf32>
    %843 = math.tanh %842 : vector<16x64xf32>
    %844 = vector.broadcast %3 : vector<1x64xf32> to vector<16x64xf32>
    %845 = arith.mulf %840, %844 : vector<16x64xf32>
    %846 = arith.mulf %839, %843 : vector<16x64xf32>
    %847 = arith.addf %845, %846 : vector<16x64xf32>
    %848 = math.tanh %847 : vector<16x64xf32>
    %849 = arith.mulf %841, %848 : vector<16x64xf32>
    %cst_353 = arith.constant dense<0.000000e+00> : vector<16x11xf32>
    %850 = tpu.matmul %849, %4, %cst_353 {dimension_numbers = #tpu.dot_dimension_numbers<[1], [0], [0], [1], [0, 0, 1, 1], [], []>} : vector<16x64xf32>, vector<64x11xf32>, vector<16x11xf32> -> vector<16x11xf32>
    %851 = vector.extract_strided_slice %850 {offsets = [0, 0], sizes = [16, 8], strides = [1, 1]} : vector<16x11xf32> to vector<16x8xf32>
    %852 = vector.extract_strided_slice %850 {offsets = [0, 8], sizes = [16, 3], strides = [1, 1]} : vector<16x11xf32> to vector<16x3xf32>
    %cst_354 = arith.constant dense<0xFF800000> : vector<16xf32>
    %853 = vector.multi_reduction <maximumf>, %851, %cst_354 [1] : vector<16x8xf32> to vector<16xf32>
    %854 = vector.shape_cast %853 : vector<16xf32> to vector<16x1xf32>
    %855 = vector.broadcast %854 : vector<16x1xf32> to vector<16x8xf32>
    %856 = arith.subf %851, %855 : vector<16x8xf32>
    %857 = math.exp %856 : vector<16x8xf32>
    %cst_355 = arith.constant dense<0.000000e+00> : vector<16xf32>
    %858 = vector.multi_reduction <add>, %857, %cst_355 [1] : vector<16x8xf32> to vector<16xf32>
    %859 = vector.shape_cast %858 : vector<16xf32> to vector<16x1xf32>
    %860 = vector.broadcast %859 : vector<16x1xf32> to vector<16x8xf32>
    %861 = arith.divf %857, %860 : vector<16x8xf32>
    %cst_356 = arith.constant dense<0xFF800000> : vector<16xf32>
    %862 = vector.multi_reduction <maximumf>, %852, %cst_356 [1] : vector<16x3xf32> to vector<16xf32>
    %863 = vector.shape_cast %862 : vector<16xf32> to vector<16x1xf32>
    %864 = vector.broadcast %863 : vector<16x1xf32> to vector<16x3xf32>
    %865 = arith.subf %852, %864 : vector<16x3xf32>
    %866 = math.exp %865 : vector<16x3xf32>
    %cst_357 = arith.constant dense<0.000000e+00> : vector<16xf32>
    %867 = vector.multi_reduction <add>, %866, %cst_357 [1] : vector<16x3xf32> to vector<16xf32>
    %868 = vector.shape_cast %867 : vector<16xf32> to vector<16x1xf32>
    %869 = math.log %868 : vector<16x1xf32>
    %870 = vector.broadcast %869 : vector<16x1xf32> to vector<16x3xf32>
    %871 = arith.subf %865, %870 : vector<16x3xf32>
    %c9_358 = arith.constant 9 : index
    %c0_359 = arith.constant 0 : index
    %c0_360 = arith.constant 0 : index
    %872 = vector.load %arg8[%c9_358, %c0_359, %c0_360] : memref<10x16x256xf32, #tpu.memory_space<vmem>>, vector<1x16x8xf32>
    %873 = vector.shape_cast %872 : vector<1x16x8xf32> to vector<16x8xf32>
    %874 = vector.shape_cast %861 : vector<16x8xf32> to vector<1x16x8xf32>
    tpu.vector_store %arg8[%c9_358, %c0_359, %c0_360], %874 {strides = array<i32>} : memref<10x16x256xf32, #tpu.memory_space<vmem>>, vector<1x16x8xf32>,
    %c9_361 = arith.constant 9 : index
    %c0_362 = arith.constant 0 : index
    %c8_363 = arith.constant 8 : index
    %875 = vector.load %arg8[%c9_361, %c0_362, %c8_363] : memref<10x16x256xf32, #tpu.memory_space<vmem>>, vector<1x16x3xf32>
    %876 = vector.shape_cast %875 : vector<1x16x3xf32> to vector<16x3xf32>
    %877 = vector.shape_cast %871 : vector<16x3xf32> to vector<1x16x3xf32>
    tpu.vector_store %arg8[%c9_361, %c0_362, %c8_363], %877 {strides = array<i32>} : memref<10x16x256xf32, #tpu.memory_space<vmem>>, vector<1x16x3xf32>,
    %c9_364 = arith.constant 9 : index
    %c0_365 = arith.constant 0 : index
    %c11_366 = arith.constant 11 : index
    %878 = vector.load %arg8[%c9_364, %c0_365, %c11_366] : memref<10x16x256xf32, #tpu.memory_space<vmem>>, vector<1x16x1xf32>
    %879 = vector.shape_cast %878 : vector<1x16x1xf32> to vector<16x1xf32>
    %880 = vector.shape_cast %827 : vector<16x1xf32> to vector<1x16x1xf32>
    tpu.vector_store %arg8[%c9_364, %c0_365, %c11_366], %880 {strides = array<i32>} : memref<10x16x256xf32, #tpu.memory_space<vmem>>, vector<1x16x1xf32>,
    %881 = arith.sitofp %820 : vector<16x1xi32> to vector<16x1xf32>
    %c9_367 = arith.constant 9 : index
    %c0_368 = arith.constant 0 : index
    %c12_369 = arith.constant 12 : index
    %882 = vector.load %arg8[%c9_367, %c0_368, %c12_369] : memref<10x16x256xf32, #tpu.memory_space<vmem>>, vector<1x16x1xf32>
    %883 = vector.shape_cast %882 : vector<1x16x1xf32> to vector<16x1xf32>
    %884 = vector.shape_cast %881 : vector<16x1xf32> to vector<1x16x1xf32>
    tpu.vector_store %arg8[%c9_367, %c0_368, %c12_369], %884 {strides = array<i32>} : memref<10x16x256xf32, #tpu.memory_space<vmem>>, vector<1x16x1xf32>,
    %c9_370 = arith.constant 9 : index
    %c0_371 = arith.constant 0 : index
    %c16_372 = arith.constant 16 : index
    %885 = vector.load %arg8[%c9_370, %c0_371, %c16_372] : memref<10x16x256xf32, #tpu.memory_space<vmem>>, vector<1x16x8xf32>
    %886 = vector.shape_cast %885 : vector<1x16x8xf32> to vector<16x8xf32>
    %887 = vector.shape_cast %808 : vector<16x8xf32> to vector<1x16x8xf32>
    tpu.vector_store %arg8[%c9_370, %c0_371, %c16_372], %887 {strides = array<i32>} : memref<10x16x256xf32, #tpu.memory_space<vmem>>, vector<1x16x8xf32>,
    %c9_373 = arith.constant 9 : index
    %c0_374 = arith.constant 0 : index
    %c128_375 = arith.constant 128 : index
    %888 = vector.load %arg8[%c9_373, %c0_374, %c128_375] : memref<10x16x256xf32, #tpu.memory_space<vmem>>, vector<1x16x64xf32>
    %889 = vector.shape_cast %888 : vector<1x16x64xf32> to vector<16x64xf32>
    %890 = vector.shape_cast %849 : vector<16x64xf32> to vector<1x16x64xf32>
    tpu.vector_store %arg8[%c9_373, %c0_374, %c128_375], %890 {strides = array<i32>} : memref<10x16x256xf32, #tpu.memory_space<vmem>>, vector<1x16x64xf32>,
    %c9_376 = arith.constant 9 : index
    %c0_377 = arith.constant 0 : index
    %c192_378 = arith.constant 192 : index
    %891 = vector.load %arg8[%c9_376, %c0_377, %c192_378] : memref<10x16x256xf32, #tpu.memory_space<vmem>>, vector<1x16x64xf32>
    %892 = vector.shape_cast %891 : vector<1x16x64xf32> to vector<16x64xf32>
    %893 = vector.shape_cast %847 : vector<16x64xf32> to vector<1x16x64xf32>
    tpu.vector_store %arg8[%c9_376, %c0_377, %c192_378], %893 {strides = array<i32>} : memref<10x16x256xf32, #tpu.memory_space<vmem>>, vector<1x16x64xf32>,
    return
  }
  func.func @transform_0(%arg0: i32) -> (i32, i32, i32) {
    %c0_i32 = arith.constant 0 : i32
    %c0_i32_0 = arith.constant 0 : i32
    %c0_i32_1 = arith.constant 0 : i32
    return %c0_i32, %arg0, %c0_i32_0 : i32, i32, i32
  }
  func.func @transform_1(%arg0: i32) -> (i32, i32) {
    %c0_i32 = arith.constant 0 : i32
    %c0_i32_0 = arith.constant 0 : i32
    return %arg0, %c0_i32 : i32, i32
  }
  func.func @transform_2(%arg0: i32) -> (i32, i32) {
    %c0_i32 = arith.constant 0 : i32
    %c0_i32_0 = arith.constant 0 : i32
    %c0_i32_1 = arith.constant 0 : i32
    return %c0_i32, %c0_i32_0 : i32, i32
  }
  func.func @transform_3(%arg0: i32) -> (i32, i32) {
    %c0_i32 = arith.constant 0 : i32
    %c0_i32_0 = arith.constant 0 : i32
    %c0_i32_1 = arith.constant 0 : i32
    return %c0_i32, %c0_i32_0 : i32, i32
  }
  func.func @transform_4(%arg0: i32) -> (i32, i32) {
    %c0_i32 = arith.constant 0 : i32
    %c0_i32_0 = arith.constant 0 : i32
    %c0_i32_1 = arith.constant 0 : i32
    return %c0_i32, %c0_i32_0 : i32, i32
  }
  func.func @transform_5(%arg0: i32) -> (i32, i32) {
    %c0_i32 = arith.constant 0 : i32
    %c0_i32_0 = arith.constant 0 : i32
    %c0_i32_1 = arith.constant 0 : i32
    return %c0_i32, %c0_i32_0 : i32, i32
  }
  func.func @transform_6(%arg0: i32) -> (i32, i32) {
    %c0_i32 = arith.constant 0 : i32
    %c0_i32_0 = arith.constant 0 : i32
    %c0_i32_1 = arith.constant 0 : i32
    return %c0_i32, %c0_i32_0 : i32, i32
  }
  func.func @transform_7(%arg0: i32) -> (i32, i32, i32) {
    %c0_i32 = arith.constant 0 : i32
    %c0_i32_0 = arith.constant 0 : i32
    %c0_i32_1 = arith.constant 0 : i32
    return %c0_i32, %arg0, %c0_i32_0 : i32, i32, i32
  }
}

</mosaic_0001>

<bundles_post_ra>
// kernel: tpu_custom_call.1
= control target key start
LH: loop header
LB: loop body
LE: loop exit
PB: predicated region body
PF: predicated region fallthrough
CT: control target
= control target key end

     0   :  { %v41_v0 = vlaneseq  ;;  %s7087_s0 = inlined_call_operand.vmem [shape: f32[10,16,8], index: 0, kind: input, shape index: {}]   ;;  %s7088_s1 = inlined_call_operand.vmem [shape: f32[16,8], index: 1, kind: input, shape index: {}]   ;;  %s7089_s2 = inlined_call_operand.vmem [shape: f32[8,256], index: 2, kind: input, shape index: {}]   ;;  %s7090_s3 = inlined_call_operand.vmem [shape: f32[8,256], index: 3, kind: input, shape index: {}]   ;;  %s7091_s4 = inlined_call_operand.vmem [shape: f32[1,256], index: 4, kind: input, shape index: {}]   ;;  %s7092_s5 = inlined_call_operand.vmem [shape: f32[1,64], index: 5, kind: input, shape index: {}]   ;;  %s7093_s6 = inlined_call_operand.vmem [shape: f32[64,11], index: 6, kind: input, shape index: {}]   ;;  %s7094_s7 = inlined_call_operand.hbm [shape: f32[10,16,256], index: 7, kind: output, shape index: {}]  }
   0x1   :  { %v88_v1 = vld [vmem:[%s7088_s1] sm:$0xff] }
   0x2   :  { %v90_v2 = vld [vmem:[%s7087_s0] sm:$0xff] }
   0x3   :  { %v5275_v3 = vmul.f32 %v90_v2, %v88_v1 }
   0x4   :  { %12 = vsyncpa [#allocation3], 0  ;;  %v42_v4 = vshrl.u32 %v41_v0, 7  ;;  %v5277_v5 = vand.u32 127, %v41_v0  ;;  %vm94_vm0 = vcmask 64512   ;;  %v89_v8 = vld [vmem:[%s7088_s1 + $0x8] sm:$0xff] }
   0x5   :  { %v124_v6 = vsel %vm94_vm0, %v5275_v3, 0.0  ;;  %v91_v9 = vld [vmem:[%s7087_s0 + $0x8] sm:$0xff]  ;;  %v7095_v10 = vmov 1.0   ;;  %v7099_v17 = vmov 0   ;;  %v5317_v33 = vld [vmem:[%s7089_s2] sm:$0xff]  ;;  %v5223_v36 = vmov 0.0  }
   0x6   :  { %vm5282_vm1 = vcmp.le.s32.totalorder %v42_v4, %v5277_v5  ;;  %125 = vadd.xlane.f32.xlu0 %v124_v6  ;;  %v5297_v11 = vmul.f32 %v91_v9, %v89_v8  ;;  %v5310_v32 = vld [vmem:[%s7089_s2 + $0x8] sm:$0xff]  ;;  %253 = vmatpush.msra.mxu3 %v5317_v33  ;;  %v5325_v34 = vld [vmem:[%s7090_s3] sm:$0xff]  ;;  %48 = vst [vmem:[#allocation2] sm:$0xff] %v5223_v36  ;;  %s5224_s19 = smov 64   ;;  %s5226_s28 = smov 16  }
   0x7   :  { %4545 = vmatpush.msk.msra.mxu0 %vm5282_vm1, %v7095_v10  ;;  %4554 = vmatmul.msk.f32.vlgmr.msra.gmra.mxu3 %vm94_vm0, %v88_v1  ;;  %v5330_v35 = vld [vmem:[%s7090_s3 + $0x8] sm:$0xff]  ;;  %49 = vst [vmem:[#allocation2 + $0x8] sm:$0xff] %v5223_v36  ;;  %v4761_v37 = vld [vmem:[%s7092_s5] ss:$0 sm:$0xff]  ;;  %s4532_s8 = sshll.u32 %s7094_s7, 4  ;;  %s5227_s9 = smov [#allocation2]   ;;  %s4533_s8 = int_to_ptr.hbm [resolvable:$true] %s4532_s8 }
   0x8   :  { %4546 = vmatmul.msk.f32.vlgmr.msra.gmra.mxu0 %vm94_vm0, %v5275_v3  ;;  %v127_v12 = vsel %vm94_vm0, %v5297_v11, 0.0  ;;  %201 = vmatpush.msra.mxu1 %v5325_v34  ;;  %50 = vst [vmem:[#allocation2 + $0x10] sm:$0xff] %v5223_v36  ;;  %v31_v55 = vld [vmem:[%s7091_s4] sm:$0x3]  ;;  %s4530_s10 = sshll.u32 %s5227_s9, 4  ;;  %s5228_s11 = smov 256   ;;  %s4531_s10 = int_to_ptr.vmem [resolvable:$true] %s4530_s10 }
   0x9   :  { %276 = vmatpush.msrb.mxu0 %v5310_v32  ;;  %224 = vmatpush.msra.mxu2 %v5330_v35  ;;  %51 = vst [vmem:[#allocation2 + $0x18] sm:$0xff] %v5223_v36  ;;  %v5413_v56 = vperm.slane %v31_v55, 1 }
   0xa   :  { %659 = vmatpush.msrb.mxu3 %v5325_v34  ;;  %52 = vst [vmem:[#allocation2 + $0x20] sm:$0xff] %v5223_v36 }
   0xb   :  { %4566 = vmatpush.msk.msrb.mxu2 %vm5282_vm1, %v7095_v10  ;;  %682 = vmatpush.msra.mxu0 %v5330_v35  ;;  %53 = vst [vmem:[#allocation2 + $0x28] sm:$0xff] %v5223_v36 }
   0xc   :  { %54 = vst [vmem:[#allocation2 + $0x30] sm:$0xff] %v5223_v36 }
   0xd   :  { %55 = vst [vmem:[#allocation2 + $0x38] sm:$0xff] %v5223_v36 }
   0xe   :  { %128 = vadd.xlane.f32.xlu0 %v127_v12  ;;  %56 = vst [vmem:[#allocation2 + $0x40] sm:$0xff] %v5223_v36 }
   0xf   :  { %4555 = vmatmul.msk.f32.gmra.mxu3 %vm94_vm0, %v89_v8  ;;  %57 = vst [vmem:[#allocation2 + $0x48] sm:$0xff] %v5223_v36 }
  0x10   :  { %4547 = vmatmul.msk.f32.gmra.mxu0 %vm94_vm0, %v5297_v11  ;;  %58 = vst [vmem:[#allocation2 + $0x50] sm:$0xff] %v5223_v36 }
  0x11   :  { %59 = vst [vmem:[#allocation2 + $0x58] sm:$0xff] %v5223_v36 }
  0x12   :  { %60 = vst [vmem:[#allocation2 + $0x60] sm:$0xff] %v5223_v36 }
  0x13   :  { %61 = vst [vmem:[#allocation2 + $0x68] sm:$0xff] %v5223_v36 }
  0x14   :  { %62 = vst [vmem:[#allocation2 + $0x70] sm:$0xff] %v5223_v36 }
  0x15   :  { %63 = vst [vmem:[#allocation2 + $0x78] sm:$0xff] %v5223_v36 }
  0x16   :  { %64 = vst [vmem:[#allocation2 + $0x80] sm:$0xff] %v5223_v36 }
  0x17   :  { %65 = vst [vmem:[#allocation2 + $0x88] sm:$0xff] %v5223_v36 }
  0x18   :  { %4556 = vmatmul.msk.f32.vlgmr.msrb.gmra.mxu0 %vm94_vm0, %v88_v1  ;;  %66 = vst [vmem:[#allocation2 + $0x90] sm:$0xff] %v5223_v36 }
  0x19   :  { %4587 = vmatpush.msk.msrb.mxu0 %vm5282_vm1, %v7095_v10  ;;  %67 = vst [vmem:[#allocation2 + $0x98] sm:$0xff] %v5223_v36 }
  0x1a   :  { %68 = vst [vmem:[#allocation2 + $0xa0] sm:$0xff] %v5223_v36 }
  0x1b   :  { %69 = vst [vmem:[#allocation2 + $0xa8] sm:$0xff] %v5223_v36 }
  0x1c   :  { %70 = vst [vmem:[#allocation2 + $0xb0] sm:$0xff] %v5223_v36 }
  0x1d   :  { %71 = vst [vmem:[#allocation2 + $0xb8] sm:$0xff] %v5223_v36 }
  0x1e   :  { %72 = vst [vmem:[#allocation2 + $0xc0] sm:$0xff] %v5223_v36 }
  0x1f   :  { %73 = vst [vmem:[#allocation2 + $0xc8] sm:$0xff] %v5223_v36 }
  0x20   :  { %4557 = vmatmul.msk.f32.gmra.mxu0 %vm94_vm0, %v89_v8  ;;  %74 = vst [vmem:[#allocation2 + $0xd0] sm:$0xff] %v5223_v36  ;;  %v5425_v8 = vperm.slane %v31_v55, 0 }
  0x21   :  { %75 = vst [vmem:[#allocation2 + $0xd8] sm:$0xff] %v5223_v36 }
  0x22   :  { %76 = vst [vmem:[#allocation2 + $0xe0] sm:$0xff] %v5223_v36 }
  0x23   :  { %77 = vst [vmem:[#allocation2 + $0xe8] sm:$0xff] %v5223_v36 }
  0x24   :  { %78 = vst [vmem:[#allocation2 + $0xf0] sm:$0xff] %v5223_v36 }
  0x25   :  { %79 = vst [vmem:[#allocation2 + $0xf8] sm:$0xff] %v5223_v36 }
  0x26   :  { %80 = vst [vmem:[#allocation2 + $0x100] sm:$0xff] %v5223_v36 }
  0x27   :  { %81 = vst [vmem:[#allocation2 + $0x108] sm:$0xff] %v5223_v36 }
  0x28   :  { %82 = vst [vmem:[#allocation2 + $0x110] sm:$0xff] %v5223_v36 }
  0x29   :  { %83 = vst [vmem:[#allocation2 + $0x118] sm:$0xff] %v5223_v36 }
  0x2a   :  { %84 = vst [vmem:[#allocation2 + $0x120] sm:$0xff] %v5223_v36 }
  0x2b   :  { %85 = vst [vmem:[#allocation2 + $0x128] sm:$0xff] %v5223_v36 }
  0x2c   :  { %86 = vst [vmem:[#allocation2 + $0x130] sm:$0xff] %v5223_v36 }
  0x2d   :  { %87 = vst [vmem:[#allocation2 + $0x138] sm:$0xff] %v5223_v36 }
  0x79   :  { %v126_v13 = vpop.xlane.xlu0 %125 }
  0x7a   :  { %v130_v14 = vmul.f32 0.77132064, %v126_v13 }
  0x81   :  { %v129_v16 = vpop.xlane.xlu0 %128 }
  0x82   :  { %v131_v21 = vmul.f32 0.77132064, %v129_v16 }
  0x85   :  { %v118_v15 = vpop.f32.mrf.mxu0 }
  0x86   :  { %vm132_vm2 = vcmp.le.f32.partialorder %v118_v15, %v130_v14 }
  0x87   :  { %v134_v18 = vsel %vm132_vm2, 1, %v7099_v17 }
  0x88   :  { %v136_v19 = vsel %vm94_vm0, %v134_v18, 0 }
  0x89   :  { %v138_v20 = vshrl.u32 %v136_v19, 16  ;;  %v137_v24 = vand.u32 65535, %v136_v19 }
  0x8a   :  { %v255_v4 = vpop.f32.mrf.mxu3 }
  0x8b   :  { %v140_v22 = vcvt.s32.f32 %v138_v20  ;;  %v139_v28 = vcvt.s32.f32 %v137_v24 }
  0x8d   :  { %143 = vadd.xlane.f32.xlu1 %v140_v22  ;;  %v121_v23 = vpop.f32.mrf.mxu0 }
  0x8e   :  { %vm133_vm3 = vcmp.le.f32.partialorder %v121_v23, %v131_v21 }
  0x8f   :  { %v135_v25 = vsel %vm133_vm3, 1, %v7099_v17 }
  0x90   :  { %v149_v26 = vsel %vm94_vm0, %v135_v25, 0 }
  0x91   :  { %v151_v27 = vshrl.u32 %v149_v26, 16  ;;  %v150_v30 = vand.u32 65535, %v149_v26 }
  0x92   :  { %v258_v12 = vpop.f32.mrf.mxu3 }
  0x93   :  { %v153_v29 = vcvt.s32.f32 %v151_v27  ;;  %v152_v31 = vcvt.s32.f32 %v150_v30 }
  0x95   :  { %141 = vadd.xlane.f32.xlu1 %v139_v28  ;;  %156 = vadd.xlane.f32.xlu2 %v153_v29  ;;  %v278_v54 = vpop.f32.mrf.mxu0 }
  0x9d   :  { %154 = vadd.xlane.f32.xlu2 %v152_v31  ;;  %v281_v60 = vpop.f32.mrf.mxu0 }
  0xb5   :  { %373 = vrot.lane.b32.xlu2 %v4761_v37, %s5224_s19 }
 0x100   :  { %v144_v38 = vpop.xlane.xlu1 %143 }
 0x101   :  { %v146_v39 = vcvt.f32.s32 %v144_v38 }
 0x103   :  { %v147_v42 = vshll.u32 %v146_v39, 16 }
 0x108   :  { %v142_v40 = vpop.xlane.xlu1 %141  ;;  %v157_v41 = vpop.xlane.xlu2 %156 }
 0x109   :  { %v145_v43 = vcvt.f32.s32 %v142_v40  ;;  %v159_v45 = vcvt.f32.s32 %v157_v41 }
 0x10b   :  { %v148_v44 = vadd.s32 %v147_v42, %v145_v43  ;;  %v160_v47 = vshll.u32 %v159_v45, 16 }
 0x10d   :  { %vm162_vm4 = vcmp.lt.s32.totalorder %v148_v44, 7 }
 0x10e   :  { %v5377_v46 = vsel %vm162_vm4, %v148_v44, 7 }
 0x10f   :  { %vm166_vm5 = vcmp.eq.s32.totalorder %v5277_v5, %v5377_v46 }
 0x110   :  { %v155_v48 = vpop.xlane.xlu2 %154  ;;  %v5384_v49 = vsel %vm166_vm5, 1.0, %v5223_v36 }
 0x111   :  { %v158_v50 = vcvt.f32.s32 %v155_v48  ;;  %4550 = vmatmul.msk.f32.vlgmr.msra.gmra.mxu1 %vm94_vm0, %v5384_v49  ;;  %4552 = vmatmul.msk.f32.vlgmr.msra.gmra.mxu2 %vm94_vm0, %v5384_v49 }
 0x112   :  { %734 = vmatpush.msra.mxu2 %v5310_v32 }
 0x113   :  { %v161_v51 = vadd.s32 %v160_v47, %v158_v50 }
 0x115   :  { %vm164_vm6 = vcmp.lt.s32.totalorder %v161_v51, 7 }
 0x116   :  { %v5398_v52 = vsel %vm164_vm6, %v161_v51, 7  ;;  %vm410_vm6 = vcmask 523264  }
 0x117   :  { %vm167_vm7 = vcmp.eq.s32.totalorder %v5277_v5, %v5398_v52 }
 0x118   :  { %v5404_v53 = vsel %vm167_vm7, 1.0, %v5223_v36  ;;  %vm545_vm7 = vcmask 1048064  }
 0x119   :  { %4553 = vmatmul.msk.f32.gmra.mxu2 %vm94_vm0, %v5404_v53  ;;  %4551 = vmatmul.msk.f32.gmra.mxu1 %vm94_vm0, %v5404_v53 }
 0x18e   :  { %v203_v2 = vpop.f32.mrf.mxu1 }
 0x18f   :  { %v256_v6 = vadd.f32 %v255_v4, %v203_v2 }
 0x191   :  { %v289_v13 = vadd.f32 %v5425_v8, %v256_v6 }
 0x193   :  { %v4558_v15 = vmul.f32 -1.442695, %v289_v13 }
 0x194   :  { %v226_v57 = vpop.f32.mrf.mxu2 }
 0x195   :  { %v279_v58 = vadd.f32 %v278_v54, %v226_v57  ;;  %v5431_v57 = vpop.permute.xlu2 %373 }
 0x196   :  { %v206_v9 = vpop.f32.mrf.mxu1 }
 0x197   :  { %v5416_v59 = vadd.f32 %v5413_v56, %v279_v58  ;;  %v259_v14 = vadd.f32 %v258_v12, %v206_v9 }
 0x199   :  { %4762 = vtanh.f32 %v5416_v59  ;;  %v291_v16 = vadd.f32 %v5425_v8, %v259_v14  ;;  %v4559_v13 = vmul.f32 -1.442695, %v5416_v59  ;;  %v5448_v14 = vld [vmem:[%s7093_s6 + $0x38] sm:$0xff]  ;;  %v5467_v59 = vld [vmem:[%s7093_s6 + $0x20] sm:$0xff] }
 0x19a   :  { %425 = vmatpush.msrb.mxu1 %v5448_v14  ;;  %872 = vmatpush.msra.mxu3 %v5448_v14 }
 0x19b   :  { %v4560_v18 = vmul.f32 -1.442695, %v291_v16  ;;  %v5474_v16 = vld [vmem:[%s7093_s6 + $0x18] sm:$0xff] }
 0x19c   :  { %v229_v61 = vpop.f32.mrf.mxu2 }
 0x19d   :  { %v282_v62 = vadd.f32 %v281_v60, %v229_v61 }
 0x19f   :  { %v4763_v63 = vpop.eup %4762  ;;  %v5420_v0 = vadd.f32 %v5413_v56, %v282_v62 }
 0x1a0   :  { %380 = vrot.lane.b32.xlu0 %v4763_v63, %s5224_s19 }
 0x1a1   :  { %4764 = vtanh.f32 %v5420_v0  ;;  %v4561_v6 = vmul.f32 -1.442695, %v5420_v0  ;;  %v5460_v0 = vld [vmem:[%s7093_s6 + $0x28] sm:$0xff] }
 0x1a2   :  { %4766 = vpow2.f32 %v4558_v15  ;;  %v5454_v15 = vld [vmem:[%s7093_s6 + $0x30] sm:$0xff] }
 0x1a3   :  { %4768 = vpow2.f32 %v4560_v18  ;;  %426 = vmatpush.msrb.mxu1 %v5454_v15  ;;  %873 = vmatpush.msra.mxu3 %v5454_v15 }
 0x1a5   :  { %427 = vmatpush.msrb.mxu1 %v5460_v0  ;;  %874 = vmatpush.msra.mxu3 %v5460_v0 }
 0x1a7   :  { %v4765_v1 = vpop.eup %4764  ;;  %428 = vmatpush.msrb.mxu1 %v5467_v59  ;;  %875 = vmatpush.msra.mxu3 %v5467_v59 }
 0x1a8   :  { %382 = vrot.lane.b32.xlu1 %v4765_v1, %s5224_s19  ;;  %v4767_v19 = vpop.eup %4766 }
 0x1a9   :  { %v305_v20 = vadd.f32 1.0, %v4767_v19  ;;  %v4769_v21 = vpop.eup %4768  ;;  %v5481_v19 = vld [vmem:[%s7093_s6 + $0x10] sm:$0xff]  ;;  %429 = vmatpush.msrb.mxu1 %v5474_v16  ;;  %876 = vmatpush.msra.mxu3 %v5474_v16 }
 0x1aa   :  { %v307_v22 = vadd.f32 1.0, %v4769_v21 }
 0x1ab   :  { %4770 = vrcp.f32 %v305_v20  ;;  %v320_v31 = vand.u32 2147483648, %v305_v20  ;;  %vm314_vm9 = vweird.f32 %v305_v20  ;;  %v318_v37 = vand.u32 2147483647, %v305_v20  ;;  %430 = vmatpush.msrb.mxu1 %v5481_v19  ;;  %877 = vmatpush.msra.mxu3 %v5481_v19 }
 0x1ac   :  { %4772 = vrcp.f32 %v307_v22  ;;  %vm344_vm11 = vweird.f32 %v307_v22  ;;  %v350_v41 = vand.u32 2147483648, %v307_v22  ;;  %v348_v43 = vand.u32 2147483647, %v307_v22 }
 0x1ad   :  { %v321_v40 = vor.u32 1.1754944e-38, %v320_v31  ;;  %vm319_vm13 = vcmp.eq.f32.partialorder %v318_v37, 8.507059e+37 }
 0x1ae   :  { %v351_v48 = vor.u32 1.1754944e-38, %v350_v41  ;;  %vm349_vm15 = vcmp.eq.f32.partialorder %v348_v43, 8.507059e+37 }
 0x1b1   :  { %v4771_v23 = vpop.eup %4770 }
 0x1b2   :  { %v310_v24 = vmul.f32 %v4771_v23, %v305_v20  ;;  %v4773_v25 = vpop.eup %4772  ;;  %vm315_vm8 = vweird.f32 %v4771_v23 }
 0x1b3   :  { %v340_v27 = vmul.f32 %v4773_v25, %v307_v22  ;;  %vm316_vm10 = vmor %vm314_vm9, %vm315_vm8  ;;  %vm345_vm12 = vweird.f32 %v4773_v25  ;;  %v5488_v22 = vld [vmem:[%s7093_s6 + $0x8] sm:$0xff] }
 0x1b4   :  { %v311_v26 = vsub.f32 1.0, %v310_v24  ;;  %vm346_vm14 = vmor %vm344_vm11, %vm345_vm12  ;;  %431 = vmatpush.msrb.mxu1 %v5488_v22  ;;  %878 = vmatpush.msra.mxu3 %v5488_v22 }
 0x1b5   :  { %v341_v29 = vsub.f32 1.0, %v340_v27 }
 0x1b6   :  { %v312_v28 = vmul.f32 %v4771_v23, %v311_v26 }
 0x1b7   :  { %v342_v38 = vmul.f32 %v4773_v25, %v341_v29 }
 0x1b8   :  { %v313_v30 = vadd.f32 %v4771_v23, %v312_v28 }
 0x1b9   :  { %v343_v42 = vadd.f32 %v4773_v25, %v342_v38 }
 0x1ba   :  { %v317_v39 = vsel %vm316_vm10, %v4771_v23, %v313_v30 }
 0x1bb   :  { %v322_v45 = vsel %vm319_vm13, %v321_v40, %v317_v39  ;;  %v347_v50 = vsel %vm346_vm14, %v4773_v25, %v343_v42  ;;  %v5497_v25 = vld [vmem:[%s7093_s6] sm:$0xff] }
 0x1bc   :  { %v352_v51 = vsel %vm349_vm15, %v351_v48, %v347_v50  ;;  %v376_v63 = vmul.f32 %v5431_v57, %v322_v45  ;;  %432 = vmatpush.msrb.mxu1 %v5497_v25  ;;  %879 = vmatpush.msra.mxu3 %v5497_v25 }
 0x1bd   :  { %v377_v58 = vmul.f32 %v5431_v57, %v352_v51 }
 0x1be   :  { %711 = vmatpush.msra.mxu1 %v5317_v33 }
 0x212   :  { %v381_v44 = vpop.permute.xlu0 %380 }
 0x213   :  { %v386_v47 = vmul.f32 %v381_v44, %v322_v45 }
 0x215   :  { %390 = vrot.lane.b32.xlu0 %v386_v47, %s5224_s19 }
 0x21a   :  { %v383_v54 = vpop.permute.xlu1 %382 }
 0x21b   :  { %v387_v55 = vmul.f32 %v383_v54, %v352_v51 }
 0x21d   :  { %392 = vrot.lane.b32.xlu2 %v387_v55, %s5224_s19 }
 0x277   :  { %v393_v60 = vpop.permute.xlu2 %392 }
 0x278   :  { %v5434_v61 = vadd.f32 %v393_v60, %v377_v58 }
 0x27a   :  { %4774 = vtanh.f32 %v5434_v61 }
 0x280   :  { %v4775_v62 = vpop.eup %4774 }
 0x281   :  { %404 = vrot.lane.b32.xlu0 %v4775_v62, %s5224_s19 }
 0x287   :  { %v391_v1 = vpop.permute.xlu0 %390 }
 0x288   :  { %v5439_v2 = vadd.f32 %v391_v1, %v376_v63 }
 0x28a   :  { %4776 = vtanh.f32 %v5439_v2 }
 0x28b   :  { %4778 = vpow2.f32 %v4561_v6 }
 0x290   :  { %v4777_v4 = vpop.eup %4776 }
 0x291   :  { %402 = vrot.lane.b32.xlu1 %v4777_v4, %s5224_s19  ;;  %v4779_v9 = vpop.eup %4778 }
 0x292   :  { %v308_v12 = vadd.f32 1.0, %v4779_v9 }
 0x294   :  { %4780 = vrcp.f32 %v308_v12  ;;  %vm359_vm2 = vweird.f32 %v308_v12  ;;  %v365_v27 = vand.u32 2147483648, %v308_v12  ;;  %v363_v29 = vand.u32 2147483647, %v308_v12 }
 0x295   :  { %4782 = vpow2.f32 %v4559_v13 }
 0x296   :  { %v366_v31 = vor.u32 1.1754944e-38, %v365_v27  ;;  %vm364_vm5 = vcmp.eq.f32.partialorder %v363_v29, 8.507059e+37 }
 0x29a   :  { %v4781_v18 = vpop.eup %4780 }
 0x29b   :  { %v4783_v20 = vpop.eup %4782  ;;  %v355_v21 = vmul.f32 %v4781_v18, %v308_v12  ;;  %vm360_vm3 = vweird.f32 %v4781_v18 }
 0x29c   :  { %v306_v23 = vadd.f32 1.0, %v4783_v20  ;;  %vm361_vm4 = vmor %vm359_vm2, %vm360_vm3 }
 0x29d   :  { %v356_v24 = vsub.f32 1.0, %v355_v21 }
 0x29e   :  { %4784 = vrcp.f32 %v306_v23  ;;  %v335_v45 = vand.u32 2147483648, %v306_v23  ;;  %vm329_vm9 = vweird.f32 %v306_v23  ;;  %v333_v47 = vand.u32 2147483647, %v306_v23 }
 0x29f   :  { %v357_v26 = vmul.f32 %v4781_v18, %v356_v24 }
 0x2a0   :  { %v336_v50 = vor.u32 1.1754944e-38, %v335_v45  ;;  %vm334_vm11 = vcmp.eq.f32.partialorder %v333_v47, 8.507059e+37 }
 0x2a1   :  { %v358_v28 = vadd.f32 %v4781_v18, %v357_v26 }
 0x2a3   :  { %v362_v37 = vsel %vm361_vm4, %v4781_v18, %v358_v28 }
 0x2a4   :  { %v4785_v30 = vpop.eup %4784  ;;  %v367_v39 = vsel %vm364_vm5, %v366_v31, %v362_v37 }
 0x2a5   :  { %v325_v38 = vmul.f32 %v4785_v30, %v306_v23  ;;  %vm330_vm8 = vweird.f32 %v4785_v30 }
 0x2a6   :  { %vm331_vm10 = vmor %vm329_vm9, %vm330_vm8 }
 0x2a7   :  { %v326_v42 = vsub.f32 1.0, %v325_v38 }
 0x2a9   :  { %v327_v43 = vmul.f32 %v4785_v30, %v326_v42  ;;  %v4564_v42 = vld [vmem:[%s7087_s0 + $0x10] sm:$0xff] }
 0x2ab   :  { %v328_v44 = vadd.f32 %v4785_v30, %v327_v43 }
 0x2ad   :  { %v332_v48 = vsel %vm331_vm10, %v4785_v30, %v328_v44 }
 0x2ae   :  { %v337_v51 = vsel %vm334_vm11, %v336_v50, %v332_v48 }
 0x2f3   :  { %v405_v40 = vpop.permute.xlu0 %404 }
 0x2f4   :  { %v409_v41 = vmul.f32 %v405_v40, %v367_v39 }
 0x2f6   :  { %544 = vst.msk [vmem:[#allocation2 + $0x18] sm:$0xff] %vm410_vm6, %v409_v41 }
 0x2f7   :  { %547 = vst.msk [vmem:[#allocation2 + $0x18] sm:$0xff] %vm545_vm7, %v5434_v61 }
 0x303   :  { %v403_v54 = vpop.permute.xlu1 %402 }
 0x304   :  { %v408_v55 = vmul.f32 %v403_v54, %v337_v51 }
 0x306   :  { %543 = vst.msk [vmem:[#allocation2 + $0x8] sm:$0xff] %vm410_vm6, %v408_v55  ;;  %4562 = vmatmul.msk.f32.vlgmr.msrb.gmra.mxu1 %vm410_vm6, %v408_v55 }
 0x307   :  { %546 = vst.msk [vmem:[#allocation2 + $0x8] sm:$0xff] %vm545_vm7, %v5439_v2  ;;  %1101 = vmatpush.msrb.mxu1 %v5325_v34 }
 0x30e   :  { %4563 = vmatmul.msk.f32.gmra.mxu1 %vm410_vm6, %v409_v41 }
 0x383   :  { %v5511_v58 = vpop.f32.mrf.mxu1 }
 0x384   :  { %v440_v60 = vsel %vm94_vm0, %v5511_v58, -inf }
 0x385   :  { %441 = vmax.xlane.f32.xlu2 %v440_v60 }
 0x38b   :  { %v5515_v61 = vpop.f32.mrf.mxu1 }
 0x38c   :  { %v443_v62 = vsel %vm94_vm0, %v5515_v61, -inf }
 0x38d   :  { %444 = vmax.xlane.f32.xlu1 %v443_v62 }
 0x3f8   :  { %v442_v63 = vpop.xlane.xlu2 %441 }
 0x3f9   :  { %v446_v1 = vsub.f32 %v5511_v58, %v442_v63  ;;  %v4565_v63 = vld [vmem:[%s7087_s0 + $0x18] sm:$0xff] }
 0x3fb   :  { %v448_v2 = vmul.f32 1.442695, %v446_v1 }
 0x3fd   :  { %4786 = vpow2.f32 %v448_v2 }
 0x400   :  { %v445_v4 = vpop.xlane.xlu1 %444 }
 0x401   :  { %v447_v6 = vsub.f32 %v5515_v61, %v445_v4 }
 0x403   :  { %v4787_v9 = vpop.eup %4786  ;;  %v450_v12 = vmul.f32 1.442695, %v447_v6 }
 0x404   :  { %v452_v13 = vsel %vm94_vm0, %v4787_v9, 0.0 }
 0x405   :  { %4788 = vpow2.f32 %v450_v12  ;;  %453 = vadd.xlane.f32.xlu0 %v452_v13 }
 0x40b   :  { %v4789_v18 = vpop.eup %4788 }
 0x40c   :  { %v455_v20 = vsel %vm94_vm0, %v4789_v18, 0.0 }
 0x40d   :  { %456 = vadd.xlane.f32.xlu2 %v455_v20 }
 0x478   :  { %v454_v21 = vpop.xlane.xlu0 %453 }
 0x479   :  { %4790 = vrcp.f32 %v454_v21  ;;  %v469_v28 = vand.u32 2147483648, %v454_v21  ;;  %v467_v30 = vand.u32 2147483647, %v454_v21  ;;  %vm463_vm13 = vweird.f32 %v454_v21 }
 0x47b   :  { %v470_v38 = vor.u32 1.1754944e-38, %v469_v28  ;;  %vm468_vm15 = vcmp.eq.f32.partialorder %v467_v30, 8.507059e+37 }
 0x47f   :  { %v4791_v23 = vpop.eup %4790 }
 0x480   :  { %v459_v24 = vmul.f32 %v4791_v23, %v454_v21  ;;  %v457_v26 = vpop.xlane.xlu2 %456  ;;  %vm464_vm12 = vweird.f32 %v4791_v23 }
 0x481   :  { %4792 = vrcp.f32 %v457_v26  ;;  %vm465_vm14 = vmor %vm463_vm13, %vm464_vm12  ;;  %v484_v45 = vand.u32 2147483648, %v457_v26  ;;  %v482_v48 = vand.u32 2147483647, %v457_v26  ;;  %vm478_vm3 = vweird.f32 %v457_v26 }
 0x482   :  { %v460_v27 = vsub.f32 1.0, %v459_v24 }
 0x483   :  { %v485_v55 = vor.u32 1.1754944e-38, %v484_v45  ;;  %vm483_vm5 = vcmp.eq.f32.partialorder %v482_v48, 8.507059e+37 }
 0x484   :  { %v461_v29 = vmul.f32 %v4791_v23, %v460_v27 }
 0x486   :  { %v462_v31 = vadd.f32 %v4791_v23, %v461_v29 }
 0x487   :  { %v4793_v37 = vpop.eup %4792 }
 0x488   :  { %v466_v39 = vsel %vm465_vm14, %v4791_v23, %v462_v31  ;;  %v474_v40 = vmul.f32 %v4793_v37, %v457_v26  ;;  %vm479_vm2 = vweird.f32 %v4793_v37 }
 0x489   :  { %v471_v41 = vsel %vm468_vm15, %v470_v38, %v466_v39  ;;  %vm480_vm4 = vmor %vm478_vm3, %vm479_vm2 }
 0x48a   :  { %v475_v43 = vsub.f32 1.0, %v474_v40  ;;  %v5526_v44 = vmul.f32 %v4787_v9, %v471_v41 }
 0x48c   :  { %v476_v47 = vmul.f32 %v4793_v37, %v475_v43  ;;  %4575 = vmatmul.msk.f32.vlgmr.msra.gmra.mxu1 %vm94_vm0, %v5526_v44  ;;  %522 = vst.msk [vmem:[#allocation2] sm:$0xff] %vm94_vm0, %v5526_v44  ;;  %v5533_v50 = vmul.f32 %v4564_v42, %v5526_v44 }
 0x48d   :  { %1314 = vmatpush.msra.mxu1 %v5448_v14 }
 0x48e   :  { %v477_v51 = vadd.f32 %v4793_v37, %v476_v47  ;;  %4567 = vmatmul.msk.f32.vlgmr.msrb.gmra.mxu2 %vm94_vm0, %v5533_v50  ;;  %v582_v54 = vsel %vm94_vm0, %v5533_v50, 0.0 }
 0x48f   :  { %583 = vadd.xlane.f32.xlu1 %v582_v54  ;;  %1124 = vmatpush.msrb.mxu2 %v5330_v35 }
 0x490   :  { %v481_v60 = vsel %vm480_vm4, %v4793_v37, %v477_v51  ;;  %1315 = vmatpush.msra.mxu1 %v5454_v15 }
 0x491   :  { %v486_v62 = vsel %vm483_vm5, %v485_v55, %v481_v60 }
 0x492   :  { %v5545_v1 = vmul.f32 %v4789_v18, %v486_v62  ;;  %1316 = vmatpush.msra.mxu1 %v5460_v0 }
 0x494   :  { %4576 = vmatmul.msk.f32.gmra.mxu1 %vm94_vm0, %v5545_v1  ;;  %523 = vst.msk [vmem:[#allocation2 + $0x10] sm:$0xff] %vm94_vm0, %v5545_v1  ;;  %v5553_v35 = vmul.f32 %v4565_v63, %v5545_v1 }
 0x495   :  { %1317 = vmatpush.msra.mxu1 %v5467_v59 }
 0x496   :  { %4568 = vmatmul.msk.f32.gmra.mxu2 %vm94_vm0, %v5553_v35  ;;  %v585_v2 = vsel %vm94_vm0, %v5553_v35, 0.0 }
 0x497   :  { %586 = vadd.xlane.f32.xlu0 %v585_v2  ;;  %1318 = vmatpush.msra.mxu1 %v5474_v16 }
 0x499   :  { %1319 = vmatpush.msra.mxu1 %v5481_v19 }
 0x49b   :  { %1320 = vmatpush.msra.mxu1 %v5488_v22 }
 0x49d   :  { %1321 = vmatpush.msra.mxu1 %v5497_v25 }
 0x49e   :  { %4577 = vmatmul.msk.f32.vlgmr.msra.gmra.mxu2 %vm94_vm0, %v5526_v44 }
 0x49f   :  { %4608 = vmatpush.msk.msra.mxu2 %vm5282_vm1, %v7095_v10 }
 0x4a6   :  { %4578 = vmatmul.msk.f32.gmra.mxu2 %vm94_vm0, %v5545_v1 }
 0x502   :  { %v584_v4 = vpop.xlane.xlu1 %583 }
 0x503   :  { %v588_v6 = vmul.f32 0.77132064, %v584_v4 }
 0x50a   :  { %v587_v18 = vpop.xlane.xlu0 %586 }
 0x50b   :  { %v589_v26 = vmul.f32 0.77132064, %v587_v18 }
 0x511   :  { %v576_v9 = vpop.f32.mrf.mxu2 }
 0x512   :  { %vm590_vm8 = vcmp.le.f32.partialorder %v576_v9, %v588_v6 }
 0x513   :  { %v592_v12 = vsel %vm590_vm8, 1, %v7099_v17 }
 0x514   :  { %v594_v13 = vsel %vm94_vm0, %v592_v12, 0 }
 0x515   :  { %v596_v20 = vshrl.u32 %v594_v13, 16  ;;  %v595_v21 = vand.u32 65535, %v594_v13 }
 0x517   :  { %v598_v23 = vcvt.s32.f32 %v596_v20  ;;  %v597_v24 = vcvt.s32.f32 %v595_v21 }
 0x519   :  { %v579_v27 = vpop.f32.mrf.mxu2  ;;  %601 = vadd.xlane.f32.xlu2 %v598_v23  ;;  %599 = vadd.xlane.f32.xlu1 %v597_v24  ;;  %v713_v24 = vpop.f32.mrf.mxu1 }
 0x51a   :  { %vm591_vm9 = vcmp.le.f32.partialorder %v579_v27, %v589_v26 }
 0x51b   :  { %v593_v28 = vsel %vm591_vm9, 1, %v7099_v17 }
 0x51c   :  { %v607_v29 = vsel %vm94_vm0, %v593_v28, 0 }
 0x51d   :  { %v609_v30 = vshrl.u32 %v607_v29, 16  ;;  %v608_v31 = vand.u32 65535, %v607_v29 }
 0x51f   :  { %v611_v37 = vcvt.s32.f32 %v609_v30  ;;  %v610_v38 = vcvt.s32.f32 %v608_v31 }
 0x521   :  { %614 = vadd.xlane.f32.xlu0 %v611_v37  ;;  %612 = vadd.xlane.f32.xlu2 %v610_v38  ;;  %v736_v6 = vpop.f32.mrf.mxu2  ;;  %v716_v29 = vpop.f32.mrf.mxu1 }
 0x529   :  { %v739_v12 = vpop.f32.mrf.mxu2 }
 0x58c   :  { %v602_v39 = vpop.xlane.xlu2 %601  ;;  %v600_v40 = vpop.xlane.xlu1 %599 }
 0x58d   :  { %v604_v41 = vcvt.f32.s32 %v602_v39  ;;  %v603_v43 = vcvt.f32.s32 %v600_v40 }
 0x58f   :  { %v605_v42 = vshll.u32 %v604_v41, 16 }
 0x591   :  { %v606_v45 = vadd.s32 %v605_v42, %v603_v43 }
 0x593   :  { %vm620_vm10 = vcmp.lt.s32.totalorder %v606_v45, 7 }
 0x594   :  { %v615_v47 = vpop.xlane.xlu0 %614  ;;  %v613_v48 = vpop.xlane.xlu2 %612  ;;  %v5575_v51 = vsel %vm620_vm10, %v606_v45, 7 }
 0x595   :  { %v617_v54 = vcvt.f32.s32 %v615_v47  ;;  %vm624_vm11 = vcmp.eq.s32.totalorder %v5277_v5, %v5575_v51  ;;  %v616_v62 = vcvt.f32.s32 %v613_v48 }
 0x596   :  { %v5580_v55 = vsel %vm624_vm11, 1.0, %v5223_v36 }
 0x597   :  { %v618_v60 = vshll.u32 %v617_v54, 16  ;;  %4571 = vmatmul.msk.f32.vlgmr.msrb.gmra.mxu3 %vm94_vm0, %v5580_v55  ;;  %4573 = vmatmul.msk.f32.vlgmr.msra.gmra.mxu0 %vm94_vm0, %v5580_v55 }
 0x598   :  { %1153 = vmatpush.msrb.mxu3 %v5317_v33  ;;  %1176 = vmatpush.msra.mxu0 %v5310_v32 }
 0x599   :  { %v619_v63 = vadd.s32 %v618_v60, %v616_v62 }
 0x59b   :  { %vm622_vm12 = vcmp.lt.s32.totalorder %v619_v63, 7 }
 0x59c   :  { %v5588_v2 = vsel %vm622_vm12, %v619_v63, 7 }
 0x59d   :  { %vm625_vm13 = vcmp.eq.s32.totalorder %v5277_v5, %v5588_v2 }
 0x59e   :  { %v5593_v4 = vsel %vm625_vm13, 1.0, %v5223_v36 }
 0x59f   :  { %4572 = vmatmul.msk.f32.gmra.mxu3 %vm94_vm0, %v5593_v4  ;;  %4574 = vmatmul.msk.f32.gmra.mxu0 %vm94_vm0, %v5593_v4 }
 0x614   :  { %v684_v33 = vpop.f32.mrf.mxu0 }
 0x615   :  { %v737_v9 = vadd.f32 %v736_v6, %v684_v33 }
 0x617   :  { %v5600_v32 = vadd.f32 %v737_v9, %v5413_v56 }
 0x619   :  { %4794 = vtanh.f32 %v5600_v32 }
 0x61a   :  { %v661_v23 = vpop.f32.mrf.mxu3 }
 0x61b   :  { %v714_v26 = vadd.f32 %v713_v24, %v661_v23 }
 0x61c   :  { %v687_v13 = vpop.f32.mrf.mxu0 }
 0x61d   :  { %v740_v18 = vadd.f32 %v739_v12, %v687_v13  ;;  %v742_v27 = vadd.f32 %v714_v26, %v5425_v8 }
 0x61f   :  { %v4795_v20 = vpop.eup %4794  ;;  %v5604_v36 = vadd.f32 %v740_v18, %v5413_v56  ;;  %v4579_v30 = vmul.f32 -1.442695, %v742_v27 }
 0x620   :  { %828 = vrot.lane.b32.xlu1 %v4795_v20, %s5224_s19 }
 0x621   :  { %4796 = vtanh.f32 %v5604_v36 }
 0x622   :  { %v664_v28 = vpop.f32.mrf.mxu3  ;;  %4798 = vpow2.f32 %v4579_v30 }
 0x623   :  { %v717_v31 = vadd.f32 %v716_v29, %v664_v28 }
 0x625   :  { %v744_v37 = vadd.f32 %v717_v31, %v5425_v8 }
 0x627   :  { %v4797_v21 = vpop.eup %4796  ;;  %v4581_v38 = vmul.f32 -1.442695, %v744_v37 }
 0x628   :  { %830 = vrot.lane.b32.xlu0 %v4797_v21, %s5224_s19  ;;  %v4799_v39 = vpop.eup %4798 }
 0x629   :  { %v758_v40 = vadd.f32 1.0, %v4799_v39  ;;  %4800 = vpow2.f32 %v4581_v38 }
 0x62b   :  { %4802 = vrcp.f32 %v758_v40  ;;  %v773_v63 = vand.u32 2147483648, %v758_v40  ;;  %vm767_vm15 = vweird.f32 %v758_v40  ;;  %v771_v33 = vand.u32 2147483647, %v758_v40 }
 0x62d   :  { %v774_v12 = vor.u32 1.1754944e-38, %v773_v63  ;;  %vm772_vm3 = vcmp.eq.f32.partialorder %v771_v33, 8.507059e+37 }
 0x62f   :  { %v4801_v41 = vpop.eup %4800 }
 0x630   :  { %v760_v42 = vadd.f32 1.0, %v4801_v41 }
 0x631   :  { %v4803_v43 = vpop.eup %4802 }
 0x632   :  { %4804 = vrcp.f32 %v760_v42  ;;  %v763_v45 = vmul.f32 %v4803_v43, %v758_v40  ;;  %vm768_vm14 = vweird.f32 %v4803_v43  ;;  %v803_v24 = vand.u32 2147483648, %v760_v42 }
 0x633   :  { %vm769_vm2 = vmor %vm767_vm15, %vm768_vm14  ;;  %vm797_vm5 = vweird.f32 %v760_v42  ;;  %v801_v26 = vand.u32 2147483647, %v760_v42 }
 0x634   :  { %v764_v47 = vsub.f32 1.0, %v763_v45  ;;  %v804_v28 = vor.u32 1.1754944e-38, %v803_v24 }
 0x635   :  { %vm802_vm9 = vcmp.eq.f32.partialorder %v801_v26, 8.507059e+37 }
 0x636   :  { %v765_v54 = vmul.f32 %v4803_v43, %v764_v47  ;;  %v4580_v47 = vmul.f32 -1.442695, %v5600_v32 }
 0x638   :  { %v4805_v48 = vpop.eup %4804  ;;  %v766_v62 = vadd.f32 %v4803_v43, %v765_v54 }
 0x639   :  { %v793_v60 = vmul.f32 %v4805_v48, %v760_v42  ;;  %vm798_vm4 = vweird.f32 %v4805_v48 }
 0x63a   :  { %v770_v9 = vsel %vm769_vm2, %v4803_v43, %v766_v62  ;;  %vm799_vm8 = vmor %vm797_vm5, %vm798_vm4 }
 0x63b   :  { %v794_v6 = vsub.f32 1.0, %v793_v60  ;;  %v775_v20 = vsel %vm772_vm3, %v774_v12, %v770_v9 }
 0x63c   :  { %v824_v37 = vmul.f32 %v775_v20, %v5431_v57 }
 0x63d   :  { %v795_v13 = vmul.f32 %v4805_v48, %v794_v6 }
 0x63f   :  { %v796_v23 = vadd.f32 %v4805_v48, %v795_v13 }
 0x641   :  { %v800_v27 = vsel %vm799_vm8, %v4805_v48, %v796_v23  ;;  %v4582_v48 = vmul.f32 -1.442695, %v5604_v36 }
 0x642   :  { %v805_v30 = vsel %vm802_vm9, %v804_v28, %v800_v27 }
 0x643   :  { %v825_v41 = vmul.f32 %v805_v30, %v5431_v57 }
 0x692   :  { %v829_v18 = vpop.permute.xlu1 %828 }
 0x693   :  { %v834_v21 = vmul.f32 %v829_v18, %v775_v20 }
 0x695   :  { %838 = vrot.lane.b32.xlu2 %v834_v21, %s5224_s19 }
 0x69a   :  { %v831_v29 = vpop.permute.xlu0 %830 }
 0x69b   :  { %v835_v31 = vmul.f32 %v831_v29, %v805_v30 }
 0x69d   :  { %840 = vrot.lane.b32.xlu0 %v835_v31, %s5224_s19 }
 0x6ef   :  { %v839_v38 = vpop.permute.xlu2 %838 }
 0x6f0   :  { %v844_v39 = vadd.f32 %v839_v38, %v824_v37 }
 0x6f2   :  { %4806 = vtanh.f32 %v844_v39 }
 0x6f8   :  { %v4807_v40 = vpop.eup %4806 }
 0x6f9   :  { %850 = vrot.lane.b32.xlu1 %v4807_v40, %s5224_s19 }
 0x70f   :  { %v841_v42 = vpop.permute.xlu0 %840 }
 0x710   :  { %v845_v43 = vadd.f32 %v841_v42, %v825_v41 }
 0x712   :  { %4808 = vtanh.f32 %v845_v43 }
 0x713   :  { %4810 = vpow2.f32 %v4580_v47 }
 0x714   :  { %4812 = vpow2.f32 %v4582_v48 }
 0x718   :  { %v4809_v45 = vpop.eup %4808 }
 0x719   :  { %852 = vrot.lane.b32.xlu2 %v4809_v45, %s5224_s19  ;;  %v4811_v54 = vpop.eup %4810 }
 0x71a   :  { %v759_v60 = vadd.f32 1.0, %v4811_v54  ;;  %v4813_v62 = vpop.eup %4812 }
 0x71b   :  { %v761_v63 = vadd.f32 1.0, %v4813_v62 }
 0x71c   :  { %4814 = vrcp.f32 %v759_v60  ;;  %v788_v21 = vand.u32 2147483648, %v759_v60  ;;  %vm782_vm11 = vweird.f32 %v759_v60  ;;  %v786_v23 = vand.u32 2147483647, %v759_v60 }
 0x71d   :  { %4816 = vrcp.f32 %v761_v63  ;;  %v818_v31 = vand.u32 2147483648, %v761_v63  ;;  %vm812_vm15 = vweird.f32 %v761_v63  ;;  %v816_v37 = vand.u32 2147483647, %v761_v63 }
 0x71e   :  { %v789_v24 = vor.u32 1.1754944e-38, %v788_v21  ;;  %vm787_vm13 = vcmp.eq.f32.partialorder %v786_v23, 8.507059e+37 }
 0x71f   :  { %v819_v40 = vor.u32 1.1754944e-38, %v818_v31  ;;  %vm817_vm3 = vcmp.eq.f32.partialorder %v816_v37, 8.507059e+37 }
 0x722   :  { %v4815_v6 = vpop.eup %4814 }
 0x723   :  { %v778_v33 = vmul.f32 %v4815_v6, %v759_v60  ;;  %v4817_v12 = vpop.eup %4816  ;;  %vm783_vm10 = vweird.f32 %v4815_v6 }
 0x724   :  { %v808_v18 = vmul.f32 %v4817_v12, %v761_v63  ;;  %vm784_vm12 = vmor %vm782_vm11, %vm783_vm10  ;;  %vm813_vm14 = vweird.f32 %v4817_v12 }
 0x725   :  { %v779_v9 = vsub.f32 1.0, %v778_v33  ;;  %vm814_vm2 = vmor %vm812_vm15, %vm813_vm14 }
 0x726   :  { %v809_v32 = vsub.f32 1.0, %v808_v18 }
 0x727   :  { %v780_v13 = vmul.f32 %v4815_v6, %v779_v9 }
 0x728   :  { %v810_v26 = vmul.f32 %v4817_v12, %v809_v32 }
 0x729   :  { %v781_v20 = vadd.f32 %v4815_v6, %v780_v13 }
 0x72a   :  { %v811_v30 = vadd.f32 %v4817_v12, %v810_v26 }
 0x72b   :  { %v785_v36 = vsel %vm784_vm12, %v4815_v6, %v781_v20 }
 0x72c   :  { %v790_v27 = vsel %vm787_vm13, %v789_v24, %v785_v36  ;;  %v815_v38 = vsel %vm814_vm2, %v4817_v12, %v811_v30 }
 0x72d   :  { %v820_v41 = vsel %vm817_vm3, %v819_v40, %v815_v38  ;;  %v4585_v38 = vld [vmem:[%s7087_s0 + $0x20] sm:$0xff] }
 0x76b   :  { %v851_v28 = vpop.permute.xlu1 %850 }
 0x76c   :  { %v856_v29 = vmul.f32 %v851_v28, %v790_v27 }
 0x76e   :  { %986 = vst.msk [vmem:[#allocation2 + $0x28] sm:$0xff] %vm410_vm6, %v856_v29  ;;  %4583 = vmatmul.msk.f32.vlgmr.msra.gmra.mxu3 %vm410_vm6, %v856_v29 }
 0x76f   :  { %988 = vst.msk [vmem:[#allocation2 + $0x28] sm:$0xff] %vm545_vm7, %v844_v39  ;;  %1543 = vmatpush.msra.mxu3 %v5325_v34 }
 0x773   :  { %v853_v42 = vpop.permute.xlu2 %852 }
 0x774   :  { %v857_v45 = vmul.f32 %v853_v42, %v820_v41 }
 0x776   :  { %987 = vst.msk [vmem:[#allocation2 + $0x38] sm:$0xff] %vm410_vm6, %v857_v45  ;;  %4584 = vmatmul.msk.f32.gmra.mxu3 %vm410_vm6, %v857_v45 }
 0x777   :  { %989 = vst.msk [vmem:[#allocation2 + $0x38] sm:$0xff] %vm545_vm7, %v845_v43 }
 0x7f1   :  { %v5626_v47 = vpop.f32.mrf.mxu3 }
 0x7f2   :  { %v887_v39 = vsel %vm94_vm0, %v5626_v47, -inf }
 0x7f3   :  { %888 = vmax.xlane.f32.xlu0 %v887_v39 }
 0x7f9   :  { %v5630_v34 = vpop.f32.mrf.mxu3 }
 0x7fa   :  { %v890_v48 = vsel %vm94_vm0, %v5630_v34, -inf }
 0x7fb   :  { %891 = vmax.xlane.f32.xlu1 %v890_v48 }
 0x866   :  { %v889_v54 = vpop.xlane.xlu0 %888 }
 0x867   :  { %v893_v60 = vsub.f32 %v5626_v47, %v889_v54 }
 0x869   :  { %v895_v62 = vmul.f32 1.442695, %v893_v60 }
 0x86b   :  { %4818 = vpow2.f32 %v895_v62  ;;  %v5658_v62 = vld [vmem:[%s7090_s3 + $0x8] sm:$0xff] }
 0x86e   :  { %v892_v63 = vpop.xlane.xlu1 %891 }
 0x86f   :  { %v894_v43 = vsub.f32 %v5630_v34, %v892_v63 }
 0x871   :  { %v4819_v6 = vpop.eup %4818  ;;  %v897_v33 = vmul.f32 1.442695, %v894_v43 }
 0x872   :  { %v899_v9 = vsel %vm94_vm0, %v4819_v6, 0.0 }
 0x873   :  { %900 = vadd.xlane.f32.xlu2 %v899_v9  ;;  %4820 = vpow2.f32 %v897_v33 }
 0x879   :  { %v4821_v12 = vpop.eup %4820 }
 0x87a   :  { %v902_v13 = vsel %vm94_vm0, %v4821_v12, 0.0 }
 0x87b   :  { %903 = vadd.xlane.f32.xlu0 %v902_v13 }
 0x8e6   :  { %v901_v18 = vpop.xlane.xlu2 %900 }
 0x8e7   :  { %4822 = vrcp.f32 %v901_v18  ;;  %v916_v36 = vand.u32 2147483648, %v901_v18  ;;  %v914_v26 = vand.u32 2147483647, %v901_v18  ;;  %vm910_vm5 = vweird.f32 %v901_v18 }
 0x8e9   :  { %v917_v28 = vor.u32 1.1754944e-38, %v916_v36  ;;  %vm915_vm9 = vcmp.eq.f32.partialorder %v914_v26, 8.507059e+37 }
 0x8ed   :  { %v4823_v20 = vpop.eup %4822 }
 0x8ee   :  { %v906_v21 = vmul.f32 %v4823_v20, %v901_v18  ;;  %v904_v32 = vpop.xlane.xlu0 %903  ;;  %vm911_vm4 = vweird.f32 %v4823_v20 }
 0x8ef   :  { %4824 = vrcp.f32 %v904_v32  ;;  %vm912_vm8 = vmor %vm910_vm5, %vm911_vm4  ;;  %v931_v42 = vand.u32 2147483648, %v904_v32  ;;  %v929_v48 = vand.u32 2147483647, %v904_v32  ;;  %vm925_vm11 = vweird.f32 %v904_v32 }
 0x8f0   :  { %v907_v23 = vsub.f32 1.0, %v906_v21 }
 0x8f1   :  { %v932_v63 = vor.u32 1.1754944e-38, %v931_v42  ;;  %vm930_vm13 = vcmp.eq.f32.partialorder %v929_v48, 8.507059e+37 }
 0x8f2   :  { %v908_v24 = vmul.f32 %v4823_v20, %v907_v23 }
 0x8f4   :  { %v909_v27 = vadd.f32 %v4823_v20, %v908_v24 }
 0x8f5   :  { %v4825_v29 = vpop.eup %4824 }
 0x8f6   :  { %v913_v30 = vsel %vm912_vm8, %v4823_v20, %v909_v27  ;;  %v921_v31 = vmul.f32 %v4825_v29, %v904_v32  ;;  %vm926_vm10 = vweird.f32 %v4825_v29 }
 0x8f7   :  { %v918_v37 = vsel %vm915_vm9, %v917_v28, %v913_v30  ;;  %vm927_vm12 = vmor %vm925_vm11, %vm926_vm10 }
 0x8f8   :  { %v5641_v40 = vmul.f32 %v4819_v6, %v918_v37  ;;  %v922_v41 = vsub.f32 1.0, %v921_v31  ;;  %v4586_v6 = vld [vmem:[%s7087_s0 + $0x28] sm:$0xff] }
 0x8fa   :  { %4596 = vmatmul.msk.f32.vlgmr.msrb.gmra.mxu3 %vm94_vm0, %v5641_v40  ;;  %968 = vst.msk [vmem:[#allocation2 + $0x20] sm:$0xff] %vm94_vm0, %v5641_v40  ;;  %v5648_v45 = vmul.f32 %v4585_v38, %v5641_v40  ;;  %v923_v39 = vmul.f32 %v4825_v29, %v922_v41 }
 0x8fb   :  { %1756 = vmatpush.msrb.mxu3 %v5448_v14 }
 0x8fc   :  { %7157 = vst [vmem:[#allocation5_spill] sm:$0xff] %v5648_v45  ;;  %4588 = vmatmul.msk.f32.vlgmr.msrb.gmra.mxu0 %vm94_vm0, %v5648_v45  ;;  %v1024_v54 = vsel %vm94_vm0, %v5648_v45, 0.0  ;;  %v924_v60 = vadd.f32 %v4825_v29, %v923_v39 }
 0x8fd   :  { %1025 = vadd.xlane.f32.xlu1 %v1024_v54  ;;  %1566 = vmatpush.msrb.mxu0 %v5658_v62 }
 0x8fe   :  { %1757 = vmatpush.msrb.mxu3 %v5454_v15  ;;  %v928_v14 = vsel %vm927_vm12, %v4825_v29, %v924_v60  ;;  %v5699_v60 = vld [vmem:[#allocation2 + $0x40] sm:$0xff] }
 0x8ff   :  { %v933_v43 = vsel %vm930_vm13, %v932_v63, %v928_v14 }
 0x900   :  { %1758 = vmatpush.msrb.mxu3 %v5460_v0  ;;  %v5666_v33 = vmul.f32 %v4821_v12, %v933_v43 }
 0x902   :  { %7158 = vst [vmem:[#allocation6_spill] sm:$0xff] %v5666_v33  ;;  %1759 = vmatpush.msrb.mxu3 %v5467_v59  ;;  %v5674_v15 = vmul.f32 %v4586_v6, %v5666_v33  ;;  %v5711_v6 = vld [vmem:[%s7089_s2] sm:$0xff] }
 0x903   :  { %4597 = vmatmul.msk.f32.gmra.mxu3 %vm94_vm0, %v5666_v33  ;;  %969 = vst.msk [vmem:[#allocation2 + $0x30] sm:$0xff] %vm94_vm0, %v5666_v33 }
 0x904   :  { %7159 = vst [vmem:[#allocation7_spill] sm:$0xff] %v5674_v15  ;;  %1760 = vmatpush.msrb.mxu3 %v5474_v16  ;;  %4589 = vmatmul.msk.f32.gmra.mxu0 %vm94_vm0, %v5674_v15  ;;  %v1027_v0 = vsel %vm94_vm0, %v5674_v15, 0.0 }
 0x905   :  { %1028 = vadd.xlane.f32.xlu2 %v1027_v0  ;;  %v5717_v0 = vld [vmem:[%s7089_s2 + $0x8] sm:$0xff] }
 0x906   :  { %1761 = vmatpush.msrb.mxu3 %v5481_v19 }
 0x908   :  { %1762 = vmatpush.msrb.mxu3 %v5488_v22 }
 0x90a   :  { %1763 = vmatpush.msrb.mxu3 %v5497_v25 }
 0x90c   :  { %4598 = vmatmul.msk.f32.vlgmr.msra.gmra.mxu0 %vm94_vm0, %v5641_v40 }
 0x90d   :  { %4629 = vmatpush.msk.msra.mxu0 %vm5282_vm1, %v7095_v10 }
 0x914   :  { %4599 = vmatmul.msk.f32.gmra.mxu0 %vm94_vm0, %v5666_v33 }
 0x970   :  { %v1026_v59 = vpop.xlane.xlu1 %1025 }
 0x971   :  { %v1030_v16 = vmul.f32 0.77132064, %v1026_v59 }
 0x978   :  { %v1029_v13 = vpop.xlane.xlu2 %1028 }
 0x979   :  { %v1018_v9 = vpop.f32.mrf.mxu0  ;;  %v1031_v21 = vmul.f32 0.77132064, %v1029_v13 }
 0x97a   :  { %vm1032_vm14 = vcmp.le.f32.partialorder %v1018_v9, %v1030_v16 }
 0x97b   :  { %v1034_v19 = vsel %vm1032_vm14, 1, %v7099_v17 }
 0x97c   :  { %v1036_v22 = vsel %vm94_vm0, %v1034_v19, 0 }
 0x97d   :  { %v1038_v12 = vshrl.u32 %v1036_v22, 16  ;;  %v1037_v25 = vand.u32 65535, %v1036_v22 }
 0x97f   :  { %v1040_v18 = vcvt.s32.f32 %v1038_v12  ;;  %v1039_v20 = vcvt.s32.f32 %v1037_v25 }
 0x981   :  { %1043 = vadd.xlane.f32.xlu0 %v1040_v18  ;;  %1041 = vadd.xlane.f32.xlu1 %v1039_v20  ;;  %v1021_v32 = vpop.f32.mrf.mxu0 }
 0x982   :  { %vm1033_vm15 = vcmp.le.f32.partialorder %v1021_v32, %v1031_v21 }
 0x983   :  { %v1035_v23 = vsel %vm1033_vm15, 1, %v7099_v17 }
 0x984   :  { %v1049_v36 = vsel %vm94_vm0, %v1035_v23, 0 }
 0x985   :  { %v1051_v24 = vshrl.u32 %v1049_v36, 16  ;;  %v1050_v26 = vand.u32 65535, %v1049_v36 }
 0x987   :  { %v1053_v27 = vcvt.s32.f32 %v1051_v24  ;;  %v1052_v28 = vcvt.s32.f32 %v1050_v26  ;;  %v1155_v24 = vpop.f32.mrf.mxu3 }
 0x989   :  { %1056 = vadd.xlane.f32.xlu2 %v1053_v27  ;;  %1054 = vadd.xlane.f32.xlu0 %v1052_v28  ;;  %v1178_v19 = vpop.f32.mrf.mxu0 }
 0x98f   :  { %v1158_v27 = vpop.f32.mrf.mxu3 }
 0x991   :  { %v1181_v13 = vpop.f32.mrf.mxu0 }
 0x9f4   :  { %v1044_v29 = vpop.xlane.xlu0 %1043  ;;  %v1042_v30 = vpop.xlane.xlu1 %1041 }
 0x9f5   :  { %v1046_v31 = vcvt.f32.s32 %v1044_v29  ;;  %v1045_v38 = vcvt.f32.s32 %v1042_v30 }
 0x9f7   :  { %v1047_v37 = vshll.u32 %v1046_v31, 16 }
 0x9f9   :  { %v1048_v41 = vadd.s32 %v1047_v37, %v1045_v38 }
 0x9fb   :  { %vm1062_vm2 = vcmp.lt.s32.totalorder %v1048_v41, 7 }
 0x9fc   :  { %v5695_v42 = vsel %vm1062_vm2, %v1048_v41, 7  ;;  %v1057_v39 = vpop.xlane.xlu2 %1056  ;;  %v1055_v48 = vpop.xlane.xlu0 %1054 }
 0x9fd   :  { %7160 = vst [vmem:[#allocation8_spill] sm:$0xff] %v5695_v42  ;;  %vm1066_vm3 = vcmp.eq.s32.totalorder %v5277_v5, %v5695_v42  ;;  %v1059_v54 = vcvt.f32.s32 %v1057_v39  ;;  %v1058_v43 = vcvt.f32.s32 %v1055_v48 }
 0x9fe   :  { %v5702_v63 = vsel %vm1066_vm3, 1.0, %v5699_v60 }
 0x9ff   :  { %4592 = vmatmul.msk.f32.vlgmr.msrb.gmra.mxu1 %vm94_vm0, %v5702_v63  ;;  %4594 = vmatmul.msk.f32.vlgmr.msrb.gmra.mxu2 %vm94_vm0, %v5702_v63  ;;  %v1060_v14 = vshll.u32 %v1059_v54, 16 }
 0xa00   :  { %1595 = vmatpush.msrb.mxu1 %v5711_v6  ;;  %1618 = vmatpush.msrb.mxu2 %v5717_v0 }
 0xa01   :  { %v1061_v59 = vadd.s32 %v1060_v14, %v1058_v43 }
 0xa03   :  { %vm1064_vm4 = vcmp.lt.s32.totalorder %v1061_v59, 7 }
 0xa04   :  { %v5720_v16 = vsel %vm1064_vm4, %v1061_v59, 7 }
 0xa05   :  { %7161 = vst [vmem:[#allocation9_spill] sm:$0xff] %v5720_v16  ;;  %vm1067_vm5 = vcmp.eq.s32.totalorder %v5277_v5, %v5720_v16 }
 0xa06   :  { %v5725_v9 = vsel %vm1067_vm5, 1.0, %v5699_v60 }
 0xa07   :  { %7162 = vst [vmem:[#allocation10_spill] sm:$0xff] %v5725_v9  ;;  %4593 = vmatmul.msk.f32.gmra.mxu1 %vm94_vm0, %v5725_v9  ;;  %4595 = vmatmul.msk.f32.gmra.mxu2 %vm94_vm0, %v5725_v9 }
 0xa7c   :  { %v1103_v36 = vpop.f32.mrf.mxu1 }
 0xa7d   :  { %v1156_v31 = vadd.f32 %v1155_v24, %v1103_v36 }
 0xa7f   :  { %v1184_v38 = vadd.f32 %v1156_v31, %v5425_v8 }
 0xa81   :  { %v4600_v39 = vmul.f32 -1.442695, %v1184_v38 }
 0xa82   :  { %v1126_v22 = vpop.f32.mrf.mxu2 }
 0xa83   :  { %v1179_v12 = vadd.f32 %v1178_v19, %v1126_v22 }
 0xa84   :  { %v1106_v26 = vpop.f32.mrf.mxu1 }
 0xa85   :  { %v5732_v25 = vadd.f32 %v1179_v12, %v5413_v56  ;;  %v1159_v28 = vadd.f32 %v1158_v27, %v1106_v26 }
 0xa87   :  { %4826 = vtanh.f32 %v5732_v25  ;;  %v1186_v29 = vadd.f32 %v1159_v28, %v5425_v8 }
 0xa89   :  { %v4602_v30 = vmul.f32 -1.442695, %v1186_v29 }
 0xa8a   :  { %v1129_v18 = vpop.f32.mrf.mxu2 }
 0xa8b   :  { %v1182_v20 = vadd.f32 %v1181_v13, %v1129_v18 }
 0xa8d   :  { %v4827_v21 = vpop.eup %4826  ;;  %v5736_v32 = vadd.f32 %v1182_v20, %v5413_v56 }
 0xa8e   :  { %1270 = vrot.lane.b32.xlu1 %v4827_v21, %s5224_s19 }
 0xa8f   :  { %4828 = vtanh.f32 %v5736_v32 }
 0xa90   :  { %4830 = vpow2.f32 %v4602_v30 }
 0xa95   :  { %v4829_v23 = vpop.eup %4828 }
 0xa96   :  { %1272 = vrot.lane.b32.xlu2 %v4829_v23, %s5224_s19  ;;  %v4831_v37 = vpop.eup %4830 }
 0xa97   :  { %v1202_v41 = vadd.f32 1.0, %v4831_v37 }
 0xa99   :  { %4832 = vrcp.f32 %v1202_v41  ;;  %v1245_v13 = vand.u32 2147483648, %v1202_v41  ;;  %vm1239_vm9 = vweird.f32 %v1202_v41  ;;  %v1243_v18 = vand.u32 2147483647, %v1202_v41 }
 0xa9a   :  { %4834 = vpow2.f32 %v4600_v39 }
 0xa9b   :  { %v1246_v23 = vor.u32 1.1754944e-38, %v1245_v13  ;;  %vm1244_vm11 = vcmp.eq.f32.partialorder %v1243_v18, 8.507059e+37  ;;  %v4603_v18 = vmul.f32 -1.442695, %v5736_v32 }
 0xa9f   :  { %v4833_v48 = vpop.eup %4832 }
 0xaa0   :  { %v4835_v54 = vpop.eup %4834  ;;  %v1235_v14 = vmul.f32 %v4833_v48, %v1202_v41  ;;  %vm1240_vm8 = vweird.f32 %v4833_v48 }
 0xaa1   :  { %v1200_v43 = vadd.f32 1.0, %v4835_v54  ;;  %vm1241_vm10 = vmor %vm1239_vm9, %vm1240_vm8 }
 0xaa2   :  { %v1236_v59 = vsub.f32 1.0, %v1235_v14 }
 0xaa3   :  { %4836 = vrcp.f32 %v1200_v43  ;;  %v1215_v30 = vand.u32 2147483648, %v1200_v43  ;;  %vm1209_vm13 = vweird.f32 %v1200_v43  ;;  %v1213_v31 = vand.u32 2147483647, %v1200_v43 }
 0xaa4   :  { %v1237_v19 = vmul.f32 %v4833_v48, %v1236_v59 }
 0xaa5   :  { %v1216_v38 = vor.u32 1.1754944e-38, %v1215_v30  ;;  %vm1214_vm15 = vcmp.eq.f32.partialorder %v1213_v31, 8.507059e+37 }
 0xaa6   :  { %v1238_v12 = vadd.f32 %v4833_v48, %v1237_v19 }
 0xaa8   :  { %v1242_v21 = vsel %vm1241_vm10, %v4833_v48, %v1238_v12 }
 0xaa9   :  { %v4837_v22 = vpop.eup %4836  ;;  %v1247_v24 = vsel %vm1244_vm11, %v1246_v23, %v1242_v21 }
 0xaaa   :  { %v1205_v20 = vmul.f32 %v4837_v22, %v1200_v43  ;;  %vm1210_vm12 = vweird.f32 %v4837_v22  ;;  %v1267_v54 = vmul.f32 %v1247_v24, %v5431_v57 }
 0xaab   :  { %vm1211_vm14 = vmor %vm1209_vm13, %vm1210_vm12 }
 0xaac   :  { %v1206_v26 = vsub.f32 1.0, %v1205_v20 }
 0xaae   :  { %v1207_v28 = vmul.f32 %v4837_v22, %v1206_v26 }
 0xab0   :  { %v1208_v29 = vadd.f32 %v4837_v22, %v1207_v28  ;;  %v4601_v28 = vmul.f32 -1.442695, %v5732_v25 }
 0xab2   :  { %v1212_v37 = vsel %vm1211_vm14, %v4837_v22, %v1208_v29 }
 0xab3   :  { %v1217_v41 = vsel %vm1214_vm15, %v1216_v38, %v1212_v37 }
 0xab4   :  { %v1266_v12 = vmul.f32 %v1217_v41, %v5431_v57 }
 0xaf0   :  { %v1273_v36 = vpop.permute.xlu2 %1272 }
 0xaf1   :  { %v1277_v27 = vmul.f32 %v1273_v36, %v1247_v24 }
 0xaf3   :  { %1282 = vrot.lane.b32.xlu1 %v1277_v27, %s5224_s19 }
 0xb00   :  { %v1271_v39 = vpop.permute.xlu1 %1270 }
 0xb01   :  { %v1276_v48 = vmul.f32 %v1271_v39, %v1217_v41 }
 0xb03   :  { %1280 = vrot.lane.b32.xlu0 %v1276_v48, %s5224_s19 }
 0xb65   :  { %v1283_v14 = vpop.permute.xlu1 %1282 }
 0xb66   :  { %v1287_v59 = vadd.f32 %v1283_v14, %v1267_v54 }
 0xb68   :  { %4838 = vtanh.f32 %v1287_v59 }
 0xb6e   :  { %v4839_v19 = vpop.eup %4838 }
 0xb6f   :  { %1294 = vrot.lane.b32.xlu2 %v4839_v19, %s5224_s19 }
 0xb75   :  { %v1281_v43 = vpop.permute.xlu0 %1280 }
 0xb76   :  { %v1286_v13 = vadd.f32 %v1281_v43, %v1266_v12 }
 0xb78   :  { %4840 = vtanh.f32 %v1286_v13 }
 0xb79   :  { %4842 = vpow2.f32 %v4603_v18 }
 0xb7e   :  { %v4841_v22 = vpop.eup %4840 }
 0xb7f   :  { %1292 = vrot.lane.b32.xlu0 %v4841_v22, %s5224_s19  ;;  %v4843_v20 = vpop.eup %4842 }
 0xb80   :  { %v1203_v21 = vadd.f32 1.0, %v4843_v20 }
 0xb82   :  { %4844 = vrcp.f32 %v1203_v21  ;;  %v1260_v29 = vand.u32 2147483648, %v1203_v21  ;;  %vm1254_vm3 = vweird.f32 %v1203_v21  ;;  %v1258_v30 = vand.u32 2147483647, %v1203_v21 }
 0xb83   :  { %4846 = vpow2.f32 %v4601_v28 }
 0xb84   :  { %v1261_v37 = vor.u32 1.1754944e-38, %v1260_v29  ;;  %vm1259_vm5 = vcmp.eq.f32.partialorder %v1258_v30, 8.507059e+37 }
 0xb88   :  { %v4845_v23 = vpop.eup %4844 }
 0xb89   :  { %v1250_v36 = vmul.f32 %v4845_v23, %v1203_v21  ;;  %vm1255_vm2 = vweird.f32 %v4845_v23  ;;  %v4847_v39 = vpop.eup %4846 }
 0xb8a   :  { %vm1256_vm4 = vmor %vm1254_vm3, %vm1255_vm2  ;;  %v1201_v48 = vadd.f32 1.0, %v4847_v39 }
 0xb8b   :  { %v1251_v24 = vsub.f32 1.0, %v1250_v36 }
 0xb8c   :  { %4848 = vrcp.f32 %v1201_v48  ;;  %v1230_v43 = vand.u32 2147483648, %v1201_v48  ;;  %vm1224_vm9 = vweird.f32 %v1201_v48  ;;  %v1228_v22 = vand.u32 2147483647, %v1201_v48 }
 0xb8d   :  { %v1252_v26 = vmul.f32 %v4845_v23, %v1251_v24 }
 0xb8e   :  { %v1231_v20 = vor.u32 1.1754944e-38, %v1230_v43  ;;  %vm1229_vm11 = vcmp.eq.f32.partialorder %v1228_v22, 8.507059e+37 }
 0xb8f   :  { %v1253_v27 = vadd.f32 %v4845_v23, %v1252_v26 }
 0xb91   :  { %v1257_v31 = vsel %vm1256_vm4, %v4845_v23, %v1253_v27 }
 0xb92   :  { %v1262_v32 = vsel %vm1259_vm5, %v1261_v37, %v1257_v31  ;;  %v4849_v54 = vpop.eup %4848 }
 0xb93   :  { %v1220_v25 = vmul.f32 %v4849_v54, %v1201_v48  ;;  %vm1225_vm8 = vweird.f32 %v4849_v54 }
 0xb94   :  { %vm1226_vm10 = vmor %vm1224_vm9, %vm1225_vm8 }
 0xb95   :  { %v1221_v14 = vsub.f32 1.0, %v1220_v25 }
 0xb97   :  { %v1222_v19 = vmul.f32 %v4849_v54, %v1221_v14 }
 0xb99   :  { %v1223_v12 = vadd.f32 %v4849_v54, %v1222_v19 }
 0xb9b   :  { %v1227_v18 = vsel %vm1226_vm10, %v4849_v54, %v1223_v12 }
 0xb9c   :  { %v1232_v21 = vsel %vm1229_vm11, %v1231_v20, %v1227_v18 }
 0xbc9   :  { %v1295_v38 = vpop.permute.xlu2 %1294 }
 0xbca   :  { %v1299_v41 = vmul.f32 %v1295_v38, %v1262_v32 }
 0xbcc   :  { %1429 = vst.msk [vmem:[#allocation2 + $0x58] sm:$0xff] %vm410_vm6, %v1299_v41 }
 0xbcd   :  { %1431 = vst.msk [vmem:[#allocation2 + $0x58] sm:$0xff] %vm545_vm7, %v1287_v59  ;;  %v5759_v59 = vld [vmem:[%s7090_s3] sm:$0xff] }
 0xbf1   :  { %v1293_v23 = vpop.permute.xlu0 %1292 }
 0xbf2   :  { %v1298_v36 = vmul.f32 %v1293_v23, %v1232_v21 }
 0xbf4   :  { %1428 = vst.msk [vmem:[#allocation2 + $0x48] sm:$0xff] %vm410_vm6, %v1298_v36  ;;  %4604 = vmatmul.msk.f32.vlgmr.msra.gmra.mxu1 %vm410_vm6, %v1298_v36 }
 0xbf5   :  { %1430 = vst.msk [vmem:[#allocation2 + $0x48] sm:$0xff] %vm545_vm7, %v1286_v13  ;;  %1985 = vmatpush.msra.mxu1 %v5759_v59 }
 0xbfc   :  { %4605 = vmatmul.msk.f32.gmra.mxu1 %vm410_vm6, %v1299_v41 }
 0xc71   :  { %v5763_v24 = vpop.f32.mrf.mxu1 }
 0xc72   :  { %v1329_v26 = vsel %vm94_vm0, %v5763_v24, -inf }
 0xc73   :  { %1330 = vmax.xlane.f32.xlu1 %v1329_v26 }
 0xc79   :  { %v5767_v27 = vpop.f32.mrf.mxu1 }
 0xc7a   :  { %v1332_v13 = vsel %vm94_vm0, %v5767_v27, -inf }
 0xc7b   :  { %1333 = vmax.xlane.f32.xlu0 %v1332_v13 }
 0xce6   :  { %v1331_v28 = vpop.xlane.xlu1 %1330 }
 0xce7   :  { %v1335_v29 = vsub.f32 %v5763_v24, %v1331_v28  ;;  %v4606_v28 = vld [vmem:[%s7087_s0 + $0x30] sm:$0xff] }
 0xce9   :  { %v1337_v30 = vmul.f32 1.442695, %v1335_v29 }
 0xceb   :  { %4850 = vpow2.f32 %v1337_v30 }
 0xcee   :  { %v1334_v31 = vpop.xlane.xlu0 %1333 }
 0xcef   :  { %v1336_v37 = vsub.f32 %v5767_v27, %v1334_v31 }
 0xcf1   :  { %v4851_v32 = vpop.eup %4850  ;;  %v1339_v38 = vmul.f32 1.442695, %v1336_v37 }
 0xcf2   :  { %v1341_v41 = vsel %vm94_vm0, %v4851_v32, 0.0 }
 0xcf3   :  { %4852 = vpow2.f32 %v1339_v38  ;;  %1342 = vadd.xlane.f32.xlu2 %v1341_v41 }
 0xcf9   :  { %v4853_v39 = vpop.eup %4852 }
 0xcfa   :  { %v1344_v48 = vsel %vm94_vm0, %v4853_v39, 0.0 }
 0xcfb   :  { %1345 = vadd.xlane.f32.xlu1 %v1344_v48  ;;  %v5790_v48 = vld [vmem:[%s7093_s6 + $0x38] sm:$0xff] }
 0xd66   :  { %v1343_v54 = vpop.xlane.xlu2 %1342 }
 0xd67   :  { %4854 = vrcp.f32 %v1343_v54  ;;  %v1358_v43 = vand.u32 2147483648, %v1343_v54  ;;  %v1356_v18 = vand.u32 2147483647, %v1343_v54  ;;  %vm1352_vm13 = vweird.f32 %v1343_v54 }
 0xd69   :  { %v1359_v23 = vor.u32 1.1754944e-38, %v1358_v43  ;;  %vm1357_vm15 = vcmp.eq.f32.partialorder %v1356_v18, 8.507059e+37  ;;  %v4607_v43 = vld [vmem:[%s7087_s0 + $0x38] sm:$0xff] }
 0xd6d   :  { %v4855_v25 = vpop.eup %4854 }
 0xd6e   :  { %v1348_v14 = vmul.f32 %v4855_v25, %v1343_v54  ;;  %v1346_v19 = vpop.xlane.xlu1 %1345  ;;  %vm1353_vm12 = vweird.f32 %v4855_v25 }
 0xd6f   :  { %4856 = vrcp.f32 %v1346_v19  ;;  %vm1354_vm14 = vmor %vm1352_vm13, %vm1353_vm12  ;;  %v1373_v31 = vand.u32 2147483648, %v1346_v19  ;;  %v1371_v38 = vand.u32 2147483647, %v1346_v19  ;;  %vm1367_vm3 = vweird.f32 %v1346_v19 }
 0xd70   :  { %v1349_v12 = vsub.f32 1.0, %v1348_v14 }
 0xd71   :  { %vm1372_vm5 = vcmp.eq.f32.partialorder %v1371_v38, 8.507059e+37 }
 0xd72   :  { %v1350_v22 = vmul.f32 %v4855_v25, %v1349_v12  ;;  %v5801_v12 = vld [vmem:[%s7093_s6 + $0x30] sm:$0xff] }
 0xd74   :  { %v1351_v20 = vadd.f32 %v4855_v25, %v1350_v22 }
 0xd75   :  { %v4857_v21 = vpop.eup %4856 }
 0xd76   :  { %v1355_v36 = vsel %vm1354_vm14, %v4855_v25, %v1351_v20  ;;  %v1363_v26 = vmul.f32 %v4857_v21, %v1346_v19  ;;  %vm1368_vm2 = vweird.f32 %v4857_v21  ;;  %v1374_v25 = vor.u32 1.1754944e-38, %v1373_v31 }
 0xd77   :  { %v1360_v13 = vsel %vm1357_vm15, %v1359_v23, %v1355_v36  ;;  %vm1369_vm4 = vmor %vm1367_vm3, %vm1368_vm2  ;;  %v5841_v23 = vld [vmem:[%s7093_s6 + $0x10] sm:$0xff]  ;;  %v5847_v36 = vld [vmem:[%s7093_s6 + $0x8] sm:$0xff] }
 0xd78   :  { %v1364_v29 = vsub.f32 1.0, %v1363_v26  ;;  %v5778_v30 = vmul.f32 %v4851_v32, %v1360_v13  ;;  %v5853_v26 = vld [vmem:[%s7093_s6] sm:$0xff] }
 0xd7a   :  { %7163 = vst [vmem:[#allocation11_spill] sm:$0xff] %v5778_v30  ;;  %v1365_v37 = vmul.f32 %v4857_v21, %v1364_v29  ;;  %4617 = vmatmul.msk.f32.vlgmr.msrb.gmra.mxu1 %vm94_vm0, %v5778_v30  ;;  %v5785_v41 = vmul.f32 %v4606_v28, %v5778_v30 }
 0xd7b   :  { %1410 = vst.msk [vmem:[#allocation2 + $0x40] sm:$0xff] %vm94_vm0, %v5778_v30  ;;  %2198 = vmatpush.msrb.mxu1 %v5790_v48 }
 0xd7c   :  { %7164 = vst [vmem:[#allocation12_spill] sm:$0xff] %v5785_v41  ;;  %v1366_v32 = vadd.f32 %v4857_v21, %v1365_v37  ;;  %4609 = vmatmul.msk.f32.vlgmr.msra.gmra.mxu2 %vm94_vm0, %v5785_v41  ;;  %v1466_v54 = vsel %vm94_vm0, %v5785_v41, 0.0 }
 0xd7d   :  { %1467 = vadd.xlane.f32.xlu0 %v1466_v54  ;;  %2008 = vmatpush.msra.mxu2 %v5658_v62  ;;  %v5812_v62 = vld [vmem:[%s7093_s6 + $0x28] sm:$0xff] }
 0xd7e   :  { %v1370_v14 = vsel %vm1369_vm4, %v4857_v21, %v1366_v32  ;;  %2199 = vmatpush.msrb.mxu1 %v5801_v12  ;;  %v5835_v21 = vld [vmem:[%s7093_s6 + $0x18] sm:$0xff] }
 0xd7f   :  { %v1375_v19 = vsel %vm1372_vm5, %v1374_v25, %v1370_v14 }
 0xd80   :  { %v5807_v22 = vmul.f32 %v4853_v39, %v1375_v19  ;;  %2200 = vmatpush.msrb.mxu1 %v5812_v62  ;;  %v5825_v39 = vld [vmem:[%s7093_s6 + $0x20] sm:$0xff] }
 0xd82   :  { %7165 = vst [vmem:[#allocation13_spill] sm:$0xff] %v5807_v22  ;;  %4618 = vmatmul.msk.f32.gmra.mxu1 %vm94_vm0, %v5807_v22  ;;  %v5820_v18 = vmul.f32 %v4607_v43, %v5807_v22 }
 0xd83   :  { %1411 = vst.msk [vmem:[#allocation2 + $0x50] sm:$0xff] %vm94_vm0, %v5807_v22  ;;  %2201 = vmatpush.msrb.mxu1 %v5825_v39 }
 0xd84   :  { %7166 = vst [vmem:[#allocation14_spill] sm:$0xff] %v5820_v18  ;;  %4610 = vmatmul.msk.f32.gmra.mxu2 %vm94_vm0, %v5820_v18  ;;  %v1469_v20 = vsel %vm94_vm0, %v5820_v18, 0.0 }
 0xd85   :  { %1470 = vadd.xlane.f32.xlu2 %v1469_v20  ;;  %2202 = vmatpush.msrb.mxu1 %v5835_v21 }
 0xd87   :  { %2203 = vmatpush.msrb.mxu1 %v5841_v23 }
 0xd89   :  { %2204 = vmatpush.msrb.mxu1 %v5847_v36 }
 0xd8b   :  { %2205 = vmatpush.msrb.mxu1 %v5853_v26 }
 0xd8c   :  { %4619 = vmatmul.msk.f32.vlgmr.msrb.gmra.mxu2 %vm94_vm0, %v5778_v30 }
 0xd8d   :  { %4650 = vmatpush.msk.msrb.mxu2 %vm5282_vm1, %v7095_v10 }
 0xd94   :  { %4620 = vmatmul.msk.f32.gmra.mxu2 %vm94_vm0, %v5807_v22 }
 0xdf0   :  { %v1468_v13 = vpop.xlane.xlu0 %1467 }
 0xdf1   :  { %v1472_v28 = vmul.f32 0.77132064, %v1468_v13 }
 0xdf8   :  { %v1471_v38 = vpop.xlane.xlu2 %1470 }
 0xdf9   :  { %v1473_v19 = vmul.f32 0.77132064, %v1471_v38 }
 0xdff   :  { %v1460_v29 = vpop.f32.mrf.mxu2 }
 0xe00   :  { %vm1474_vm8 = vcmp.le.f32.partialorder %v1460_v29, %v1472_v28 }
 0xe01   :  { %v1476_v31 = vsel %vm1474_vm8, 1, %v7099_v17 }
 0xe02   :  { %v1478_v37 = vsel %vm94_vm0, %v1476_v31, 0 }
 0xe03   :  { %v1480_v32 = vshrl.u32 %v1478_v37, 16  ;;  %v1479_v54 = vand.u32 65535, %v1478_v37 }
 0xe05   :  { %v1482_v25 = vcvt.s32.f32 %v1480_v32  ;;  %v1481_v14 = vcvt.s32.f32 %v1479_v54 }
 0xe07   :  { %v1463_v43 = vpop.f32.mrf.mxu2  ;;  %1485 = vadd.xlane.f32.xlu1 %v1482_v25  ;;  %1483 = vadd.xlane.f32.xlu0 %v1481_v14 }
 0xe08   :  { %vm1475_vm9 = vcmp.le.f32.partialorder %v1463_v43, %v1473_v19 }
 0xe09   :  { %v1477_v20 = vsel %vm1475_vm9, 1, %v7099_v17 }
 0xe0a   :  { %v1491_v13 = vsel %vm94_vm0, %v1477_v20, 0 }
 0xe0b   :  { %v1493_v10 = vshrl.u32 %v1491_v13, 16  ;;  %v1492_v28 = vand.u32 65535, %v1491_v13 }
 0xe0d   :  { %v1495_v29 = vcvt.s32.f32 %v1493_v10  ;;  %v1494_v41 = vcvt.s32.f32 %v1492_v28 }
 0xe0f   :  { %1498 = vadd.xlane.f32.xlu2 %v1495_v29  ;;  %1496 = vadd.xlane.f32.xlu1 %v1494_v41  ;;  %v1620_v29 = vpop.f32.mrf.mxu2 }
 0xe7a   :  { %v1486_v31 = vpop.xlane.xlu1 %1485  ;;  %v1484_v18 = vpop.xlane.xlu0 %1483 }
 0xe7b   :  { %v1488_v37 = vcvt.f32.s32 %v1486_v31  ;;  %v1487_v54 = vcvt.f32.s32 %v1484_v18 }
 0xe7d   :  { %v1489_v32 = vshll.u32 %v1488_v37, 16  ;;  %v1623_v37 = vpop.f32.mrf.mxu2 }
 0xe7f   :  { %v1490_v38 = vadd.s32 %v1489_v32, %v1487_v54 }
 0xe81   :  { %vm1504_vm10 = vcmp.lt.s32.totalorder %v1490_v38, 7 }
 0xe82   :  { %v5867_v25 = vsel %vm1504_vm10, %v1490_v38, 7  ;;  %v1499_v14 = vpop.xlane.xlu2 %1498  ;;  %v1497_v19 = vpop.xlane.xlu1 %1496 }
 0xe83   :  { %7167 = vst [vmem:[#allocation15_spill] sm:$0xff] %v5867_v25  ;;  %v1501_v43 = vcvt.f32.s32 %v1499_v14  ;;  %vm1508_vm11 = vcmp.eq.s32.totalorder %v5277_v5, %v5867_v25  ;;  %v1500_v41 = vcvt.f32.s32 %v1497_v19 }
 0xe84   :  { %v5872_v10 = vsel %vm1508_vm11, 1.0, %v5699_v60 }
 0xe85   :  { %7168 = vst [vmem:[#allocation16_spill] sm:$0xff] %v5872_v10  ;;  %v1502_v20 = vshll.u32 %v1501_v43, 16  ;;  %4613 = vmatmul.msk.f32.vlgmr.msra.gmra.mxu3 %vm94_vm0, %v5872_v10  ;;  %4615 = vmatmul.msk.f32.vlgmr.msrb.gmra.mxu0 %vm94_vm0, %v5872_v10  ;;  %v1597_v43 = vpop.f32.mrf.mxu1 }
 0xe86   :  { %2037 = vmatpush.msra.mxu3 %v5711_v6  ;;  %2060 = vmatpush.msrb.mxu0 %v5717_v0 }
 0xe87   :  { %v1503_v18 = vadd.s32 %v1502_v20, %v1500_v41 }
 0xe89   :  { %vm1506_vm12 = vcmp.lt.s32.totalorder %v1503_v18, 7 }
 0xe8a   :  { %v5880_v13 = vsel %vm1506_vm12, %v1503_v18, 7 }
 0xe8b   :  { %7169 = vst [vmem:[#allocation17_spill] sm:$0xff] %v5880_v13  ;;  %vm1509_vm13 = vcmp.eq.s32.totalorder %v5277_v5, %v5880_v13 }
 0xe8c   :  { %v5885_v28 = vsel %vm1509_vm13, 1.0, %v5699_v60 }
 0xe8d   :  { %7170 = vst [vmem:[#allocation18_spill] sm:$0xff] %v5885_v28  ;;  %4614 = vmatmul.msk.f32.gmra.mxu3 %vm94_vm0, %v5885_v28  ;;  %4616 = vmatmul.msk.f32.gmra.mxu0 %vm94_vm0, %v5885_v28  ;;  %v1600_v41 = vpop.f32.mrf.mxu1 }
 0xf02   :  { %v1568_v6 = vpop.f32.mrf.mxu0 }
 0xf03   :  { %v1621_v31 = vadd.f32 %v1620_v29, %v1568_v6 }
 0xf05   :  { %v5892_v0 = vadd.f32 %v1621_v31, %v5413_v56 }
 0xf07   :  { %4858 = vtanh.f32 %v5892_v0 }
 0xf08   :  { %v1545_v19 = vpop.f32.mrf.mxu3 }
 0xf09   :  { %v1598_v31 = vadd.f32 %v1597_v43, %v1545_v19 }
 0xf0a   :  { %v1571_v32 = vpop.f32.mrf.mxu0 }
 0xf0b   :  { %v1624_v54 = vadd.f32 %v1623_v37, %v1571_v32  ;;  %v1626_v32 = vadd.f32 %v1598_v31, %v5425_v8 }
 0xf0d   :  { %v4859_v38 = vpop.eup %4858  ;;  %v5896_v60 = vadd.f32 %v1624_v54, %v5413_v56 }
 0xf0e   :  { %1712 = vrot.lane.b32.xlu0 %v4859_v38, %s5224_s19  ;;  %v4621_v38 = vmul.f32 -1.442695, %v1626_v32 }
 0xf0f   :  { %4860 = vtanh.f32 %v5896_v60 }
 0xf10   :  { %v1548_v20 = vpop.f32.mrf.mxu3 }
 0xf11   :  { %v1601_v18 = vadd.f32 %v1600_v41, %v1548_v20 }
 0xf13   :  { %v1628_v29 = vadd.f32 %v1601_v18, %v5425_v8 }
 0xf15   :  { %v4861_v14 = vpop.eup %4860  ;;  %v4623_v6 = vmul.f32 -1.442695, %v1628_v29 }
 0xf16   :  { %1714 = vrot.lane.b32.xlu2 %v4861_v14, %s5224_s19 }
 0xf17   :  { %4862 = vpow2.f32 %v4623_v6 }
 0xf1d   :  { %v4863_v37 = vpop.eup %4862 }
 0xf1e   :  { %v1644_v54 = vadd.f32 1.0, %v4863_v37 }
 0xf20   :  { %4864 = vrcp.f32 %v1644_v54  ;;  %v1687_v18 = vand.u32 2147483648, %v1644_v54  ;;  %vm1681_vm15 = vweird.f32 %v1644_v54  ;;  %v1685_v19 = vand.u32 2147483647, %v1644_v54 }
 0xf21   :  { %4866 = vpow2.f32 %v4621_v38 }
 0xf22   :  { %v1688_v6 = vor.u32 1.1754944e-38, %v1687_v18  ;;  %vm1686_vm3 = vcmp.eq.f32.partialorder %v1685_v19, 8.507059e+37 }
 0xf26   :  { %v4865_v17 = vpop.eup %4864 }
 0xf27   :  { %v4867_v13 = vpop.eup %4866  ;;  %v1677_v14 = vmul.f32 %v4865_v17, %v1644_v54  ;;  %vm1682_vm14 = vweird.f32 %v4865_v17 }
 0xf28   :  { %v1642_v25 = vadd.f32 1.0, %v4867_v13  ;;  %vm1683_vm2 = vmor %vm1681_vm15, %vm1682_vm14 }
 0xf29   :  { %v1678_v16 = vsub.f32 1.0, %v1677_v14 }
 0xf2a   :  { %4868 = vrcp.f32 %v1642_v25  ;;  %vm1651_vm5 = vweird.f32 %v1642_v25 }
 0xf2b   :  { %v1679_v42 = vmul.f32 %v4865_v17, %v1678_v16  ;;  %v1657_v16 = vand.u32 2147483648, %v1642_v25 }
 0xf2d   :  { %v1680_v41 = vadd.f32 %v4865_v17, %v1679_v42  ;;  %v1655_v42 = vand.u32 2147483647, %v1642_v25  ;;  %v1658_v54 = vor.u32 1.1754944e-38, %v1657_v16 }
 0xf2f   :  { %v1684_v29 = vsel %vm1683_vm2, %v4865_v17, %v1680_v41  ;;  %vm1656_vm9 = vcmp.eq.f32.partialorder %v1655_v42, 8.507059e+37 }
 0xf30   :  { %v4869_v20 = vpop.eup %4868  ;;  %v1689_v37 = vsel %vm1686_vm3, %v1688_v6, %v1684_v29 }
 0xf31   :  { %v1647_v43 = vmul.f32 %v4869_v20, %v1642_v25  ;;  %vm1652_vm4 = vweird.f32 %v4869_v20  ;;  %v1709_v18 = vmul.f32 %v1689_v37, %v5431_v57 }
 0xf32   :  { %vm1653_vm8 = vmor %vm1651_vm5, %vm1652_vm4 }
 0xf33   :  { %v1648_v32 = vsub.f32 1.0, %v1647_v43 }
 0xf35   :  { %v1649_v13 = vmul.f32 %v4869_v20, %v1648_v32 }
 0xf37   :  { %v1650_v14 = vadd.f32 %v4869_v20, %v1649_v13 }
 0xf39   :  { %v1654_v28 = vsel %vm1653_vm8, %v4869_v20, %v1650_v14 }
 0xf3a   :  { %v1659_v17 = vsel %vm1656_vm9, %v1658_v54, %v1654_v28  ;;  %v4624_v28 = vmul.f32 -1.442695, %v5896_v60 }
 0xf3b   :  { %v1708_v6 = vmul.f32 %v1659_v17, %v5431_v57 }
 0xf70   :  { %v1715_v31 = vpop.permute.xlu2 %1714 }
 0xf71   :  { %v1719_v38 = vmul.f32 %v1715_v31, %v1689_v37 }
 0xf73   :  { %1724 = vrot.lane.b32.xlu0 %v1719_v38, %s5224_s19 }
 0xf80   :  { %v1713_v22 = vpop.permute.xlu0 %1712 }
 0xf81   :  { %v1718_v41 = vmul.f32 %v1713_v22, %v1659_v17  ;;  %v4622_v22 = vmul.f32 -1.442695, %v5892_v0 }
 0xf83   :  { %1722 = vrot.lane.b32.xlu1 %v1718_v41, %s5224_s19 }
 0xfe5   :  { %v1725_v19 = vpop.permute.xlu0 %1724 }
 0xfe6   :  { %v1729_v43 = vadd.f32 %v1725_v19, %v1709_v18 }
 0xfe8   :  { %4870 = vtanh.f32 %v1729_v43 }
 0xfee   :  { %v4871_v29 = vpop.eup %4870 }
 0xfef   :  { %1736 = vrot.lane.b32.xlu0 %v4871_v29, %s5224_s19 }
 0xff5   :  { %v1723_v25 = vpop.permute.xlu1 %1722 }
 0xff6   :  { %v1728_v31 = vadd.f32 %v1723_v25, %v1708_v6 }
 0xff8   :  { %4872 = vtanh.f32 %v1728_v31 }
 0xff9   :  { %4874 = vpow2.f32 %v4622_v22 }
 0xffa   :  { %4876 = vpow2.f32 %v4624_v28 }
 0xffe   :  { %v4873_v20 = vpop.eup %4872 }
 0xfff   :  { %1734 = vrot.lane.b32.xlu2 %v4873_v20, %s5224_s19  ;;  %v4875_v37 = vpop.eup %4874 }
0x1000   :  { %v1643_v32 = vadd.f32 1.0, %v4875_v37  ;;  %v4877_v38 = vpop.eup %4876 }
0x1001   :  { %v1645_v13 = vadd.f32 1.0, %v4877_v38 }
0x1002   :  { %4878 = vrcp.f32 %v1643_v32  ;;  %v1672_v19 = vand.u32 2147483648, %v1643_v32  ;;  %vm1666_vm11 = vweird.f32 %v1643_v32  ;;  %v1670_v29 = vand.u32 2147483647, %v1643_v32 }
0x1003   :  { %4880 = vrcp.f32 %v1645_v13  ;;  %v1702_v38 = vand.u32 2147483648, %v1645_v13  ;;  %vm1696_vm15 = vweird.f32 %v1645_v13 }
0x1004   :  { %v1673_v6 = vor.u32 1.1754944e-38, %v1672_v19  ;;  %vm1671_vm13 = vcmp.eq.f32.partialorder %v1670_v29, 8.507059e+37 }
0x1008   :  { %v4879_v14 = vpop.eup %4878 }
0x1009   :  { %v1662_v16 = vmul.f32 %v4879_v14, %v1643_v32  ;;  %v4881_v54 = vpop.eup %4880  ;;  %vm1667_vm10 = vweird.f32 %v4879_v14 }
0x100a   :  { %v1692_v41 = vmul.f32 %v4881_v54, %v1645_v13  ;;  %vm1668_vm12 = vmor %vm1666_vm11, %vm1667_vm10  ;;  %vm1697_vm14 = vweird.f32 %v4881_v54 }
0x100b   :  { %v1663_v42 = vsub.f32 1.0, %v1662_v16  ;;  %v1700_v16 = vand.u32 2147483647, %v1645_v13  ;;  %vm1698_vm2 = vmor %vm1696_vm15, %vm1697_vm14 }
0x100c   :  { %v1693_v0 = vsub.f32 1.0, %v1692_v41 }
0x100d   :  { %v1664_v17 = vmul.f32 %v4879_v14, %v1663_v42  ;;  %vm1701_vm3 = vcmp.eq.f32.partialorder %v1700_v16, 8.507059e+37 }
0x100e   :  { %v1694_v25 = vmul.f32 %v4881_v54, %v1693_v0 }
0x100f   :  { %v1665_v18 = vadd.f32 %v4879_v14, %v1664_v17 }
0x1010   :  { %v1695_v37 = vadd.f32 %v4881_v54, %v1694_v25 }
0x1011   :  { %v1669_v60 = vsel %vm1668_vm12, %v4879_v14, %v1665_v18  ;;  %v1703_v14 = vor.u32 1.1754944e-38, %v1702_v38 }
0x1012   :  { %v1674_v20 = vsel %vm1671_vm13, %v1673_v6, %v1669_v60  ;;  %v1699_v32 = vsel %vm1698_vm2, %v4881_v54, %v1695_v37 }
0x1013   :  { %v1704_v42 = vsel %vm1701_vm3, %v1703_v14, %v1699_v32 }
0x1059   :  { %v1735_v22 = vpop.permute.xlu2 %1734 }
0x105a   :  { %v1740_v28 = vmul.f32 %v1735_v22, %v1674_v20 }
0x105c   :  { %1870 = vst.msk [vmem:[#allocation2 + $0x68] sm:$0xff] %vm410_vm6, %v1740_v28  ;;  %4625 = vmatmul.msk.f32.vlgmr.msrb.gmra.mxu3 %vm410_vm6, %v1740_v28 }
0x105d   :  { %1872 = vst.msk [vmem:[#allocation2 + $0x68] sm:$0xff] %vm545_vm7, %v1728_v31  ;;  %2427 = vmatpush.msrb.mxu3 %v5759_v59 }
0x1061   :  { %v1737_v17 = vpop.permute.xlu0 %1736 }
0x1062   :  { %v1741_v41 = vmul.f32 %v1737_v17, %v1704_v42 }
0x1064   :  { %1871 = vst.msk [vmem:[#allocation2 + $0x78] sm:$0xff] %vm410_vm6, %v1741_v41  ;;  %4626 = vmatmul.msk.f32.gmra.mxu3 %vm410_vm6, %v1741_v41 }
0x1065   :  { %1873 = vst.msk [vmem:[#allocation2 + $0x78] sm:$0xff] %vm545_vm7, %v1729_v43 }
0x10df   :  { %v5918_v18 = vpop.f32.mrf.mxu3 }
0x10e0   :  { %7171 = vst [vmem:[#allocation19_spill] sm:$0xff] %v5918_v18  ;;  %v1771_v31 = vsel %vm94_vm0, %v5918_v18, -inf }
0x10e1   :  { %1772 = vmax.xlane.f32.xlu1 %v1771_v31 }
0x10e7   :  { %v5922_v13 = vpop.f32.mrf.mxu3 }
0x10e8   :  { %7172 = vst [vmem:[#allocation20_spill] sm:$0xff] %v5922_v13  ;;  %v1774_v54 = vsel %vm94_vm0, %v5922_v13, -inf }
0x10e9   :  { %1775 = vmax.xlane.f32.xlu2 %v1774_v54 }
0x1154   :  { %v1773_v19 = vpop.xlane.xlu1 %1772 }
0x1155   :  { %v1777_v0 = vsub.f32 %v5918_v18, %v1773_v19 }
0x1157   :  { %v1779_v29 = vmul.f32 1.442695, %v1777_v0 }
0x1159   :  { %4882 = vpow2.f32 %v1779_v29 }
0x115c   :  { %v1776_v60 = vpop.xlane.xlu2 %1775 }
0x115d   :  { %v1778_v43 = vsub.f32 %v5922_v13, %v1776_v60 }
0x115f   :  { %v4883_v6 = vpop.eup %4882  ;;  %v1781_v25 = vmul.f32 1.442695, %v1778_v43  ;;  %v4627_v43 = vld [vmem:[%s7087_s0 + $0x40] sm:$0xff] }
0x1160   :  { %v1783_v20 = vsel %vm94_vm0, %v4883_v6, 0.0 }
0x1161   :  { %1784 = vadd.xlane.f32.xlu0 %v1783_v20  ;;  %4884 = vpow2.f32 %v1781_v25 }
0x1167   :  { %v4885_v22 = vpop.eup %4884 }
0x1168   :  { %v1786_v28 = vsel %vm94_vm0, %v4885_v22, 0.0 }
0x1169   :  { %1787 = vadd.xlane.f32.xlu1 %v1786_v28 }
0x11d4   :  { %v1785_v37 = vpop.xlane.xlu0 %1784 }
0x11d5   :  { %4886 = vrcp.f32 %v1785_v37  ;;  %v1800_v42 = vand.u32 2147483648, %v1785_v37  ;;  %v1798_v41 = vand.u32 2147483647, %v1785_v37  ;;  %vm1794_vm5 = vweird.f32 %v1785_v37 }
0x11d7   :  { %v1801_v54 = vor.u32 1.1754944e-38, %v1800_v42  ;;  %vm1799_vm9 = vcmp.eq.f32.partialorder %v1798_v41, 8.507059e+37  ;;  %v5950_v42 = vld [vmem:[%s7090_s3 + $0x8] sm:$0xff] }
0x11db   :  { %v4887_v38 = vpop.eup %4886 }
0x11dc   :  { %v1790_v16 = vmul.f32 %v4887_v38, %v1785_v37  ;;  %v1788_v32 = vpop.xlane.xlu1 %1787  ;;  %vm1795_vm4 = vweird.f32 %v4887_v38 }
0x11dd   :  { %4888 = vrcp.f32 %v1788_v32  ;;  %vm1796_vm8 = vmor %vm1794_vm5, %vm1795_vm4  ;;  %v1815_v28 = vand.u32 2147483648, %v1788_v32  ;;  %vm1809_vm11 = vweird.f32 %v1788_v32 }
0x11de   :  { %v1791_v14 = vsub.f32 1.0, %v1790_v16  ;;  %v1813_v16 = vand.u32 2147483647, %v1788_v32 }
0x11e0   :  { %v1792_v17 = vmul.f32 %v4887_v38, %v1791_v14  ;;  %vm1814_vm13 = vcmp.eq.f32.partialorder %v1813_v16, 8.507059e+37 }
0x11e2   :  { %v1793_v31 = vadd.f32 %v4887_v38, %v1792_v17  ;;  %v1816_v17 = vor.u32 1.1754944e-38, %v1815_v28 }
0x11e3   :  { %v4889_v19 = vpop.eup %4888 }
0x11e4   :  { %v1797_v0 = vsel %vm1796_vm8, %v4887_v38, %v1793_v31  ;;  %v1805_v29 = vmul.f32 %v4889_v19, %v1788_v32  ;;  %vm1810_vm10 = vweird.f32 %v4889_v19 }
0x11e5   :  { %v1802_v60 = vsel %vm1799_vm9, %v1801_v54, %v1797_v0  ;;  %vm1811_vm12 = vmor %vm1809_vm11, %vm1810_vm10  ;;  %v4628_v54 = vld [vmem:[%s7087_s0 + $0x48] sm:$0xff]  ;;  %v7177_v0 = vmov 1.0  }
0x11e6   :  { %v5933_v25 = vmul.f32 %v4883_v6, %v1802_v60  ;;  %v1806_v20 = vsub.f32 1.0, %v1805_v29 }
0x11e8   :  { %7173 = vst [vmem:[#allocation21_spill] sm:$0xff] %v5933_v25  ;;  %4638 = vmatmul.msk.f32.vlgmr.msra.gmra.mxu3 %vm94_vm0, %v5933_v25  ;;  %v5940_v37 = vmul.f32 %v4627_v43, %v5933_v25  ;;  %v1807_v38 = vmul.f32 %v4889_v19, %v1806_v20  ;;  %v7178_v20 = vmov 0  }
0x11e9   :  { %1852 = vst.msk [vmem:[#allocation2 + $0x60] sm:$0xff] %vm94_vm0, %v5933_v25  ;;  %2640 = vmatpush.msra.mxu3 %v5790_v48 }
0x11ea   :  { %7174 = vst [vmem:[#allocation22_spill] sm:$0xff] %v5940_v37  ;;  %4630 = vmatmul.msk.f32.vlgmr.msra.gmra.mxu0 %vm94_vm0, %v5940_v37  ;;  %v1908_v6 = vsel %vm94_vm0, %v5940_v37, 0.0  ;;  %v1808_v14 = vadd.f32 %v4889_v19, %v1807_v38 }
0x11eb   :  { %1909 = vadd.xlane.f32.xlu2 %v1908_v6  ;;  %2450 = vmatpush.msra.mxu0 %v5950_v42 }
0x11ec   :  { %2641 = vmatpush.msra.mxu3 %v5801_v12  ;;  %v1812_v41 = vsel %vm1811_vm12, %v4889_v19, %v1808_v14 }
0x11ed   :  { %v1817_v31 = vsel %vm1814_vm13, %v1816_v17, %v1812_v41 }
0x11ee   :  { %2642 = vmatpush.msra.mxu3 %v5812_v62  ;;  %v5958_v32 = vmul.f32 %v4885_v22, %v1817_v31 }
0x11f0   :  { %7175 = vst [vmem:[#allocation23_spill] sm:$0xff] %v5958_v32  ;;  %2643 = vmatpush.msra.mxu3 %v5825_v39  ;;  %v5966_v19 = vmul.f32 %v4628_v54, %v5958_v32 }
0x11f1   :  { %4639 = vmatmul.msk.f32.gmra.mxu3 %vm94_vm0, %v5958_v32  ;;  %1853 = vst.msk [vmem:[#allocation2 + $0x70] sm:$0xff] %vm94_vm0, %v5958_v32 }
0x11f2   :  { %7176 = vst [vmem:[#allocation24_spill] sm:$0xff] %v5966_v19  ;;  %2644 = vmatpush.msra.mxu3 %v5835_v21  ;;  %4631 = vmatmul.msk.f32.gmra.mxu0 %vm94_vm0, %v5966_v19  ;;  %v1911_v22 = vsel %vm94_vm0, %v5966_v19, 0.0 }
0x11f3   :  { %1912 = vadd.xlane.f32.xlu0 %v1911_v22 }
0x11f4   :  { %2645 = vmatpush.msra.mxu3 %v5841_v23 }
0x11f6   :  { %2646 = vmatpush.msra.mxu3 %v5847_v36 }
0x11f8   :  { %2647 = vmatpush.msra.mxu3 %v5853_v26 }
0x11fa   :  { %4640 = vmatmul.msk.f32.vlgmr.msrb.gmra.mxu0 %vm94_vm0, %v5933_v25 }
0x11fb   :  { %4671 = vmatpush.msk.msrb.mxu0 %vm5282_vm1, %v7177_v0 }
0x1202   :  { %4641 = vmatmul.msk.f32.gmra.mxu0 %vm94_vm0, %v5958_v32 }
0x125e   :  { %v1910_v29 = vpop.xlane.xlu2 %1909 }
0x125f   :  { %v1914_v60 = vmul.f32 0.77132064, %v1910_v29 }
0x1266   :  { %v1913_v14 = vpop.xlane.xlu0 %1912 }
0x1267   :  { %v1902_v43 = vpop.f32.mrf.mxu0  ;;  %v1915_v31 = vmul.f32 0.77132064, %v1913_v14 }
0x1268   :  { %vm1916_vm14 = vcmp.le.f32.partialorder %v1902_v43, %v1914_v60 }
0x1269   :  { %v1918_v28 = vsel %vm1916_vm14, 1, %v7178_v20 }
0x126a   :  { %v1920_v38 = vsel %vm94_vm0, %v1918_v28, 0 }
0x126b   :  { %v1922_v16 = vshrl.u32 %v1920_v38, 16  ;;  %v1921_v6 = vand.u32 65535, %v1920_v38 }
0x126d   :  { %v1924_v17 = vcvt.s32.f32 %v1922_v16  ;;  %v1923_v41 = vcvt.s32.f32 %v1921_v6 }
0x126f   :  { %1927 = vadd.xlane.f32.xlu1 %v1924_v17  ;;  %1925 = vadd.xlane.f32.xlu2 %v1923_v41  ;;  %v1905_v54 = vpop.f32.mrf.mxu0 }
0x1270   :  { %vm1917_vm15 = vcmp.le.f32.partialorder %v1905_v54, %v1915_v31 }
0x1271   :  { %v1919_v22 = vsel %vm1917_vm15, 1, %v7178_v20 }
0x1272   :  { %v1933_v29 = vsel %vm94_vm0, %v1919_v22, 0  ;;  %v5991_v22 = vld [vmem:[#allocation2 + $0x80] sm:$0xff] }
0x1273   :  { %v1935_v19 = vshrl.u32 %v1933_v29, 16  ;;  %v1934_v60 = vand.u32 65535, %v1933_v29  ;;  %v6003_v29 = vld [vmem:[%s7089_s2] sm:$0xff] }
0x1275   :  { %v1937_v43 = vcvt.s32.f32 %v1935_v19  ;;  %v1936_v37 = vcvt.s32.f32 %v1934_v60  ;;  %v6009_v60 = vld [vmem:[%s7089_s2 + $0x8] sm:$0xff] }
0x1277   :  { %1940 = vadd.xlane.f32.xlu0 %v1937_v43  ;;  %1938 = vadd.xlane.f32.xlu1 %v1936_v37 }
0x12e2   :  { %v1928_v28 = vpop.xlane.xlu1 %1927  ;;  %v1926_v38 = vpop.xlane.xlu2 %1925 }
0x12e3   :  { %v1930_v32 = vcvt.f32.s32 %v1928_v28  ;;  %v1929_v6 = vcvt.f32.s32 %v1926_v38 }
0x12e5   :  { %v1931_v16 = vshll.u32 %v1930_v32, 16 }
0x12e7   :  { %v1932_v14 = vadd.s32 %v1931_v16, %v1929_v6  ;;  %v2062_v16 = vpop.f32.mrf.mxu0 }
0x12e9   :  { %vm1946_vm2 = vcmp.lt.s32.totalorder %v1932_v14, 7 }
0x12ea   :  { %v5987_v17 = vsel %vm1946_vm2, %v1932_v14, 7  ;;  %v1941_v41 = vpop.xlane.xlu0 %1940  ;;  %v1939_v31 = vpop.xlane.xlu1 %1938 }
0x12eb   :  { %7179 = vst [vmem:[#allocation25_spill] sm:$0xff] %v5987_v17  ;;  %vm1950_vm3 = vcmp.eq.s32.totalorder %v5277_v5, %v5987_v17  ;;  %v1943_v54 = vcvt.f32.s32 %v1941_v41  ;;  %v1942_v32 = vcvt.f32.s32 %v1939_v31 }
0x12ec   :  { %v5994_v19 = vsel %vm1950_vm3, 1.0, %v5991_v22 }
0x12ed   :  { %7180 = vst [vmem:[#allocation26_spill] sm:$0xff] %v5994_v19  ;;  %4634 = vmatmul.msk.f32.vlgmr.msra.gmra.mxu1 %vm94_vm0, %v5994_v19  ;;  %4636 = vmatmul.msk.f32.vlgmr.msra.gmra.mxu2 %vm94_vm0, %v5994_v19  ;;  %v1944_v37 = vshll.u32 %v1943_v54, 16 }
0x12ee   :  { %2479 = vmatpush.msra.mxu1 %v6003_v29  ;;  %2502 = vmatpush.msra.mxu2 %v6009_v60 }
0x12ef   :  { %v1945_v43 = vadd.s32 %v1944_v37, %v1942_v32  ;;  %v2065_v31 = vpop.f32.mrf.mxu0 }
0x12f1   :  { %vm1948_vm4 = vcmp.lt.s32.totalorder %v1945_v43, 7 }
0x12f2   :  { %v6012_v28 = vsel %vm1948_vm4, %v1945_v43, 7 }
0x12f3   :  { %7181 = vst [vmem:[#allocation27_spill] sm:$0xff] %v6012_v28  ;;  %vm1951_vm5 = vcmp.eq.s32.totalorder %v5277_v5, %v6012_v28 }
0x12f4   :  { %v6017_v38 = vsel %vm1951_vm5, 1.0, %v5991_v22 }
0x12f5   :  { %7182 = vst [vmem:[#allocation28_spill] sm:$0xff] %v6017_v38  ;;  %4635 = vmatmul.msk.f32.gmra.mxu1 %vm94_vm0, %v6017_v38  ;;  %4637 = vmatmul.msk.f32.gmra.mxu2 %vm94_vm0, %v6017_v38 }
0x1370   :  { %v2010_v6 = vpop.f32.mrf.mxu2 }
0x1371   :  { %v2063_v14 = vadd.f32 %v2062_v16, %v2010_v6  ;;  %v1987_v16 = vpop.f32.mrf.mxu1  ;;  %v2039_v6 = vpop.f32.mrf.mxu3 }
0x1373   :  { %v6024_v41 = vadd.f32 %v2063_v14, %v5413_v56  ;;  %v2040_v14 = vadd.f32 %v2039_v6, %v1987_v16 }
0x1375   :  { %4890 = vtanh.f32 %v6024_v41  ;;  %v2068_v28 = vadd.f32 %v2040_v14, %v5425_v8 }
0x1377   :  { %v4642_v38 = vmul.f32 -1.442695, %v2068_v28 }
0x1378   :  { %v2013_v54 = vpop.f32.mrf.mxu2 }
0x1379   :  { %v2066_v37 = vadd.f32 %v2065_v31, %v2013_v54  ;;  %v1990_v54 = vpop.f32.mrf.mxu1  ;;  %v2042_v25 = vpop.f32.mrf.mxu3 }
0x137a   :  { %v2043_v15 = vadd.f32 %v2042_v25, %v1990_v54 }
0x137b   :  { %v4891_v32 = vpop.eup %4890  ;;  %v6028_v43 = vadd.f32 %v2066_v37, %v5413_v56 }
0x137c   :  { %2154 = vrot.lane.b32.xlu2 %v4891_v32, %s5224_s19  ;;  %v2070_v13 = vadd.f32 %v2043_v15, %v5425_v8 }
0x137d   :  { %4892 = vtanh.f32 %v6028_v43 }
0x137e   :  { %4894 = vpow2.f32 %v4642_v38  ;;  %v4644_v10 = vmul.f32 -1.442695, %v2070_v13 }
0x1383   :  { %v4893_v17 = vpop.eup %4892 }
0x1384   :  { %2156 = vrot.lane.b32.xlu0 %v4893_v17, %s5224_s19  ;;  %v4895_v19 = vpop.eup %4894 }
0x1385   :  { %v2084_v31 = vadd.f32 1.0, %v4895_v19 }
0x1387   :  { %4896 = vrcp.f32 %v2084_v31  ;;  %v2099_v16 = vand.u32 2147483648, %v2084_v31  ;;  %vm2093_vm9 = vweird.f32 %v2084_v31  ;;  %v2097_v28 = vand.u32 2147483647, %v2084_v31 }
0x1388   :  { %4898 = vpow2.f32 %v4644_v10 }
0x1389   :  { %v2100_v6 = vor.u32 1.1754944e-38, %v2099_v16  ;;  %vm2098_vm11 = vcmp.eq.f32.partialorder %v2097_v28, 8.507059e+37 }
0x138d   :  { %v4897_v37 = vpop.eup %4896 }
0x138e   :  { %v2089_v32 = vmul.f32 %v4897_v37, %v2084_v31  ;;  %vm2094_vm8 = vweird.f32 %v4897_v37  ;;  %v4899_v19 = vpop.eup %4898 }
0x138f   :  { %vm2095_vm10 = vmor %vm2093_vm9, %vm2094_vm8  ;;  %v2086_v25 = vadd.f32 1.0, %v4899_v19 }
0x1390   :  { %v2090_v18 = vsub.f32 1.0, %v2089_v32 }
0x1391   :  { %4900 = vrcp.f32 %v2086_v25  ;;  %vm2123_vm13 = vweird.f32 %v2086_v25  ;;  %v2127_v31 = vand.u32 2147483647, %v2086_v25 }
0x1392   :  { %v2091_v17 = vmul.f32 %v4897_v37, %v2090_v18 }
0x1393   :  { %vm2128_vm15 = vcmp.eq.f32.partialorder %v2127_v31, 8.507059e+37 }
0x1394   :  { %v2092_v30 = vadd.f32 %v4897_v37, %v2091_v17  ;;  %v2129_v17 = vand.u32 2147483648, %v2086_v25 }
0x1396   :  { %v2096_v38 = vsel %vm2095_vm10, %v4897_v37, %v2092_v30  ;;  %v2130_v37 = vor.u32 1.1754944e-38, %v2129_v17 }
0x1397   :  { %v2101_v14 = vsel %vm2098_vm11, %v2100_v6, %v2096_v38  ;;  %v4901_v15 = vpop.eup %4900 }
0x1398   :  { %v2119_v18 = vmul.f32 %v4901_v15, %v2086_v25  ;;  %vm2124_vm12 = vweird.f32 %v4901_v15 }
0x1399   :  { %vm2125_vm14 = vmor %vm2123_vm13, %vm2124_vm12 }
0x139a   :  { %v2120_v10 = vsub.f32 1.0, %v2119_v18 }
0x139c   :  { %v2121_v13 = vmul.f32 %v4901_v15, %v2120_v10 }
0x139e   :  { %v2122_v32 = vadd.f32 %v4901_v15, %v2121_v13  ;;  %v4643_v13 = vmul.f32 -1.442695, %v6024_v41 }
0x13a0   :  { %v2126_v30 = vsel %vm2125_vm14, %v4901_v15, %v2122_v32 }
0x13a1   :  { %v2131_v28 = vsel %vm2128_vm15, %v2130_v37, %v2126_v30 }
0x13a2   :  { %v2151_v18 = vmul.f32 %v2131_v28, %v5431_v57 }
0x13d6   :  { %v2155_v45 = vpop.permute.xlu2 %2154 }
0x13d7   :  { %v2160_v54 = vmul.f32 %v2155_v45, %v2101_v14  ;;  %v2150_v45 = vmul.f32 %v2101_v14, %v5431_v57 }
0x13d9   :  { %2164 = vrot.lane.b32.xlu1 %v2160_v54, %s5224_s19 }
0x13f6   :  { %v2157_v16 = vpop.permute.xlu0 %2156 }
0x13f7   :  { %v2161_v38 = vmul.f32 %v2157_v16, %v2131_v28 }
0x13f9   :  { %2166 = vrot.lane.b32.xlu0 %v2161_v38, %s5224_s19 }
0x144b   :  { %v2165_v19 = vpop.permute.xlu1 %2164 }
0x144c   :  { %v2170_v6 = vadd.f32 %v2165_v19, %v2150_v45 }
0x144e   :  { %4902 = vtanh.f32 %v2170_v6 }
0x1454   :  { %v4903_v54 = vpop.eup %4902 }
0x1455   :  { %2176 = vrot.lane.b32.xlu2 %v4903_v54, %s5224_s19 }
0x146b   :  { %v2167_v25 = vpop.permute.xlu0 %2166 }
0x146c   :  { %v2171_v10 = vadd.f32 %v2167_v25, %v2151_v18  ;;  %v4645_v25 = vmul.f32 -1.442695, %v6028_v43 }
0x146e   :  { %4904 = vtanh.f32 %v2171_v10 }
0x146f   :  { %4906 = vpow2.f32 %v4643_v13 }
0x1474   :  { %v4905_v15 = vpop.eup %4904 }
0x1475   :  { %2178 = vrot.lane.b32.xlu0 %v4905_v15, %s5224_s19  ;;  %v4907_v32 = vpop.eup %4906 }
0x1476   :  { %v2085_v17 = vadd.f32 1.0, %v4907_v32 }
0x1478   :  { %4908 = vrcp.f32 %v2085_v17  ;;  %v2114_v38 = vand.u32 2147483648, %v2085_v17  ;;  %vm2108_vm3 = vweird.f32 %v2085_v17  ;;  %v2112_v28 = vand.u32 2147483647, %v2085_v17 }
0x1479   :  { %4910 = vpow2.f32 %v4645_v25 }
0x147a   :  { %v2115_v19 = vor.u32 1.1754944e-38, %v2114_v38  ;;  %vm2113_vm5 = vcmp.eq.f32.partialorder %v2112_v28, 8.507059e+37 }
0x147e   :  { %v4909_v14 = vpop.eup %4908 }
0x147f   :  { %v2104_v31 = vmul.f32 %v4909_v14, %v2085_v17  ;;  %vm2109_vm2 = vweird.f32 %v4909_v14  ;;  %v4911_v15 = vpop.eup %4910 }
0x1480   :  { %vm2110_vm4 = vmor %vm2108_vm3, %vm2109_vm2  ;;  %v2087_v13 = vadd.f32 1.0, %v4911_v15 }
0x1481   :  { %v2105_v30 = vsub.f32 1.0, %v2104_v31 }
0x1482   :  { %4912 = vrcp.f32 %v2087_v13  ;;  %vm2138_vm9 = vweird.f32 %v2087_v13 }
0x1483   :  { %v2106_v37 = vmul.f32 %v4909_v14, %v2105_v30 }
0x1485   :  { %v2107_v16 = vadd.f32 %v4909_v14, %v2106_v37  ;;  %v2144_v37 = vand.u32 2147483648, %v2087_v13 }
0x1487   :  { %v2111_v45 = vsel %vm2110_vm4, %v4909_v14, %v2107_v16  ;;  %v2142_v16 = vand.u32 2147483647, %v2087_v13 }
0x1488   :  { %v2116_v54 = vsel %vm2113_vm5, %v2115_v19, %v2111_v45  ;;  %v4913_v32 = vpop.eup %4912 }
0x1489   :  { %v2134_v17 = vmul.f32 %v4913_v32, %v2087_v13  ;;  %vm2139_vm8 = vweird.f32 %v4913_v32  ;;  %vm2143_vm11 = vcmp.eq.f32.partialorder %v2142_v16, 8.507059e+37 }
0x148a   :  { %vm2140_vm10 = vmor %vm2138_vm9, %vm2139_vm8 }
0x148b   :  { %v2135_v14 = vsub.f32 1.0, %v2134_v17 }
0x148d   :  { %v2136_v31 = vmul.f32 %v4913_v32, %v2135_v14 }
0x148f   :  { %v2137_v30 = vadd.f32 %v4913_v32, %v2136_v31 }
0x1491   :  { %v2141_v38 = vsel %vm2140_vm10, %v4913_v32, %v2137_v30 }
0x14af   :  { %v2177_v18 = vpop.permute.xlu2 %2176 }
0x14b0   :  { %v2182_v41 = vmul.f32 %v2177_v18, %v2116_v54 }
0x14b2   :  { %2312 = vst.msk [vmem:[#allocation2 + $0x88] sm:$0xff] %vm410_vm6, %v2182_v41  ;;  %4646 = vmatmul.msk.f32.vlgmr.msrb.gmra.mxu1 %vm410_vm6, %v2182_v41 }
0x14b3   :  { %2314 = vst.msk [vmem:[#allocation2 + $0x88] sm:$0xff] %vm545_vm7, %v2170_v6  ;;  %2869 = vmatpush.msrb.mxu1 %v5759_v59  ;;  %v2145_v6 = vor.u32 1.1754944e-38, %v2144_v37 }
0x14b5   :  { %v2146_v59 = vsel %vm2143_vm11, %v2145_v6, %v2141_v38 }
0x14e7   :  { %v2179_v28 = vpop.permute.xlu0 %2178 }
0x14e8   :  { %v2183_v43 = vmul.f32 %v2179_v28, %v2146_v59 }
0x14ea   :  { %2313 = vst.msk [vmem:[#allocation2 + $0x98] sm:$0xff] %vm410_vm6, %v2183_v43  ;;  %4647 = vmatmul.msk.f32.gmra.mxu1 %vm410_vm6, %v2183_v43 }
0x14eb   :  { %2315 = vst.msk [vmem:[#allocation2 + $0x98] sm:$0xff] %vm545_vm7, %v2171_v10 }
0x152f   :  { %v6050_v45 = vpop.f32.mrf.mxu1 }
0x1530   :  { %7183 = vst [vmem:[#allocation29_spill] sm:$0xff] %v6050_v45  ;;  %v2213_v19 = vsel %vm94_vm0, %v6050_v45, -inf }
0x1531   :  { %2214 = vmax.xlane.f32.xlu2 %v2213_v19 }
0x1567   :  { %v6054_v54 = vpop.f32.mrf.mxu1 }
0x1568   :  { %7184 = vst [vmem:[#allocation30_spill] sm:$0xff] %v6054_v54  ;;  %v2216_v18 = vsel %vm94_vm0, %v6054_v54, -inf }
0x1569   :  { %2217 = vmax.xlane.f32.xlu1 %v2216_v18 }
0x15a4   :  { %v2215_v41 = vpop.xlane.xlu2 %2214 }
0x15a5   :  { %v2219_v25 = vsub.f32 %v6050_v45, %v2215_v41 }
0x15a7   :  { %v2221_v15 = vmul.f32 1.442695, %v2219_v25 }
0x15a9   :  { %4914 = vpow2.f32 %v2221_v15  ;;  %v4648_v15 = vld [vmem:[%s7087_s0 + $0x50] sm:$0xff] }
0x15af   :  { %v4915_v13 = vpop.eup %4914 }
0x15b0   :  { %v2225_v10 = vsel %vm94_vm0, %v4915_v13, 0.0 }
0x15b1   :  { %2226 = vadd.xlane.f32.xlu0 %v2225_v10 }
0x15dc   :  { %v2218_v32 = vpop.xlane.xlu1 %2217 }
0x15dd   :  { %v2220_v17 = vsub.f32 %v6054_v54, %v2218_v32 }
0x15df   :  { %v2223_v14 = vmul.f32 1.442695, %v2220_v17 }
0x15e1   :  { %4916 = vpow2.f32 %v2223_v14 }
0x15e7   :  { %v4917_v31 = vpop.eup %4916 }
0x15e8   :  { %v2228_v30 = vsel %vm94_vm0, %v4917_v31, 0.0 }
0x15e9   :  { %2229 = vadd.xlane.f32.xlu2 %v2228_v30 }
0x1624   :  { %v2227_v37 = vpop.xlane.xlu0 %2226 }
0x1625   :  { %4918 = vrcp.f32 %v2227_v37  ;;  %v2242_v59 = vand.u32 2147483648, %v2227_v37  ;;  %v2240_v43 = vand.u32 2147483647, %v2227_v37  ;;  %vm2236_vm13 = vweird.f32 %v2227_v37 }
0x1627   :  { %v2243_v18 = vor.u32 1.1754944e-38, %v2242_v59  ;;  %vm2241_vm15 = vcmp.eq.f32.partialorder %v2240_v43, 8.507059e+37 }
0x162b   :  { %v4919_v16 = vpop.eup %4918 }
0x162c   :  { %v2232_v38 = vmul.f32 %v4919_v16, %v2227_v37  ;;  %vm2237_vm12 = vweird.f32 %v4919_v16 }
0x162d   :  { %vm2238_vm14 = vmor %vm2236_vm13, %vm2237_vm12 }
0x162e   :  { %v2233_v6 = vsub.f32 1.0, %v2232_v38 }
0x1630   :  { %v2234_v28 = vmul.f32 %v4919_v16, %v2233_v6 }
0x1632   :  { %v2235_v19 = vadd.f32 %v4919_v16, %v2234_v28 }
0x1634   :  { %v2239_v41 = vsel %vm2238_vm14, %v4919_v16, %v2235_v19 }
0x1635   :  { %v2244_v25 = vsel %vm2241_vm15, %v2243_v18, %v2239_v41 }
0x1636   :  { %v6065_v10 = vmul.f32 %v4915_v13, %v2244_v25 }
0x1638   :  { %7185 = vst [vmem:[#allocation31_spill] sm:$0xff] %v6065_v10  ;;  %4659 = vmatmul.msk.f32.vlgmr.msra.gmra.mxu1 %vm94_vm0, %v6065_v10  ;;  %v6072_v32 = vmul.f32 %v4648_v15, %v6065_v10 }
0x1639   :  { %2294 = vst.msk [vmem:[#allocation2 + $0x80] sm:$0xff] %vm94_vm0, %v6065_v10  ;;  %3082 = vmatpush.msra.mxu1 %v5790_v48 }
0x163a   :  { %7186 = vst [vmem:[#allocation32_spill] sm:$0xff] %v6072_v32  ;;  %4651 = vmatmul.msk.f32.vlgmr.msrb.gmra.mxu2 %vm94_vm0, %v6072_v32  ;;  %v2350_v17 = vsel %vm94_vm0, %v6072_v32, 0.0 }
0x163b   :  { %2351 = vadd.xlane.f32.xlu1 %v2350_v17  ;;  %2892 = vmatpush.msrb.mxu2 %v5950_v42 }
0x163c   :  { %3083 = vmatpush.msra.mxu1 %v5801_v12 }
0x163e   :  { %3084 = vmatpush.msra.mxu1 %v5812_v62 }
0x1640   :  { %3085 = vmatpush.msra.mxu1 %v5825_v39 }
0x1642   :  { %3086 = vmatpush.msra.mxu1 %v5835_v21 }
0x1644   :  { %3087 = vmatpush.msra.mxu1 %v5841_v23 }
0x1646   :  { %3088 = vmatpush.msra.mxu1 %v5847_v36  ;;  %v4649_v36 = vld [vmem:[%s7087_s0 + $0x58] sm:$0xff] }
0x1648   :  { %3089 = vmatpush.msra.mxu1 %v5853_v26 }
0x165c   :  { %v2230_v48 = vpop.xlane.xlu2 %2229 }
0x165d   :  { %4920 = vrcp.f32 %v2230_v48  ;;  %v2257_v42 = vand.u32 2147483648, %v2230_v48  ;;  %v2255_v12 = vand.u32 2147483647, %v2230_v48  ;;  %vm2251_vm3 = vweird.f32 %v2230_v48 }
0x165f   :  { %v2258_v39 = vor.u32 1.1754944e-38, %v2257_v42  ;;  %vm2256_vm5 = vcmp.eq.f32.partialorder %v2255_v12, 8.507059e+37 }
0x1663   :  { %v4921_v13 = vpop.eup %4920 }
0x1664   :  { %v2247_v14 = vmul.f32 %v4921_v13, %v2230_v48  ;;  %vm2252_vm2 = vweird.f32 %v4921_v13 }
0x1665   :  { %vm2253_vm4 = vmor %vm2251_vm3, %vm2252_vm2 }
0x1666   :  { %v2248_v30 = vsub.f32 1.0, %v2247_v14 }
0x1668   :  { %v2249_v37 = vmul.f32 %v4921_v13, %v2248_v30 }
0x166a   :  { %v2250_v62 = vadd.f32 %v4921_v13, %v2249_v37 }
0x166c   :  { %v2254_v21 = vsel %vm2253_vm4, %v4921_v13, %v2250_v62 }
0x166d   :  { %v2259_v23 = vsel %vm2256_vm5, %v2258_v39, %v2254_v21 }
0x166e   :  { %v6090_v26 = vmul.f32 %v4917_v31, %v2259_v23 }
0x1670   :  { %7187 = vst [vmem:[#allocation33_spill] sm:$0xff] %v6090_v26  ;;  %4660 = vmatmul.msk.f32.gmra.mxu1 %vm94_vm0, %v6090_v26  ;;  %v6097_v16 = vmul.f32 %v4649_v36, %v6090_v26 }
0x1671   :  { %2295 = vst.msk [vmem:[#allocation2 + $0x90] sm:$0xff] %vm94_vm0, %v6090_v26 }
0x1672   :  { %7188 = vst [vmem:[#allocation34_spill] sm:$0xff] %v6097_v16  ;;  %4652 = vmatmul.msk.f32.gmra.mxu2 %vm94_vm0, %v6097_v16  ;;  %v2353_v38 = vsel %vm94_vm0, %v6097_v16, 0.0 }
0x1673   :  { %2354 = vadd.xlane.f32.xlu2 %v2353_v38 }
0x167a   :  { %4661 = vmatmul.msk.f32.vlgmr.msra.gmra.mxu2 %vm94_vm0, %v6065_v10 }
0x167b   :  { %4692 = vmatpush.msk.msra.mxu2 %vm5282_vm1, %v7177_v0 }
0x1682   :  { %4662 = vmatmul.msk.f32.gmra.mxu2 %vm94_vm0, %v6090_v26 }
0x16ae   :  { %v2352_v31 = vpop.xlane.xlu1 %2351 }
0x16af   :  { %v2356_v6 = vmul.f32 0.77132064, %v2352_v31 }
0x16bd   :  { %v2344_v59 = vpop.f32.mrf.mxu2 }
0x16be   :  { %vm2358_vm8 = vcmp.le.f32.partialorder %v2344_v59, %v2356_v6 }
0x16bf   :  { %v2360_v28 = vsel %vm2358_vm8, 1, %v7178_v20 }
0x16c0   :  { %v2362_v43 = vsel %vm94_vm0, %v2360_v28, 0 }
0x16c1   :  { %v2364_v19 = vshrl.u32 %v2362_v43, 16  ;;  %v2363_v18 = vand.u32 65535, %v2362_v43 }
0x16c3   :  { %v2366_v41 = vcvt.s32.f32 %v2364_v19  ;;  %v2365_v25 = vcvt.s32.f32 %v2363_v18 }
0x16c5   :  { %2369 = vadd.xlane.f32.xlu0 %v2366_v41  ;;  %2367 = vadd.xlane.f32.xlu1 %v2365_v25 }
0x16e6   :  { %v2355_v15 = vpop.xlane.xlu2 %2354 }
0x16e7   :  { %v2357_v17 = vmul.f32 0.77132064, %v2355_v15 }
0x16f5   :  { %v2347_v48 = vpop.f32.mrf.mxu2 }
0x16f6   :  { %vm2359_vm9 = vcmp.le.f32.partialorder %v2347_v48, %v2357_v17 }
0x16f7   :  { %v2361_v13 = vsel %vm2359_vm9, 1, %v7178_v20 }
0x16f8   :  { %v2375_v14 = vsel %vm94_vm0, %v2361_v13, 0 }
0x16f9   :  { %v2377_v30 = vshrl.u32 %v2375_v14, 16  ;;  %v2376_v42 = vand.u32 65535, %v2375_v14 }
0x16fb   :  { %v2379_v37 = vcvt.s32.f32 %v2377_v30  ;;  %v2378_v12 = vcvt.s32.f32 %v2376_v42 }
0x16fd   :  { %2382 = vadd.xlane.f32.xlu2 %v2379_v37  ;;  %2380 = vadd.xlane.f32.xlu0 %v2378_v12 }
0x1738   :  { %v2370_v62 = vpop.xlane.xlu0 %2369  ;;  %v2368_v39 = vpop.xlane.xlu1 %2367 }
0x1739   :  { %v2372_v21 = vcvt.f32.s32 %v2370_v62  ;;  %v2371_v36 = vcvt.f32.s32 %v2368_v39  ;;  %v2481_v62 = vpop.f32.mrf.mxu1 }
0x173b   :  { %v2373_v23 = vshll.u32 %v2372_v21, 16 }
0x173d   :  { %v2374_v38 = vadd.s32 %v2373_v23, %v2371_v36 }
0x173f   :  { %vm2388_vm10 = vcmp.lt.s32.totalorder %v2374_v38, 7 }
0x1740   :  { %v6114_v31 = vsel %vm2388_vm10, %v2374_v38, 7 }
0x1741   :  { %7189 = vst [vmem:[#allocation35_spill] sm:$0xff] %v6114_v31  ;;  %vm2392_vm11 = vcmp.eq.s32.totalorder %v5277_v5, %v6114_v31 }
0x1742   :  { %v6119_v6 = vsel %vm2392_vm11, 1.0, %v5991_v22 }
0x1743   :  { %7190 = vst [vmem:[#allocation36_spill] sm:$0xff] %v6119_v6  ;;  %4655 = vmatmul.msk.f32.vlgmr.msrb.gmra.mxu3 %vm94_vm0, %v6119_v6  ;;  %4657 = vmatmul.msk.f32.vlgmr.msra.gmra.mxu0 %vm94_vm0, %v6119_v6 }
0x1744   :  { %2921 = vmatpush.msrb.mxu3 %v6003_v29  ;;  %2944 = vmatpush.msra.mxu0 %v6009_v60  ;;  %v2504_v29 = vpop.f32.mrf.mxu2 }
0x174c   :  { %v2507_v14 = vpop.f32.mrf.mxu2 }
0x1770   :  { %v2383_v59 = vpop.xlane.xlu2 %2382  ;;  %v2381_v28 = vpop.xlane.xlu0 %2380 }
0x1771   :  { %v2385_v43 = vcvt.f32.s32 %v2383_v59  ;;  %v2384_v18 = vcvt.f32.s32 %v2381_v28 }
0x1773   :  { %v2386_v19 = vshll.u32 %v2385_v43, 16  ;;  %v2484_v43 = vpop.f32.mrf.mxu1 }
0x1775   :  { %v2387_v41 = vadd.s32 %v2386_v19, %v2384_v18 }
0x1777   :  { %vm2390_vm12 = vcmp.lt.s32.totalorder %v2387_v41, 7 }
0x1778   :  { %v6127_v25 = vsel %vm2390_vm12, %v2387_v41, 7 }
0x1779   :  { %7191 = vst [vmem:[#allocation37_spill] sm:$0xff] %v6127_v25  ;;  %vm2393_vm13 = vcmp.eq.s32.totalorder %v5277_v5, %v6127_v25 }
0x177a   :  { %v6132_v15 = vsel %vm2393_vm13, 1.0, %v5991_v22 }
0x177b   :  { %7192 = vst [vmem:[#allocation38_spill] sm:$0xff] %v6132_v15  ;;  %4656 = vmatmul.msk.f32.gmra.mxu3 %vm94_vm0, %v6132_v15  ;;  %4658 = vmatmul.msk.f32.gmra.mxu0 %vm94_vm0, %v6132_v15 }
0x17c0   :  { %v2452_v60 = vpop.f32.mrf.mxu0 }
0x17c1   :  { %v2505_v17 = vadd.f32 %v2504_v29, %v2452_v60 }
0x17c3   :  { %v6139_v48 = vadd.f32 %v2505_v17, %v5413_v56 }
0x17c5   :  { %4922 = vtanh.f32 %v6139_v48 }
0x17c6   :  { %v2429_v12 = vpop.f32.mrf.mxu3 }
0x17c7   :  { %v2482_v39 = vadd.f32 %v2481_v62, %v2429_v12 }
0x17c9   :  { %v2510_v21 = vadd.f32 %v2482_v39, %v5425_v8 }
0x17cb   :  { %v4923_v13 = vpop.eup %4922  ;;  %v4663_v23 = vmul.f32 -1.442695, %v2510_v21 }
0x17cc   :  { %2596 = vrot.lane.b32.xlu1 %v4923_v13, %s5224_s19 }
0x17f8   :  { %v2455_v22 = vpop.f32.mrf.mxu0 }
0x17f9   :  { %v2508_v30 = vadd.f32 %v2507_v14, %v2455_v22 }
0x17fb   :  { %v6144_v42 = vadd.f32 %v2508_v30, %v5413_v56 }
0x17fd   :  { %4924 = vtanh.f32 %v6144_v42 }
0x17fe   :  { %4926 = vpow2.f32 %v4663_v23  ;;  %v2432_v59 = vpop.f32.mrf.mxu3 }
0x17ff   :  { %v2485_v19 = vadd.f32 %v2484_v43, %v2432_v59 }
0x1801   :  { %v2512_v41 = vadd.f32 %v2485_v19, %v5425_v8 }
0x1803   :  { %v4925_v37 = vpop.eup %4924  ;;  %v4665_v60 = vmul.f32 -1.442695, %v2512_v41 }
0x1804   :  { %2598 = vrot.lane.b32.xlu2 %v4925_v37, %s5224_s19  ;;  %v4927_v36 = vpop.eup %4926 }
0x1805   :  { %v2526_v38 = vadd.f32 1.0, %v4927_v36 }
0x1807   :  { %4928 = vrcp.f32 %v2526_v38  ;;  %v2541_v14 = vand.u32 2147483648, %v2526_v38  ;;  %vm2535_vm15 = vweird.f32 %v2526_v38  ;;  %v2539_v22 = vand.u32 2147483647, %v2526_v38 }
0x1808   :  { %4930 = vpow2.f32 %v4665_v60 }
0x1809   :  { %v2542_v12 = vor.u32 1.1754944e-38, %v2541_v14  ;;  %vm2540_vm3 = vcmp.eq.f32.partialorder %v2539_v22, 8.507059e+37 }
0x180d   :  { %v4929_v28 = vpop.eup %4928 }
0x180e   :  { %v2531_v18 = vmul.f32 %v4929_v28, %v2526_v38  ;;  %vm2536_vm14 = vweird.f32 %v4929_v28  ;;  %v4931_v37 = vpop.eup %4930 }
0x180f   :  { %vm2537_vm2 = vmor %vm2535_vm15, %vm2536_vm14  ;;  %v2528_v21 = vadd.f32 1.0, %v4931_v37 }
0x1810   :  { %v2532_v29 = vsub.f32 1.0, %v2531_v18 }
0x1811   :  { %4932 = vrcp.f32 %v2528_v21  ;;  %v2571_v41 = vand.u32 2147483648, %v2528_v21  ;;  %vm2565_vm5 = vweird.f32 %v2528_v21  ;;  %v2569_v38 = vand.u32 2147483647, %v2528_v21 }
0x1812   :  { %v2533_v17 = vmul.f32 %v4929_v28, %v2532_v29 }
0x1813   :  { %v2572_v29 = vor.u32 1.1754944e-38, %v2571_v41  ;;  %vm2570_vm9 = vcmp.eq.f32.partialorder %v2569_v38, 8.507059e+37 }
0x1814   :  { %v2534_v13 = vadd.f32 %v4929_v28, %v2533_v17 }
0x1816   :  { %v2538_v30 = vsel %vm2537_vm2, %v4929_v28, %v2534_v13 }
0x1817   :  { %v2543_v39 = vsel %vm2540_vm3, %v2542_v12, %v2538_v30  ;;  %v4933_v36 = vpop.eup %4932 }
0x1818   :  { %v2561_v59 = vmul.f32 %v4933_v36, %v2528_v21  ;;  %vm2566_vm4 = vweird.f32 %v4933_v36  ;;  %v2592_v14 = vmul.f32 %v2543_v39, %v5431_v57 }
0x1819   :  { %vm2567_vm8 = vmor %vm2565_vm5, %vm2566_vm4 }
0x181a   :  { %v2562_v43 = vsub.f32 1.0, %v2561_v59  ;;  %v4666_v59 = vmul.f32 -1.442695, %v6144_v42 }
0x181c   :  { %v2563_v19 = vmul.f32 %v4933_v36, %v2562_v43 }
0x181e   :  { %v2564_v18 = vadd.f32 %v4933_v36, %v2563_v19 }
0x1820   :  { %v2568_v28 = vsel %vm2567_vm8, %v4933_v36, %v2564_v18  ;;  %v4664_v36 = vmul.f32 -1.442695, %v6139_v48 }
0x1821   :  { %v2573_v17 = vsel %vm2570_vm9, %v2572_v29, %v2568_v28 }
0x1822   :  { %v2593_v12 = vmul.f32 %v2573_v17, %v5431_v57 }
0x183e   :  { %v2597_v62 = vpop.permute.xlu1 %2596 }
0x183f   :  { %v2602_v23 = vmul.f32 %v2597_v62, %v2543_v39 }
0x1841   :  { %2606 = vrot.lane.b32.xlu0 %v2602_v23, %s5224_s19 }
0x185e   :  { %v2599_v60 = vpop.permute.xlu2 %2598 }
0x185f   :  { %v2603_v13 = vmul.f32 %v2599_v60, %v2573_v17 }
0x1861   :  { %2608 = vrot.lane.b32.xlu1 %v2603_v13, %s5224_s19 }
0x18b3   :  { %v2607_v22 = vpop.permute.xlu0 %2606 }
0x18b4   :  { %v2612_v30 = vadd.f32 %v2607_v22, %v2592_v14 }
0x18b6   :  { %4934 = vtanh.f32 %v2612_v30 }
0x18bc   :  { %v4935_v37 = vpop.eup %4934 }
0x18bd   :  { %2618 = vrot.lane.b32.xlu0 %v4935_v37, %s5224_s19 }
0x18d3   :  { %v2609_v62 = vpop.permute.xlu1 %2608 }
0x18d4   :  { %v2613_v21 = vadd.f32 %v2609_v62, %v2593_v12 }
0x18d6   :  { %4936 = vtanh.f32 %v2613_v21 }
0x18d7   :  { %4938 = vpow2.f32 %v4664_v36 }
0x18d8   :  { %4940 = vpow2.f32 %v4666_v59 }
0x18dc   :  { %v4937_v23 = vpop.eup %4936 }
0x18dd   :  { %2620 = vrot.lane.b32.xlu2 %v4937_v23, %s5224_s19  ;;  %v4939_v39 = vpop.eup %4938 }
0x18de   :  { %v2527_v43 = vadd.f32 1.0, %v4939_v39  ;;  %v4941_v19 = vpop.eup %4940 }
0x18df   :  { %v2529_v18 = vadd.f32 1.0, %v4941_v19 }
0x18e0   :  { %4942 = vrcp.f32 %v2527_v43  ;;  %v2556_v14 = vand.u32 2147483648, %v2527_v43  ;;  %vm2550_vm11 = vweird.f32 %v2527_v43  ;;  %v2554_v22 = vand.u32 2147483647, %v2527_v43 }
0x18e1   :  { %4944 = vrcp.f32 %v2529_v18  ;;  %v2586_v39 = vand.u32 2147483648, %v2529_v18  ;;  %vm2580_vm15 = vweird.f32 %v2529_v18  ;;  %v2584_v19 = vand.u32 2147483647, %v2529_v18 }
0x18e2   :  { %v2557_v37 = vor.u32 1.1754944e-38, %v2556_v14  ;;  %vm2555_vm13 = vcmp.eq.f32.partialorder %v2554_v22, 8.507059e+37 }
0x18e3   :  { %vm2585_vm3 = vcmp.eq.f32.partialorder %v2584_v19, 8.507059e+37 }
0x18e6   :  { %v4943_v41 = vpop.eup %4942 }
0x18e7   :  { %v2546_v38 = vmul.f32 %v4943_v41, %v2527_v43  ;;  %v4945_v29 = vpop.eup %4944  ;;  %vm2551_vm10 = vweird.f32 %v4943_v41  ;;  %v6164_v43 = vld [vmem:[%s7090_s3] sm:$0xff] }
0x18e8   :  { %v2576_v17 = vmul.f32 %v4945_v29, %v2529_v18  ;;  %vm2552_vm12 = vmor %vm2550_vm11, %vm2551_vm10  ;;  %vm2581_vm14 = vweird.f32 %v4945_v29 }
0x18e9   :  { %v2547_v28 = vsub.f32 1.0, %v2546_v38  ;;  %vm2582_vm2 = vmor %vm2580_vm15, %vm2581_vm14  ;;  %v2587_v38 = vor.u32 1.1754944e-38, %v2586_v39 }
0x18ea   :  { %v2577_v48 = vsub.f32 1.0, %v2576_v17 }
0x18eb   :  { %v2548_v60 = vmul.f32 %v4943_v41, %v2547_v28 }
0x18ec   :  { %v2578_v12 = vmul.f32 %v4945_v29, %v2577_v48 }
0x18ed   :  { %v2549_v13 = vadd.f32 %v4943_v41, %v2548_v60 }
0x18ee   :  { %v2579_v59 = vadd.f32 %v4945_v29, %v2578_v12 }
0x18ef   :  { %v2553_v42 = vsel %vm2552_vm12, %v4943_v41, %v2549_v13 }
0x18f0   :  { %v2558_v62 = vsel %vm2555_vm13, %v2557_v37, %v2553_v42  ;;  %v2583_v41 = vsel %vm2582_vm2, %v4945_v29, %v2579_v59 }
0x18f1   :  { %v2588_v28 = vsel %vm2585_vm3, %v2587_v38, %v2583_v41 }
0x192f   :  { %v2619_v23 = vpop.permute.xlu0 %2618 }
0x1930   :  { %v2624_v36 = vmul.f32 %v2619_v23, %v2558_v62 }
0x1932   :  { %2754 = vst.msk [vmem:[#allocation2 + $0xa8] sm:$0xff] %vm410_vm6, %v2624_v36  ;;  %4667 = vmatmul.msk.f32.vlgmr.msra.gmra.mxu3 %vm410_vm6, %v2624_v36 }
0x1933   :  { %2756 = vst.msk [vmem:[#allocation2 + $0xa8] sm:$0xff] %vm545_vm7, %v2612_v30  ;;  %3311 = vmatpush.msra.mxu3 %v6164_v43 }
0x1937   :  { %v2621_v60 = vpop.permute.xlu2 %2620 }
0x1938   :  { %v2625_v17 = vmul.f32 %v2621_v60, %v2588_v28 }
0x193a   :  { %2755 = vst.msk [vmem:[#allocation2 + $0xb8] sm:$0xff] %vm410_vm6, %v2625_v17  ;;  %4668 = vmatmul.msk.f32.gmra.mxu3 %vm410_vm6, %v2625_v17 }
0x193b   :  { %2757 = vst.msk [vmem:[#allocation2 + $0xb8] sm:$0xff] %vm545_vm7, %v2613_v21 }
0x19b5   :  { %v6170_v30 = vpop.f32.mrf.mxu3 }
0x19b6   :  { %7193 = vst [vmem:[#allocation39_spill] sm:$0xff] %v6170_v30  ;;  %v2655_v18 = vsel %vm94_vm0, %v6170_v30, -inf }
0x19b7   :  { %2656 = vmax.xlane.f32.xlu1 %v2655_v18 }
0x19bd   :  { %v6174_v13 = vpop.f32.mrf.mxu3 }
0x19be   :  { %7194 = vst [vmem:[#allocation40_spill] sm:$0xff] %v6174_v13  ;;  %v2658_v29 = vsel %vm94_vm0, %v6174_v13, -inf }
0x19bf   :  { %2659 = vmax.xlane.f32.xlu0 %v2658_v29 }
0x1a2a   :  { %v2657_v14 = vpop.xlane.xlu1 %2656 }
0x1a2b   :  { %v2661_v48 = vsub.f32 %v6170_v30, %v2657_v14 }
0x1a2d   :  { %v2663_v22 = vmul.f32 1.442695, %v2661_v48 }
0x1a2f   :  { %4946 = vpow2.f32 %v2663_v22 }
0x1a32   :  { %v2660_v42 = vpop.xlane.xlu0 %2659 }
0x1a33   :  { %v2662_v21 = vsub.f32 %v6174_v13, %v2660_v42 }
0x1a35   :  { %v4947_v37 = vpop.eup %4946  ;;  %v2665_v12 = vmul.f32 1.442695, %v2662_v21  ;;  %v4669_v21 = vld [vmem:[%s7087_s0 + $0x60] sm:$0xff] }
0x1a36   :  { %v2667_v62 = vsel %vm94_vm0, %v4947_v37, 0.0 }
0x1a37   :  { %2668 = vadd.xlane.f32.xlu2 %v2667_v62  ;;  %4948 = vpow2.f32 %v2665_v12 }
0x1a3d   :  { %v4949_v23 = vpop.eup %4948 }
0x1a3e   :  { %v2670_v36 = vsel %vm94_vm0, %v4949_v23, 0.0 }
0x1a3f   :  { %2671 = vadd.xlane.f32.xlu1 %v2670_v36 }
0x1aaa   :  { %v2669_v59 = vpop.xlane.xlu2 %2668 }
0x1aab   :  { %4950 = vrcp.f32 %v2669_v59  ;;  %v2684_v28 = vand.u32 2147483648, %v2669_v59  ;;  %v2682_v17 = vand.u32 2147483647, %v2669_v59  ;;  %vm2678_vm5 = vweird.f32 %v2669_v59 }
0x1aad   :  { %v2685_v29 = vor.u32 1.1754944e-38, %v2684_v28  ;;  %vm2683_vm9 = vcmp.eq.f32.partialorder %v2682_v17, 8.507059e+37 }
0x1ab1   :  { %v4951_v39 = vpop.eup %4950 }
0x1ab2   :  { %v2674_v19 = vmul.f32 %v4951_v39, %v2669_v59  ;;  %v2672_v41 = vpop.xlane.xlu1 %2671  ;;  %vm2679_vm4 = vweird.f32 %v4951_v39 }
0x1ab3   :  { %4952 = vrcp.f32 %v2672_v41  ;;  %vm2680_vm8 = vmor %vm2678_vm5, %vm2679_vm4  ;;  %v2699_v36 = vand.u32 2147483648, %v2672_v41  ;;  %vm2693_vm11 = vweird.f32 %v2672_v41 }
0x1ab4   :  { %v2675_v38 = vsub.f32 1.0, %v2674_v19  ;;  %v2697_v19 = vand.u32 2147483647, %v2672_v41 }
0x1ab5   :  { %v2700_v17 = vor.u32 1.1754944e-38, %v2699_v36  ;;  %v6253_v36 = vld [vmem:[%s7093_s6 + $0x10] sm:$0xff] }
0x1ab6   :  { %v2676_v60 = vmul.f32 %v4951_v39, %v2675_v38  ;;  %v6197_v38 = vld [vmem:[%s7093_s6 + $0x38] sm:$0xff]  ;;  %vm2698_vm13 = vcmp.eq.f32.partialorder %v2697_v19, 8.507059e+37  ;;  %v6265_v19 = vld [vmem:[%s7093_s6] sm:$0xff] }
0x1ab8   :  { %v2677_v18 = vadd.f32 %v4951_v39, %v2676_v60  ;;  %v6207_v60 = vld [vmem:[%s7090_s3 + $0x8] sm:$0xff] }
0x1ab9   :  { %v4953_v14 = vpop.eup %4952 }
0x1aba   :  { %v2681_v48 = vsel %vm2680_vm8, %v4951_v39, %v2677_v18  ;;  %v2689_v22 = vmul.f32 %v4953_v14, %v2672_v41  ;;  %vm2694_vm10 = vweird.f32 %v4953_v14  ;;  %v6213_v18 = vld [vmem:[%s7093_s6 + $0x30] sm:$0xff] }
0x1abb   :  { %v2686_v42 = vsel %vm2683_vm9, %v2685_v29, %v2681_v48  ;;  %vm2695_vm12 = vmor %vm2693_vm11, %vm2694_vm10  ;;  %v4670_v48 = vld [vmem:[%s7087_s0 + $0x68] sm:$0xff] }
0x1abc   :  { %v6185_v12 = vmul.f32 %v4947_v37, %v2686_v42  ;;  %v2690_v62 = vsub.f32 1.0, %v2689_v22  ;;  %v6222_v22 = vld [vmem:[%s7093_s6 + $0x28] sm:$0xff] }
0x1abe   :  { %7195 = vst [vmem:[#allocation41_spill] sm:$0xff] %v6185_v12  ;;  %4680 = vmatmul.msk.f32.vlgmr.msrb.gmra.mxu3 %vm94_vm0, %v6185_v12  ;;  %v6192_v59 = vmul.f32 %v4669_v21, %v6185_v12  ;;  %v2691_v39 = vmul.f32 %v4953_v14, %v2690_v62  ;;  %v6230_v21 = vld [vmem:[%s7093_s6 + $0x20] sm:$0xff] }
0x1abf   :  { %2736 = vst.msk [vmem:[#allocation2 + $0xa0] sm:$0xff] %vm94_vm0, %v6185_v12  ;;  %3524 = vmatpush.msrb.mxu3 %v6197_v38 }
0x1ac0   :  { %7196 = vst [vmem:[#allocation42_spill] sm:$0xff] %v6192_v59  ;;  %4672 = vmatmul.msk.f32.vlgmr.msrb.gmra.mxu0 %vm94_vm0, %v6192_v59  ;;  %v2792_v37 = vsel %vm94_vm0, %v6192_v59, 0.0  ;;  %v2692_v28 = vadd.f32 %v4953_v14, %v2691_v39  ;;  %v6259_v39 = vld [vmem:[%s7093_s6 + $0x8] sm:$0xff] }
0x1ac1   :  { %2793 = vadd.xlane.f32.xlu0 %v2792_v37  ;;  %3334 = vmatpush.msrb.mxu0 %v6207_v60 }
0x1ac2   :  { %3525 = vmatpush.msrb.mxu3 %v6213_v18  ;;  %v2696_v29 = vsel %vm2695_vm12, %v4953_v14, %v2692_v28 }
0x1ac3   :  { %v2701_v41 = vsel %vm2698_vm13, %v2700_v17, %v2696_v29 }
0x1ac4   :  { %3526 = vmatpush.msrb.mxu3 %v6222_v22  ;;  %v6225_v42 = vmul.f32 %v4949_v23, %v2701_v41  ;;  %v6243_v23 = vld [vmem:[%s7093_s6 + $0x18] sm:$0xff] }
0x1ac6   :  { %7197 = vst [vmem:[#allocation43_spill] sm:$0xff] %v6225_v42  ;;  %3527 = vmatpush.msrb.mxu3 %v6230_v21  ;;  %v6238_v14 = vmul.f32 %v4670_v48, %v6225_v42 }
0x1ac7   :  { %4681 = vmatmul.msk.f32.gmra.mxu3 %vm94_vm0, %v6225_v42  ;;  %2737 = vst.msk [vmem:[#allocation2 + $0xb0] sm:$0xff] %vm94_vm0, %v6225_v42 }
0x1ac8   :  { %7198 = vst [vmem:[#allocation44_spill] sm:$0xff] %v6238_v14  ;;  %3528 = vmatpush.msrb.mxu3 %v6243_v23  ;;  %4673 = vmatmul.msk.f32.gmra.mxu0 %vm94_vm0, %v6238_v14  ;;  %v2795_v62 = vsel %vm94_vm0, %v6238_v14, 0.0 }
0x1ac9   :  { %2796 = vadd.xlane.f32.xlu2 %v2795_v62 }
0x1aca   :  { %3529 = vmatpush.msrb.mxu3 %v6253_v36 }
0x1acc   :  { %3530 = vmatpush.msrb.mxu3 %v6259_v39 }
0x1ace   :  { %3531 = vmatpush.msrb.mxu3 %v6265_v19 }
0x1ad0   :  { %4682 = vmatmul.msk.f32.vlgmr.msra.gmra.mxu0 %vm94_vm0, %v6185_v12 }
0x1ad1   :  { %4713 = vmatpush.msk.msra.mxu0 %vm5282_vm1, %v7177_v0 }
0x1ad8   :  { %4683 = vmatmul.msk.f32.gmra.mxu0 %vm94_vm0, %v6225_v42 }
0x1b34   :  { %v2794_v37 = vpop.xlane.xlu0 %2793 }
0x1b35   :  { %v2798_v28 = vmul.f32 0.77132064, %v2794_v37 }
0x1b3c   :  { %v2797_v59 = vpop.xlane.xlu2 %2796 }
0x1b3d   :  { %v2786_v17 = vpop.f32.mrf.mxu0  ;;  %v2799_v31 = vmul.f32 0.77132064, %v2797_v59 }
0x1b3e   :  { %vm2800_vm14 = vcmp.le.f32.partialorder %v2786_v17, %v2798_v28 }
0x1b3f   :  { %v2802_v29 = vsel %vm2800_vm14, 1, %v7178_v20 }
0x1b40   :  { %v2804_v41 = vsel %vm94_vm0, %v2802_v29, 0 }
0x1b41   :  { %v2806_v48 = vshrl.u32 %v2804_v41, 16  ;;  %v2805_v62 = vand.u32 65535, %v2804_v41 }
0x1b43   :  { %v2808_v25 = vcvt.s32.f32 %v2806_v48  ;;  %v2807_v14 = vcvt.s32.f32 %v2805_v62 }
0x1b45   :  { %2811 = vadd.xlane.f32.xlu1 %v2808_v25  ;;  %2809 = vadd.xlane.f32.xlu0 %v2807_v14  ;;  %v2789_v32 = vpop.f32.mrf.mxu0  ;;  %v6283_v14 = vld [vmem:[#allocation2 + $0xc0] sm:$0xff] }
0x1b46   :  { %vm2801_vm15 = vcmp.le.f32.partialorder %v2789_v32, %v2799_v31 }
0x1b47   :  { %v2803_v42 = vsel %vm2801_vm15, 1, %v7178_v20 }
0x1b48   :  { %v2817_v37 = vsel %vm94_vm0, %v2803_v42, 0 }
0x1b49   :  { %v2819_v12 = vshrl.u32 %v2817_v37, 16  ;;  %v2818_v28 = vand.u32 65535, %v2817_v37  ;;  %v6295_v37 = vld [vmem:[%s7089_s2] sm:$0xff] }
0x1b4b   :  { %v2821_v17 = vcvt.s32.f32 %v2819_v12  ;;  %v2820_v16 = vcvt.s32.f32 %v2818_v28  ;;  %v6301_v28 = vld [vmem:[%s7089_s2 + $0x8] sm:$0xff] }
0x1b4d   :  { %2824 = vadd.xlane.f32.xlu2 %v2821_v17  ;;  %2822 = vadd.xlane.f32.xlu1 %v2820_v16 }
0x1bb8   :  { %v2812_v29 = vpop.xlane.xlu1 %2811  ;;  %v2810_v41 = vpop.xlane.xlu0 %2809 }
0x1bb9   :  { %v2814_v15 = vcvt.f32.s32 %v2812_v29  ;;  %v2813_v62 = vcvt.f32.s32 %v2810_v41 }
0x1bbb   :  { %v2815_v48 = vshll.u32 %v2814_v15, 16 }
0x1bbd   :  { %v2816_v59 = vadd.s32 %v2815_v48, %v2813_v62  ;;  %v2946_v48 = vpop.f32.mrf.mxu0 }
0x1bbf   :  { %vm2830_vm2 = vcmp.lt.s32.totalorder %v2816_v59, 7 }
0x1bc0   :  { %v6279_v25 = vsel %vm2830_vm2, %v2816_v59, 7  ;;  %v2825_v32 = vpop.xlane.xlu2 %2824  ;;  %v2823_v31 = vpop.xlane.xlu1 %2822 }
0x1bc1   :  { %7199 = vst [vmem:[#allocation45_spill] sm:$0xff] %v6279_v25  ;;  %vm2834_vm3 = vcmp.eq.s32.totalorder %v5277_v5, %v6279_v25  ;;  %v2827_v42 = vcvt.f32.s32 %v2825_v32  ;;  %v2826_v15 = vcvt.f32.s32 %v2823_v31 }
0x1bc2   :  { %v6286_v12 = vsel %vm2834_vm3, 1.0, %v6283_v14 }
0x1bc3   :  { %7200 = vst [vmem:[#allocation46_spill] sm:$0xff] %v6286_v12  ;;  %4676 = vmatmul.msk.f32.vlgmr.msrb.gmra.mxu1 %vm94_vm0, %v6286_v12  ;;  %4678 = vmatmul.msk.f32.vlgmr.msrb.gmra.mxu2 %vm94_vm0, %v6286_v12  ;;  %v2828_v16 = vshll.u32 %v2827_v42, 16 }
0x1bc4   :  { %3363 = vmatpush.msrb.mxu1 %v6295_v37  ;;  %3386 = vmatpush.msrb.mxu2 %v6301_v28 }
0x1bc5   :  { %v2829_v17 = vadd.s32 %v2828_v16, %v2826_v15  ;;  %v2949_v31 = vpop.f32.mrf.mxu0 }
0x1bc7   :  { %vm2832_vm4 = vcmp.lt.s32.totalorder %v2829_v17, 7 }
0x1bc8   :  { %v6304_v29 = vsel %vm2832_vm4, %v2829_v17, 7 }
0x1bc9   :  { %7201 = vst [vmem:[#allocation47_spill] sm:$0xff] %v6304_v29  ;;  %vm2835_vm5 = vcmp.eq.s32.totalorder %v5277_v5, %v6304_v29 }
0x1bca   :  { %v6309_v41 = vsel %vm2835_vm5, 1.0, %v6283_v14 }
0x1bcb   :  { %7202 = vst [vmem:[#allocation48_spill] sm:$0xff] %v6309_v41  ;;  %4677 = vmatmul.msk.f32.gmra.mxu1 %vm94_vm0, %v6309_v41  ;;  %4679 = vmatmul.msk.f32.gmra.mxu2 %vm94_vm0, %v6309_v41 }
0x1c46   :  { %v2894_v62 = vpop.f32.mrf.mxu2 }
0x1c47   :  { %v2947_v59 = vadd.f32 %v2946_v48, %v2894_v62  ;;  %v2871_v48 = vpop.f32.mrf.mxu1  ;;  %v2923_v62 = vpop.f32.mrf.mxu3 }
0x1c49   :  { %v6316_v32 = vadd.f32 %v2947_v59, %v5413_v56 }
0x1c4b   :  { %4954 = vtanh.f32 %v6316_v32 }
0x1c4e   :  { %v2897_v42 = vpop.f32.mrf.mxu2 }
0x1c4f   :  { %v2950_v16 = vadd.f32 %v2949_v31, %v2897_v42  ;;  %v2874_v59 = vpop.f32.mrf.mxu1  ;;  %v2926_v29 = vpop.f32.mrf.mxu3  ;;  %v2924_v31 = vadd.f32 %v2923_v62, %v2871_v48 }
0x1c50   :  { %v2927_v41 = vadd.f32 %v2926_v29, %v2874_v59 }
0x1c51   :  { %v4955_v15 = vpop.eup %4954  ;;  %v6320_v17 = vadd.f32 %v2950_v16, %v5413_v56  ;;  %v2952_v16 = vadd.f32 %v2924_v31, %v5425_v8 }
0x1c52   :  { %3038 = vrot.lane.b32.xlu0 %v4955_v15, %s5224_s19  ;;  %v2954_v12 = vadd.f32 %v2927_v41, %v5425_v8 }
0x1c53   :  { %4956 = vtanh.f32 %v6320_v17  ;;  %v4684_v15 = vmul.f32 -1.442695, %v2952_v16 }
0x1c54   :  { %v4686_v26 = vmul.f32 -1.442695, %v2954_v12 }
0x1c56   :  { %4958 = vpow2.f32 %v4686_v26 }
0x1c59   :  { %v4957_v25 = vpop.eup %4956 }
0x1c5a   :  { %3040 = vrot.lane.b32.xlu2 %v4957_v25, %s5224_s19 }
0x1c5c   :  { %v4959_v42 = vpop.eup %4958 }
0x1c5d   :  { %v2970_v6 = vadd.f32 1.0, %v4959_v42 }
0x1c5f   :  { %4960 = vrcp.f32 %v2970_v6  ;;  %v3013_v12 = vand.u32 2147483648, %v2970_v6  ;;  %vm3007_vm9 = vweird.f32 %v2970_v6  ;;  %v3011_v26 = vand.u32 2147483647, %v2970_v6 }
0x1c60   :  { %4962 = vpow2.f32 %v4684_v15 }
0x1c61   :  { %v3014_v62 = vor.u32 1.1754944e-38, %v3013_v12  ;;  %vm3012_vm11 = vcmp.eq.f32.partialorder %v3011_v26, 8.507059e+37 }
0x1c65   :  { %v4961_v10 = vpop.eup %4960 }
0x1c66   :  { %v4963_v13 = vpop.eup %4962  ;;  %v3003_v25 = vmul.f32 %v4961_v10, %v2970_v6  ;;  %vm3008_vm8 = vweird.f32 %v4961_v10 }
0x1c67   :  { %v2968_v30 = vadd.f32 1.0, %v4963_v13  ;;  %vm3009_vm10 = vmor %vm3007_vm9, %vm3008_vm8 }
0x1c68   :  { %v3004_v54 = vsub.f32 1.0, %v3003_v25 }
0x1c69   :  { %4964 = vrcp.f32 %v2968_v30  ;;  %vm2977_vm13 = vweird.f32 %v2968_v30 }
0x1c6a   :  { %v3005_v45 = vmul.f32 %v4961_v10, %v3004_v54  ;;  %v2983_v54 = vand.u32 2147483648, %v2968_v30 }
0x1c6c   :  { %v3006_v59 = vadd.f32 %v4961_v10, %v3005_v45  ;;  %v2981_v45 = vand.u32 2147483647, %v2968_v30  ;;  %v2984_v6 = vor.u32 1.1754944e-38, %v2983_v54 }
0x1c6e   :  { %v3010_v48 = vsel %vm3009_vm10, %v4961_v10, %v3006_v59  ;;  %vm2982_vm15 = vcmp.eq.f32.partialorder %v2981_v45, 8.507059e+37 }
0x1c6f   :  { %v4965_v29 = vpop.eup %4964  ;;  %v3015_v42 = vsel %vm3012_vm11, %v3014_v62, %v3010_v48 }
0x1c70   :  { %v2973_v41 = vmul.f32 %v4965_v29, %v2968_v30  ;;  %vm2978_vm12 = vweird.f32 %v4965_v29  ;;  %v3035_v12 = vmul.f32 %v3015_v42, %v5431_v57 }
0x1c71   :  { %vm2979_vm14 = vmor %vm2977_vm13, %vm2978_vm12 }
0x1c72   :  { %v2974_v16 = vsub.f32 1.0, %v2973_v41 }
0x1c74   :  { %v2975_v13 = vmul.f32 %v4965_v29, %v2974_v16  ;;  %v4687_v16 = vmul.f32 -1.442695, %v6320_v17 }
0x1c76   :  { %v2976_v25 = vadd.f32 %v4965_v29, %v2975_v13 }
0x1c78   :  { %v2980_v9 = vsel %vm2979_vm14, %v4965_v29, %v2976_v25 }
0x1c79   :  { %v2985_v33 = vsel %vm2982_vm15, %v2984_v6, %v2980_v9  ;;  %v4685_v9 = vmul.f32 -1.442695, %v6316_v32 }
0x1c7a   :  { %v3034_v62 = vmul.f32 %v2985_v33, %v5431_v57 }
0x1cb4   :  { %v3041_v31 = vpop.permute.xlu2 %3040 }
0x1cb5   :  { %v3045_v15 = vmul.f32 %v3041_v31, %v3015_v42 }
0x1cb7   :  { %3050 = vrot.lane.b32.xlu0 %v3045_v15, %s5224_s19 }
0x1cc4   :  { %v3039_v10 = vpop.permute.xlu0 %3038 }
0x1cc5   :  { %v3044_v59 = vmul.f32 %v3039_v10, %v2985_v33 }
0x1cc7   :  { %3048 = vrot.lane.b32.xlu1 %v3044_v59, %s5224_s19 }
0x1d29   :  { %v3051_v26 = vpop.permute.xlu0 %3050 }
0x1d2a   :  { %v3055_v41 = vadd.f32 %v3051_v26, %v3035_v12 }
0x1d2c   :  { %4966 = vtanh.f32 %v3055_v41 }
0x1d32   :  { %v4967_v48 = vpop.eup %4966 }
0x1d33   :  { %3062 = vrot.lane.b32.xlu0 %v4967_v48, %s5224_s19 }
0x1d39   :  { %v3049_v30 = vpop.permute.xlu1 %3048 }
0x1d3a   :  { %v3054_v31 = vadd.f32 %v3049_v30, %v3034_v62 }
0x1d3c   :  { %4968 = vtanh.f32 %v3054_v31 }
0x1d3d   :  { %4970 = vpow2.f32 %v4685_v9 }
0x1d3e   :  { %4972 = vpow2.f32 %v4687_v16 }
0x1d42   :  { %v4969_v29 = vpop.eup %4968 }
0x1d43   :  { %3060 = vrot.lane.b32.xlu2 %v4969_v29, %s5224_s19  ;;  %v4971_v42 = vpop.eup %4970 }
0x1d44   :  { %v2969_v15 = vadd.f32 1.0, %v4971_v42  ;;  %v4973_v13 = vpop.eup %4972 }
0x1d45   :  { %v2971_v25 = vadd.f32 1.0, %v4973_v13 }
0x1d46   :  { %4974 = vrcp.f32 %v2969_v15  ;;  %v2998_v26 = vand.u32 2147483648, %v2969_v15  ;;  %vm2992_vm3 = vweird.f32 %v2969_v15  ;;  %v2996_v48 = vand.u32 2147483647, %v2969_v15 }
0x1d47   :  { %4976 = vrcp.f32 %v2971_v25  ;;  %v3028_v13 = vand.u32 2147483648, %v2971_v25  ;;  %vm3022_vm9 = vweird.f32 %v2971_v25 }
0x1d48   :  { %v2999_v62 = vor.u32 1.1754944e-38, %v2998_v26  ;;  %vm2997_vm5 = vcmp.eq.f32.partialorder %v2996_v48, 8.507059e+37 }
0x1d4c   :  { %v4975_v54 = vpop.eup %4974 }
0x1d4d   :  { %v2988_v33 = vmul.f32 %v4975_v54, %v2969_v15  ;;  %v4977_v6 = vpop.eup %4976  ;;  %vm2993_vm2 = vweird.f32 %v4975_v54 }
0x1d4e   :  { %v3018_v59 = vmul.f32 %v4977_v6, %v2971_v25  ;;  %vm2994_vm4 = vmor %vm2992_vm3, %vm2993_vm2  ;;  %vm3023_vm8 = vweird.f32 %v4977_v6 }
0x1d4f   :  { %v2989_v45 = vsub.f32 1.0, %v2988_v33  ;;  %v3026_v33 = vand.u32 2147483647, %v2971_v25  ;;  %vm3024_vm10 = vmor %vm3022_vm9, %vm3023_vm8 }
0x1d50   :  { %v3019_v32 = vsub.f32 1.0, %v3018_v59 }
0x1d51   :  { %v2990_v10 = vmul.f32 %v4975_v54, %v2989_v45  ;;  %vm3027_vm11 = vcmp.eq.f32.partialorder %v3026_v33, 8.507059e+37 }
0x1d52   :  { %v3020_v30 = vmul.f32 %v4977_v6, %v3019_v32 }
0x1d53   :  { %v2991_v12 = vadd.f32 %v4975_v54, %v2990_v10 }
0x1d54   :  { %v3021_v42 = vadd.f32 %v4977_v6, %v3020_v30 }
0x1d55   :  { %v2995_v17 = vsel %vm2994_vm4, %v4975_v54, %v2991_v12  ;;  %v3029_v54 = vor.u32 1.1754944e-38, %v3028_v13 }
0x1d56   :  { %v3000_v29 = vsel %vm2997_vm5, %v2999_v62, %v2995_v17  ;;  %v3025_v15 = vsel %vm3024_vm10, %v4977_v6, %v3021_v42 }
0x1d57   :  { %v3030_v45 = vsel %vm3027_vm11, %v3029_v54, %v3025_v15 }
0x1d9d   :  { %v3061_v9 = vpop.permute.xlu2 %3060 }
0x1d9e   :  { %v3066_v16 = vmul.f32 %v3061_v9, %v3000_v29 }
0x1da0   :  { %3196 = vst.msk [vmem:[#allocation2 + $0xc8] sm:$0xff] %vm410_vm6, %v3066_v16  ;;  %4688 = vmatmul.msk.f32.vlgmr.msra.gmra.mxu1 %vm410_vm6, %v3066_v16 }
0x1da1   :  { %3198 = vst.msk [vmem:[#allocation2 + $0xc8] sm:$0xff] %vm545_vm7, %v3054_v31  ;;  %3753 = vmatpush.msra.mxu1 %v6164_v43 }
0x1da5   :  { %v3063_v10 = vpop.permute.xlu0 %3062 }
0x1da6   :  { %v3067_v59 = vmul.f32 %v3063_v10, %v3030_v45 }
0x1da8   :  { %3197 = vst.msk [vmem:[#allocation2 + $0xd8] sm:$0xff] %vm410_vm6, %v3067_v59  ;;  %4689 = vmatmul.msk.f32.gmra.mxu1 %vm410_vm6, %v3067_v59 }
0x1da9   :  { %3199 = vst.msk [vmem:[#allocation2 + $0xd8] sm:$0xff] %vm545_vm7, %v3055_v41 }
0x1e1d   :  { %v6342_v12 = vpop.f32.mrf.mxu1 }
0x1e1e   :  { %v3097_v31 = vsel %vm94_vm0, %v6342_v12, -inf }
0x1e1f   :  { %3098 = vmax.xlane.f32.xlu1 %v3097_v31 }
0x1e25   :  { %v6346_v25 = vpop.f32.mrf.mxu1 }
0x1e26   :  { %v3100_v6 = vsel %vm94_vm0, %v6346_v25, -inf }
0x1e27   :  { %3101 = vmax.xlane.f32.xlu2 %v3100_v6 }
0x1e92   :  { %v3099_v26 = vpop.xlane.xlu1 %3098 }
0x1e93   :  { %v3103_v32 = vsub.f32 %v6342_v12, %v3099_v26 }
0x1e95   :  { %v3105_v48 = vmul.f32 1.442695, %v3103_v32 }
0x1e97   :  { %4978 = vpow2.f32 %v3105_v48 }
0x1e9a   :  { %v3102_v17 = vpop.xlane.xlu2 %3101 }
0x1e9b   :  { %v3104_v41 = vsub.f32 %v6346_v25, %v3102_v17 }
0x1e9d   :  { %v4979_v62 = vpop.eup %4978  ;;  %v3107_v30 = vmul.f32 1.442695, %v3104_v41  ;;  %v4690_v41 = vld [vmem:[%s7087_s0 + $0x70] sm:$0xff] }
0x1e9e   :  { %v3109_v29 = vsel %vm94_vm0, %v4979_v62, 0.0 }
0x1e9f   :  { %3110 = vadd.xlane.f32.xlu0 %v3109_v29  ;;  %4980 = vpow2.f32 %v3107_v30 }
0x1ea5   :  { %v4981_v9 = vpop.eup %4980 }
0x1ea6   :  { %v3112_v16 = vsel %vm94_vm0, %v4981_v9, 0.0 }
0x1ea7   :  { %3113 = vadd.xlane.f32.xlu1 %v3112_v16 }
0x1f12   :  { %v3111_v42 = vpop.xlane.xlu0 %3110 }
0x1f13   :  { %4982 = vrcp.f32 %v3111_v42  ;;  %v3126_v45 = vand.u32 2147483648, %v3111_v42  ;;  %v3124_v59 = vand.u32 2147483647, %v3111_v42  ;;  %vm3120_vm13 = vweird.f32 %v3111_v42 }
0x1f15   :  { %v3127_v6 = vor.u32 1.1754944e-38, %v3126_v45  ;;  %vm3125_vm15 = vcmp.eq.f32.partialorder %v3124_v59, 8.507059e+37 }
0x1f19   :  { %v4983_v13 = vpop.eup %4982 }
0x1f1a   :  { %v3116_v33 = vmul.f32 %v4983_v13, %v3111_v42  ;;  %v3114_v15 = vpop.xlane.xlu1 %3113  ;;  %vm3121_vm12 = vweird.f32 %v4983_v13 }
0x1f1b   :  { %4984 = vrcp.f32 %v3114_v15  ;;  %vm3122_vm14 = vmor %vm3120_vm13, %vm3121_vm12  ;;  %v3141_v16 = vand.u32 2147483648, %v3114_v15  ;;  %vm3135_vm3 = vweird.f32 %v3114_v15 }
0x1f1c   :  { %v3117_v54 = vsub.f32 1.0, %v3116_v33  ;;  %v3139_v33 = vand.u32 2147483647, %v3114_v15 }
0x1f1d   :  { %v3142_v45 = vor.u32 1.1754944e-38, %v3141_v16 }
0x1f1e   :  { %v3118_v10 = vmul.f32 %v4983_v13, %v3117_v54  ;;  %vm3140_vm5 = vcmp.eq.f32.partialorder %v3139_v33, 8.507059e+37 }
0x1f20   :  { %v3119_v31 = vadd.f32 %v4983_v13, %v3118_v10 }
0x1f21   :  { %v4985_v26 = vpop.eup %4984 }
0x1f22   :  { %v3123_v32 = vsel %vm3122_vm14, %v4983_v13, %v3119_v31  ;;  %v3131_v48 = vmul.f32 %v4985_v26, %v3114_v15  ;;  %vm3136_vm2 = vweird.f32 %v4985_v26  ;;  %v4691_v31 = vld [vmem:[%s7087_s0 + $0x78] sm:$0xff] }
0x1f23   :  { %v3128_v17 = vsel %vm3125_vm15, %v3127_v6, %v3123_v32  ;;  %vm3137_vm4 = vmor %vm3135_vm3, %vm3136_vm2 }
0x1f24   :  { %v6357_v30 = vmul.f32 %v4979_v62, %v3128_v17  ;;  %v3132_v29 = vsub.f32 1.0, %v3131_v48 }
0x1f26   :  { %4701 = vmatmul.msk.f32.vlgmr.msrb.gmra.mxu1 %vm94_vm0, %v6357_v30  ;;  %3178 = vst.msk [vmem:[#allocation2 + $0xc0] sm:$0xff] %vm94_vm0, %v6357_v30  ;;  %v6364_v42 = vmul.f32 %v4690_v41, %v6357_v30  ;;  %v3133_v13 = vmul.f32 %v4985_v26, %v3132_v29 }
0x1f27   :  { %3966 = vmatpush.msrb.mxu1 %v6197_v38 }
0x1f28   :  { %7203 = vst [vmem:[#allocation49_spill] sm:$0xff] %v6364_v42  ;;  %4693 = vmatmul.msk.f32.vlgmr.msra.gmra.mxu2 %vm94_vm0, %v6364_v42  ;;  %v3234_v62 = vsel %vm94_vm0, %v6364_v42, 0.0  ;;  %v3134_v54 = vadd.f32 %v4985_v26, %v3133_v13 }
0x1f29   :  { %3235 = vadd.xlane.f32.xlu2 %v3234_v62  ;;  %3776 = vmatpush.msra.mxu2 %v6207_v60 }
0x1f2a   :  { %3967 = vmatpush.msrb.mxu1 %v6213_v18  ;;  %v3138_v10 = vsel %vm3137_vm4, %v4985_v26, %v3134_v54 }
0x1f2b   :  { %v3143_v59 = vsel %vm3140_vm5, %v3142_v45, %v3138_v10 }
0x1f2c   :  { %3968 = vmatpush.msrb.mxu1 %v6222_v22  ;;  %v6377_v6 = vmul.f32 %v4981_v9, %v3143_v59 }
0x1f2e   :  { %7204 = vst [vmem:[#allocation50_spill] sm:$0xff] %v6377_v6  ;;  %3969 = vmatpush.msrb.mxu1 %v6230_v21  ;;  %v6385_v15 = vmul.f32 %v4691_v31, %v6377_v6 }
0x1f2f   :  { %4702 = vmatmul.msk.f32.gmra.mxu1 %vm94_vm0, %v6377_v6  ;;  %3179 = vst.msk [vmem:[#allocation2 + $0xd0] sm:$0xff] %vm94_vm0, %v6377_v6 }
0x1f30   :  { %7205 = vst [vmem:[#allocation51_spill] sm:$0xff] %v6385_v15  ;;  %3970 = vmatpush.msrb.mxu1 %v6243_v23  ;;  %4694 = vmatmul.msk.f32.gmra.mxu2 %vm94_vm0, %v6385_v15  ;;  %v3237_v9 = vsel %vm94_vm0, %v6385_v15, 0.0 }
0x1f31   :  { %3238 = vadd.xlane.f32.xlu0 %v3237_v9 }
0x1f32   :  { %3971 = vmatpush.msrb.mxu1 %v6253_v36 }
0x1f34   :  { %3972 = vmatpush.msrb.mxu1 %v6259_v39 }
0x1f36   :  { %3973 = vmatpush.msrb.mxu1 %v6265_v19 }
0x1f38   :  { %4703 = vmatmul.msk.f32.vlgmr.msrb.gmra.mxu2 %vm94_vm0, %v6357_v30 }
0x1f39   :  { %4734 = vmatpush.msk.msrb.mxu2 %vm5282_vm1, %v7177_v0 }
0x1f40   :  { %4704 = vmatmul.msk.f32.gmra.mxu2 %vm94_vm0, %v6377_v6 }
0x1f9c   :  { %v3236_v26 = vpop.xlane.xlu2 %3235 }
0x1f9d   :  { %v3240_v32 = vmul.f32 0.77132064, %v3236_v26 }
0x1fa4   :  { %v3239_v13 = vpop.xlane.xlu0 %3238 }
0x1fa5   :  { %v3241_v54 = vmul.f32 0.77132064, %v3239_v13 }
0x1fab   :  { %v3228_v48 = vpop.f32.mrf.mxu2 }
0x1fac   :  { %vm3242_vm8 = vcmp.le.f32.partialorder %v3228_v48, %v3240_v32 }
0x1fad   :  { %v3244_v17 = vsel %vm3242_vm8, 1, %v7178_v20 }
0x1fae   :  { %v3246_v41 = vsel %vm94_vm0, %v3244_v17, 0 }
0x1faf   :  { %v3248_v29 = vshrl.u32 %v3246_v41, 16  ;;  %v3247_v16 = vand.u32 65535, %v3246_v41 }
0x1fb1   :  { %v3250_v33 = vcvt.s32.f32 %v3248_v29  ;;  %v3249_v62 = vcvt.s32.f32 %v3247_v16 }
0x1fb3   :  { %3253 = vadd.xlane.f32.xlu1 %v3250_v33  ;;  %3251 = vadd.xlane.f32.xlu2 %v3249_v62  ;;  %v3231_v7 = vpop.f32.mrf.mxu2 }
0x1fb4   :  { %vm3243_vm1 = vcmp.le.f32.partialorder %v3231_v7, %v3241_v54 }
0x1fb5   :  { %v3245_v0 = vsel %vm3243_vm1, 1, %v7178_v20 }
0x1fb6   :  { %v3259_v45 = vsel %vm94_vm0, %v3245_v0, 0 }
0x1fb7   :  { %v3261_v10 = vshrl.u32 %v3259_v45, 16  ;;  %v3260_v59 = vand.u32 65535, %v3259_v45 }
0x1fb9   :  { %v3263_v31 = vcvt.s32.f32 %v3261_v10  ;;  %v3262_v9 = vcvt.s32.f32 %v3260_v59 }
0x1fbb   :  { %3266 = vadd.xlane.f32.xlu0 %v3263_v31  ;;  %3264 = vadd.xlane.f32.xlu1 %v3262_v9  ;;  %v3388_v31 = vpop.f32.mrf.mxu2 }
0x2026   :  { %v3254_v26 = vpop.xlane.xlu1 %3253  ;;  %v3252_v32 = vpop.xlane.xlu2 %3251 }
0x2027   :  { %v3256_v48 = vcvt.f32.s32 %v3254_v26  ;;  %v3255_v41 = vcvt.f32.s32 %v3252_v32 }
0x2029   :  { %v3257_v17 = vshll.u32 %v3256_v48, 16  ;;  %v3391_v48 = vpop.f32.mrf.mxu2 }
0x202b   :  { %v3258_v29 = vadd.s32 %v3257_v17, %v3255_v41 }
0x202d   :  { %vm3272_vm9 = vcmp.lt.s32.totalorder %v3258_v29, 7 }
0x202e   :  { %v6406_v16 = vsel %vm3272_vm9, %v3258_v29, 7  ;;  %v3267_v13 = vpop.xlane.xlu0 %3266  ;;  %v3265_v33 = vpop.xlane.xlu1 %3264 }
0x202f   :  { %7206 = vst [vmem:[#allocation52_spill] sm:$0xff] %v6406_v16  ;;  %vm3276_vm10 = vcmp.eq.s32.totalorder %v5277_v5, %v6406_v16  ;;  %v3269_v62 = vcvt.f32.s32 %v3267_v13  ;;  %v3268_v0 = vcvt.f32.s32 %v3265_v33 }
0x2030   :  { %v6411_v54 = vsel %vm3276_vm10, 1.0, %v6283_v14 }
0x2031   :  { %4697 = vmatmul.msk.f32.vlgmr.msra.gmra.mxu3 %vm94_vm0, %v6411_v54  ;;  %4699 = vmatmul.msk.f32.vlgmr.msrb.gmra.mxu0 %vm94_vm0, %v6411_v54  ;;  %v3270_v7 = vshll.u32 %v3269_v62, 16 }
0x2032   :  { %3805 = vmatpush.msra.mxu3 %v6295_v37  ;;  %3828 = vmatpush.msrb.mxu0 %v6301_v28 }
0x2033   :  { %v3271_v45 = vadd.s32 %v3270_v7, %v3268_v0  ;;  %v3365_v7 = vpop.f32.mrf.mxu1 }
0x2035   :  { %vm3274_vm11 = vcmp.lt.s32.totalorder %v3271_v45, 7 }
0x2036   :  { %v6419_v10 = vsel %vm3274_vm11, %v3271_v45, 7 }
0x2037   :  { %7207 = vst [vmem:[#allocation53_spill] sm:$0xff] %v6419_v10  ;;  %vm3277_vm12 = vcmp.eq.s32.totalorder %v5277_v5, %v6419_v10 }
0x2038   :  { %v6424_v59 = vsel %vm3277_vm12, 1.0, %v6283_v14 }
0x2039   :  { %7208 = vst [vmem:[#allocation54_spill] sm:$0xff] %v6424_v59  ;;  %4698 = vmatmul.msk.f32.gmra.mxu3 %vm94_vm0, %v6424_v59  ;;  %4700 = vmatmul.msk.f32.gmra.mxu0 %vm94_vm0, %v6424_v59 }
0x20ae   :  { %v3336_v9 = vpop.f32.mrf.mxu0 }
0x20af   :  { %v3389_v26 = vadd.f32 %v3388_v31, %v3336_v9 }
0x20b1   :  { %v6431_v32 = vadd.f32 %v3389_v26, %v5413_v56 }
0x20b3   :  { %4986 = vtanh.f32 %v6431_v32 }
0x20b4   :  { %v3313_v62 = vpop.f32.mrf.mxu3 }
0x20b5   :  { %v3366_v0 = vadd.f32 %v3365_v7, %v3313_v62 }
0x20b6   :  { %v3339_v17 = vpop.f32.mrf.mxu0 }
0x20b7   :  { %v3392_v41 = vadd.f32 %v3391_v48, %v3339_v17  ;;  %v3394_v45 = vadd.f32 %v3366_v0, %v5425_v8 }
0x20b9   :  { %v4987_v29 = vpop.eup %4986  ;;  %v6435_v13 = vadd.f32 %v3392_v41, %v5413_v56  ;;  %v4705_v31 = vmul.f32 -1.442695, %v3394_v45  ;;  %v3368_v41 = vpop.f32.mrf.mxu1 }
0x20ba   :  { %3480 = vrot.lane.b32.xlu2 %v4987_v29, %s5224_s19 }
0x20bb   :  { %4988 = vtanh.f32 %v6435_v13 }
0x20bc   :  { %4990 = vpow2.f32 %v4705_v31  ;;  %v3316_v48 = vpop.f32.mrf.mxu3 }
0x20bd   :  { %v3369_v16 = vadd.f32 %v3368_v41, %v3316_v48 }
0x20bf   :  { %v3396_v10 = vadd.f32 %v3369_v16, %v5425_v8 }
0x20c1   :  { %v4989_v33 = vpop.eup %4988  ;;  %v4707_v42 = vmul.f32 -1.442695, %v3396_v10 }
0x20c2   :  { %3482 = vrot.lane.b32.xlu0 %v4989_v33, %s5224_s19  ;;  %v4991_v9 = vpop.eup %4990 }
0x20c3   :  { %v3410_v26 = vadd.f32 1.0, %v4991_v9 }
0x20c5   :  { %4992 = vrcp.f32 %v3410_v26  ;;  %v3425_v62 = vand.u32 2147483648, %v3410_v26  ;;  %vm3419_vm14 = vweird.f32 %v3410_v26  ;;  %v3423_v7 = vand.u32 2147483647, %v3410_v26 }
0x20c6   :  { %4994 = vpow2.f32 %v4707_v42 }
0x20c7   :  { %v3426_v31 = vor.u32 1.1754944e-38, %v3425_v62  ;;  %vm3424_vm2 = vcmp.eq.f32.partialorder %v3423_v7, 8.507059e+37 }
0x20cb   :  { %v4993_v17 = vpop.eup %4992 }
0x20cc   :  { %v3415_v29 = vmul.f32 %v4993_v17, %v3410_v26  ;;  %vm3420_vm13 = vweird.f32 %v4993_v17  ;;  %v4995_v45 = vpop.eup %4994 }
0x20cd   :  { %vm3421_vm15 = vmor %vm3419_vm14, %vm3420_vm13  ;;  %v3412_v48 = vadd.f32 1.0, %v4995_v45 }
0x20ce   :  { %v3416_v15 = vsub.f32 1.0, %v3415_v29 }
0x20cf   :  { %4996 = vrcp.f32 %v3412_v48  ;;  %vm3449_vm4 = vweird.f32 %v3412_v48  ;;  %v3453_v26 = vand.u32 2147483647, %v3412_v48 }
0x20d0   :  { %v3417_v33 = vmul.f32 %v4993_v17, %v3416_v15 }
0x20d1   :  { %vm3454_vm8 = vcmp.eq.f32.partialorder %v3453_v26, 8.507059e+37 }
0x20d2   :  { %v3418_v59 = vadd.f32 %v4993_v17, %v3417_v33  ;;  %v3455_v33 = vand.u32 2147483648, %v3412_v48 }
0x20d4   :  { %v3422_v0 = vsel %vm3421_vm15, %v4993_v17, %v3418_v59  ;;  %v3456_v17 = vor.u32 1.1754944e-38, %v3455_v33 }
0x20d5   :  { %v3427_v6 = vsel %vm3424_vm2, %v3426_v31, %v3422_v0  ;;  %v4997_v16 = vpop.eup %4996 }
0x20d6   :  { %v3445_v15 = vmul.f32 %v4997_v16, %v3412_v48  ;;  %vm3450_vm3 = vweird.f32 %v4997_v16  ;;  %v3476_v45 = vmul.f32 %v3427_v6, %v5431_v57 }
0x20d7   :  { %vm3451_vm5 = vmor %vm3449_vm4, %vm3450_vm3 }
0x20d8   :  { %v3446_v42 = vsub.f32 1.0, %v3445_v15 }
0x20da   :  { %v3447_v10 = vmul.f32 %v4997_v16, %v3446_v42 }
0x20dc   :  { %v3448_v29 = vadd.f32 %v4997_v16, %v3447_v10  ;;  %v4706_v10 = vmul.f32 -1.442695, %v6431_v32 }
0x20de   :  { %v3452_v59 = vsel %vm3451_vm5, %v4997_v16, %v3448_v29 }
0x20df   :  { %v3457_v7 = vsel %vm3454_vm8, %v3456_v17, %v3452_v59 }
0x20e0   :  { %v3477_v15 = vmul.f32 %v3457_v7, %v5431_v57 }
0x2114   :  { %v3481_v9 = vpop.permute.xlu2 %3480 }
0x2115   :  { %v3486_v41 = vmul.f32 %v3481_v9, %v3427_v6 }
0x2117   :  { %3490 = vrot.lane.b32.xlu1 %v3486_v41, %s5224_s19 }
0x2134   :  { %v3483_v62 = vpop.permute.xlu0 %3482 }
0x2135   :  { %v3487_v0 = vmul.f32 %v3483_v62, %v3457_v7 }
0x2137   :  { %3492 = vrot.lane.b32.xlu0 %v3487_v0, %s5224_s19 }
0x2189   :  { %v3491_v31 = vpop.permute.xlu1 %3490 }
0x218a   :  { %v3496_v9 = vadd.f32 %v3491_v31, %v3476_v45 }
0x218c   :  { %4998 = vtanh.f32 %v3496_v9 }
0x2192   :  { %v4999_v41 = vpop.eup %4998 }
0x2193   :  { %3502 = vrot.lane.b32.xlu2 %v4999_v41, %s5224_s19 }
0x21a9   :  { %v3493_v48 = vpop.permute.xlu0 %3492 }
0x21aa   :  { %v3497_v42 = vadd.f32 %v3493_v48, %v3477_v15  ;;  %v4708_v48 = vmul.f32 -1.442695, %v6435_v13 }
0x21ac   :  { %5000 = vtanh.f32 %v3497_v42 }
0x21ad   :  { %5002 = vpow2.f32 %v4706_v10 }
0x21b2   :  { %v5001_v16 = vpop.eup %5000 }
0x21b3   :  { %3504 = vrot.lane.b32.xlu0 %v5001_v16, %s5224_s19  ;;  %v5003_v29 = vpop.eup %5002 }
0x21b4   :  { %v3411_v33 = vadd.f32 1.0, %v5003_v29 }
0x21b6   :  { %5004 = vrcp.f32 %v3411_v33  ;;  %v3440_v0 = vand.u32 2147483648, %v3411_v33  ;;  %vm3434_vm9 = vweird.f32 %v3411_v33  ;;  %v3438_v7 = vand.u32 2147483647, %v3411_v33 }
0x21b7   :  { %5006 = vpow2.f32 %v4708_v48 }
0x21b8   :  { %v3441_v31 = vor.u32 1.1754944e-38, %v3440_v0  ;;  %vm3439_vm11 = vcmp.eq.f32.partialorder %v3438_v7, 8.507059e+37 }
0x21bc   :  { %v5005_v6 = vpop.eup %5004 }
0x21bd   :  { %v3430_v26 = vmul.f32 %v5005_v6, %v3411_v33  ;;  %vm3435_vm1 = vweird.f32 %v5005_v6  ;;  %v5007_v16 = vpop.eup %5006 }
0x21be   :  { %vm3436_vm10 = vmor %vm3434_vm9, %vm3435_vm1  ;;  %v3413_v10 = vadd.f32 1.0, %v5007_v16 }
0x21bf   :  { %v3431_v59 = vsub.f32 1.0, %v3430_v26 }
0x21c0   :  { %5008 = vrcp.f32 %v3413_v10  ;;  %vm3464_vm13 = vweird.f32 %v3413_v10 }
0x21c1   :  { %v3432_v17 = vmul.f32 %v5005_v6, %v3431_v59 }
0x21c3   :  { %v3433_v62 = vadd.f32 %v5005_v6, %v3432_v17  ;;  %v3470_v17 = vand.u32 2147483648, %v3413_v10 }
0x21c5   :  { %v3437_v45 = vsel %vm3436_vm10, %v5005_v6, %v3433_v62  ;;  %v3468_v62 = vand.u32 2147483647, %v3413_v10 }
0x21c6   :  { %v3442_v41 = vsel %vm3439_vm11, %v3441_v31, %v3437_v45  ;;  %v5009_v29 = vpop.eup %5008 }
0x21c7   :  { %v3460_v33 = vmul.f32 %v5009_v29, %v3413_v10  ;;  %vm3465_vm12 = vweird.f32 %v5009_v29  ;;  %vm3469_vm15 = vcmp.eq.f32.partialorder %v3468_v62, 8.507059e+37 }
0x21c8   :  { %vm3466_vm14 = vmor %vm3464_vm13, %vm3465_vm12 }
0x21c9   :  { %v3461_v6 = vsub.f32 1.0, %v3460_v33 }
0x21cb   :  { %v3462_v26 = vmul.f32 %v5009_v29, %v3461_v6 }
0x21cd   :  { %v3463_v59 = vadd.f32 %v5009_v29, %v3462_v26 }
0x21cf   :  { %v3467_v0 = vsel %vm3466_vm14, %v5009_v29, %v3463_v59 }
0x21ed   :  { %v3503_v15 = vpop.permute.xlu2 %3502 }
0x21ee   :  { %v3508_v32 = vmul.f32 %v3503_v15, %v3442_v41 }
0x21f0   :  { %3638 = vst.msk [vmem:[#allocation2 + $0xe8] sm:$0xff] %vm410_vm6, %v3508_v32  ;;  %4709 = vmatmul.msk.f32.vlgmr.msrb.gmra.mxu3 %vm410_vm6, %v3508_v32 }
0x21f1   :  { %3640 = vst.msk [vmem:[#allocation2 + $0xe8] sm:$0xff] %vm545_vm7, %v3496_v9  ;;  %4195 = vmatpush.msrb.mxu3 %v6164_v43  ;;  %v3471_v9 = vor.u32 1.1754944e-38, %v3470_v17 }
0x21f3   :  { %v3472_v43 = vsel %vm3469_vm15, %v3471_v9, %v3467_v0 }
0x2225   :  { %v3505_v7 = vpop.permute.xlu0 %3504 }
0x2226   :  { %v3509_v13 = vmul.f32 %v3505_v7, %v3472_v43 }
0x2228   :  { %3639 = vst.msk [vmem:[#allocation2 + $0xf8] sm:$0xff] %vm410_vm6, %v3509_v13  ;;  %4710 = vmatmul.msk.f32.gmra.mxu3 %vm410_vm6, %v3509_v13 }
0x2229   :  { %3641 = vst.msk [vmem:[#allocation2 + $0xf8] sm:$0xff] %vm545_vm7, %v3497_v42 }
0x2273   :  { %v6457_v45 = vpop.f32.mrf.mxu3 }
0x2274   :  { %v3539_v31 = vsel %vm94_vm0, %v6457_v45, -inf }
0x2275   :  { %3540 = vmax.xlane.f32.xlu1 %v3539_v31 }
0x22ab   :  { %v6461_v41 = vpop.f32.mrf.mxu3 }
0x22ac   :  { %v3542_v15 = vsel %vm94_vm0, %v6461_v41, -inf }
0x22ad   :  { %3543 = vmax.xlane.f32.xlu2 %v3542_v15 }
0x22e8   :  { %v3541_v32 = vpop.xlane.xlu1 %3540 }
0x22e9   :  { %v3545_v48 = vsub.f32 %v6457_v45, %v3541_v32 }
0x22eb   :  { %v3547_v16 = vmul.f32 1.442695, %v3545_v48 }
0x22ed   :  { %5010 = vpow2.f32 %v3547_v16  ;;  %v4711_v16 = vld [vmem:[%s7087_s0 + $0x80] sm:$0xff] }
0x22f3   :  { %v5011_v10 = vpop.eup %5010 }
0x22f4   :  { %v3551_v42 = vsel %vm94_vm0, %v5011_v10, 0.0 }
0x22f5   :  { %3552 = vadd.xlane.f32.xlu0 %v3551_v42 }
0x2320   :  { %v3544_v29 = vpop.xlane.xlu2 %3543 }
0x2321   :  { %v3546_v33 = vsub.f32 %v6461_v41, %v3544_v29 }
0x2323   :  { %v3549_v6 = vmul.f32 1.442695, %v3546_v33 }
0x2325   :  { %5012 = vpow2.f32 %v3549_v6 }
0x232b   :  { %v5013_v26 = vpop.eup %5012 }
0x232c   :  { %v3554_v59 = vsel %vm94_vm0, %v5013_v26, 0.0 }
0x232d   :  { %3555 = vadd.xlane.f32.xlu1 %v3554_v59 }
0x2368   :  { %v3553_v17 = vpop.xlane.xlu0 %3552 }
0x2369   :  { %5014 = vrcp.f32 %v3553_v17  ;;  %v3568_v43 = vand.u32 2147483648, %v3553_v17  ;;  %v3566_v13 = vand.u32 2147483647, %v3553_v17  ;;  %vm3562_vm3 = vweird.f32 %v3553_v17 }
0x236b   :  { %v3569_v15 = vor.u32 1.1754944e-38, %v3568_v43  ;;  %vm3567_vm5 = vcmp.eq.f32.partialorder %v3566_v13, 8.507059e+37 }
0x236f   :  { %v5015_v62 = vpop.eup %5014 }
0x2370   :  { %v3558_v0 = vmul.f32 %v5015_v62, %v3553_v17  ;;  %vm3563_vm2 = vweird.f32 %v5015_v62 }
0x2371   :  { %vm3564_vm4 = vmor %vm3562_vm3, %vm3563_vm2 }
0x2372   :  { %v3559_v9 = vsub.f32 1.0, %v3558_v0 }
0x2374   :  { %v3560_v7 = vmul.f32 %v5015_v62, %v3559_v9 }
0x2376   :  { %v3561_v31 = vadd.f32 %v5015_v62, %v3560_v7 }
0x2378   :  { %v3565_v32 = vsel %vm3564_vm4, %v5015_v62, %v3561_v31 }
0x2379   :  { %v3570_v48 = vsel %vm3567_vm5, %v3569_v15, %v3565_v32 }
0x237a   :  { %v6472_v42 = vmul.f32 %v5011_v10, %v3570_v48 }
0x237c   :  { %3620 = vst.msk [vmem:[#allocation2 + $0xe0] sm:$0xff] %vm94_vm0, %v6472_v42  ;;  %4722 = vmatmul.msk.f32.vlgmr.msra.gmra.mxu3 %vm94_vm0, %v6472_v42  ;;  %v6479_v29 = vmul.f32 %v4711_v16, %v6472_v42 }
0x237d   :  { %4408 = vmatpush.msra.mxu3 %v6197_v38 }
0x237e   :  { %4714 = vmatmul.msk.f32.vlgmr.msra.gmra.mxu0 %vm94_vm0, %v6479_v29  ;;  %v3676_v33 = vsel %vm94_vm0, %v6479_v29, 0.0 }
0x237f   :  { %3677 = vadd.xlane.f32.xlu2 %v3676_v33  ;;  %4218 = vmatpush.msra.mxu0 %v6207_v60 }
0x2380   :  { %4409 = vmatpush.msra.mxu3 %v6213_v18 }
0x2382   :  { %4410 = vmatpush.msra.mxu3 %v6222_v22 }
0x2384   :  { %4411 = vmatpush.msra.mxu3 %v6230_v21 }
0x2386   :  { %4412 = vmatpush.msra.mxu3 %v6243_v23 }
0x2388   :  { %4413 = vmatpush.msra.mxu3 %v6253_v36 }
0x238a   :  { %4414 = vmatpush.msra.mxu3 %v6259_v39  ;;  %v4712_v39 = vld [vmem:[%s7087_s0 + $0x88] sm:$0xff] }
0x238c   :  { %4415 = vmatpush.msra.mxu3 %v6265_v19 }
0x23a0   :  { %v3556_v38 = vpop.xlane.xlu1 %3555 }
0x23a1   :  { %5016 = vrcp.f32 %v3556_v38  ;;  %v3583_v60 = vand.u32 2147483648, %v3556_v38  ;;  %v3581_v18 = vand.u32 2147483647, %v3556_v38  ;;  %vm3577_vm1 = vweird.f32 %v3556_v38 }
0x23a3   :  { %v3584_v21 = vor.u32 1.1754944e-38, %v3583_v60  ;;  %vm3582_vm10 = vcmp.eq.f32.partialorder %v3581_v18, 8.507059e+37 }
0x23a7   :  { %v5017_v10 = vpop.eup %5016 }
0x23a8   :  { %v3573_v6 = vmul.f32 %v5017_v10, %v3556_v38  ;;  %vm3578_vm8 = vweird.f32 %v5017_v10 }
0x23a9   :  { %vm3579_vm9 = vmor %vm3577_vm1, %vm3578_vm8 }
0x23aa   :  { %v3574_v59 = vsub.f32 1.0, %v3573_v6 }
0x23ac   :  { %v3575_v17 = vmul.f32 %v5017_v10, %v3574_v59 }
0x23ae   :  { %v3576_v22 = vadd.f32 %v5017_v10, %v3575_v17 }
0x23b0   :  { %v3580_v23 = vsel %vm3579_vm9, %v5017_v10, %v3576_v22 }
0x23b1   :  { %v3585_v36 = vsel %vm3582_vm10, %v3584_v21, %v3580_v23 }
0x23b2   :  { %v6497_v19 = vmul.f32 %v5013_v26, %v3585_v36 }
0x23b4   :  { %4723 = vmatmul.msk.f32.gmra.mxu3 %vm94_vm0, %v6497_v19  ;;  %3621 = vst.msk [vmem:[#allocation2 + $0xf0] sm:$0xff] %vm94_vm0, %v6497_v19  ;;  %v6504_v62 = vmul.f32 %v4712_v39, %v6497_v19 }
0x23b6   :  { %4715 = vmatmul.msk.f32.gmra.mxu0 %vm94_vm0, %v6504_v62  ;;  %v3679_v0 = vsel %vm94_vm0, %v6504_v62, 0.0 }
0x23b7   :  { %3680 = vadd.xlane.f32.xlu0 %v3679_v0 }
0x23be   :  { %4724 = vmatmul.msk.f32.vlgmr.msrb.gmra.mxu0 %vm94_vm0, %v6472_v42 }
0x23c6   :  { %4725 = vmatmul.msk.f32.gmra.mxu0 %vm94_vm0, %v6497_v19 }
0x23f2   :  { %v3678_v26 = vpop.xlane.xlu2 %3677 }
0x23f3   :  { %v3682_v9 = vmul.f32 0.77132064, %v3678_v26 }
0x23fb   :  { %v3670_v43 = vpop.f32.mrf.mxu0 }
0x23fc   :  { %vm3684_vm11 = vcmp.le.f32.partialorder %v3670_v43, %v3682_v9 }
0x23fd   :  { %v3686_v7 = vsel %vm3684_vm11, 1, %v7178_v20 }
0x23fe   :  { %v3688_v13 = vsel %vm94_vm0, %v3686_v7, 0 }
0x23ff   :  { %v3690_v31 = vshrl.u32 %v3688_v13, 16  ;;  %v3689_v15 = vand.u32 65535, %v3688_v13 }
0x2401   :  { %v3692_v32 = vcvt.s32.f32 %v3690_v31  ;;  %v3691_v48 = vcvt.s32.f32 %v3689_v15 }
0x2403   :  { %3695 = vadd.xlane.f32.xlu1 %v3692_v32  ;;  %3693 = vadd.xlane.f32.xlu2 %v3691_v48 }
0x242a   :  { %v3681_v16 = vpop.xlane.xlu0 %3680 }
0x242b   :  { %v3683_v33 = vmul.f32 0.77132064, %v3681_v16 }
0x2433   :  { %v3673_v38 = vpop.f32.mrf.mxu0 }
0x2434   :  { %vm3685_vm12 = vcmp.le.f32.partialorder %v3673_v38, %v3683_v33 }
0x2435   :  { %v3687_v10 = vsel %vm3685_vm12, 1, %v7178_v20 }
0x2436   :  { %v3701_v6 = vsel %vm94_vm0, %v3687_v10, 0 }
0x2437   :  { %v3703_v59 = vshrl.u32 %v3701_v6, 16  ;;  %v3702_v60 = vand.u32 65535, %v3701_v6 }
0x2439   :  { %v3705_v17 = vcvt.s32.f32 %v3703_v59  ;;  %v3704_v18 = vcvt.s32.f32 %v3702_v60  ;;  %v3807_v59 = vpop.f32.mrf.mxu3 }
0x243b   :  { %3708 = vadd.xlane.f32.xlu0 %v3705_v17  ;;  %3706 = vadd.xlane.f32.xlu1 %v3704_v18 }
0x2476   :  { %v3696_v22 = vpop.xlane.xlu1 %3695  ;;  %v3694_v21 = vpop.xlane.xlu2 %3693 }
0x2477   :  { %v3698_v23 = vcvt.f32.s32 %v3696_v22  ;;  %v3697_v39 = vcvt.f32.s32 %v3694_v21 }
0x2479   :  { %v3699_v36 = vshll.u32 %v3698_v23, 16 }
0x247b   :  { %v3700_v0 = vadd.s32 %v3699_v36, %v3697_v39 }
0x247d   :  { %vm3714_vm13 = vcmp.lt.s32.totalorder %v3700_v0, 7 }
0x247e   :  { %v6518_v26 = vsel %vm3714_vm13, %v3700_v0, 7 }
0x247f   :  { %vm3718_vm14 = vcmp.eq.s32.totalorder %v5277_v5, %v6518_v26 }
0x2480   :  { %v6523_v9 = vsel %vm3718_vm14, 1.0, %v6283_v14  ;;  %v6535_v14 = vld [vmem:[#allocation2 + $0x100] sm:$0xff] }
0x2481   :  { %4718 = vmatmul.msk.f32.vlgmr.msra.gmra.mxu1 %vm94_vm0, %v6523_v9  ;;  %4720 = vmatmul.msk.f32.vlgmr.msra.gmra.mxu2 %vm94_vm0, %v6523_v9 }
0x2482   :  { %4247 = vmatpush.msra.mxu1 %v6295_v37  ;;  %4270 = vmatpush.msra.mxu2 %v6301_v28  ;;  %v3830_v37 = vpop.f32.mrf.mxu0 }
0x248a   :  { %v3833_v18 = vpop.f32.mrf.mxu0 }
0x24ae   :  { %v3709_v43 = vpop.xlane.xlu0 %3708  ;;  %v3707_v7 = vpop.xlane.xlu1 %3706 }
0x24af   :  { %v3711_v13 = vcvt.f32.s32 %v3709_v43  ;;  %v3710_v15 = vcvt.f32.s32 %v3707_v7 }
0x24b1   :  { %v3712_v31 = vshll.u32 %v3711_v13, 16 }
0x24b3   :  { %v3713_v32 = vadd.s32 %v3712_v31, %v3710_v15 }
0x24b5   :  { %vm3716_vm15 = vcmp.lt.s32.totalorder %v3713_v32, 7 }
0x24b6   :  { %v6531_v48 = vsel %vm3716_vm15, %v3713_v32, 7 }
0x24b7   :  { %vm3719_vm2 = vcmp.eq.s32.totalorder %v5277_v5, %v6531_v48 }
0x24b8   :  { %v6538_v16 = vsel %vm3719_vm2, 1.0, %v6535_v14 }
0x24b9   :  { %4719 = vmatmul.msk.f32.gmra.mxu1 %vm94_vm0, %v6538_v16  ;;  %4721 = vmatmul.msk.f32.gmra.mxu2 %vm94_vm0, %v6538_v16 }
0x24fe   :  { %v3755_v6 = vpop.f32.mrf.mxu1 }
0x24ff   :  { %v3808_v60 = vadd.f32 %v3807_v59, %v3755_v6 }
0x2501   :  { %v3836_v17 = vadd.f32 %v3808_v60, %v5425_v8 }
0x2503   :  { %v4726_v22 = vmul.f32 -1.442695, %v3836_v17 }
0x2504   :  { %v3778_v28 = vpop.f32.mrf.mxu2 }
0x2505   :  { %v3831_v33 = vadd.f32 %v3830_v37, %v3778_v28 }
0x2507   :  { %v6545_v38 = vadd.f32 %v3831_v33, %v5413_v56 }
0x2509   :  { %5018 = vtanh.f32 %v6545_v38 }
0x250a   :  { %5020 = vpow2.f32 %v4726_v22 }
0x250f   :  { %v5019_v10 = vpop.eup %5018 }
0x2510   :  { %3922 = vrot.lane.b32.xlu2 %v5019_v10, %s5224_s19  ;;  %v5021_v39 = vpop.eup %5020 }
0x2511   :  { %v3852_v43 = vadd.f32 1.0, %v5021_v39 }
0x2513   :  { %v3867_v37 = vand.u32 2147483648, %v3852_v43  ;;  %vm3861_vm4 = vweird.f32 %v3852_v43  ;;  %v3865_v28 = vand.u32 2147483647, %v3852_v43 }
0x2515   :  { %v3868_v10 = vor.u32 1.1754944e-38, %v3867_v37  ;;  %vm3866_vm8 = vcmp.eq.f32.partialorder %v3865_v28, 8.507059e+37 }
0x2536   :  { %v3758_v17 = vpop.f32.mrf.mxu1 }
0x253c   :  { %v3781_v21 = vpop.f32.mrf.mxu2 }
0x253d   :  { %v3834_v23 = vadd.f32 %v3833_v18, %v3781_v21  ;;  %v3810_v18 = vpop.f32.mrf.mxu3 }
0x253e   :  { %v3811_v22 = vadd.f32 %v3810_v18, %v3758_v17 }
0x253f   :  { %v6551_v36 = vadd.f32 %v3834_v23, %v5413_v56 }
0x2540   :  { %v3838_v21 = vadd.f32 %v3811_v22, %v5425_v8 }
0x2541   :  { %5022 = vtanh.f32 %v6551_v36 }
0x2542   :  { %5024 = vrcp.f32 %v3852_v43  ;;  %v4728_v23 = vmul.f32 -1.442695, %v3838_v21 }
0x2544   :  { %5026 = vpow2.f32 %v4728_v23 }
0x2547   :  { %v5023_v0 = vpop.eup %5022 }
0x2548   :  { %3924 = vrot.lane.b32.xlu0 %v5023_v0, %s5224_s19  ;;  %v5025_v7 = vpop.eup %5024 }
0x2549   :  { %v3857_v13 = vmul.f32 %v5025_v7, %v3852_v43  ;;  %vm3862_vm3 = vweird.f32 %v5025_v7 }
0x254a   :  { %vm3863_vm5 = vmor %vm3861_vm4, %vm3862_vm3  ;;  %v5027_v39 = vpop.eup %5026 }
0x254b   :  { %v3858_v31 = vsub.f32 1.0, %v3857_v13  ;;  %v3854_v0 = vadd.f32 1.0, %v5027_v39 }
0x254d   :  { %v3859_v15 = vmul.f32 %v5025_v7, %v3858_v31  ;;  %5028 = vrcp.f32 %v3854_v0  ;;  %vm3891_vm9 = vweird.f32 %v3854_v0  ;;  %v3895_v37 = vand.u32 2147483647, %v3854_v0 }
0x254f   :  { %v3860_v32 = vadd.f32 %v5025_v7, %v3859_v15  ;;  %vm3896_vm11 = vcmp.eq.f32.partialorder %v3895_v37, 8.507059e+37  ;;  %v4729_v37 = vmul.f32 -1.442695, %v6551_v36 }
0x2551   :  { %v3864_v33 = vsel %vm3863_vm5, %v5025_v7, %v3860_v32  ;;  %v3897_v32 = vand.u32 2147483648, %v3854_v0 }
0x2552   :  { %v3869_v6 = vsel %vm3866_vm8, %v3868_v10, %v3864_v33  ;;  %vm488_vm8 = vcmask 89152  }
0x2553   :  { %v5029_v43 = vpop.eup %5028  ;;  %v3898_v33 = vor.u32 1.1754944e-38, %v3897_v32  ;;  %v3918_v17 = vmul.f32 %v3869_v6, %v5431_v57 }
0x2554   :  { %v3887_v13 = vmul.f32 %v5029_v43, %v3854_v0  ;;  %vm3892_vm1 = vweird.f32 %v5029_v43 }
0x2555   :  { %vm3893_vm10 = vmor %vm3891_vm9, %vm3892_vm1 }
0x2556   :  { %v3888_v7 = vsub.f32 1.0, %v3887_v13  ;;  %v4727_v13 = vmul.f32 -1.442695, %v6545_v38 }
0x2558   :  { %v3889_v31 = vmul.f32 %v5029_v43, %v3888_v7 }
0x255a   :  { %v3890_v15 = vadd.f32 %v5029_v43, %v3889_v31 }
0x255c   :  { %v3894_v28 = vsel %vm3893_vm10, %v5029_v43, %v3890_v15 }
0x256a   :  { %v3923_v59 = vpop.permute.xlu2 %3922 }
0x256b   :  { %v3928_v60 = vmul.f32 %v3923_v59, %v3869_v6  ;;  %v3899_v59 = vsel %vm3896_vm11, %v3898_v33, %v3894_v28 }
0x256c   :  { %v3919_v23 = vmul.f32 %v3899_v59, %v5431_v57 }
0x256d   :  { %3932 = vrot.lane.b32.xlu1 %v3928_v60, %s5224_s19 }
0x25ba   :  { %v3925_v10 = vpop.permute.xlu0 %3924 }
0x25bb   :  { %v3929_v60 = vmul.f32 %v3925_v10, %v3899_v59 }
0x25bd   :  { %3934 = vrot.lane.b32.xlu2 %v3929_v60, %s5224_s19 }
0x25df   :  { %v3933_v18 = vpop.permute.xlu1 %3932 }
0x25e0   :  { %v3938_v22 = vadd.f32 %v3933_v18, %v3918_v17 }
0x25e2   :  { %5030 = vtanh.f32 %v3938_v22 }
0x25e8   :  { %v5031_v21 = vpop.eup %5030 }
0x25e9   :  { %3944 = vrot.lane.b32.xlu0 %v5031_v21, %s5224_s19 }
0x2617   :  { %v3935_v39 = vpop.permute.xlu2 %3934 }
0x2618   :  { %v3939_v0 = vadd.f32 %v3935_v39, %v3919_v23 }
0x261a   :  { %5032 = vtanh.f32 %v3939_v0 }
0x261b   :  { %5034 = vpow2.f32 %v4727_v13 }
0x2620   :  { %v5033_v43 = vpop.eup %5032 }
0x2621   :  { %3946 = vrot.lane.b32.xlu2 %v5033_v43, %s5224_s19  ;;  %v5035_v7 = vpop.eup %5034 }
0x2622   :  { %v3853_v31 = vadd.f32 1.0, %v5035_v7 }
0x2624   :  { %5036 = vrcp.f32 %v3853_v31  ;;  %v3882_v10 = vand.u32 2147483648, %v3853_v31  ;;  %vm3876_vm13 = vweird.f32 %v3853_v31  ;;  %v3880_v59 = vand.u32 2147483647, %v3853_v31 }
0x2625   :  { %5038 = vpow2.f32 %v4729_v37 }
0x2626   :  { %v3883_v38 = vor.u32 1.1754944e-38, %v3882_v10  ;;  %vm3881_vm15 = vcmp.eq.f32.partialorder %v3880_v59, 8.507059e+37 }
0x262a   :  { %v5037_v6 = vpop.eup %5036 }
0x262b   :  { %v3872_v15 = vmul.f32 %v5037_v6, %v3853_v31  ;;  %vm3877_vm12 = vweird.f32 %v5037_v6  ;;  %v5039_v17 = vpop.eup %5038 }
0x262c   :  { %vm3878_vm14 = vmor %vm3876_vm13, %vm3877_vm12  ;;  %v3855_v23 = vadd.f32 1.0, %v5039_v17  ;;  %vm509_vm12 = vcmask 23552   ;;  %vm526_vm13 = vcmask 97368  }
0x262d   :  { %v3873_v32 = vsub.f32 1.0, %v3872_v15 }
0x262e   :  { %5040 = vrcp.f32 %v3855_v23  ;;  %vm3906_vm3 = vweird.f32 %v3855_v23  ;;  %v3910_v15 = vand.u32 2147483647, %v3855_v23 }
0x262f   :  { %v3874_v28 = vmul.f32 %v5037_v6, %v3873_v32 }
0x2630   :  { %vm3911_vm5 = vcmp.eq.f32.partialorder %v3910_v15, 8.507059e+37  ;;  %v489_v15 = vsel %vm488_vm8, %v5511_v58, -inf }
0x2631   :  { %v3875_v33 = vadd.f32 %v5037_v6, %v3874_v28 }
0x2633   :  { %v3879_v60 = vsel %vm3878_vm14, %v5037_v6, %v3875_v33  ;;  %v3912_v6 = vand.u32 2147483648, %v3855_v23  ;;  %vm531_vm14 = vcmask 105568  }
0x2634   :  { %v3884_v18 = vsel %vm3881_vm15, %v3883_v38, %v3879_v60  ;;  %v5041_v36 = vpop.eup %5040  ;;  %v5193_v60 = vld [vmem:[%s7088_s1 + $0x8] sm:$0xff]  ;;  %vm540_vm15 = vcmask 195712  }
0x2635   :  { %v3902_v43 = vmul.f32 %v5041_v36, %v3855_v23  ;;  %vm3907_vm2 = vweird.f32 %v5041_v36  ;;  %v3913_v37 = vor.u32 1.1754944e-38, %v3912_v6  ;;  %v173_v17 = vmul.f32 %v5193_v60, %v5404_v53 }
0x2636   :  { %vm3908_vm4 = vmor %vm3906_vm3, %vm3907_vm2 }
0x2637   :  { %v3903_v13 = vsub.f32 1.0, %v3902_v43  ;;  %v177_v38 = vsel %vm94_vm0, %v173_v17, 0.0 }
0x2639   :  { %v3904_v7 = vmul.f32 %v5041_v36, %v3903_v13  ;;  %v5194_v13 = vld [vmem:[%s7088_s1] sm:$0xff]  ;;  %s5225_s1 = smov 120  }
0x263b   :  { %v3905_v31 = vadd.f32 %v5041_v36, %v3904_v7  ;;  %v172_v7 = vmul.f32 %v5194_v13, %v5384_v49  ;;  %v631_v49 = vmul.f32 %v5593_v4, %v5545_v1 }
0x263d   :  { %v3909_v32 = vsel %vm3908_vm4, %v5041_v36, %v3905_v31  ;;  %v174_v31 = vsel %vm94_vm0, %v172_v7, 0.0 }
0x263e   :  { %v3914_v28 = vsel %vm3911_vm5, %v3913_v37, %v3909_v32 }
0x265b   :  { %v3945_v21 = vpop.permute.xlu0 %3944 }
0x265c   :  { %v3950_v39 = vmul.f32 %v3945_v21, %v3884_v18  ;;  %v492_v18 = vsel %vm488_vm8, %v5515_v61, -inf }
0x265e   :  { %4080 = vst.msk [vmem:[#allocation2 + $0x108] sm:$0xff] %vm410_vm6, %v3950_v39  ;;  %4730 = vmatmul.msk.f32.vlgmr.msrb.gmra.mxu1 %vm410_vm6, %v3950_v39 }
0x265f   :  { %4082 = vst.msk [vmem:[#allocation2 + $0x108] sm:$0xff] %vm545_vm7, %v3938_v22 }
0x267b   :  { %v3947_v33 = vpop.permute.xlu2 %3946 }
0x267c   :  { %v3951_v10 = vmul.f32 %v3947_v33, %v3914_v28 }
0x267e   :  { %4081 = vst.msk [vmem:[#allocation2 + $0x118] sm:$0xff] %vm410_vm6, %v3951_v10  ;;  %4731 = vmatmul.msk.f32.gmra.mxu1 %vm410_vm6, %v3951_v10  ;;  %v635_v10 = vsel %vm94_vm0, %v631_v49, 0.0 }
0x267f   :  { %4083 = vst.msk [vmem:[#allocation2 + $0x118] sm:$0xff] %vm545_vm7, %v3939_v0 }
0x26db   :  { %v6570_v22 = vpop.f32.mrf.mxu1 }
0x26dc   :  { %v3981_v59 = vsel %vm94_vm0, %v6570_v22, -inf }
0x26dd   :  { %3982 = vmax.xlane.f32.xlu1 %v3981_v59  ;;  %v938_v59 = vsel %vm488_vm8, %v5630_v34, -inf }
0x26e5   :  { %178 = vadd.xlane.f32.xlu1 %v177_v38 }
0x26ed   :  { %493 = vmax.xlane.f32.xlu1 %v492_v18 }
0x26fb   :  { %v6581_v0 = vpop.f32.mrf.mxu1 }
0x26fc   :  { %v3984_v21 = vsel %vm94_vm0, %v6581_v0, -inf }
0x26fd   :  { %3985 = vmax.xlane.f32.xlu0 %v3984_v21 }
0x2750   :  { %v3983_v23 = vpop.xlane.xlu1 %3982 }
0x2751   :  { %v3987_v39 = vsub.f32 %v6570_v22, %v3983_v23 }
0x2753   :  { %v3989_v36 = vmul.f32 1.442695, %v3987_v39 }
0x2755   :  { %5042 = vpow2.f32 %v3989_v36 }
0x2758   :  { %v6592_v6 = vpop.xlane.xlu1 %178 }
0x275b   :  { %v5043_v53 = vpop.eup %5042 }
0x275c   :  { %v3993_v43 = vsel %vm94_vm0, %v5043_v53, 0.0 }
0x275d   :  { %3994 = vadd.xlane.f32.xlu2 %v3993_v43 }
0x2760   :  { %v494_v32 = vpop.xlane.xlu1 %493 }
0x2761   :  { %v6597_v37 = vsub.f32 %v5515_v61, %v494_v32 }
0x2763   :  { %v499_v28 = vmul.f32 1.442695, %v6597_v37 }
0x2765   :  { %175 = vadd.xlane.f32.xlu2 %v174_v31  ;;  %5044 = vpow2.f32 %v499_v28  ;;  %v4732_v31 = vld [vmem:[%s7087_s0 + $0x90] sm:$0xff] }
0x276b   :  { %v5045_v33 = vpop.eup %5044 }
0x276d   :  { %490 = vmax.xlane.f32.xlu2 %v489_v15 }
0x2785   :  { %505 = vrot.lane.b32.xlu2 %v5045_v33, %s5225_s1  ;;  %v935_v33 = vsel %vm488_vm8, %v5626_v47, -inf }
0x27ae   :  { %636 = vadd.xlane.f32.xlu2 %v635_v10 }
0x27b6   :  { %939 = vmax.xlane.f32.xlu2 %v938_v59 }
0x27d0   :  { %v3995_v60 = vpop.xlane.xlu2 %3994 }
0x27d1   :  { %5046 = vrcp.f32 %v3995_v60  ;;  %v4010_v21 = vand.u32 2147483648, %v3995_v60  ;;  %v4008_v39 = vand.u32 2147483647, %v3995_v60  ;;  %vm4004_vm9 = vweird.f32 %v3995_v60 }
0x27d3   :  { %v4011_v1 = vor.u32 1.1754944e-38, %v4010_v21  ;;  %vm4009_vm11 = vcmp.eq.f32.partialorder %v4008_v39, 8.507059e+37 }
0x27d7   :  { %v5047_v61 = vpop.eup %5046 }
0x27d8   :  { %v4000_v17 = vmul.f32 %v5047_v61, %v3995_v60  ;;  %v6606_v38 = vpop.xlane.xlu2 %175  ;;  %vm4005_vm1 = vweird.f32 %v5047_v61 }
0x27d9   :  { %vm4006_vm10 = vmor %vm4004_vm9, %vm4005_vm1 }
0x27da   :  { %v4001_v18 = vsub.f32 1.0, %v4000_v17 }
0x27dc   :  { %v4002_v23 = vmul.f32 %v5047_v61, %v4001_v18 }
0x27de   :  { %v4003_v36 = vadd.f32 %v5047_v61, %v4002_v23 }
0x27e0   :  { %v4007_v4 = vsel %vm4006_vm10, %v5047_v61, %v4003_v36  ;;  %v491_v43 = vpop.xlane.xlu2 %490 }
0x27e1   :  { %v4012_v13 = vsel %vm4009_vm11, %v4011_v1, %v4007_v4  ;;  %v6609_v7 = vsub.f32 %v5511_v58, %v491_v43 }
0x27e2   :  { %v6614_v15 = vmul.f32 %v5043_v53, %v4012_v13 }
0x27e3   :  { %v497_v32 = vmul.f32 1.442695, %v6609_v7 }
0x27e4   :  { %4062 = vst.msk [vmem:[#allocation2 + $0x100] sm:$0xff] %vm94_vm0, %v6614_v15  ;;  %4743 = vmatmul.msk.f32.vlgmr.msra.gmra.mxu1 %vm94_vm0, %v6614_v15  ;;  %v6622_v28 = vmul.f32 %v4732_v31, %v6614_v15  ;;  %v630_v31 = vmul.f32 %v5580_v55, %v5526_v44  ;;  %v529_v44 = vcvt.s32.f32 %v5377_v46 }
0x27e5   :  { %5048 = vpow2.f32 %v497_v32 }
0x27e6   :  { %4735 = vmatmul.msk.f32.vlgmr.msrb.gmra.mxu2 %vm94_vm0, %v6622_v28  ;;  %v632_v32 = vsel %vm94_vm0, %v630_v31, 0.0  ;;  %v530_v31 = vcvt.s32.f32 %v5398_v52 }
0x27e8   :  { %v506_v53 = vpop.permute.xlu2 %505 }
0x27e9   :  { %v513_v36 = vsel %vm509_vm12, %v506_v53, 0.0 }
0x27eb   :  { %v5049_v58 = vpop.eup %5048 }
0x27ec   :  { %503 = vrot.lane.b32.xlu0 %v5049_v58, %s5225_s1 }
0x27f4   :  { %534 = vrot.lane.b32.xlu0 %v5275_v3, %s5226_s28  ;;  %v3986_v3 = vpop.xlane.xlu0 %3985 }
0x27f5   :  { %v3988_v17 = vsub.f32 %v6581_v0, %v3986_v3 }
0x27f7   :  { %v3991_v18 = vmul.f32 1.442695, %v3988_v17 }
0x281e   :  { %936 = vmax.xlane.f32.xlu0 %v935_v33 }
0x2821   :  { %v6631_v49 = vpop.xlane.xlu2 %636 }
0x2829   :  { %v940_v10 = vpop.xlane.xlu2 %939 }
0x282a   :  { %v6634_v59 = vsub.f32 %v5630_v34, %v940_v10 }
0x282c   :  { %v945_v60 = vmul.f32 1.442695, %v6634_v59 }
0x282e   :  { %5050 = vpow2.f32 %v945_v60 }
0x282f   :  { %5052 = vpow2.f32 %v3991_v18 }
0x2834   :  { %v5051_v61 = vpop.eup %5050 }
0x2835   :  { %951 = vrot.lane.b32.xlu2 %v5051_v61, %s5225_s1  ;;  %v5053_v34 = vpop.eup %5052 }
0x2836   :  { %v3996_v39 = vsel %vm94_vm0, %v5053_v34, 0.0 }
0x283d   :  { %978 = vrot.lane.b32.xlu2 %v5533_v50, %s5226_s28 }
0x285e   :  { %v504_v21 = vpop.permute.xlu0 %503 }
0x285f   :  { %v510_v23 = vsel %vm509_vm12, %v504_v21, 0.0 }
0x2860   :  { %511 = vadd.xlane.f32.xlu1 %v510_v23 }
0x2866   :  { %v535_v1 = vpop.permute.xlu0 %534 }
0x2868   :  { %3997 = vadd.xlane.f32.xlu1 %v3996_v39 }
0x2870   :  { %514 = vadd.xlane.f32.xlu1 %v513_v36 }
0x2889   :  { %536 = vrot.lane.b32.xlu1 %v5297_v11, %s5226_s28 }
0x288f   :  { %v952_v58 = vpop.permute.xlu2 %951 }
0x2890   :  { %v958_v53 = vsel %vm509_vm12, %v952_v58, 0.0 }
0x2891   :  { %v937_v50 = vpop.xlane.xlu0 %936 }
0x2892   :  { %v6647_v4 = vsub.f32 %v5626_v47, %v937_v50 }
0x2894   :  { %v943_v43 = vmul.f32 1.442695, %v6647_v4 }
0x2896   :  { %5054 = vpow2.f32 %v943_v43 }
0x289c   :  { %v5055_v13 = vpop.eup %5054 }
0x289d   :  { %949 = vrot.lane.b32.xlu0 %v5055_v13, %s5225_s1 }
0x28b3   :  { %633 = vadd.xlane.f32.xlu1 %v632_v32 }
0x28bb   :  { %959 = vadd.xlane.f32.xlu1 %v958_v53  ;;  %v1377_v53 = vsel %vm488_vm8, %v5763_v24, -inf }
0x28d3   :  { %v512_v11 = vpop.xlane.xlu1 %511 }
0x28d4   :  { %5056 = vlog2.f32 %v512_v11  ;;  %980 = vrot.lane.b32.xlu1 %v5553_v35, %s5226_s28 }
0x28da   :  { %v5057_v47 = vpop.eup %5056 }
0x28db   :  { %v517_v33 = vmul.f32 0.6931472, %v5057_v47  ;;  %v3998_v10 = vpop.xlane.xlu1 %3997  ;;  %v1380_v47 = vsel %vm488_vm8, %v5767_v27, -inf }
0x28dc   :  { %5058 = vrcp.f32 %v3998_v10  ;;  %v4025_v17 = vand.u32 2147483648, %v3998_v10  ;;  %v4023_v18 = vand.u32 2147483647, %v3998_v10  ;;  %vm4019_vm3 = vweird.f32 %v3998_v10 }
0x28dd   :  { %v520_v60 = vsub.f32 %v6609_v7, %v517_v33 }
0x28de   :  { %v4026_v23 = vor.u32 1.1754944e-38, %v4025_v17  ;;  %vm4024_vm5 = vcmp.eq.f32.partialorder %v4023_v18, 8.507059e+37  ;;  %v4112_v18 = vpop.f32.mrf.mxu2 }
0x28df   :  { %524 = vst.msk [vmem:[#allocation2] sm:$0xff] %vm488_vm8, %v520_v60 }
0x28e0   :  { %527 = vst.msk [vmem:[#allocation2] sm:$0xff] %vm526_vm13, %v6606_v38 }
0x28e1   :  { %532 = vst.msk [vmem:[#allocation2] sm:$0xff] %vm531_vm14, %v529_v44  ;;  %v975_v44 = vcvt.s32.f32 %v5588_v2  ;;  %v974_v2 = vcvt.s32.f32 %v5575_v51  ;;  %v1072_v51 = vmul.f32 %v5702_v63, %v5641_v40 }
0x28e2   :  { %v5059_v55 = vpop.eup %5058  ;;  %541 = vst.msk [vmem:[#allocation2] sm:$0xff] %vm540_vm15, %v535_v1  ;;  %v4733_v1 = vld [vmem:[%s7087_s0 + $0x98] sm:$0xff] }
0x28e3   :  { %v4015_v35 = vmul.f32 %v5059_v55, %v3998_v10  ;;  %v515_v61 = vpop.xlane.xlu1 %514  ;;  %vm4020_vm2 = vweird.f32 %v5059_v55 }
0x28e4   :  { %5060 = vlog2.f32 %v515_v61  ;;  %vm4021_vm4 = vmor %vm4019_vm3, %vm4020_vm2 }
0x28e5   :  { %v4016_v3 = vsub.f32 1.0, %v4015_v35 }
0x28e7   :  { %v4017_v7 = vmul.f32 %v5059_v55, %v4016_v3 }
0x28e9   :  { %v4018_v46 = vadd.f32 %v5059_v55, %v4017_v7 }
0x28ea   :  { %v5061_v21 = vpop.eup %5060 }
0x28eb   :  { %v4022_v39 = vsel %vm4021_vm4, %v5059_v55, %v4018_v46  ;;  %v519_v38 = vmul.f32 0.6931472, %v5061_v21  ;;  %v979_v21 = vpop.permute.xlu2 %978 }
0x28ec   :  { %v4027_v36 = vsel %vm4024_vm5, %v4026_v23, %v4022_v39 }
0x28ed   :  { %v521_v50 = vsub.f32 %v6597_v37, %v519_v38  ;;  %v6668_v43 = vmul.f32 %v5053_v34, %v4027_v36  ;;  %v4118_v34 = vsel %vm94_vm0, %v6622_v28, 0.0 }
0x28ef   :  { %525 = vst.msk [vmem:[#allocation2 + $0x10] sm:$0xff] %vm488_vm8, %v521_v50  ;;  %4744 = vmatmul.msk.f32.gmra.mxu1 %vm94_vm0, %v6668_v43  ;;  %v6674_v13 = vmul.f32 %v4733_v1, %v6668_v43  ;;  %v7209_v1 = vld [vmem:[#allocation6_spill] sm:$0xff] }
0x28f0   :  { %528 = vst.msk [vmem:[#allocation2 + $0x10] sm:$0xff] %vm526_vm13, %v6592_v6  ;;  %v7210_v50 = vld [vmem:[#allocation10_spill] sm:$0xff] }
0x28f1   :  { %4063 = vst.msk [vmem:[#allocation2 + $0x110] sm:$0xff] %vm94_vm0, %v6668_v43  ;;  %4736 = vmatmul.msk.f32.gmra.mxu2 %vm94_vm0, %v6674_v13  ;;  %v4121_v32 = vsel %vm94_vm0, %v6674_v13, 0.0 }
0x28f2   :  { %533 = vst.msk [vmem:[#allocation2 + $0x10] sm:$0xff] %vm531_vm14, %v530_v31  ;;  %v1073_v31 = vmul.f32 %v7210_v50, %v7209_v1  ;;  %v7214_v1 = vld [vmem:[#allocation19_spill] sm:$0xff] }
0x28f3   :  { %v1819_v50 = vsel %vm488_vm8, %v7214_v1, -inf }
0x28f9   :  { %4745 = vmatmul.msk.f32.vlgmr.msra.gmra.mxu2 %vm94_vm0, %v6614_v15 }
0x28fb   :  { %v537_v37 = vpop.permute.xlu1 %536 }
0x28fc   :  { %542 = vst.msk [vmem:[#allocation2 + $0x10] sm:$0xff] %vm540_vm15, %v537_v37 }
0x2901   :  { %4746 = vmatmul.msk.f32.gmra.mxu2 %vm94_vm0, %v6668_v43 }
0x290f   :  { %v950_v52 = vpop.permute.xlu0 %949 }
0x2910   :  { %v955_v6 = vsel %vm509_vm12, %v950_v52, 0.0 }
0x2911   :  { %956 = vadd.xlane.f32.xlu0 %v955_v6  ;;  %v1074_v6 = vsel %vm94_vm0, %v1072_v51, 0.0 }
0x2919   :  { %4119 = vadd.xlane.f32.xlu0 %v4118_v34  ;;  %v1077_v34 = vsel %vm94_vm0, %v1073_v31, 0.0  ;;  %v7215_v31 = vld [vmem:[#allocation20_spill] sm:$0xff] }
0x2921   :  { %4122 = vadd.xlane.f32.xlu0 %v4121_v32 }
0x2926   :  { %v634_v58 = vpop.xlane.xlu1 %633 }
0x2929   :  { %1378 = vmax.xlane.f32.xlu0 %v1377_v53 }
0x292e   :  { %v960_v11 = vpop.xlane.xlu1 %959 }
0x292f   :  { %5062 = vlog2.f32 %v960_v11  ;;  %v7211_v11 = vld [vmem:[#allocation5_spill] sm:$0xff] }
0x2931   :  { %1381 = vmax.xlane.f32.xlu0 %v1380_v47 }
0x2935   :  { %v5063_v33 = vpop.eup %5062 }
0x2936   :  { %v964_v10 = vmul.f32 0.6931472, %v5063_v33 }
0x2938   :  { %v966_v60 = vsub.f32 %v6634_v59, %v964_v10 }
0x293a   :  { %971 = vst.msk [vmem:[#allocation2 + $0x30] sm:$0xff] %vm488_vm8, %v966_v60 }
0x293b   :  { %973 = vst.msk [vmem:[#allocation2 + $0x30] sm:$0xff] %vm526_vm13, %v6631_v49 }
0x293c   :  { %977 = vst.msk [vmem:[#allocation2 + $0x30] sm:$0xff] %vm531_vm14, %v975_v44 }
0x2946   :  { %v981_v55 = vpop.permute.xlu1 %980 }
0x2947   :  { %985 = vst.msk [vmem:[#allocation2 + $0x30] sm:$0xff] %vm540_vm15, %v981_v55  ;;  %v7212_v55 = vld [vmem:[#allocation11_spill] sm:$0xff] }
0x2974   :  { %v4115_v33 = vpop.f32.mrf.mxu2 }
0x2984   :  { %v957_v35 = vpop.xlane.xlu0 %956 }
0x2985   :  { %5064 = vlog2.f32 %v957_v35  ;;  %v7213_v35 = vld [vmem:[#allocation16_spill] sm:$0xff] }
0x298b   :  { %v5065_v61 = vpop.eup %5064 }
0x298c   :  { %v962_v3 = vmul.f32 0.6931472, %v5065_v61  ;;  %v4120_v17 = vpop.xlane.xlu0 %4119  ;;  %v1514_v61 = vmul.f32 %v7213_v35, %v7212_v55 }
0x298d   :  { %v4124_v7 = vmul.f32 0.77132064, %v4120_v17 }
0x298e   :  { %v965_v59 = vsub.f32 %v6647_v4, %v962_v3  ;;  %v1516_v3 = vsel %vm94_vm0, %v1514_v61, 0.0 }
0x298f   :  { %vm4126_vm1 = vcmp.le.f32.partialorder %v4112_v18, %v4124_v7 }
0x2990   :  { %970 = vst.msk [vmem:[#allocation2 + $0x20] sm:$0xff] %vm488_vm8, %v965_v59  ;;  %v4128_v49 = vsel %vm4126_vm1, 1, %v7178_v20 }
0x2991   :  { %972 = vst.msk [vmem:[#allocation2 + $0x20] sm:$0xff] %vm526_vm13, %v634_v58  ;;  %v4130_v46 = vsel %vm94_vm0, %v4128_v49, 0 }
0x2992   :  { %976 = vst.msk [vmem:[#allocation2 + $0x20] sm:$0xff] %vm531_vm14, %v974_v2  ;;  %v4131_v23 = vand.u32 65535, %v4130_v46  ;;  %v4132_v39 = vshrl.u32 %v4130_v46, 16 }
0x2993   :  { %984 = vst.msk [vmem:[#allocation2 + $0x20] sm:$0xff] %vm540_vm15, %v979_v21 }
0x2994   :  { %v4123_v38 = vpop.xlane.xlu0 %4122  ;;  %v4133_v4 = vcvt.s32.f32 %v4131_v23  ;;  %v4134_v36 = vcvt.s32.f32 %v4132_v39 }
0x2995   :  { %v4125_v47 = vmul.f32 0.77132064, %v4123_v38 }
0x2996   :  { %4135 = vadd.xlane.f32.xlu2 %v4133_v4  ;;  %4137 = vadd.xlane.f32.xlu1 %v4134_v36 }
0x2997   :  { %vm4127_vm9 = vcmp.le.f32.partialorder %v4115_v33, %v4125_v47 }
0x2998   :  { %v4129_v10 = vsel %vm4127_vm9, 1, %v7178_v20 }
0x2999   :  { %v4143_v60 = vsel %vm94_vm0, %v4129_v10, 0 }
0x299a   :  { %v4144_v36 = vand.u32 65535, %v4143_v60 }
0x299c   :  { %v1379_v37 = vpop.xlane.xlu0 %1378  ;;  %v4146_v51 = vcvt.s32.f32 %v4144_v36 }
0x299d   :  { %v6718_v52 = vsub.f32 %v5763_v24, %v1379_v37  ;;  %v1822_v37 = vsel %vm488_vm8, %v7215_v31, -inf }
0x299e   :  { %1075 = vadd.xlane.f32.xlu2 %v1074_v6  ;;  %1078 = vadd.xlane.f32.xlu1 %v1077_v34  ;;  %v7216_v6 = vld [vmem:[#allocation7_spill] sm:$0xff]  ;;  %v7217_v34 = vld [vmem:[#allocation13_spill] sm:$0xff] }
0x299f   :  { %v1385_v32 = vmul.f32 1.442695, %v6718_v52 }
0x29a1   :  { %5066 = vpow2.f32 %v1385_v32  ;;  %v7218_v32 = vld [vmem:[#allocation18_spill] sm:$0xff] }
0x29a4   :  { %v1382_v58 = vpop.xlane.xlu0 %1381 }
0x29a5   :  { %v6724_v40 = vsub.f32 %v5767_v27, %v1382_v58  ;;  %v4145_v27 = vshrl.u32 %v4143_v60, 16  ;;  %v1515_v58 = vmul.f32 %v7218_v32, %v7217_v34 }
0x29a7   :  { %v5067_v53 = vpop.eup %5066  ;;  %v1387_v63 = vmul.f32 1.442695, %v6724_v40  ;;  %v4147_v44 = vcvt.s32.f32 %v4145_v27 }
0x29a8   :  { %1391 = vrot.lane.b32.xlu0 %v5067_v53, %s5225_s1  ;;  %v1519_v53 = vsel %vm94_vm0, %v1515_v58, 0.0 }
0x29a9   :  { %5068 = vpow2.f32 %v1387_v63 }
0x29af   :  { %v5069_v24 = vpop.eup %5068 }
0x29b6   :  { %1393 = vrot.lane.b32.xlu2 %v5069_v24, %s5225_s1 }
0x29be   :  { %1420 = vrot.lane.b32.xlu2 %v7211_v11, %s5226_s28 }
0x29d2   :  { %4150 = vadd.xlane.f32.xlu0 %v4147_v44 }
0x29e7   :  { %1517 = vadd.xlane.f32.xlu2 %v1516_v3 }
0x2a09   :  { %v4136_v17 = vpop.xlane.xlu2 %4135  ;;  %v4138_v7 = vpop.xlane.xlu1 %4137 }
0x2a0a   :  { %v4140_v18 = vcvt.f32.s32 %v4138_v7  ;;  %v4139_v59 = vcvt.f32.s32 %v4136_v17 }
0x2a0c   :  { %v4141_v2 = vshll.u32 %v4140_v18, 16 }
0x2a0e   :  { %v4142_v49 = vadd.s32 %v4141_v2, %v4139_v59 }
0x2a10   :  { %vm4156_vm10 = vcmp.lt.s32.totalorder %v4142_v49, 7 }
0x2a11   :  { %v6736_v46 = vsel %vm4156_vm10, %v4142_v49, 7  ;;  %v1076_v20 = vpop.xlane.xlu2 %1075  ;;  %v1079_v63 = vpop.xlane.xlu1 %1078  ;;  %v7219_v49 = vld [vmem:[#allocation8_spill] sm:$0xff] }
0x2a12   :  { %vm4160_vm11 = vcmp.eq.s32.totalorder %v5277_v5, %v6736_v46 }
0x2a13   :  { %v6741_v21 = vsel %vm4160_vm11, 1.0, %v6535_v14 }
0x2a14   :  { %4739 = vmatmul.msk.f32.vlgmr.msrb.gmra.mxu3 %vm94_vm0, %v6741_v21  ;;  %4741 = vmatmul.msk.f32.vlgmr.msra.gmra.mxu0 %vm94_vm0, %v6741_v21 }
0x2a19   :  { %v1394_v23 = vpop.permute.xlu2 %1393 }
0x2a1a   :  { %v1400_v39 = vsel %vm509_vm12, %v1394_v23, 0.0  ;;  %v1392_v38 = vpop.permute.xlu0 %1391  ;;  %v1416_v23 = vcvt.s32.f32 %v7219_v49 }
0x2a1b   :  { %v1397_v4 = vsel %vm509_vm12, %v1392_v38, 0.0  ;;  %1401 = vadd.xlane.f32.xlu1 %v1400_v39 }
0x2a1c   :  { %1398 = vadd.xlane.f32.xlu0 %v1397_v4 }
0x2a23   :  { %4148 = vadd.xlane.f32.xlu1 %v4146_v51 }
0x2a24   :  { %1820 = vmax.xlane.f32.xlu0 %v1819_v50 }
0x2a2c   :  { %1823 = vmax.xlane.f32.xlu0 %v1822_v37  ;;  %v7222_v37 = vld [vmem:[#allocation21_spill] sm:$0xff] }
0x2a3c   :  { %1422 = vrot.lane.b32.xlu1 %v7216_v6, %s5226_s28  ;;  %v7223_v6 = vld [vmem:[#allocation26_spill] sm:$0xff] }
0x2a3d   :  { %v1956_v34 = vmul.f32 %v7223_v6, %v7222_v37 }
0x2a3f   :  { %v1958_v32 = vsel %vm94_vm0, %v1956_v34, 0.0 }
0x2a45   :  { %v4151_v24 = vpop.xlane.xlu0 %4150 }
0x2a46   :  { %v4153_v33 = vcvt.f32.s32 %v4151_v24 }
0x2a48   :  { %v4154_v55 = vshll.u32 %v4153_v33, 16 }
0x2a66   :  { %1520 = vadd.xlane.f32.xlu1 %v1519_v53 }
0x2a8e   :  { %v1402_v11 = vpop.xlane.xlu1 %1401 }
0x2a8f   :  { %5070 = vlog2.f32 %v1402_v11  ;;  %v1399_v47 = vpop.xlane.xlu0 %1398  ;;  %v7224_v11 = vld [vmem:[#allocation12_spill] sm:$0xff] }
0x2a90   :  { %5072 = vlog2.f32 %v1399_v47 }
0x2a91   :  { %v4220_v24 = vpop.f32.mrf.mxu0 }
0x2a95   :  { %v5071_v10 = vpop.eup %5070 }
0x2a96   :  { %v5073_v60 = vpop.eup %5072  ;;  %v1406_v27 = vmul.f32 0.6931472, %v5071_v10  ;;  %v4149_v44 = vpop.xlane.xlu1 %4148 }
0x2a97   :  { %v1404_v35 = vmul.f32 0.6931472, %v5073_v60  ;;  %v4152_v61 = vcvt.f32.s32 %v4149_v44  ;;  %v1821_v3 = vpop.xlane.xlu0 %1820 }
0x2a98   :  { %v1408_v17 = vsub.f32 %v6724_v40, %v1406_v27  ;;  %v6760_v7 = vsub.f32 %v7214_v1, %v1821_v3  ;;  %v1421_v40 = vpop.permute.xlu2 %1420  ;;  %v7221_v1 = vld [vmem:[#allocation14_spill] sm:$0xff] }
0x2a99   :  { %v1407_v18 = vsub.f32 %v6718_v52, %v1404_v35  ;;  %v4155_v59 = vadd.s32 %v4154_v55, %v4152_v61  ;;  %v7220_v52 = vld [vmem:[#allocation9_spill] sm:$0xff]  ;;  %v7226_v3 = vld [vmem:[#allocation30_spill] sm:$0xff] }
0x2a9a   :  { %1413 = vst.msk [vmem:[#allocation2 + $0x50] sm:$0xff] %vm488_vm8, %v1408_v17  ;;  %v1827_v2 = vmul.f32 1.442695, %v6760_v7  ;;  %v1417_v38 = vcvt.s32.f32 %v7220_v52  ;;  %v7225_v55 = vld [vmem:[#allocation29_spill] sm:$0xff]  ;;  %v2264_v17 = vsel %vm488_vm8, %v7226_v3, -inf }
0x2a9b   :  { %1412 = vst.msk [vmem:[#allocation2 + $0x40] sm:$0xff] %vm488_vm8, %v1407_v18  ;;  %vm4158_vm2 = vcmp.lt.s32.totalorder %v4155_v59, 7  ;;  %v2261_v35 = vsel %vm488_vm8, %v7225_v55, -inf  ;;  %v7227_v18 = vld [vmem:[#allocation23_spill] sm:$0xff] }
0x2a9c   :  { %1414 = vst.msk [vmem:[#allocation2 + $0x40] sm:$0xff] %vm526_vm13, %v1076_v20  ;;  %v6768_v39 = vsel %vm4158_vm2, %v4155_v59, 7  ;;  %5074 = vpow2.f32 %v1827_v2  ;;  %v7228_v59 = vld [vmem:[#allocation28_spill] sm:$0xff] }
0x2a9d   :  { %1418 = vst.msk [vmem:[#allocation2 + $0x40] sm:$0xff] %vm531_vm14, %v1416_v23  ;;  %vm4161_vm3 = vcmp.eq.s32.totalorder %v5277_v5, %v6768_v39  ;;  %v1957_v2 = vmul.f32 %v7228_v59, %v7227_v18 }
0x2a9e   :  { %1426 = vst.msk [vmem:[#allocation2 + $0x40] sm:$0xff] %vm540_vm15, %v1421_v40  ;;  %v6776_v4 = vsel %vm4161_vm3, 1.0, %v6535_v14 }
0x2a9f   :  { %1415 = vst.msk [vmem:[#allocation2 + $0x50] sm:$0xff] %vm526_vm13, %v1079_v63  ;;  %v1824_v36 = vpop.xlane.xlu0 %1823  ;;  %4740 = vmatmul.msk.f32.gmra.mxu3 %vm94_vm0, %v6776_v4  ;;  %4742 = vmatmul.msk.f32.gmra.mxu0 %vm94_vm0, %v6776_v4  ;;  %v4272_v63 = vpop.f32.mrf.mxu2  ;;  %v1961_v49 = vsel %vm94_vm0, %v1957_v2, 0.0 }
0x2aa0   :  { %1419 = vst.msk [vmem:[#allocation2 + $0x50] sm:$0xff] %vm531_vm14, %v1417_v38  ;;  %v1826_v5 = vsub.f32 %v7215_v31, %v1824_v36  ;;  %v1518_v31 = vpop.xlane.xlu2 %1517 }
0x2aa2   :  { %v5075_v20 = vpop.eup %5074  ;;  %v1829_v51 = vmul.f32 1.442695, %v1826_v5 }
0x2aa3   :  { %1833 = vrot.lane.b32.xlu2 %v5075_v20, %s5225_s1  ;;  %v7229_v20 = vld [vmem:[#allocation15_spill] sm:$0xff] }
0x2aa4   :  { %5076 = vpow2.f32 %v1829_v51  ;;  %v1858_v51 = vcvt.s32.f32 %v7229_v20 }
0x2aa7   :  { %v4275_v47 = vpop.f32.mrf.mxu2 }
0x2aaa   :  { %v5077_v14 = vpop.eup %5076 }
0x2aab   :  { %1835 = vrot.lane.b32.xlu0 %v5077_v14, %s5225_s1  ;;  %1864 = vrot.lane.b32.xlu2 %v7221_v1, %s5226_s28 }
0x2aae   :  { %v1423_v50 = vpop.permute.xlu1 %1422 }
0x2aaf   :  { %1427 = vst.msk [vmem:[#allocation2 + $0x50] sm:$0xff] %vm540_vm15, %v1423_v50 }
0x2ad4   :  { %1959 = vadd.xlane.f32.xlu2 %v1958_v32 }
0x2ad9   :  { %v1521_v23 = vpop.xlane.xlu1 %1520 }
0x2afd   :  { %v1834_v58 = vpop.permute.xlu2 %1833 }
0x2afe   :  { %v1839_v53 = vsel %vm509_vm12, %v1834_v58, 0.0  ;;  %v7230_v58 = vld [vmem:[#allocation17_spill] sm:$0xff] }
0x2aff   :  { %1840 = vadd.xlane.f32.xlu1 %v1839_v53  ;;  %v1859_v53 = vcvt.s32.f32 %v7230_v58 }
0x2b18   :  { %1862 = vrot.lane.b32.xlu1 %v7224_v11, %s5226_s28  ;;  %v4273_v11 = vadd.f32 %v4272_v63, %v4220_v24 }
0x2b1c   :  { %v4223_v33 = vpop.f32.mrf.mxu0 }
0x2b1d   :  { %v4276_v10 = vadd.f32 %v4275_v47, %v4223_v33  ;;  %v1836_v60 = vpop.permute.xlu0 %1835  ;;  %v6825_v47 = vadd.f32 %v4273_v11, %v5413_v56 }
0x2b1e   :  { %v1842_v27 = vsel %vm509_vm12, %v1836_v60, 0.0 }
0x2b1f   :  { %v6798_v44 = vadd.f32 %v4276_v10, %v5413_v56  ;;  %1843 = vadd.xlane.f32.xlu0 %v1842_v27  ;;  %v7231_v56 = vld [vmem:[#allocation22_spill] sm:$0xff]  ;;  %v7232_v27 = vld [vmem:[#allocation24_spill] sm:$0xff] }
0x2b21   :  { %5078 = vtanh.f32 %v6798_v44 }
0x2b27   :  { %v5079_v61 = vpop.eup %5078  ;;  %2262 = vmax.xlane.f32.xlu0 %v2261_v35  ;;  %v4249_v35 = vpop.f32.mrf.mxu1 }
0x2b28   :  { %4366 = vrot.lane.b32.xlu2 %v5079_v61, %s5224_s19 }
0x2b2f   :  { %2265 = vmax.xlane.f32.xlu0 %v2264_v17  ;;  %v4252_v18 = vpop.f32.mrf.mxu1 }
0x2b42   :  { %1962 = vadd.xlane.f32.xlu1 %v1961_v49 }
0x2b72   :  { %v1841_v40 = vpop.xlane.xlu1 %1840 }
0x2b73   :  { %5080 = vlog2.f32 %v1841_v40 }
0x2b79   :  { %v5081_v52 = vpop.eup %5080 }
0x2b7a   :  { %v1846_v38 = vmul.f32 0.6931472, %v5081_v52 }
0x2b7c   :  { %v1849_v36 = vsub.f32 %v6760_v7, %v1846_v38 }
0x2b7e   :  { %1854 = vst.msk [vmem:[#allocation2 + $0x60] sm:$0xff] %vm488_vm8, %v1849_v36 }
0x2b7f   :  { %1856 = vst.msk [vmem:[#allocation2 + $0x60] sm:$0xff] %vm526_vm13, %v1518_v31  ;;  %v1865_v31 = vpop.permute.xlu2 %1864 }
0x2b80   :  { %1860 = vst.msk [vmem:[#allocation2 + $0x60] sm:$0xff] %vm531_vm14, %v1858_v51 }
0x2b8a   :  { %v1863_v14 = vpop.permute.xlu1 %1862 }
0x2b8b   :  { %1868 = vst.msk [vmem:[#allocation2 + $0x60] sm:$0xff] %vm540_vm15, %v1863_v14 }
0x2b92   :  { %v1844_v1 = vpop.xlane.xlu0 %1843 }
0x2b93   :  { %5082 = vlog2.f32 %v1844_v1 }
0x2b99   :  { %v5083_v50 = vpop.eup %5082 }
0x2b9a   :  { %v1848_v37 = vmul.f32 0.6931472, %v5083_v50  ;;  %v2263_v6 = vpop.xlane.xlu0 %2262 }
0x2b9b   :  { %v6816_v34 = vsub.f32 %v7225_v55, %v2263_v6  ;;  %v4197_v55 = vpop.f32.mrf.mxu3  ;;  %v7233_v6 = vld [vmem:[#allocation39_spill] sm:$0xff] }
0x2b9c   :  { %v1850_v7 = vsub.f32 %v1826_v5, %v1848_v37  ;;  %v4250_v61 = vadd.f32 %v4249_v35, %v4197_v55  ;;  %v7235_v35 = vld [vmem:[#allocation31_spill] sm:$0xff] }
0x2b9d   :  { %v2269_v32 = vmul.f32 1.442695, %v6816_v34 }
0x2b9e   :  { %1855 = vst.msk [vmem:[#allocation2 + $0x70] sm:$0xff] %vm488_vm8, %v1850_v7 }
0x2b9f   :  { %1857 = vst.msk [vmem:[#allocation2 + $0x70] sm:$0xff] %vm526_vm13, %v1521_v23  ;;  %5084 = vpow2.f32 %v2269_v32  ;;  %v6841_v23 = vpop.xlane.xlu2 %1959 }
0x2ba0   :  { %1861 = vst.msk [vmem:[#allocation2 + $0x70] sm:$0xff] %vm531_vm14, %v1859_v53  ;;  %5086 = vtanh.f32 %v6825_v47 }
0x2ba1   :  { %1869 = vst.msk [vmem:[#allocation2 + $0x70] sm:$0xff] %vm540_vm15, %v1865_v31  ;;  %v7234_v31 = vld [vmem:[#allocation40_spill] sm:$0xff] }
0x2ba2   :  { %v2266_v33 = vpop.xlane.xlu0 %2265 }
0x2ba3   :  { %v6828_v5 = vsub.f32 %v7226_v3, %v2266_v33  ;;  %v4278_v3 = vadd.f32 %v4250_v61, %v5425_v8  ;;  %v4200_v17 = vpop.f32.mrf.mxu3  ;;  %v2706_v33 = vsel %vm488_vm8, %v7234_v31, -inf  ;;  %v7236_v61 = vld [vmem:[#allocation36_spill] sm:$0xff] }
0x2ba4   :  { %v4253_v2 = vadd.f32 %v4252_v18, %v4200_v17 }
0x2ba5   :  { %v5085_v10 = vpop.eup %5084  ;;  %v2271_v63 = vmul.f32 1.442695, %v6828_v5  ;;  %v4747_v59 = vmul.f32 -1.442695, %v4278_v3  ;;  %v2398_v3 = vmul.f32 %v7236_v61, %v7235_v35 }
0x2ba6   :  { %2275 = vrot.lane.b32.xlu0 %v5085_v10, %s5225_s1  ;;  %v5087_v24 = vpop.eup %5086  ;;  %v4280_v49 = vadd.f32 %v4253_v2, %v5425_v8  ;;  %v2703_v8 = vsel %vm488_vm8, %v7233_v6, -inf }
0x2ba7   :  { %5088 = vpow2.f32 %v2271_v63  ;;  %v4367_v36 = vpop.permute.xlu2 %4366 }
0x2ba8   :  { %5090 = vpow2.f32 %v4747_v59  ;;  %v4749_v40 = vmul.f32 -1.442695, %v4280_v49 }
0x2baa   :  { %5092 = vpow2.f32 %v4749_v40  ;;  %v2400_v40 = vsel %vm94_vm0, %v2398_v3, 0.0 }
0x2bad   :  { %v5089_v60 = vpop.eup %5088 }
0x2bae   :  { %4364 = vrot.lane.b32.xlu0 %v5087_v24, %s5224_s19  ;;  %2277 = vrot.lane.b32.xlu2 %v5089_v60, %s5225_s1  ;;  %v5091_v52 = vpop.eup %5090 }
0x2baf   :  { %v4294_v38 = vadd.f32 1.0, %v5091_v52 }
0x2bb0   :  { %v5093_v20 = vpop.eup %5092 }
0x2bb1   :  { %5094 = vrcp.f32 %v4294_v38  ;;  %v4296_v51 = vadd.f32 1.0, %v5093_v20  ;;  %v4309_v60 = vand.u32 2147483648, %v4294_v38  ;;  %vm4303_vm5 = vweird.f32 %v4294_v38 }
0x2bb3   :  { %5096 = vrcp.f32 %v4296_v51  ;;  %v4310_v17 = vor.u32 1.1754944e-38, %v4309_v60  ;;  %v4339_v52 = vand.u32 2147483648, %v4296_v51  ;;  %vm4333_vm11 = vweird.f32 %v4296_v51  ;;  %v7239_v60 = vld [vmem:[#allocation27_spill] sm:$0xff] }
0x2bb6   :  { %2304 = vrot.lane.b32.xlu2 %v7231_v56, %s5226_s28  ;;  %v4307_v56 = vand.u32 2147483647, %v4294_v38 }
0x2bb7   :  { %v5095_v50 = vpop.eup %5094 }
0x2bb8   :  { %v4299_v37 = vmul.f32 %v5095_v50, %v4294_v38  ;;  %vm4304_vm4 = vweird.f32 %v5095_v50  ;;  %vm4308_vm9 = vcmp.eq.f32.partialorder %v4307_v56, 8.507059e+37  ;;  %v4337_v38 = vand.u32 2147483647, %v4296_v51 }
0x2bb9   :  { %v5097_v32 = vpop.eup %5096  ;;  %vm4305_vm1 = vmor %vm4303_vm5, %vm4304_vm4  ;;  %v2301_v56 = vcvt.s32.f32 %v7239_v60 }
0x2bba   :  { %v4300_v7 = vsub.f32 1.0, %v4299_v37  ;;  %v4329_v58 = vmul.f32 %v5097_v32, %v4296_v51  ;;  %vm4334_vm10 = vweird.f32 %v5097_v32  ;;  %vm4338_vm3 = vcmp.eq.f32.partialorder %v4337_v38, 8.507059e+37  ;;  %v7237_v37 = vld [vmem:[#allocation33_spill] sm:$0xff] }
0x2bbb   :  { %vm4335_vm2 = vmor %vm4333_vm11, %vm4334_vm10 }
0x2bbc   :  { %v4301_v53 = vmul.f32 %v5095_v50, %v4300_v7  ;;  %v4330_v10 = vsub.f32 1.0, %v4329_v58 }
0x2bbe   :  { %2306 = vrot.lane.b32.xlu2 %v7232_v27, %s5226_s28  ;;  %v4302_v24 = vadd.f32 %v5095_v50, %v4301_v53  ;;  %v4331_v27 = vmul.f32 %v5097_v32, %v4330_v10 }
0x2bc0   :  { %v4306_v55 = vsel %vm4305_vm1, %v5095_v50, %v4302_v24  ;;  %v4332_v2 = vadd.f32 %v5097_v32, %v4331_v27 }
0x2bc1   :  { %v6851_v59 = vsel %vm4308_vm9, %v4310_v17, %v4306_v55 }
0x2bc2   :  { %v4336_v20 = vsel %vm4335_vm2, %v5097_v32, %v4332_v2 }
0x2c08   :  { %v2278_v14 = vpop.permute.xlu2 %2277 }
0x2c09   :  { %v2284_v1 = vsel %vm509_vm12, %v2278_v14, 0.0  ;;  %v4340_v14 = vor.u32 1.1754944e-38, %v4339_v52 }
0x2c0a   :  { %2285 = vadd.xlane.f32.xlu0 %v2284_v1 }
0x2c0b   :  { %v4341_v1 = vsel %vm4338_vm3, %v4340_v14, %v4336_v20 }
0x2c0c   :  { %v4371_v50 = vmul.f32 %v4367_v36, %v4341_v1  ;;  %v4361_v38 = vmul.f32 %v4341_v1, %v5431_v57 }
0x2c12   :  { %2704 = vmax.xlane.f32.xlu0 %v2703_v8  ;;  %v7238_v8 = vld [vmem:[#allocation38_spill] sm:$0xff] }
0x2c13   :  { %v2399_v7 = vmul.f32 %v7238_v8, %v7237_v37  ;;  %v7243_v37 = vld [vmem:[#allocation46_spill] sm:$0xff] }
0x2c15   :  { %v2403_v58 = vsel %vm94_vm0, %v2399_v7, 0.0  ;;  %v4360_v7 = vmul.f32 %v6851_v59, %v5431_v57  ;;  %v3148_v57 = vsel %vm488_vm8, %v6346_v25, -inf }
0x2c18   :  { %v2276_v11 = vpop.permute.xlu0 %2275 }
0x2c19   :  { %v2281_v63 = vsel %vm509_vm12, %v2276_v11, 0.0  ;;  %v2305_v11 = vpop.permute.xlu2 %2304 }
0x2c1a   :  { %2282 = vadd.xlane.f32.xlu1 %v2281_v63  ;;  %2707 = vmax.xlane.f32.xlu0 %v2706_v33  ;;  %v1963_v33 = vpop.xlane.xlu1 %1962 }
0x2c20   :  { %v4365_v18 = vpop.permute.xlu0 %4364 }
0x2c21   :  { %v4370_v49 = vmul.f32 %v4365_v18, %v6851_v59  ;;  %v2307_v27 = vpop.permute.xlu2 %2306 }
0x2c22   :  { %2401 = vadd.xlane.f32.xlu1 %v2400_v40  ;;  %v7240_v40 = vld [vmem:[#allocation25_spill] sm:$0xff] }
0x2c23   :  { %4374 = vrot.lane.b32.xlu2 %v4370_v49, %s5224_s19  ;;  %v2300_v52 = vcvt.s32.f32 %v7240_v40 }
0x2c2b   :  { %4376 = vrot.lane.b32.xlu2 %v4371_v50, %s5224_s19  ;;  %v7242_v50 = vld [vmem:[#allocation41_spill] sm:$0xff] }
0x2c2c   :  { %v2840_v8 = vmul.f32 %v7243_v37, %v7242_v50 }
0x2c54   :  { %2404 = vadd.xlane.f32.xlu2 %v2403_v58  ;;  %v7244_v58 = vld [vmem:[#allocation43_spill] sm:$0xff] }
0x2c7d   :  { %v2286_v53 = vpop.xlane.xlu0 %2285  ;;  %v4375_v3 = vpop.permute.xlu2 %4374 }
0x2c7e   :  { %5098 = vlog2.f32 %v2286_v53  ;;  %v6892_v1 = vadd.f32 %v4375_v3, %v4360_v7  ;;  %v7245_v53 = vld [vmem:[#allocation48_spill] sm:$0xff] }
0x2c84   :  { %v5099_v51 = vpop.eup %5098 }
0x2c85   :  { %v2290_v10 = vmul.f32 0.6931472, %v5099_v51  ;;  %v2705_v63 = vpop.xlane.xlu0 %2704 }
0x2c86   :  { %v6861_v32 = vsub.f32 %v7233_v6, %v2705_v63 }
0x2c87   :  { %v2292_v36 = vsub.f32 %v6828_v5, %v2290_v10  ;;  %v4750_v10 = vmul.f32 -1.442695, %v6798_v44 }
0x2c88   :  { %v2711_v24 = vmul.f32 1.442695, %v6861_v32 }
0x2c89   :  { %2297 = vst.msk [vmem:[#allocation2 + $0x90] sm:$0xff] %vm488_vm8, %v2292_v36 }
0x2c8a   :  { %2299 = vst.msk [vmem:[#allocation2 + $0x90] sm:$0xff] %vm526_vm13, %v1963_v33  ;;  %5100 = vpow2.f32 %v2711_v24 }
0x2c8b   :  { %2303 = vst.msk [vmem:[#allocation2 + $0x90] sm:$0xff] %vm531_vm14, %v2301_v56 }
0x2c8c   :  { %2311 = vst.msk [vmem:[#allocation2 + $0x90] sm:$0xff] %vm540_vm15, %v2307_v27 }
0x2c8d   :  { %v2708_v55 = vpop.xlane.xlu0 %2707  ;;  %v2283_v35 = vpop.xlane.xlu1 %2282 }
0x2c8e   :  { %v6871_v6 = vsub.f32 %v7234_v31, %v2708_v55  ;;  %5102 = vlog2.f32 %v2283_v35  ;;  %v4377_v31 = vpop.permute.xlu2 %4376 }
0x2c8f   :  { %v4381_v20 = vadd.f32 %v4377_v31, %v4361_v38 }
0x2c90   :  { %v5101_v5 = vpop.eup %5100  ;;  %v2713_v61 = vmul.f32 1.442695, %v6871_v6 }
0x2c91   :  { %2717 = vrot.lane.b32.xlu1 %v5101_v5, %s5225_s1 }
0x2c92   :  { %5104 = vpow2.f32 %v2713_v61 }
0x2c93   :  { %5106 = vtanh.f32 %v4381_v20 }
0x2c94   :  { %v5103_v17 = vpop.eup %5102  ;;  %5108 = vtanh.f32 %v6892_v1 }
0x2c95   :  { %v2288_v18 = vmul.f32 0.6931472, %v5103_v17  ;;  %5110 = vpow2.f32 %v4750_v10  ;;  %v6900_v24 = vpop.xlane.xlu1 %2401 }
0x2c97   :  { %v2291_v2 = vsub.f32 %v6816_v34, %v2288_v18  ;;  %v7241_v34 = vld [vmem:[#allocation34_spill] sm:$0xff] }
0x2c98   :  { %v5105_v49 = vpop.eup %5104 }
0x2c99   :  { %2296 = vst.msk [vmem:[#allocation2 + $0x80] sm:$0xff] %vm488_vm8, %v2291_v2  ;;  %2719 = vrot.lane.b32.xlu0 %v5105_v49, %s5225_s1  ;;  %v5107_v14 = vpop.eup %5106  ;;  %v4748_v49 = vmul.f32 -1.442695, %v6825_v47 }
0x2c9a   :  { %2298 = vst.msk [vmem:[#allocation2 + $0x80] sm:$0xff] %vm526_vm13, %v6841_v23  ;;  %v2842_v23 = vsel %vm94_vm0, %v2840_v8, 0.0  ;;  %v5109_v33 = vpop.eup %5108 }
0x2c9b   :  { %2302 = vst.msk [vmem:[#allocation2 + $0x80] sm:$0xff] %vm531_vm14, %v2300_v52  ;;  %v5111_v63 = vpop.eup %5110 }
0x2c9c   :  { %2310 = vst.msk [vmem:[#allocation2 + $0x80] sm:$0xff] %vm540_vm15, %v2305_v11  ;;  %v2841_v11 = vmul.f32 %v7245_v53, %v7244_v58  ;;  %v4297_v36 = vadd.f32 1.0, %v5111_v63 }
0x2c9e   :  { %v2845_v51 = vsel %vm94_vm0, %v2841_v11, 0.0  ;;  %5112 = vrcp.f32 %v4297_v36  ;;  %v4354_v17 = vand.u32 2147483648, %v4297_v36  ;;  %vm4348_vm5 = vweird.f32 %v4297_v36 }
0x2c9f   :  { %v4352_v18 = vand.u32 2147483647, %v4297_v36  ;;  %5114 = vpow2.f32 %v4748_v49 }
0x2ca0   :  { %v4355_v40 = vor.u32 1.1754944e-38, %v4354_v17 }
0x2ca1   :  { %2748 = vrot.lane.b32.xlu0 %v7241_v34, %s5226_s28  ;;  %vm4353_vm9 = vcmp.eq.f32.partialorder %v4352_v18, 8.507059e+37 }
0x2ca4   :  { %v5113_v56 = vpop.eup %5112 }
0x2ca5   :  { %v4344_v27 = vmul.f32 %v5113_v56, %v4297_v36  ;;  %vm4349_vm4 = vweird.f32 %v5113_v56  ;;  %v5115_v34 = vpop.eup %5114  ;;  %v3145_v36 = vsel %vm488_vm8, %v6342_v12, -inf }
0x2ca6   :  { %vm4350_vm1 = vmor %vm4348_vm5, %vm4349_vm4  ;;  %v4295_v50 = vadd.f32 1.0, %v5115_v34 }
0x2ca7   :  { %v4345_v44 = vsub.f32 1.0, %v4344_v27 }
0x2ca8   :  { %5116 = vrcp.f32 %v4295_v50  ;;  %v4324_v53 = vand.u32 2147483648, %v4295_v50  ;;  %vm4318_vm11 = vweird.f32 %v4295_v50  ;;  %v4322_v11 = vand.u32 2147483647, %v4295_v50 }
0x2ca9   :  { %4388 = vrot.lane.b32.xlu0 %v5107_v14, %s5224_s19  ;;  %v4346_v5 = vmul.f32 %v5113_v56, %v4345_v44  ;;  %v7246_v14 = vld [vmem:[#allocation32_spill] sm:$0xff] }
0x2caa   :  { %vm4323_vm3 = vcmp.eq.f32.partialorder %v4322_v11, 8.507059e+37 }
0x2cab   :  { %v4347_v3 = vadd.f32 %v5113_v56, %v4346_v5 }
0x2cad   :  { %v4351_v2 = vsel %vm4350_vm1, %v5113_v56, %v4347_v3  ;;  %v7247_v3 = vld [vmem:[#allocation35_spill] sm:$0xff] }
0x2cae   :  { %v4356_v52 = vsel %vm4353_vm9, %v4355_v40, %v4351_v2  ;;  %v5117_v37 = vpop.eup %5116  ;;  %v2742_v17 = vcvt.s32.f32 %v7247_v3 }
0x2caf   :  { %v4314_v8 = vmul.f32 %v5117_v37, %v4295_v50  ;;  %vm4319_vm10 = vweird.f32 %v5117_v37 }
0x2cb0   :  { %vm4320_vm2 = vmor %vm4318_vm11, %vm4319_vm10 }
0x2cbb   :  { %2843 = vadd.xlane.f32.xlu1 %v2842_v23  ;;  %v4315_v23 = vsub.f32 1.0, %v4314_v8 }
0x2cbd   :  { %v4316_v47 = vmul.f32 %v5117_v37, %v4315_v23 }
0x2cbf   :  { %v4317_v58 = vadd.f32 %v5117_v37, %v4316_v47 }
0x2cd3   :  { %2846 = vadd.xlane.f32.xlu0 %v2845_v51  ;;  %v4321_v51 = vsel %vm4320_vm2, %v5117_v37, %v4317_v58  ;;  %v7250_v58 = vld [vmem:[#allocation42_spill] sm:$0xff] }
0x2cd4   :  { %4386 = vrot.lane.b32.xlu1 %v5109_v33, %s5224_s19 }
0x2cfe   :  { %3149 = vmax.xlane.f32.xlu1 %v3148_v57  ;;  %v2405_v57 = vpop.xlane.xlu2 %2404 }
0x2d03   :  { %v2718_v59 = vpop.permute.xlu1 %2717 }
0x2d04   :  { %v2723_v60 = vsel %vm509_vm12, %v2718_v59, 0.0 }
0x2d05   :  { %2724 = vadd.xlane.f32.xlu2 %v2723_v60 }
0x2d0b   :  { %v2720_v55 = vpop.permute.xlu0 %2719 }
0x2d0c   :  { %v2726_v35 = vsel %vm509_vm12, %v2720_v55, 0.0 }
0x2d0d   :  { %2727 = vadd.xlane.f32.xlu2 %v2726_v35 }
0x2d13   :  { %v6906_v61 = vpop.permute.xlu0 %2748 }
0x2d1b   :  { %v4389_v31 = vpop.permute.xlu0 %4388 }
0x2d1c   :  { %v4393_v38 = vmul.f32 %v4389_v31, %v4356_v52 }
0x2d1e   :  { %4523 = vst.msk [vmem:[#allocation2 + $0x138] sm:$0xff] %vm410_vm6, %v4393_v38 }
0x2d1f   :  { %4525 = vst.msk [vmem:[#allocation2 + $0x138] sm:$0xff] %vm545_vm7, %v4381_v20  ;;  %v4325_v20 = vor.u32 1.1754944e-38, %v4324_v53 }
0x2d21   :  { %v4326_v33 = vsel %vm4323_vm3, %v4325_v20, %v4321_v51 }
0x2d25   :  { %2746 = vrot.lane.b32.xlu2 %v7246_v14, %s5226_s28 }
0x2d2e   :  { %v6913_v7 = vpop.xlane.xlu1 %2843 }
0x2d46   :  { %v4387_v10 = vpop.permute.xlu1 %4386  ;;  %v2847_v8 = vpop.xlane.xlu0 %2846 }
0x2d47   :  { %v4392_v63 = vmul.f32 %v4387_v10, %v4326_v33  ;;  %v7251_v10 = vld [vmem:[#allocation47_spill] sm:$0xff] }
0x2d49   :  { %4522 = vst.msk [vmem:[#allocation2 + $0x128] sm:$0xff] %vm410_vm6, %v4392_v63  ;;  %4751 = vmatmul.msk.f32.vlgmr.msra.gmra.mxu3 %vm410_vm6, %v4392_v63  ;;  %v3185_v63 = vcvt.s32.f32 %v7251_v10 }
0x2d4a   :  { %4524 = vst.msk [vmem:[#allocation2 + $0x128] sm:$0xff] %vm545_vm7, %v6892_v1 }
0x2d4e   :  { %3146 = vmax.xlane.f32.xlu2 %v3145_v36 }
0x2d51   :  { %4752 = vmatmul.msk.f32.gmra.mxu3 %vm410_vm6, %v4393_v38 }
0x2d71   :  { %v3150_v59 = vpop.xlane.xlu1 %3149 }
0x2d72   :  { %v3152_v60 = vsub.f32 %v6346_v25, %v3150_v59  ;;  %v7248_v25 = vld [vmem:[#allocation44_spill] sm:$0xff] }
0x2d74   :  { %v3155_v56 = vmul.f32 1.442695, %v3152_v60 }
0x2d76   :  { %5118 = vpow2.f32 %v3155_v56 }
0x2d78   :  { %v2725_v27 = vpop.xlane.xlu2 %2724 }
0x2d79   :  { %5120 = vlog2.f32 %v2725_v27  ;;  %v7252_v27 = vld [vmem:[#allocation50_spill] sm:$0xff] }
0x2d7c   :  { %v5119_v55 = vpop.eup %5118 }
0x2d7d   :  { %3161 = vrot.lane.b32.xlu1 %v5119_v55, %s5225_s1  ;;  %v7253_v55 = vld [vmem:[#allocation54_spill] sm:$0xff] }
0x2d7f   :  { %v5121_v35 = vpop.eup %5120 }
0x2d80   :  { %v2730_v44 = vmul.f32 0.6931472, %v5121_v35  ;;  %v2728_v1 = vpop.xlane.xlu2 %2727 }
0x2d81   :  { %5122 = vlog2.f32 %v2728_v1 }
0x2d82   :  { %v2733_v5 = vsub.f32 %v6861_v32, %v2730_v44  ;;  %v7249_v32 = vld [vmem:[#allocation37_spill] sm:$0xff] }
0x2d83   :  { %v2743_v52 = vcvt.s32.f32 %v7249_v32 }
0x2d84   :  { %2738 = vst.msk [vmem:[#allocation2 + $0xa0] sm:$0xff] %vm488_vm8, %v2733_v5 }
0x2d85   :  { %2740 = vst.msk [vmem:[#allocation2 + $0xa0] sm:$0xff] %vm526_vm13, %v6900_v24  ;;  %3190 = vrot.lane.b32.xlu1 %v7248_v25, %s5226_s28  ;;  %v3282_v24 = vmul.f32 %v6411_v54, %v6357_v30  ;;  %v3587_v30 = vsel %vm488_vm8, %v6457_v45, -inf  ;;  %v3590_v54 = vsel %vm488_vm8, %v6461_v41, -inf }
0x2d86   :  { %2744 = vst.msk [vmem:[#allocation2 + $0xa0] sm:$0xff] %vm531_vm14, %v2742_v17 }
0x2d87   :  { %v5123_v18 = vpop.eup %5122  ;;  %v3284_v31 = vsel %vm94_vm0, %v3282_v24, 0.0  ;;  %v7255_v24 = vld [vmem:[#allocation45_spill] sm:$0xff] }
0x2d88   :  { %v2732_v2 = vmul.f32 0.6931472, %v5123_v18  ;;  %v2747_v49 = vpop.permute.xlu2 %2746  ;;  %v7254_v18 = vld [vmem:[#allocation49_spill] sm:$0xff] }
0x2d89   :  { %2752 = vst.msk [vmem:[#allocation2 + $0xa0] sm:$0xff] %vm540_vm15, %v2747_v49 }
0x2d8a   :  { %v2734_v40 = vsub.f32 %v6871_v6, %v2732_v2  ;;  %v4032_v6 = vsel %vm488_vm8, %v6581_v0, -inf }
0x2d8c   :  { %2739 = vst.msk [vmem:[#allocation2 + $0xb0] sm:$0xff] %vm488_vm8, %v2734_v40 }
0x2d8d   :  { %2741 = vst.msk [vmem:[#allocation2 + $0xb0] sm:$0xff] %vm526_vm13, %v2405_v57 }
0x2d8e   :  { %2745 = vst.msk [vmem:[#allocation2 + $0xb0] sm:$0xff] %vm531_vm14, %v2743_v52 }
0x2d8f   :  { %2753 = vst.msk [vmem:[#allocation2 + $0xb0] sm:$0xff] %vm540_vm15, %v6906_v61 }
0x2daf   :  { %3285 = vadd.xlane.f32.xlu1 %v3284_v31  ;;  %v3184_v31 = vcvt.s32.f32 %v7255_v24 }
0x2db7   :  { %4033 = vmax.xlane.f32.xlu1 %v4032_v6 }
0x2dc1   :  { %v3147_v38 = vpop.xlane.xlu2 %3146 }
0x2dc2   :  { %v3151_v34 = vsub.f32 %v6342_v12, %v3147_v38  ;;  %v4029_v12 = vsel %vm488_vm8, %v6570_v22, -inf  ;;  %v3724_v38 = vmul.f32 %v6523_v9, %v6472_v42 }
0x2dc4   :  { %v3153_v14 = vmul.f32 1.442695, %v3151_v34 }
0x2dc6   :  { %5124 = vpow2.f32 %v3153_v14 }
0x2dcc   :  { %v5125_v50 = vpop.eup %5124  ;;  %v6982_v40 = vpop.f32.mrf.mxu3 }
0x2dcd   :  { %3159 = vrot.lane.b32.xlu0 %v5125_v50, %s5225_s1  ;;  %v4471_v52 = vsel %vm488_vm8, %v6982_v40, -inf }
0x2def   :  { %v3162_v37 = vpop.permute.xlu1 %3161 }
0x2df0   :  { %v3168_v61 = vsel %vm509_vm12, %v3162_v37, 0.0 }
0x2df7   :  { %3169 = vadd.xlane.f32.xlu0 %v3168_v61  ;;  %v3191_v36 = vpop.permute.xlu1 %3190 }
0x2dff   :  { %3588 = vmax.xlane.f32.xlu0 %v3587_v30 }
0x2e07   :  { %3591 = vmax.xlane.f32.xlu0 %v3590_v54 }
0x2e0f   :  { %4030 = vmax.xlane.f32.xlu0 %v4029_v12 }
0x2e22   :  { %v3286_v61 = vpop.xlane.xlu1 %3285 }
0x2e3f   :  { %v3160_v23 = vpop.permute.xlu0 %3159 }
0x2e40   :  { %v3165_v47 = vsel %vm509_vm12, %v3160_v23, 0.0 }
0x2e41   :  { %3166 = vadd.xlane.f32.xlu2 %v3165_v47 }
0x2e59   :  { %3188 = vrot.lane.b32.xlu2 %v7250_v58, %s5226_s28 }
0x2e6a   :  { %v3170_v53 = vpop.xlane.xlu0 %3169 }
0x2e6b   :  { %5126 = vlog2.f32 %v3170_v53 }
0x2e71   :  { %v5127_v11 = vpop.eup %5126 }
0x2e72   :  { %v3174_v51 = vmul.f32 0.6931472, %v5127_v11  ;;  %v3589_v20 = vpop.xlane.xlu0 %3588 }
0x2e74   :  { %v3176_v33 = vsub.f32 %v3152_v60, %v3174_v51  ;;  %v3283_v60 = vmul.f32 %v7253_v55, %v7252_v27 }
0x2e76   :  { %3181 = vst.msk [vmem:[#allocation2 + $0xd0] sm:$0xff] %vm488_vm8, %v3176_v33  ;;  %v3287_v35 = vsel %vm94_vm0, %v3283_v60, 0.0 }
0x2e77   :  { %3183 = vst.msk [vmem:[#allocation2 + $0xd0] sm:$0xff] %vm526_vm13, %v2847_v8  ;;  %v4034_v8 = vpop.xlane.xlu1 %4033 }
0x2e78   :  { %3187 = vst.msk [vmem:[#allocation2 + $0xd0] sm:$0xff] %vm531_vm14, %v3185_v63  ;;  %v6999_v42 = vsub.f32 %v6581_v0, %v4034_v8  ;;  %v4423_v0 = vsel %vm94_vm0, %v6982_v40, -inf  ;;  %v7256_v63 = vld [vmem:[#allocation51_spill] sm:$0xff] }
0x2e79   :  { %3195 = vst.msk [vmem:[#allocation2 + $0xd0] sm:$0xff] %vm540_vm15, %v3191_v36 }
0x2e7a   :  { %v3592_v57 = vpop.xlane.xlu0 %3591  ;;  %v4039_v9 = vmul.f32 1.442695, %v6999_v42 }
0x2e7b   :  { %v6963_v59 = vsub.f32 %v6461_v41, %v3592_v57  ;;  %v6975_v41 = vsub.f32 %v6457_v45, %v3589_v20  ;;  %v4420_v20 = vpop.f32.mrf.mxu3 }
0x2e7c   :  { %v4474_v33 = vsel %vm488_vm8, %v4420_v20, -inf  ;;  %v4426_v10 = vsel %vm94_vm0, %v4420_v20, -inf }
0x2e7d   :  { %v3597_v56 = vmul.f32 1.442695, %v6963_v59  ;;  %v3595_v25 = vmul.f32 1.442695, %v6975_v41 }
0x2e7f   :  { %5128 = vpow2.f32 %v3597_v56 }
0x2e82   :  { %3288 = vadd.xlane.f32.xlu2 %v3287_v35  ;;  %v4031_v44 = vpop.xlane.xlu0 %4030 }
0x2e83   :  { %v6970_v1 = vsub.f32 %v6570_v22, %v4031_v44  ;;  %v7257_v44 = vld [vmem:[#allocation53_spill] sm:$0xff] }
0x2e85   :  { %v5129_v5 = vpop.eup %5128  ;;  %v4037_v3 = vmul.f32 1.442695, %v6970_v1 }
0x2e86   :  { %3603 = vrot.lane.b32.xlu0 %v5129_v5, %s5225_s1  ;;  %v3627_v5 = vcvt.s32.f32 %v7257_v44 }
0x2e87   :  { %5130 = vpow2.f32 %v4037_v3 }
0x2e88   :  { %5132 = vpow2.f32 %v3595_v25 }
0x2e8d   :  { %v5131_v17 = vpop.eup %5130 }
0x2e8e   :  { %4043 = vrot.lane.b32.xlu0 %v5131_v17, %s5225_s1  ;;  %v5133_v22 = vpop.eup %5132 }
0x2e96   :  { %3630 = vrot.lane.b32.xlu0 %v7254_v18, %s5226_s28 }
0x2e9a   :  { %3601 = vrot.lane.b32.xlu2 %v5133_v22, %s5225_s1  ;;  %v7258_v22 = vld [vmem:[#allocation52_spill] sm:$0xff] }
0x2eb4   :  { %v3167_v2 = vpop.xlane.xlu2 %3166 }
0x2eb5   :  { %5134 = vlog2.f32 %v3167_v2  ;;  %v3626_v2 = vcvt.s32.f32 %v7258_v22 }
0x2eb6   :  { %5136 = vpow2.f32 %v4039_v9 }
0x2ebb   :  { %v5135_v49 = vpop.eup %5134 }
0x2ebc   :  { %v3172_v32 = vmul.f32 0.6931472, %v5135_v49  ;;  %v3189_v6 = vpop.permute.xlu2 %3188  ;;  %v5137_v23 = vpop.eup %5136  ;;  %v4068_v49 = vcvt.s32.f32 %v6518_v26 }
0x2ebe   :  { %v3175_v45 = vsub.f32 %v3151_v34, %v3172_v32  ;;  %v3726_v34 = vsel %vm94_vm0, %v3724_v38, 0.0 }
0x2ec0   :  { %3180 = vst.msk [vmem:[#allocation2 + $0xc0] sm:$0xff] %vm488_vm8, %v3175_v45  ;;  %4472 = vmax.xlane.f32.xlu0 %v4471_v52 }
0x2ec1   :  { %3182 = vst.msk [vmem:[#allocation2 + $0xc0] sm:$0xff] %vm526_vm13, %v6913_v7 }
0x2ec2   :  { %3186 = vst.msk [vmem:[#allocation2 + $0xc0] sm:$0xff] %vm531_vm14, %v3184_v31 }
0x2ec3   :  { %3194 = vst.msk [vmem:[#allocation2 + $0xc0] sm:$0xff] %vm540_vm15, %v3189_v6 }
0x2ec8   :  { %3727 = vadd.xlane.f32.xlu0 %v3726_v34 }
0x2ef5   :  { %v3289_v14 = vpop.xlane.xlu2 %3288 }
0x2ef8   :  { %v3604_v50 = vpop.permute.xlu0 %3603 }
0x2ef9   :  { %v3610_v37 = vsel %vm509_vm12, %v3604_v50, 0.0 }
0x2efa   :  { %3611 = vadd.xlane.f32.xlu2 %v3610_v37 }
0x2efd   :  { %v3602_v30 = vpop.permute.xlu2 %3601 }
0x2efe   :  { %v3607_v7 = vsel %vm509_vm12, %v3602_v30, 0.0 }
0x2eff   :  { %3608 = vadd.xlane.f32.xlu1 %v3607_v7 }
0x2f00   :  { %v4044_v54 = vpop.permute.xlu0 %4043 }
0x2f01   :  { %v4049_v12 = vsel %vm509_vm12, %v4044_v54, 0.0 }
0x2f02   :  { %4050 = vadd.xlane.f32.xlu2 %v4049_v12 }
0x2f08   :  { %v3631_v47 = vpop.permute.xlu0 %3630 }
0x2f18   :  { %4045 = vrot.lane.b32.xlu1 %v5137_v23, %s5225_s1 }
0x2f33   :  { %v4473_v58 = vpop.xlane.xlu0 %4472 }
0x2f34   :  { %v7004_v53 = vsub.f32 %v6982_v40, %v4473_v58 }
0x2f36   :  { %v4479_v11 = vmul.f32 1.442695, %v7004_v53 }
0x2f38   :  { %5138 = vpow2.f32 %v4479_v11 }
0x2f3b   :  { %v3728_v32 = vpop.xlane.xlu0 %3727 }
0x2f3e   :  { %v5139_v51 = vpop.eup %5138 }
0x2f3f   :  { %4485 = vrot.lane.b32.xlu0 %v5139_v51, %s5225_s1 }
0x2f42   :  { %4424 = vmax.xlane.f32.xlu1 %v4423_v0 }
0x2f4a   :  { %4475 = vmax.xlane.f32.xlu1 %v4474_v33 }
0x2f52   :  { %4427 = vmax.xlane.f32.xlu1 %v4426_v10 }
0x2f6b   :  { %3632 = vrot.lane.b32.xlu1 %v7256_v63, %s5226_s28 }
0x2f6d   :  { %v3612_v36 = vpop.xlane.xlu2 %3611 }
0x2f6e   :  { %5140 = vlog2.f32 %v3612_v36 }
0x2f72   :  { %v3609_v57 = vpop.xlane.xlu1 %3608 }
0x2f73   :  { %5142 = vlog2.f32 %v3609_v57 }
0x2f74   :  { %v5141_v56 = vpop.eup %5140 }
0x2f75   :  { %v3616_v27 = vmul.f32 0.6931472, %v5141_v56  ;;  %v4051_v55 = vpop.xlane.xlu2 %4050 }
0x2f76   :  { %5144 = vlog2.f32 %v4051_v55 }
0x2f77   :  { %v3618_v60 = vsub.f32 %v6963_v59, %v3616_v27 }
0x2f79   :  { %v5143_v35 = vpop.eup %5142  ;;  %3623 = vst.msk [vmem:[#allocation2 + $0xf0] sm:$0xff] %vm488_vm8, %v3618_v60 }
0x2f7a   :  { %v3614_v3 = vmul.f32 0.6931472, %v5143_v35  ;;  %3625 = vst.msk [vmem:[#allocation2 + $0xf0] sm:$0xff] %vm526_vm13, %v3289_v14 }
0x2f7b   :  { %3629 = vst.msk [vmem:[#allocation2 + $0xf0] sm:$0xff] %vm531_vm14, %v3627_v5 }
0x2f7c   :  { %v5145_v17 = vpop.eup %5144  ;;  %v3617_v25 = vsub.f32 %v6975_v41, %v3614_v3 }
0x2f7d   :  { %v4056_v18 = vmul.f32 0.6931472, %v5145_v17 }
0x2f7e   :  { %3622 = vst.msk [vmem:[#allocation2 + $0xe0] sm:$0xff] %vm488_vm8, %v3617_v25 }
0x2f7f   :  { %3624 = vst.msk [vmem:[#allocation2 + $0xe0] sm:$0xff] %vm526_vm13, %v3286_v61  ;;  %v4059_v59 = vsub.f32 %v6970_v1, %v4056_v18  ;;  %v4166_v1 = vmul.f32 %v6741_v21, %v6614_v15  ;;  %v4167_v15 = vmul.f32 %v6776_v4, %v6668_v43  ;;  %v3725_v4 = vmul.f32 %v6538_v16, %v6497_v19 }
0x2f80   :  { %3628 = vst.msk [vmem:[#allocation2 + $0xe0] sm:$0xff] %vm531_vm14, %v3626_v2 }
0x2f81   :  { %3636 = vst.msk [vmem:[#allocation2 + $0xe0] sm:$0xff] %vm540_vm15, %v3631_v47  ;;  %v4168_v52 = vsel %vm94_vm0, %v4166_v1, 0.0  ;;  %v3729_v9 = vsel %vm94_vm0, %v3725_v4, 0.0  ;;  %v4510_v1 = vcvt.s32.f32 %v6736_v46 }
0x2f82   :  { %4064 = vst.msk [vmem:[#allocation2 + $0x100] sm:$0xff] %vm488_vm8, %v4059_v59 }
0x2f83   :  { %4066 = vst.msk [vmem:[#allocation2 + $0x100] sm:$0xff] %vm526_vm13, %v3728_v32 }
0x2f84   :  { %4070 = vst.msk [vmem:[#allocation2 + $0x100] sm:$0xff] %vm531_vm14, %v4068_v49 }
0x2f8a   :  { %v4046_v41 = vpop.permute.xlu1 %4045 }
0x2f8b   :  { %v4052_v45 = vsel %vm509_vm12, %v4046_v41, 0.0 }
0x2f8c   :  { %4053 = vadd.xlane.f32.xlu2 %v4052_v45 }
0x2f94   :  { %4169 = vadd.xlane.f32.xlu2 %v4168_v52 }
0x2fb1   :  { %v4486_v12 = vpop.permute.xlu0 %4485 }
0x2fb2   :  { %v4491_v8 = vsel %vm509_vm12, %v4486_v12, 0.0 }
0x2fb5   :  { %v4425_v24 = vpop.xlane.xlu1 %4424 }
0x2fb6   :  { %v4429_v26 = vsub.f32 %v6982_v40, %v4425_v24  ;;  %v4171_v40 = vsel %vm94_vm0, %v4167_v15, 0.0 }
0x2fb8   :  { %v4431_v31 = vmul.f32 1.442695, %v4429_v26 }
0x2fba   :  { %5146 = vpow2.f32 %v4431_v31 }
0x2fbd   :  { %v4476_v6 = vpop.xlane.xlu1 %4475 }
0x2fbe   :  { %v7035_v38 = vsub.f32 %v4420_v20, %v4476_v6 }
0x2fc0   :  { %v5147_v34 = vpop.eup %5146  ;;  %v4481_v14 = vmul.f32 1.442695, %v7035_v38 }
0x2fc1   :  { %v4435_v50 = vsel %vm94_vm0, %v5147_v34, 0.0 }
0x2fc2   :  { %5148 = vpow2.f32 %v4481_v14  ;;  %4436 = vadd.xlane.f32.xlu1 %v4435_v50 }
0x2fc5   :  { %v4428_v37 = vpop.xlane.xlu1 %4427 }
0x2fc6   :  { %v4430_v21 = vsub.f32 %v4420_v20, %v4428_v37 }
0x2fc8   :  { %v5149_v61 = vpop.eup %5148  ;;  %v4433_v30 = vmul.f32 1.442695, %v4430_v21 }
0x2fc9   :  { %4487 = vrot.lane.b32.xlu0 %v5149_v61, %s5225_s1 }
0x2fca   :  { %5150 = vpow2.f32 %v4433_v30  ;;  %4172 = vadd.xlane.f32.xlu1 %v4171_v40 }
0x2fd0   :  { %v7043_v7 = vpop.eup %5150 }
0x2fd1   :  { %v4438_v54 = vsel %vm94_vm0, %v7043_v7, 0.0 }
0x2fd2   :  { %4439 = vadd.xlane.f32.xlu2 %v4438_v54 }
0x2fda   :  { %4492 = vadd.xlane.f32.xlu2 %v4491_v8 }
0x2fdd   :  { %v3633_v43 = vpop.permute.xlu1 %3632 }
0x2fde   :  { %3637 = vst.msk [vmem:[#allocation2 + $0xf0] sm:$0xff] %vm540_vm15, %v3633_v43 }
0x2fe3   :  { %4514 = vrot.lane.b32.xlu1 %v6622_v28, %s5226_s28 }
0x2ff3   :  { %3730 = vadd.xlane.f32.xlu0 %v3729_v9 }
0x2fff   :  { %v4054_v23 = vpop.xlane.xlu2 %4053 }
0x3000   :  { %5152 = vlog2.f32 %v4054_v23 }
0x3006   :  { %v5153_v47 = vpop.eup %5152 }
0x3007   :  { %v4058_v58 = vmul.f32 0.6931472, %v5153_v47  ;;  %4072 = vrot.lane.b32.xlu0 %v6479_v29, %s5226_s28  ;;  %v4170_v0 = vpop.xlane.xlu2 %4169 }
0x3009   :  { %v4060_v11 = vsub.f32 %v6999_v42, %v4058_v58 }
0x300b   :  { %4065 = vst.msk [vmem:[#allocation2 + $0x110] sm:$0xff] %vm488_vm8, %v4060_v11 }
0x300f   :  { %4516 = vrot.lane.b32.xlu0 %v6674_v13, %s5226_s28 }
0x3035   :  { %v4437_v28 = vpop.xlane.xlu1 %4436 }
0x3036   :  { %5154 = vrcp.f32 %v4437_v28  ;;  %v4452_v10 = vand.u32 2147483648, %v4437_v28  ;;  %v4450_v29 = vand.u32 2147483647, %v4437_v28  ;;  %vm4446_vm7 = vweird.f32 %v4437_v28 }
0x3038   :  { %v4453_v36 = vor.u32 1.1754944e-38, %v4452_v10  ;;  %vm4451_vm5 = vcmp.eq.f32.partialorder %v4450_v29, 8.507059e+37 }
0x303b   :  { %v4488_v19 = vpop.permute.xlu0 %4487 }
0x303c   :  { %v5155_v16 = vpop.eup %5154  ;;  %v4494_v51 = vsel %vm509_vm12, %v4488_v19, 0.0 }
0x303d   :  { %v4442_v20 = vmul.f32 %v5155_v16, %v4437_v28  ;;  %4495 = vadd.xlane.f32.xlu2 %v4494_v51  ;;  %vm4447_vm6 = vweird.f32 %v5155_v16  ;;  %v4173_v22 = vpop.xlane.xlu1 %4172 }
0x303e   :  { %vm4448_vm4 = vmor %vm4446_vm7, %vm4447_vm6 }
0x303f   :  { %v4443_v33 = vsub.f32 1.0, %v4442_v20 }
0x3041   :  { %v4444_v63 = vmul.f32 %v5155_v16, %v4443_v33 }
0x3043   :  { %v4445_v42 = vadd.f32 %v5155_v16, %v4444_v63 }
0x3045   :  { %v4449_v57 = vsel %vm4448_vm4, %v5155_v16, %v4445_v42  ;;  %v4440_v13 = vpop.xlane.xlu2 %4439 }
0x3046   :  { %v4454_v56 = vsel %vm4451_vm5, %v4453_v36, %v4449_v57  ;;  %5156 = vrcp.f32 %v4440_v13  ;;  %v4467_v5 = vand.u32 2147483648, %v4440_v13  ;;  %v4465_v17 = vand.u32 2147483647, %v4440_v13 }
0x3047   :  { %v4455_v27 = vmul.f32 %v5147_v34, %v4454_v56  ;;  %vm4461_vm1 = vweird.f32 %v4440_v13  ;;  %v4511_v34 = vcvt.s32.f32 %v6768_v39 }
0x3048   :  { %v4468_v2 = vor.u32 1.1754944e-38, %v4467_v5  ;;  %vm4466_vm10 = vcmp.eq.f32.partialorder %v4465_v17, 8.507059e+37 }
0x3049   :  { %4504 = vst.msk [vmem:[#allocation2 + $0x120] sm:$0xff] %vm94_vm0, %v4455_v27 }
0x304c   :  { %v5157_v55 = vpop.eup %5156 }
0x304d   :  { %v4457_v60 = vmul.f32 %v5157_v55, %v4440_v13  ;;  %v4493_v35 = vpop.xlane.xlu2 %4492  ;;  %vm4462_vm12 = vweird.f32 %v5157_v55 }
0x304e   :  { %5158 = vlog2.f32 %v4493_v35  ;;  %vm4463_vm9 = vmor %vm4461_vm1, %vm4462_vm12 }
0x304f   :  { %v4458_v44 = vsub.f32 1.0, %v4457_v60 }
0x3051   :  { %v4459_v3 = vmul.f32 %v5157_v55, %v4458_v44 }
0x3053   :  { %v4460_v25 = vadd.f32 %v5157_v55, %v4459_v3 }
0x3054   :  { %v5159_v18 = vpop.eup %5158 }
0x3055   :  { %v4464_v59 = vsel %vm4463_vm9, %v5157_v55, %v4460_v25  ;;  %v4498_v49 = vmul.f32 0.6931472, %v5159_v18  ;;  %4074 = vrot.lane.b32.xlu2 %v6504_v62, %s5226_s28  ;;  %v4515_v52 = vpop.permute.xlu1 %4514  ;;  %v4069_v62 = vcvt.s32.f32 %v6531_v48 }
0x3056   :  { %v4469_v32 = vsel %vm4466_vm10, %v4468_v2, %v4464_v59 }
0x3057   :  { %v4470_v41 = vmul.f32 %v7043_v7, %v4469_v32  ;;  %v4501_v45 = vsub.f32 %v7004_v53, %v4498_v49 }
0x3059   :  { %4505 = vst.msk [vmem:[#allocation2 + $0x130] sm:$0xff] %vm94_vm0, %v4470_v41 }
0x305a   :  { %4506 = vst.msk [vmem:[#allocation2 + $0x120] sm:$0xff] %vm488_vm8, %v4501_v45 }
0x305b   :  { %4508 = vst.msk [vmem:[#allocation2 + $0x120] sm:$0xff] %vm526_vm13, %v4170_v0 }
0x305c   :  { %4512 = vst.msk [vmem:[#allocation2 + $0x120] sm:$0xff] %vm531_vm14, %v4510_v1 }
0x305d   :  { %4520 = vst.msk [vmem:[#allocation2 + $0x120] sm:$0xff] %vm540_vm15, %v4515_v52 }
0x3066   :  { %v3731_v24 = vpop.xlane.xlu0 %3730 }
0x3067   :  { %4067 = vst.msk [vmem:[#allocation2 + $0x110] sm:$0xff] %vm526_vm13, %v3731_v24 }
0x3068   :  { %4071 = vst.msk [vmem:[#allocation2 + $0x110] sm:$0xff] %vm531_vm14, %v4069_v62 }
0x3079   :  { %v4073_v53 = vpop.permute.xlu0 %4072 }
0x307a   :  { %4078 = vst.msk [vmem:[#allocation2 + $0x100] sm:$0xff] %vm540_vm15, %v4073_v53 }
0x3081   :  { %v4517_v14 = vpop.permute.xlu0 %4516 }
0x30b0   :  { %v4496_v46 = vpop.xlane.xlu2 %4495 }
0x30b1   :  { %5160 = vlog2.f32 %v4496_v46 }
0x30b7   :  { %v5161_v26 = vpop.eup %5160 }
0x30b8   :  { %v4500_v31 = vmul.f32 0.6931472, %v5161_v26  ;;  %v4075_v6 = vpop.permute.xlu2 %4074 }
0x30b9   :  { %4079 = vst.msk [vmem:[#allocation2 + $0x110] sm:$0xff] %vm540_vm15, %v4075_v6 }
0x30ba   :  { %v4502_v48 = vsub.f32 %v7035_v38, %v4500_v31 }
0x30bc   :  { %4507 = vst.msk [vmem:[#allocation2 + $0x130] sm:$0xff] %vm488_vm8, %v4502_v48 }
0x30bd   :  { %4509 = vst.msk [vmem:[#allocation2 + $0x130] sm:$0xff] %vm526_vm13, %v4173_v22 }
0x30be   :  { %4513 = vst.msk [vmem:[#allocation2 + $0x130] sm:$0xff] %vm531_vm14, %v4511_v34 }
0x30bf   :  { %4521 = vst.msk [vmem:[#allocation2 + $0x130] sm:$0xff] %vm540_vm15, %v4517_v14 }
0x30c0   :  { %4538 = dma.vmem_to_hbm [thread:$0]  %s4531_s10, 5120, %s4533_s8, [#allocation3], %s5228_s11, %s5228_s11, %s5226_s28  }
0x30c1   :  { %5219 = dma.done.wait [#allocation3], 5120  }
0x30c2   :  { %5220 = vsyncadd [#allocation3], 4294962176 }
0x30c3   :  { %4543 = vsyncpa [#allocation3], 1 }

</bundles_post_ra>
